<compile_context>
chip_gen: v6e
topology: v6e:2x2x1
jax: 0.10.0
libtpu: 0.0.40
codegen_flags: <defaults>
</compile_context>

<pallas_src>
import functools

import jax
import jax.numpy as jnp
from jax.experimental import pallas as pl
from jax.experimental.pallas import tpu as pltpu  # noqa: F401  (kept for CompilerParams if needed)

# ----------------------------- configuration -----------------------------
N_SCENE = 2
N_TARGET = 4
N_PRED = 4            # number of modes
HIDDEN = 32           # hidden_dim
N_HEAD = 4
HEAD_DIM = HIDDEN // N_HEAD
SEQ = 8               # context tokens per target agent
N_STEP_FUTURE = 8     # mlp_head['n_step_future']
PRED_DIM = 5
FF = 4 * HIDDEN       # d_feedforward
N_DECODER_LAYERS = 2  # each TransformerBlock gets n_decoder_layers // 2 layers
LAYERS_PER_BLOCK = N_DECODER_LAYERS // 2

NEG_PAD = -3.0e4      # padding-mask additive term (exp underflows to 0 in f32)
NEG_XBATCH = -1.0e9   # cross-batch / cross-scene additive term


# ----------------------------- in-kernel helpers -----------------------------
def _layer_norm(x, g, b, eps=1e-5):
    mu = jnp.mean(x, axis=-1, keepdims=True)
    var = jnp.mean((x - mu) ** 2, axis=-1, keepdims=True)
    return (x - mu) * jax.lax.rsqrt(var + eps) * g + b


def _attn_ffn_layer(src, tgt, mask, p):
    """One cross-attention + FFN decoder layer, whole batch folded on M axis.

    src:  [M, D]   queries (all (batch, mode) rows)
    tgt:  [Lk, D]  keys/values (all (batch, token) rows)
    mask: [M, Lk]  additive mask (0 = attend, NEG_PAD = padded, NEG_XBATCH = other batch)
    """
    (wq, wkv, wo, g1, be1, w1, b1, w2, b2, g2, be2) = p
    d = src.shape[-1]
    hd = d // N_HEAD
    scale = 1.0 / (hd ** 0.5)

    q = jnp.dot(src, wq[...], preferred_element_type=jnp.float32)      # [M, D]
    kv = jnp.dot(tgt, wkv[...], preferred_element_type=jnp.float32)    # [Lk, 2D] fused K|V
    k = kv[:, :d]
    v = kv[:, d:]
    wo_v = wo[...]

    o = None
    for h in range(N_HEAD):                       # unrolled at trace time (H=4)
        qh = q[:, h * hd:(h + 1) * hd] * scale
        kh = k[:, h * hd:(h + 1) * hd]
        vh = v[:, h * hd:(h + 1) * hd]
        s = jax.lax.dot_general(qh, kh, (((1,), (1,)), ((), ())),
                                preferred_element_type=jnp.float32)    # [M, Lk]
        s = s + mask
        m = jnp.max(s, axis=-1, keepdims=True)
        e = jnp.exp(s - m)
        pa = e * pl.reciprocal(jnp.sum(e, axis=-1, keepdims=True), approx=True)
        ctx_h = jnp.dot(pa, vh, preferred_element_type=jnp.float32)    # [M, hd]
        # accumulate attn @ Wo via per-head slices of Wo (no lane concatenate)
        oh = jnp.dot(ctx_h, wo_v[h * hd:(h + 1) * hd, :],
                     preferred_element_type=jnp.float32)               # [M, D]
        o = oh if o is None else o + oh

    x = _layer_norm(src + o, g1[...], be1[...])
    ff = jnp.maximum(
        jnp.dot(x, w1[...], preferred_element_type=jnp.float32) + b1[...], 0.0)
    ff = jnp.dot(ff, w2[...], preferred_element_type=jnp.float32) + b2[...]
    return _layer_norm(x + ff, g2[...], be2[...])


def _mlp_head(x, p):
    """Returns (hidden [M, D], pred|conf slab [M, T*5 + 1])."""
    wh, bh, wcp, bcp = p
    hid = jnp.maximum(
        jnp.dot(x, wh[...], preferred_element_type=jnp.float32) + bh[...], 0.0)
    cp = jnp.dot(hid, wcp[...], preferred_element_type=jnp.float32) + bcp[...]
    return hid, cp


# ----------------------------- fused kernel -----------------------------
def _dual_decoder_kernel(*refs, n_layers):
    (sel_ref, pool_ref, emb_ref, mqs_ref, mpp_ref, rt_ref, vmask_ref,
     anc_w_ref, ctx_w_ref, ctx_b_ref, proj_w_ref, proj_b_ref) = refs[:12]
    rest = refs[12:]

    i = 0
    def take(n):
        nonlocal i
        chunk = rest[i:i + n]
        i += n
        return chunk

    tf_blocks = [[take(11) for _ in range(nl)] for nl in n_layers]
    head0 = take(4)
    head1 = take(4)
    reenc = take(6)
    out_hid0, out_cp0, out_hid1, out_cp1 = rest[i:i + 4]

    T = N_STEP_FUTURE

    emb = emb_ref[...]          # [B*S, D]
    vmask = vmask_ref[...]      # [B*P, 1]  (1.0 = valid agent)
    rt = rt_ref[...]            # [B*P, 6]  (r00, r01, r10, r11, tx, ty)
    mqs = mqs_ref[...]          # [B*P, B*S] additive mask (decoders 0 & 2)
    mpp = mpp_ref[...]          # [B*P, B*P] additive mask (decoder 1)

    # ---- MultiModalAnchors: (type, mode)-selected anchors + pooled agent context ----
    anchor_sel = jnp.dot(sel_ref[...], anc_w_ref[...],
                         preferred_element_type=jnp.float32)            # [B*P, D]
    ctx = jnp.dot(pool_ref[...], emb, preferred_element_type=jnp.float32)  # masked mean
    ctx_proj = jnp.dot(ctx, ctx_w_ref[...],
                       preferred_element_type=jnp.float32) + ctx_b_ref[...]
    anch = anchor_sel + ctx_proj
    motion_anchors = jnp.maximum(
        jnp.dot(anch, proj_w_ref[...], preferred_element_type=jnp.float32)
        + proj_b_ref[...], 0.0) * vmask                                  # [B*P, D]

    # ---- decoder 0: cross-attend anchors to agent context ----
    x = motion_anchors
    for p in tf_blocks[0]:
        x = _attn_ffn_layer(x, emb, mqs, p)
    dec0 = x

    hid0, cp0 = _mlp_head(dec0, head0)    # cp0: [x(T)|y(T)|ch2..ch4(3T)|conf(1)]
    out_hid0[...] = hid0
    out_cp0[...] = cp0

    # ---- pos2global on xy channels (pos @ rot + ref_pos), channel-major layout ----
    px = cp0[:, 0:T]
    py = cp0[:, T:2 * T]
    other = cp0[:, 2 * T:PRED_DIM * T]
    r00 = rt[:, 0:1]; r01 = rt[:, 1:2]; r10 = rt[:, 2:3]; r11 = rt[:, 3:4]
    tx = rt[:, 4:5]; ty = rt[:, 5:6]
    gx = px * r00 + py * r10 + tx
    gy = px * r01 + py * r11 + ty

    # ---- MLP re-encoder on global prediction; first layer split per channel group
    #      (avoids an in-kernel lane concatenate of [gx | gy | other]) ----
    w1r, b1r, w2r, b2r, w3r, b3r = reenc
    w1v = w1r[...]
    h = (jnp.dot(gx, w1v[0:T, :], preferred_element_type=jnp.float32)
         + jnp.dot(gy, w1v[T:2 * T, :], preferred_element_type=jnp.float32)
         + jnp.dot(other, w1v[2 * T:PRED_DIM * T, :], preferred_element_type=jnp.float32)
         + b1r[...])
    h = jnp.maximum(h, 0.0)
    h = jnp.maximum(
        jnp.dot(h, w2r[...], preferred_element_type=jnp.float32) + b2r[...], 0.0)
    reencoded = (jnp.dot(h, w3r[...], preferred_element_type=jnp.float32)
                 + b3r[...]) * vmask                                      # [B*P, D]

    # ---- decoder 1: scene-level self-attention over all (target, mode) tokens ----
    # NOTE: reproduces the reference literally: the *valid* mask is used as the
    #       padding mask here (1.0 = masked out), encoded in mpp.
    x = reencoded
    for p in tf_blocks[1]:
        x = _attn_ffn_layer(x, reencoded, mpp, p)
    dec1 = x

    # ---- decoder 2: cross-attend refined modes back to agent context ----
    x = dec1
    for p in tf_blocks[2]:
        x = _attn_ffn_layer(x, emb, mqs, p)
    dec2 = x

    hid1, cp1 = _mlp_head(dec2, head1)
    out_hid1[...] = hid1
    out_cp1[...] = cp1


# ----------------------------- parameters -----------------------------
def _dense(key, shape, scale=0.02):
    return scale * jax.random.normal(key, shape, jnp.float32)


def init_tf_layer_params(key):
    ks = jax.random.split(key, 6)
    d = HIDDEN
    return (
        _dense(ks[0], (d, d)),            # wq
        _dense(ks[1], (d, 2 * d)),        # wkv (fused K|V)
        _dense(ks[2], (d, d)),            # wo
        jnp.ones((1, d)), jnp.zeros((1, d)),        # ln1 gamma/beta
        _dense(ks[3], (d, FF)), jnp.zeros((1, FF)),  # ffn w1/b1
        _dense(ks[4], (FF, d)), jnp.zeros((1, d)),   # ffn w2/b2
        jnp.ones((1, d)), jnp.zeros((1, d)),         # ln2 gamma/beta
    )


def init_head_params(key):
    ks = jax.random.split(key, 2)
    d = HIDDEN
    out_dim = N_STEP_FUTURE * PRED_DIM + 1   # [pred(channel-major 5*T) | conf(1)]
    return (
        _dense(ks[0], (d, d)), jnp.zeros((1, d)),          # shared hidden layer
        _dense(ks[1], (d, out_dim)), jnp.zeros((1, out_dim)),
    )


def init_reenc_params(key):
    ks = jax.random.split(key, 3)
    in_dim = N_STEP_FUTURE * PRED_DIM        # channel-major [x(T)|y(T)|rest(3T)]
    d2 = 2 * HIDDEN
    return (
        _dense(ks[0], (in_dim, d2)), jnp.zeros((1, d2)),
        _dense(ks[1], (d2, d2)), jnp.zeros((1, d2)),
        _dense(ks[2], (d2, HIDDEN)), jnp.zeros((1, HIDDEN)),
    )


def init_params(key):
    ks = jax.random.split(key, 10)
    # anchor table: rows 0..3*P-1 = per-(type, mode) anchor; rows 3*P..3*P+P-1 = per-mode bias
    anchor_w = jnp.concatenate(
        [_dense(ks[0], (3 * N_PRED, HIDDEN)), jnp.zeros((N_PRED, HIDDEN))], axis=0)
    return {
        "anchor_w": anchor_w,                                  # [3*P + P, D]
        "ctx_w": _dense(ks[1], (HIDDEN, HIDDEN)),
        "ctx_b": jnp.zeros((1, HIDDEN)),
        "proj_w": _dense(ks[2], (HIDDEN, HIDDEN)),
        "proj_b": jnp.zeros((1, HIDDEN)),
        "tf0": [init_tf_layer_params(k)
                for k in jax.random.split(ks[3], LAYERS_PER_BLOCK)],
        "tf1": [init_tf_layer_params(k)
                for k in jax.random.split(ks[4], LAYERS_PER_BLOCK)],
        "tf2": [init_tf_layer_params(k)
                for k in jax.random.split(ks[5], LAYERS_PER_BLOCK)],
        "head0": init_head_params(ks[6]),
        "head1": init_head_params(ks[7]),
        "reenc": init_reenc_params(ks[8]),
    }


# ----------------------------- forward -----------------------------
def dual_decoder_forward(params, valid, target_type, emb, emb_invalid,
                         ref_rot, ref_pos, ref_role):
    """
    valid:        [n_scene, n_target] bool
    target_type:  [n_scene, n_target, 3] bool one-hot
    emb:          [n_scene*n_target, S, hidden_dim] f32
    emb_invalid:  [n_scene*n_target, S] bool (True = invalid)
    ref_rot:      [n_scene, n_target, 2, 2] f32
    ref_pos:      [n_scene, n_target, 1, 2] f32
    ref_role:     [n_scene, n_target, 3] bool
    """
    ns, nt = valid.shape
    b = ns * nt
    bp = b * N_PRED
    bs = b * SEQ
    T = N_STEP_FUTURE

    valid_f = valid.reshape(b).astype(jnp.float32)
    tt_f = target_type.reshape(b, 3).astype(jnp.float32)
    inv_f = emb_invalid.astype(jnp.float32)                    # [B, S] 1.0 = invalid

    # ---- auxiliary (layout) tensors built once outside the kernel ----
    # anchor selector: one-hot over (type, mode) + per-mode bias row
    type_rep = jnp.repeat(tt_f, N_PRED, axis=0)                # [B*P, 3]
    mode_oh = jnp.tile(jnp.eye(N_PRED, dtype=jnp.float32), (b, 1))   # [B*P, P]
    sel12 = (type_rep[:, :, None] * mode_oh[:, None, :]).reshape(bp, 3 * N_PRED)
    sel_anchor = jnp.concatenate([sel12, mode_oh], axis=-1)    # [B*P, 3*P + P]

    # masked-mean pooling matrix (rows repeated per mode), block-diagonal per batch
    row_b = jnp.repeat(jnp.arange(b), N_PRED)                  # [B*P]
    col_b = jnp.repeat(jnp.arange(b), SEQ)                     # [B*S]
    same_batch = row_b[:, None] == col_b[None, :]
    w_tok = 1.0 - inv_f                                        # [B, S]
    denom = jnp.maximum(w_tok.sum(axis=1, keepdims=True), 1.0)
    w_norm = (w_tok / denom).reshape(bs)
    pool_mat = jnp.where(same_batch, w_norm[None, :], 0.0)     # [B*P, B*S]

    # additive attention masks
    inv_cols = inv_f.reshape(bs)
    mask_qs = jnp.where(same_batch, inv_cols[None, :] * NEG_PAD, NEG_XBATCH)

    scene_rows = jnp.repeat(jnp.arange(ns), nt * N_PRED)       # [B*P]
    same_scene = scene_rows[:, None] == scene_rows[None, :]
    valid_token = jnp.repeat(valid_f, N_PRED)                  # [B*P] 1.0 = valid
    # literal reproduction of the reference: *valid* used as padding mask (1.0 = masked)
    mask_pp = jnp.where(same_scene, valid_token[None, :] * NEG_PAD, NEG_XBATCH)

    # rigid transform params per (batch, mode) row
    rt = jnp.repeat(jnp.concatenate(
        [ref_rot.reshape(b, 4), ref_pos.reshape(b, 2)], axis=-1), N_PRED, axis=0)  # [B*P, 6]
    valid_rep = valid_token[:, None]                           # [B*P, 1]

    emb_flat = emb.reshape(bs, HIDDEN)

    # ---- flatten weights in the kernel's expected order ----
    tf_flat = []
    for blk in ("tf0", "tf1", "tf2"):
        for layer in params[blk]:
            tf_flat.extend(layer)
    inputs = (
        sel_anchor, pool_mat, emb_flat, mask_qs, mask_pp, rt, valid_rep,
        params["anchor_w"], params["ctx_w"], params["ctx_b"],
        params["proj_w"], params["proj_b"],
        *tf_flat, *params["head0"], *params["head1"], *params["reenc"],
    )

    kernel = functools.partial(
        _dual_decoder_kernel,
        n_layers=(LAYERS_PER_BLOCK, LAYERS_PER_BLOCK, LAYERS_PER_BLOCK))
    cp_dim = N_STEP_FUTURE * PRED_DIM + 1
    hid0, cp0, hid1, cp1 = pl.pallas_call(
        kernel,
        out_shape=(
            jax.ShapeDtypeStruct((bp, HIDDEN), jnp.float32),
            jax.ShapeDtypeStruct((bp, cp_dim), jnp.float32),
            jax.ShapeDtypeStruct((bp, HIDDEN), jnp.float32),
            jax.ShapeDtypeStruct((bp, cp_dim), jnp.float32),
        ),
    )(*inputs)

    def split_head(hid, cp):
        conf = cp[:, PRED_DIM * T].reshape(ns, nt, N_PRED)
        # channel-major [5, T] -> [T, 5]
        pred = jnp.swapaxes(
            cp[:, :PRED_DIM * T].reshape(ns, nt, N_PRED, PRED_DIM, T), -1, -2)
        lhs = hid.reshape(ns, nt, N_PRED, HIDDEN)
        return conf, pred, lhs

    conf_0, pred_0, last_hidden_state_0 = split_head(hid0, cp0)
    conf_1, pred_1, last_hidden_state_1 = split_head(hid1, cp1)
    to_predict = ref_role[..., 2]

    return (conf_0, pred_0, valid, conf_1, pred_1, to_predict,
            last_hidden_state_0, last_hidden_state_1)


# ----------------------------- main -----------------------------
if __name__ == "__main__":
    key = jax.random.PRNGKey(0)
    k_emb, k_inv, k_tt, k_rot, k_pos, k_role, k_par = jax.random.split(key, 7)

    b = N_SCENE * N_TARGET
    params = init_params(k_par)

    valid = jnp.array([[True, True, True, False],
                       [True, True, False, True]], dtype=jnp.bool_)
    tt_idx = jax.random.randint(k_tt, (N_SCENE, N_TARGET), 0, 3)
    target_type = jax.nn.one_hot(tt_idx, 3) > 0.5                     # bool one-hot
    emb = jax.random.normal(k_emb, (b, SEQ, HIDDEN), jnp.float32)
    emb_invalid = jax.random.bernoulli(k_inv, 0.2, (b, SEQ))

    ang = jax.random.uniform(k_rot, (N_SCENE, N_TARGET)) * 2.0 * jnp.pi
    c, s = jnp.cos(ang), jnp.sin(ang)
    ref_rot = jnp.stack([jnp.stack([c, -s], axis=-1),
                         jnp.stack([s, c], axis=-1)], axis=-2)        # [ns, nt, 2, 2]
    ref_pos = 5.0 * jax.random.normal(k_pos, (N_SCENE, N_TARGET, 1, 2), jnp.float32)
    ref_role = jax.random.bernoulli(k_role, 0.5, (N_SCENE, N_TARGET, 3))

    fwd = jax.jit(dual_decoder_forward)
    outs = fwd(params, valid, target_type, emb, emb_invalid, ref_rot, ref_pos, ref_role)
    jax.block_until_ready(outs)

    conf_0, pred_0, valid_out, conf_1, pred_1, to_predict, lhs0, lhs1 = outs
    assert conf_0.shape == (N_SCENE, N_TARGET, N_PRED)
    assert pred_0.shape == (N_SCENE, N_TARGET, N_PRED, N_STEP_FUTURE, PRED_DIM)
    assert conf_1.shape == (N_SCENE, N_TARGET, N_PRED)
    assert pred_1.shape == (N_SCENE, N_TARGET, N_PRED, N_STEP_FUTURE, PRED_DIM)
    assert lhs0.shape == (N_SCENE, N_TARGET, N_PRED, HIDDEN)
    assert lhs1.shape == (N_SCENE, N_TARGET, N_PRED, HIDDEN)
    assert bool(jnp.all(jnp.isfinite(pred_0))) and bool(jnp.all(jnp.isfinite(pred_1)))
    print("KERNEL_OK")
</pallas_src>

<mosaic_0001>
module attributes {stable_mosaic.version = 11 : i64} {
  func.func @_dual_decoder_kernel(%arg0: memref<32x16xf32, #tpu.memory_space<vmem>>, %arg1: memref<32x64xf32, #tpu.memory_space<vmem>>, %arg2: memref<64x32xf32, #tpu.memory_space<vmem>>, %arg3: memref<32x64xf32, #tpu.memory_space<vmem>>, %arg4: memref<32x32xf32, #tpu.memory_space<vmem>>, %arg5: memref<32x6xf32, #tpu.memory_space<vmem>>, %arg6: memref<32x1xf32, #tpu.memory_space<vmem>>, %arg7: memref<16x32xf32, #tpu.memory_space<vmem>>, %arg8: memref<32x32xf32, #tpu.memory_space<vmem>>, %arg9: memref<1x32xf32, #tpu.memory_space<vmem>>, %arg10: memref<32x32xf32, #tpu.memory_space<vmem>>, %arg11: memref<1x32xf32, #tpu.memory_space<vmem>>, %arg12: memref<32x32xf32, #tpu.memory_space<vmem>>, %arg13: memref<32x64xf32, #tpu.memory_space<vmem>>, %arg14: memref<32x32xf32, #tpu.memory_space<vmem>>, %arg15: memref<1x32xf32, #tpu.memory_space<vmem>>, %arg16: memref<1x32xf32, #tpu.memory_space<vmem>>, %arg17: memref<32x128xf32, #tpu.memory_space<vmem>>, %arg18: memref<1x128xf32, #tpu.memory_space<vmem>>, %arg19: memref<128x32xf32, #tpu.memory_space<vmem>>, %arg20: memref<1x32xf32, #tpu.memory_space<vmem>>, %arg21: memref<1x32xf32, #tpu.memory_space<vmem>>, %arg22: memref<1x32xf32, #tpu.memory_space<vmem>>, %arg23: memref<32x32xf32, #tpu.memory_space<vmem>>, %arg24: memref<32x64xf32, #tpu.memory_space<vmem>>, %arg25: memref<32x32xf32, #tpu.memory_space<vmem>>, %arg26: memref<1x32xf32, #tpu.memory_space<vmem>>, %arg27: memref<1x32xf32, #tpu.memory_space<vmem>>, %arg28: memref<32x128xf32, #tpu.memory_space<vmem>>, %arg29: memref<1x128xf32, #tpu.memory_space<vmem>>, %arg30: memref<128x32xf32, #tpu.memory_space<vmem>>, %arg31: memref<1x32xf32, #tpu.memory_space<vmem>>, %arg32: memref<1x32xf32, #tpu.memory_space<vmem>>, %arg33: memref<1x32xf32, #tpu.memory_space<vmem>>, %arg34: memref<32x32xf32, #tpu.memory_space<vmem>>, %arg35: memref<32x64xf32, #tpu.memory_space<vmem>>, %arg36: memref<32x32xf32, #tpu.memory_space<vmem>>, %arg37: memref<1x32xf32, #tpu.memory_space<vmem>>, %arg38: memref<1x32xf32, #tpu.memory_space<vmem>>, %arg39: memref<32x128xf32, #tpu.memory_space<vmem>>, %arg40: memref<1x128xf32, #tpu.memory_space<vmem>>, %arg41: memref<128x32xf32, #tpu.memory_space<vmem>>, %arg42: memref<1x32xf32, #tpu.memory_space<vmem>>, %arg43: memref<1x32xf32, #tpu.memory_space<vmem>>, %arg44: memref<1x32xf32, #tpu.memory_space<vmem>>, %arg45: memref<32x32xf32, #tpu.memory_space<vmem>>, %arg46: memref<1x32xf32, #tpu.memory_space<vmem>>, %arg47: memref<32x41xf32, #tpu.memory_space<vmem>>, %arg48: memref<1x41xf32, #tpu.memory_space<vmem>>, %arg49: memref<32x32xf32, #tpu.memory_space<vmem>>, %arg50: memref<1x32xf32, #tpu.memory_space<vmem>>, %arg51: memref<32x41xf32, #tpu.memory_space<vmem>>, %arg52: memref<1x41xf32, #tpu.memory_space<vmem>>, %arg53: memref<40x64xf32, #tpu.memory_space<vmem>>, %arg54: memref<1x64xf32, #tpu.memory_space<vmem>>, %arg55: memref<64x64xf32, #tpu.memory_space<vmem>>, %arg56: memref<1x64xf32, #tpu.memory_space<vmem>>, %arg57: memref<64x32xf32, #tpu.memory_space<vmem>>, %arg58: memref<1x32xf32, #tpu.memory_space<vmem>>, %arg59: memref<32x32xf32, #tpu.memory_space<vmem>>, %arg60: memref<32x41xf32, #tpu.memory_space<vmem>>, %arg61: memref<32x32xf32, #tpu.memory_space<vmem>>, %arg62: memref<32x41xf32, #tpu.memory_space<vmem>>) attributes {dimension_semantics = [], scalar_prefetch = 0 : i64, scratch_operands = 0 : i64, tpu.core_type = #tpu.core_type<tc>} {
    %c0 = arith.constant 0 : index
    %c0_0 = arith.constant 0 : index
    %0 = vector.load %arg2[%c0, %c0_0] : memref<64x32xf32, #tpu.memory_space<vmem>>, vector<64x32xf32>
    %c0_1 = arith.constant 0 : index
    %c0_2 = arith.constant 0 : index
    %1 = vector.load %arg6[%c0_1, %c0_2] : memref<32x1xf32, #tpu.memory_space<vmem>>, vector<32x1xf32>
    %c0_3 = arith.constant 0 : index
    %c0_4 = arith.constant 0 : index
    %2 = vector.load %arg5[%c0_3, %c0_4] : memref<32x6xf32, #tpu.memory_space<vmem>>, vector<32x6xf32>
    %c0_5 = arith.constant 0 : index
    %c0_6 = arith.constant 0 : index
    %3 = vector.load %arg3[%c0_5, %c0_6] : memref<32x64xf32, #tpu.memory_space<vmem>>, vector<32x64xf32>
    %c0_7 = arith.constant 0 : index
    %c0_8 = arith.constant 0 : index
    %4 = vector.load %arg4[%c0_7, %c0_8] : memref<32x32xf32, #tpu.memory_space<vmem>>, vector<32x32xf32>
    %c0_9 = arith.constant 0 : index
    %c0_10 = arith.constant 0 : index
    %5 = vector.load %arg0[%c0_9, %c0_10] : memref<32x16xf32, #tpu.memory_space<vmem>>, vector<32x16xf32>
    %c0_11 = arith.constant 0 : index
    %c0_12 = arith.constant 0 : index
    %6 = vector.load %arg7[%c0_11, %c0_12] : memref<16x32xf32, #tpu.memory_space<vmem>>, vector<16x32xf32>
    %cst = arith.constant dense<0.000000e+00> : vector<32x32xf32>
    %7 = tpu.matmul %5, %6, %cst {dimension_numbers = #tpu.dot_dimension_numbers<[1], [0], [0], [1], [0, 0, 1, 1], [], []>} : vector<32x16xf32>, vector<16x32xf32>, vector<32x32xf32> -> vector<32x32xf32>
    %c0_13 = arith.constant 0 : index
    %c0_14 = arith.constant 0 : index
    %8 = vector.load %arg1[%c0_13, %c0_14] : memref<32x64xf32, #tpu.memory_space<vmem>>, vector<32x64xf32>
    %cst_15 = arith.constant dense<0.000000e+00> : vector<32x32xf32>
    %9 = tpu.matmul %8, %0, %cst_15 {dimension_numbers = #tpu.dot_dimension_numbers<[1], [0], [0], [1], [0, 0, 1, 1], [], []>} : vector<32x64xf32>, vector<64x32xf32>, vector<32x32xf32> -> vector<32x32xf32>
    %c0_16 = arith.constant 0 : index
    %c0_17 = arith.constant 0 : index
    %10 = vector.load %arg8[%c0_16, %c0_17] : memref<32x32xf32, #tpu.memory_space<vmem>>, vector<32x32xf32>
    %cst_18 = arith.constant dense<0.000000e+00> : vector<32x32xf32>
    %11 = tpu.matmul %9, %10, %cst_18 {dimension_numbers = #tpu.dot_dimension_numbers<[1], [0], [0], [1], [0, 0, 1, 1], [], []>} : vector<32x32xf32>, vector<32x32xf32>, vector<32x32xf32> -> vector<32x32xf32>
    %c0_19 = arith.constant 0 : index
    %c0_20 = arith.constant 0 : index
    %12 = vector.load %arg9[%c0_19, %c0_20] : memref<1x32xf32, #tpu.memory_space<vmem>>, vector<1x32xf32>
    %13 = vector.broadcast %12 : vector<1x32xf32> to vector<32x32xf32>
    %14 = arith.addf %11, %13 : vector<32x32xf32>
    %15 = arith.addf %7, %14 : vector<32x32xf32>
    %c0_21 = arith.constant 0 : index
    %c0_22 = arith.constant 0 : index
    %16 = vector.load %arg10[%c0_21, %c0_22] : memref<32x32xf32, #tpu.memory_space<vmem>>, vector<32x32xf32>
    %cst_23 = arith.constant dense<0.000000e+00> : vector<32x32xf32>
    %17 = tpu.matmul %15, %16, %cst_23 {dimension_numbers = #tpu.dot_dimension_numbers<[1], [0], [0], [1], [0, 0, 1, 1], [], []>} : vector<32x32xf32>, vector<32x32xf32>, vector<32x32xf32> -> vector<32x32xf32>
    %c0_24 = arith.constant 0 : index
    %c0_25 = arith.constant 0 : index
    %18 = vector.load %arg11[%c0_24, %c0_25] : memref<1x32xf32, #tpu.memory_space<vmem>>, vector<1x32xf32>
    %19 = vector.broadcast %18 : vector<1x32xf32> to vector<32x32xf32>
    %20 = arith.addf %17, %19 : vector<32x32xf32>
    %cst_26 = arith.constant 0.000000e+00 : f32
    %21 = vector.broadcast %cst_26 : f32 to vector<32x32xf32>
    %22 = arith.maximumf %20, %21 : vector<32x32xf32>
    %23 = vector.broadcast %1 : vector<32x1xf32> to vector<32x32xf32>
    %24 = arith.mulf %22, %23 : vector<32x32xf32>
    %c0_27 = arith.constant 0 : index
    %c0_28 = arith.constant 0 : index
    %25 = vector.load %arg12[%c0_27, %c0_28] : memref<32x32xf32, #tpu.memory_space<vmem>>, vector<32x32xf32>
    %cst_29 = arith.constant dense<0.000000e+00> : vector<32x32xf32>
    %26 = tpu.matmul %24, %25, %cst_29 {dimension_numbers = #tpu.dot_dimension_numbers<[1], [0], [0], [1], [0, 0, 1, 1], [], []>} : vector<32x32xf32>, vector<32x32xf32>, vector<32x32xf32> -> vector<32x32xf32>
    %c0_30 = arith.constant 0 : index
    %c0_31 = arith.constant 0 : index
    %27 = vector.load %arg13[%c0_30, %c0_31] : memref<32x64xf32, #tpu.memory_space<vmem>>, vector<32x64xf32>
    %cst_32 = arith.constant dense<0.000000e+00> : vector<64x64xf32>
    %28 = tpu.matmul %0, %27, %cst_32 {dimension_numbers = #tpu.dot_dimension_numbers<[1], [0], [0], [1], [0, 0, 1, 1], [], []>} : vector<64x32xf32>, vector<32x64xf32>, vector<64x64xf32> -> vector<64x64xf32>
    %29 = vector.extract_strided_slice %28 {offsets = [0, 0], sizes = [64, 32], strides = [1, 1]} : vector<64x64xf32> to vector<64x32xf32>
    %30 = vector.extract_strided_slice %28 {offsets = [0, 32], sizes = [64, 32], strides = [1, 1]} : vector<64x64xf32> to vector<64x32xf32>
    %c0_33 = arith.constant 0 : index
    %c0_34 = arith.constant 0 : index
    %31 = vector.load %arg14[%c0_33, %c0_34] : memref<32x32xf32, #tpu.memory_space<vmem>>, vector<32x32xf32>
    %32 = vector.extract_strided_slice %26 {offsets = [0, 0], sizes = [32, 8], strides = [1, 1]} : vector<32x32xf32> to vector<32x8xf32>
    %cst_35 = arith.constant 0.353553385 : f32
    %33 = vector.broadcast %cst_35 : f32 to vector<32x8xf32>
    %34 = arith.mulf %32, %33 : vector<32x8xf32>
    %35 = vector.extract_strided_slice %29 {offsets = [0, 0], sizes = [64, 8], strides = [1, 1]} : vector<64x32xf32> to vector<64x8xf32>
    %36 = vector.extract_strided_slice %30 {offsets = [0, 0], sizes = [64, 8], strides = [1, 1]} : vector<64x32xf32> to vector<64x8xf32>
    %cst_36 = arith.constant dense<0.000000e+00> : vector<32x64xf32>
    %37 = tpu.matmul %34, %35, %cst_36 {dimension_numbers = #tpu.dot_dimension_numbers<[1], [1], [0], [0], [0, 0, 1, 0], [], []>} : vector<32x8xf32>, vector<64x8xf32>, vector<32x64xf32> -> vector<32x64xf32>
    %38 = arith.addf %37, %3 : vector<32x64xf32>
    %cst_37 = arith.constant dense<0xFF800000> : vector<32xf32>
    %39 = vector.multi_reduction <maximumf>, %38, %cst_37 [1] : vector<32x64xf32> to vector<32xf32>
    %40 = vector.shape_cast %39 : vector<32xf32> to vector<32x1xf32>
    %41 = vector.broadcast %40 : vector<32x1xf32> to vector<32x64xf32>
    %42 = arith.subf %38, %41 : vector<32x64xf32>
    %43 = math.exp %42 : vector<32x64xf32>
    %cst_38 = arith.constant dense<0.000000e+00> : vector<32xf32>
    %44 = vector.multi_reduction <add>, %43, %cst_38 [1] : vector<32x64xf32> to vector<32xf32>
    %45 = vector.shape_cast %44 : vector<32xf32> to vector<32x1xf32>
    %46 = tpu.reciprocal %45 {approx = true} : vector<32x1xf32> -> vector<32x1xf32>
    %47 = vector.broadcast %46 : vector<32x1xf32> to vector<32x64xf32>
    %48 = arith.mulf %43, %47 : vector<32x64xf32>
    %cst_39 = arith.constant dense<0.000000e+00> : vector<32x8xf32>
    %49 = tpu.matmul %48, %36, %cst_39 {dimension_numbers = #tpu.dot_dimension_numbers<[1], [0], [0], [1], [0, 0, 1, 1], [], []>} : vector<32x64xf32>, vector<64x8xf32>, vector<32x8xf32> -> vector<32x8xf32>
    %50 = vector.extract_strided_slice %31 {offsets = [0, 0], sizes = [8, 32], strides = [1, 1]} : vector<32x32xf32> to vector<8x32xf32>
    %cst_40 = arith.constant dense<0.000000e+00> : vector<32x32xf32>
    %51 = tpu.matmul %49, %50, %cst_40 {dimension_numbers = #tpu.dot_dimension_numbers<[1], [0], [0], [1], [0, 0, 1, 1], [], []>} : vector<32x8xf32>, vector<8x32xf32>, vector<32x32xf32> -> vector<32x32xf32>
    %52 = vector.extract_strided_slice %26 {offsets = [0, 8], sizes = [32, 8], strides = [1, 1]} : vector<32x32xf32> to vector<32x8xf32>
    %cst_41 = arith.constant 0.353553385 : f32
    %53 = vector.broadcast %cst_41 : f32 to vector<32x8xf32>
    %54 = arith.mulf %52, %53 : vector<32x8xf32>
    %55 = vector.extract_strided_slice %29 {offsets = [0, 8], sizes = [64, 8], strides = [1, 1]} : vector<64x32xf32> to vector<64x8xf32>
    %56 = vector.extract_strided_slice %30 {offsets = [0, 8], sizes = [64, 8], strides = [1, 1]} : vector<64x32xf32> to vector<64x8xf32>
    %cst_42 = arith.constant dense<0.000000e+00> : vector<32x64xf32>
    %57 = tpu.matmul %54, %55, %cst_42 {dimension_numbers = #tpu.dot_dimension_numbers<[1], [1], [0], [0], [0, 0, 1, 0], [], []>} : vector<32x8xf32>, vector<64x8xf32>, vector<32x64xf32> -> vector<32x64xf32>
    %58 = arith.addf %57, %3 : vector<32x64xf32>
    %cst_43 = arith.constant dense<0xFF800000> : vector<32xf32>
    %59 = vector.multi_reduction <maximumf>, %58, %cst_43 [1] : vector<32x64xf32> to vector<32xf32>
    %60 = vector.shape_cast %59 : vector<32xf32> to vector<32x1xf32>
    %61 = vector.broadcast %60 : vector<32x1xf32> to vector<32x64xf32>
    %62 = arith.subf %58, %61 : vector<32x64xf32>
    %63 = math.exp %62 : vector<32x64xf32>
    %cst_44 = arith.constant dense<0.000000e+00> : vector<32xf32>
    %64 = vector.multi_reduction <add>, %63, %cst_44 [1] : vector<32x64xf32> to vector<32xf32>
    %65 = vector.shape_cast %64 : vector<32xf32> to vector<32x1xf32>
    %66 = tpu.reciprocal %65 {approx = true} : vector<32x1xf32> -> vector<32x1xf32>
    %67 = vector.broadcast %66 : vector<32x1xf32> to vector<32x64xf32>
    %68 = arith.mulf %63, %67 : vector<32x64xf32>
    %cst_45 = arith.constant dense<0.000000e+00> : vector<32x8xf32>
    %69 = tpu.matmul %68, %56, %cst_45 {dimension_numbers = #tpu.dot_dimension_numbers<[1], [0], [0], [1], [0, 0, 1, 1], [], []>} : vector<32x64xf32>, vector<64x8xf32>, vector<32x8xf32> -> vector<32x8xf32>
    %70 = vector.extract_strided_slice %31 {offsets = [8, 0], sizes = [8, 32], strides = [1, 1]} : vector<32x32xf32> to vector<8x32xf32>
    %cst_46 = arith.constant dense<0.000000e+00> : vector<32x32xf32>
    %71 = tpu.matmul %69, %70, %cst_46 {dimension_numbers = #tpu.dot_dimension_numbers<[1], [0], [0], [1], [0, 0, 1, 1], [], []>} : vector<32x8xf32>, vector<8x32xf32>, vector<32x32xf32> -> vector<32x32xf32>
    %72 = arith.addf %51, %71 : vector<32x32xf32>
    %73 = vector.extract_strided_slice %26 {offsets = [0, 16], sizes = [32, 8], strides = [1, 1]} : vector<32x32xf32> to vector<32x8xf32>
    %cst_47 = arith.constant 0.353553385 : f32
    %74 = vector.broadcast %cst_47 : f32 to vector<32x8xf32>
    %75 = arith.mulf %73, %74 : vector<32x8xf32>
    %76 = vector.extract_strided_slice %29 {offsets = [0, 16], sizes = [64, 8], strides = [1, 1]} : vector<64x32xf32> to vector<64x8xf32>
    %77 = vector.extract_strided_slice %30 {offsets = [0, 16], sizes = [64, 8], strides = [1, 1]} : vector<64x32xf32> to vector<64x8xf32>
    %cst_48 = arith.constant dense<0.000000e+00> : vector<32x64xf32>
    %78 = tpu.matmul %75, %76, %cst_48 {dimension_numbers = #tpu.dot_dimension_numbers<[1], [1], [0], [0], [0, 0, 1, 0], [], []>} : vector<32x8xf32>, vector<64x8xf32>, vector<32x64xf32> -> vector<32x64xf32>
    %79 = arith.addf %78, %3 : vector<32x64xf32>
    %cst_49 = arith.constant dense<0xFF800000> : vector<32xf32>
    %80 = vector.multi_reduction <maximumf>, %79, %cst_49 [1] : vector<32x64xf32> to vector<32xf32>
    %81 = vector.shape_cast %80 : vector<32xf32> to vector<32x1xf32>
    %82 = vector.broadcast %81 : vector<32x1xf32> to vector<32x64xf32>
    %83 = arith.subf %79, %82 : vector<32x64xf32>
    %84 = math.exp %83 : vector<32x64xf32>
    %cst_50 = arith.constant dense<0.000000e+00> : vector<32xf32>
    %85 = vector.multi_reduction <add>, %84, %cst_50 [1] : vector<32x64xf32> to vector<32xf32>
    %86 = vector.shape_cast %85 : vector<32xf32> to vector<32x1xf32>
    %87 = tpu.reciprocal %86 {approx = true} : vector<32x1xf32> -> vector<32x1xf32>
    %88 = vector.broadcast %87 : vector<32x1xf32> to vector<32x64xf32>
    %89 = arith.mulf %84, %88 : vector<32x64xf32>
    %cst_51 = arith.constant dense<0.000000e+00> : vector<32x8xf32>
    %90 = tpu.matmul %89, %77, %cst_51 {dimension_numbers = #tpu.dot_dimension_numbers<[1], [0], [0], [1], [0, 0, 1, 1], [], []>} : vector<32x64xf32>, vector<64x8xf32>, vector<32x8xf32> -> vector<32x8xf32>
    %91 = vector.extract_strided_slice %31 {offsets = [16, 0], sizes = [8, 32], strides = [1, 1]} : vector<32x32xf32> to vector<8x32xf32>
    %cst_52 = arith.constant dense<0.000000e+00> : vector<32x32xf32>
    %92 = tpu.matmul %90, %91, %cst_52 {dimension_numbers = #tpu.dot_dimension_numbers<[1], [0], [0], [1], [0, 0, 1, 1], [], []>} : vector<32x8xf32>, vector<8x32xf32>, vector<32x32xf32> -> vector<32x32xf32>
    %93 = arith.addf %72, %92 : vector<32x32xf32>
    %94 = vector.extract_strided_slice %26 {offsets = [0, 24], sizes = [32, 8], strides = [1, 1]} : vector<32x32xf32> to vector<32x8xf32>
    %cst_53 = arith.constant 0.353553385 : f32
    %95 = vector.broadcast %cst_53 : f32 to vector<32x8xf32>
    %96 = arith.mulf %94, %95 : vector<32x8xf32>
    %97 = vector.extract_strided_slice %29 {offsets = [0, 24], sizes = [64, 8], strides = [1, 1]} : vector<64x32xf32> to vector<64x8xf32>
    %98 = vector.extract_strided_slice %30 {offsets = [0, 24], sizes = [64, 8], strides = [1, 1]} : vector<64x32xf32> to vector<64x8xf32>
    %cst_54 = arith.constant dense<0.000000e+00> : vector<32x64xf32>
    %99 = tpu.matmul %96, %97, %cst_54 {dimension_numbers = #tpu.dot_dimension_numbers<[1], [1], [0], [0], [0, 0, 1, 0], [], []>} : vector<32x8xf32>, vector<64x8xf32>, vector<32x64xf32> -> vector<32x64xf32>
    %100 = arith.addf %99, %3 : vector<32x64xf32>
    %cst_55 = arith.constant dense<0xFF800000> : vector<32xf32>
    %101 = vector.multi_reduction <maximumf>, %100, %cst_55 [1] : vector<32x64xf32> to vector<32xf32>
    %102 = vector.shape_cast %101 : vector<32xf32> to vector<32x1xf32>
    %103 = vector.broadcast %102 : vector<32x1xf32> to vector<32x64xf32>
    %104 = arith.subf %100, %103 : vector<32x64xf32>
    %105 = math.exp %104 : vector<32x64xf32>
    %cst_56 = arith.constant dense<0.000000e+00> : vector<32xf32>
    %106 = vector.multi_reduction <add>, %105, %cst_56 [1] : vector<32x64xf32> to vector<32xf32>
    %107 = vector.shape_cast %106 : vector<32xf32> to vector<32x1xf32>
    %108 = tpu.reciprocal %107 {approx = true} : vector<32x1xf32> -> vector<32x1xf32>
    %109 = vector.broadcast %108 : vector<32x1xf32> to vector<32x64xf32>
    %110 = arith.mulf %105, %109 : vector<32x64xf32>
    %cst_57 = arith.constant dense<0.000000e+00> : vector<32x8xf32>
    %111 = tpu.matmul %110, %98, %cst_57 {dimension_numbers = #tpu.dot_dimension_numbers<[1], [0], [0], [1], [0, 0, 1, 1], [], []>} : vector<32x64xf32>, vector<64x8xf32>, vector<32x8xf32> -> vector<32x8xf32>
    %112 = vector.extract_strided_slice %31 {offsets = [24, 0], sizes = [8, 32], strides = [1, 1]} : vector<32x32xf32> to vector<8x32xf32>
    %cst_58 = arith.constant dense<0.000000e+00> : vector<32x32xf32>
    %113 = tpu.matmul %111, %112, %cst_58 {dimension_numbers = #tpu.dot_dimension_numbers<[1], [0], [0], [1], [0, 0, 1, 1], [], []>} : vector<32x8xf32>, vector<8x32xf32>, vector<32x32xf32> -> vector<32x32xf32>
    %114 = arith.addf %93, %113 : vector<32x32xf32>
    %115 = arith.addf %24, %114 : vector<32x32xf32>
    %c0_59 = arith.constant 0 : index
    %c0_60 = arith.constant 0 : index
    %116 = vector.load %arg15[%c0_59, %c0_60] : memref<1x32xf32, #tpu.memory_space<vmem>>, vector<1x32xf32>
    %c0_61 = arith.constant 0 : index
    %c0_62 = arith.constant 0 : index
    %117 = vector.load %arg16[%c0_61, %c0_62] : memref<1x32xf32, #tpu.memory_space<vmem>>, vector<1x32xf32>
    %cst_63 = arith.constant dense<0.000000e+00> : vector<32xf32>
    %118 = vector.multi_reduction <add>, %115, %cst_63 [1] : vector<32x32xf32> to vector<32xf32>
    %119 = vector.shape_cast %118 : vector<32xf32> to vector<32x1xf32>
    %cst_64 = arith.constant 3.200000e+01 : f32
    %120 = vector.broadcast %cst_64 : f32 to vector<32x1xf32>
    %121 = arith.divf %119, %120 : vector<32x1xf32>
    %122 = vector.broadcast %121 : vector<32x1xf32> to vector<32x32xf32>
    %123 = arith.subf %115, %122 : vector<32x32xf32>
    %124 = arith.mulf %123, %123 : vector<32x32xf32>
    %cst_65 = arith.constant dense<0.000000e+00> : vector<32xf32>
    %125 = vector.multi_reduction <add>, %124, %cst_65 [1] : vector<32x32xf32> to vector<32xf32>
    %126 = vector.shape_cast %125 : vector<32xf32> to vector<32x1xf32>
    %cst_66 = arith.constant 3.200000e+01 : f32
    %127 = vector.broadcast %cst_66 : f32 to vector<32x1xf32>
    %128 = arith.divf %126, %127 : vector<32x1xf32>
    %129 = vector.broadcast %121 : vector<32x1xf32> to vector<32x32xf32>
    %130 = arith.subf %115, %129 : vector<32x32xf32>
    %cst_67 = arith.constant 9.99999974E-6 : f32
    %131 = vector.broadcast %cst_67 : f32 to vector<32x1xf32>
    %132 = arith.addf %128, %131 : vector<32x1xf32>
    %133 = math.rsqrt %132 : vector<32x1xf32>
    %134 = vector.broadcast %133 : vector<32x1xf32> to vector<32x32xf32>
    %135 = arith.mulf %130, %134 : vector<32x32xf32>
    %136 = vector.broadcast %116 : vector<1x32xf32> to vector<32x32xf32>
    %137 = arith.mulf %135, %136 : vector<32x32xf32>
    %138 = vector.broadcast %117 : vector<1x32xf32> to vector<32x32xf32>
    %139 = arith.addf %137, %138 : vector<32x32xf32>
    %c0_68 = arith.constant 0 : index
    %c0_69 = arith.constant 0 : index
    %140 = vector.load %arg17[%c0_68, %c0_69] : memref<32x128xf32, #tpu.memory_space<vmem>>, vector<32x128xf32>
    %cst_70 = arith.constant dense<0.000000e+00> : vector<32x128xf32>
    %141 = tpu.matmul %139, %140, %cst_70 {dimension_numbers = #tpu.dot_dimension_numbers<[1], [0], [0], [1], [0, 0, 1, 1], [], []>} : vector<32x32xf32>, vector<32x128xf32>, vector<32x128xf32> -> vector<32x128xf32>
    %c0_71 = arith.constant 0 : index
    %c0_72 = arith.constant 0 : index
    %142 = vector.load %arg18[%c0_71, %c0_72] : memref<1x128xf32, #tpu.memory_space<vmem>>, vector<1x128xf32>
    %143 = vector.broadcast %142 : vector<1x128xf32> to vector<32x128xf32>
    %144 = arith.addf %141, %143 : vector<32x128xf32>
    %cst_73 = arith.constant 0.000000e+00 : f32
    %145 = vector.broadcast %cst_73 : f32 to vector<32x128xf32>
    %146 = arith.maximumf %144, %145 : vector<32x128xf32>
    %c0_74 = arith.constant 0 : index
    %c0_75 = arith.constant 0 : index
    %147 = vector.load %arg19[%c0_74, %c0_75] : memref<128x32xf32, #tpu.memory_space<vmem>>, vector<128x32xf32>
    %cst_76 = arith.constant dense<0.000000e+00> : vector<32x32xf32>
    %148 = tpu.matmul %146, %147, %cst_76 {dimension_numbers = #tpu.dot_dimension_numbers<[1], [0], [0], [1], [0, 0, 1, 1], [], []>} : vector<32x128xf32>, vector<128x32xf32>, vector<32x32xf32> -> vector<32x32xf32>
    %c0_77 = arith.constant 0 : index
    %c0_78 = arith.constant 0 : index
    %149 = vector.load %arg20[%c0_77, %c0_78] : memref<1x32xf32, #tpu.memory_space<vmem>>, vector<1x32xf32>
    %150 = vector.broadcast %149 : vector<1x32xf32> to vector<32x32xf32>
    %151 = arith.addf %148, %150 : vector<32x32xf32>
    %152 = arith.addf %139, %151 : vector<32x32xf32>
    %c0_79 = arith.constant 0 : index
    %c0_80 = arith.constant 0 : index
    %153 = vector.load %arg21[%c0_79, %c0_80] : memref<1x32xf32, #tpu.memory_space<vmem>>, vector<1x32xf32>
    %c0_81 = arith.constant 0 : index
    %c0_82 = arith.constant 0 : index
    %154 = vector.load %arg22[%c0_81, %c0_82] : memref<1x32xf32, #tpu.memory_space<vmem>>, vector<1x32xf32>
    %cst_83 = arith.constant dense<0.000000e+00> : vector<32xf32>
    %155 = vector.multi_reduction <add>, %152, %cst_83 [1] : vector<32x32xf32> to vector<32xf32>
    %156 = vector.shape_cast %155 : vector<32xf32> to vector<32x1xf32>
    %cst_84 = arith.constant 3.200000e+01 : f32
    %157 = vector.broadcast %cst_84 : f32 to vector<32x1xf32>
    %158 = arith.divf %156, %157 : vector<32x1xf32>
    %159 = vector.broadcast %158 : vector<32x1xf32> to vector<32x32xf32>
    %160 = arith.subf %152, %159 : vector<32x32xf32>
    %161 = arith.mulf %160, %160 : vector<32x32xf32>
    %cst_85 = arith.constant dense<0.000000e+00> : vector<32xf32>
    %162 = vector.multi_reduction <add>, %161, %cst_85 [1] : vector<32x32xf32> to vector<32xf32>
    %163 = vector.shape_cast %162 : vector<32xf32> to vector<32x1xf32>
    %cst_86 = arith.constant 3.200000e+01 : f32
    %164 = vector.broadcast %cst_86 : f32 to vector<32x1xf32>
    %165 = arith.divf %163, %164 : vector<32x1xf32>
    %166 = vector.broadcast %158 : vector<32x1xf32> to vector<32x32xf32>
    %167 = arith.subf %152, %166 : vector<32x32xf32>
    %cst_87 = arith.constant 9.99999974E-6 : f32
    %168 = vector.broadcast %cst_87 : f32 to vector<32x1xf32>
    %169 = arith.addf %165, %168 : vector<32x1xf32>
    %170 = math.rsqrt %169 : vector<32x1xf32>
    %171 = vector.broadcast %170 : vector<32x1xf32> to vector<32x32xf32>
    %172 = arith.mulf %167, %171 : vector<32x32xf32>
    %173 = vector.broadcast %153 : vector<1x32xf32> to vector<32x32xf32>
    %174 = arith.mulf %172, %173 : vector<32x32xf32>
    %175 = vector.broadcast %154 : vector<1x32xf32> to vector<32x32xf32>
    %176 = arith.addf %174, %175 : vector<32x32xf32>
    %c0_88 = arith.constant 0 : index
    %c0_89 = arith.constant 0 : index
    %177 = vector.load %arg45[%c0_88, %c0_89] : memref<32x32xf32, #tpu.memory_space<vmem>>, vector<32x32xf32>
    %cst_90 = arith.constant dense<0.000000e+00> : vector<32x32xf32>
    %178 = tpu.matmul %176, %177, %cst_90 {dimension_numbers = #tpu.dot_dimension_numbers<[1], [0], [0], [1], [0, 0, 1, 1], [], []>} : vector<32x32xf32>, vector<32x32xf32>, vector<32x32xf32> -> vector<32x32xf32>
    %c0_91 = arith.constant 0 : index
    %c0_92 = arith.constant 0 : index
    %179 = vector.load %arg46[%c0_91, %c0_92] : memref<1x32xf32, #tpu.memory_space<vmem>>, vector<1x32xf32>
    %180 = vector.broadcast %179 : vector<1x32xf32> to vector<32x32xf32>
    %181 = arith.addf %178, %180 : vector<32x32xf32>
    %cst_93 = arith.constant 0.000000e+00 : f32
    %182 = vector.broadcast %cst_93 : f32 to vector<32x32xf32>
    %183 = arith.maximumf %181, %182 : vector<32x32xf32>
    %c0_94 = arith.constant 0 : index
    %c0_95 = arith.constant 0 : index
    %184 = vector.load %arg47[%c0_94, %c0_95] : memref<32x41xf32, #tpu.memory_space<vmem>>, vector<32x41xf32>
    %cst_96 = arith.constant dense<0.000000e+00> : vector<32x41xf32>
    %185 = tpu.matmul %183, %184, %cst_96 {dimension_numbers = #tpu.dot_dimension_numbers<[1], [0], [0], [1], [0, 0, 1, 1], [], []>} : vector<32x32xf32>, vector<32x41xf32>, vector<32x41xf32> -> vector<32x41xf32>
    %c0_97 = arith.constant 0 : index
    %c0_98 = arith.constant 0 : index
    %186 = vector.load %arg48[%c0_97, %c0_98] : memref<1x41xf32, #tpu.memory_space<vmem>>, vector<1x41xf32>
    %187 = vector.broadcast %186 : vector<1x41xf32> to vector<32x41xf32>
    %188 = arith.addf %185, %187 : vector<32x41xf32>
    %c0_99 = arith.constant 0 : index
    %c0_100 = arith.constant 0 : index
    %189 = vector.load %arg59[%c0_99, %c0_100] : memref<32x32xf32, #tpu.memory_space<vmem>>, vector<32x32xf32>
    tpu.vector_store %arg59[%c0_99, %c0_100], %183 {strides = array<i32>} : memref<32x32xf32, #tpu.memory_space<vmem>>, vector<32x32xf32>,
    %c0_101 = arith.constant 0 : index
    %c0_102 = arith.constant 0 : index
    %190 = vector.load %arg60[%c0_101, %c0_102] : memref<32x41xf32, #tpu.memory_space<vmem>>, vector<32x41xf32>
    tpu.vector_store %arg60[%c0_101, %c0_102], %188 {strides = array<i32>} : memref<32x41xf32, #tpu.memory_space<vmem>>, vector<32x41xf32>,
    %191 = vector.extract_strided_slice %188 {offsets = [0, 0], sizes = [32, 8], strides = [1, 1]} : vector<32x41xf32> to vector<32x8xf32>
    %192 = vector.extract_strided_slice %188 {offsets = [0, 8], sizes = [32, 8], strides = [1, 1]} : vector<32x41xf32> to vector<32x8xf32>
    %193 = vector.extract_strided_slice %188 {offsets = [0, 16], sizes = [32, 24], strides = [1, 1]} : vector<32x41xf32> to vector<32x24xf32>
    %194 = vector.extract_strided_slice %2 {offsets = [0, 0], sizes = [32, 1], strides = [1, 1]} : vector<32x6xf32> to vector<32x1xf32>
    %195 = vector.extract_strided_slice %2 {offsets = [0, 1], sizes = [32, 1], strides = [1, 1]} : vector<32x6xf32> to vector<32x1xf32>
    %196 = vector.extract_strided_slice %2 {offsets = [0, 2], sizes = [32, 1], strides = [1, 1]} : vector<32x6xf32> to vector<32x1xf32>
    %197 = vector.extract_strided_slice %2 {offsets = [0, 3], sizes = [32, 1], strides = [1, 1]} : vector<32x6xf32> to vector<32x1xf32>
    %198 = vector.extract_strided_slice %2 {offsets = [0, 4], sizes = [32, 1], strides = [1, 1]} : vector<32x6xf32> to vector<32x1xf32>
    %199 = vector.extract_strided_slice %2 {offsets = [0, 5], sizes = [32, 1], strides = [1, 1]} : vector<32x6xf32> to vector<32x1xf32>
    %200 = vector.broadcast %194 : vector<32x1xf32> to vector<32x8xf32>
    %201 = arith.mulf %191, %200 : vector<32x8xf32>
    %202 = vector.broadcast %196 : vector<32x1xf32> to vector<32x8xf32>
    %203 = arith.mulf %192, %202 : vector<32x8xf32>
    %204 = arith.addf %201, %203 : vector<32x8xf32>
    %205 = vector.broadcast %198 : vector<32x1xf32> to vector<32x8xf32>
    %206 = arith.addf %204, %205 : vector<32x8xf32>
    %207 = vector.broadcast %195 : vector<32x1xf32> to vector<32x8xf32>
    %208 = arith.mulf %191, %207 : vector<32x8xf32>
    %209 = vector.broadcast %197 : vector<32x1xf32> to vector<32x8xf32>
    %210 = arith.mulf %192, %209 : vector<32x8xf32>
    %211 = arith.addf %208, %210 : vector<32x8xf32>
    %212 = vector.broadcast %199 : vector<32x1xf32> to vector<32x8xf32>
    %213 = arith.addf %211, %212 : vector<32x8xf32>
    %c0_103 = arith.constant 0 : index
    %c0_104 = arith.constant 0 : index
    %214 = vector.load %arg53[%c0_103, %c0_104] : memref<40x64xf32, #tpu.memory_space<vmem>>, vector<40x64xf32>
    %215 = vector.extract_strided_slice %214 {offsets = [0, 0], sizes = [8, 64], strides = [1, 1]} : vector<40x64xf32> to vector<8x64xf32>
    %cst_105 = arith.constant dense<0.000000e+00> : vector<32x64xf32>
    %216 = tpu.matmul %206, %215, %cst_105 {dimension_numbers = #tpu.dot_dimension_numbers<[1], [0], [0], [1], [0, 0, 1, 1], [], []>} : vector<32x8xf32>, vector<8x64xf32>, vector<32x64xf32> -> vector<32x64xf32>
    %217 = vector.extract_strided_slice %214 {offsets = [8, 0], sizes = [8, 64], strides = [1, 1]} : vector<40x64xf32> to vector<8x64xf32>
    %cst_106 = arith.constant dense<0.000000e+00> : vector<32x64xf32>
    %218 = tpu.matmul %213, %217, %cst_106 {dimension_numbers = #tpu.dot_dimension_numbers<[1], [0], [0], [1], [0, 0, 1, 1], [], []>} : vector<32x8xf32>, vector<8x64xf32>, vector<32x64xf32> -> vector<32x64xf32>
    %219 = arith.addf %216, %218 : vector<32x64xf32>
    %220 = vector.extract_strided_slice %214 {offsets = [16, 0], sizes = [24, 64], strides = [1, 1]} : vector<40x64xf32> to vector<24x64xf32>
    %cst_107 = arith.constant dense<0.000000e+00> : vector<32x64xf32>
    %221 = tpu.matmul %193, %220, %cst_107 {dimension_numbers = #tpu.dot_dimension_numbers<[1], [0], [0], [1], [0, 0, 1, 1], [], []>} : vector<32x24xf32>, vector<24x64xf32>, vector<32x64xf32> -> vector<32x64xf32>
    %222 = arith.addf %219, %221 : vector<32x64xf32>
    %c0_108 = arith.constant 0 : index
    %c0_109 = arith.constant 0 : index
    %223 = vector.load %arg54[%c0_108, %c0_109] : memref<1x64xf32, #tpu.memory_space<vmem>>, vector<1x64xf32>
    %224 = vector.broadcast %223 : vector<1x64xf32> to vector<32x64xf32>
    %225 = arith.addf %222, %224 : vector<32x64xf32>
    %cst_110 = arith.constant 0.000000e+00 : f32
    %226 = vector.broadcast %cst_110 : f32 to vector<32x64xf32>
    %227 = arith.maximumf %225, %226 : vector<32x64xf32>
    %c0_111 = arith.constant 0 : index
    %c0_112 = arith.constant 0 : index
    %228 = vector.load %arg55[%c0_111, %c0_112] : memref<64x64xf32, #tpu.memory_space<vmem>>, vector<64x64xf32>
    %cst_113 = arith.constant dense<0.000000e+00> : vector<32x64xf32>
    %229 = tpu.matmul %227, %228, %cst_113 {dimension_numbers = #tpu.dot_dimension_numbers<[1], [0], [0], [1], [0, 0, 1, 1], [], []>} : vector<32x64xf32>, vector<64x64xf32>, vector<32x64xf32> -> vector<32x64xf32>
    %c0_114 = arith.constant 0 : index
    %c0_115 = arith.constant 0 : index
    %230 = vector.load %arg56[%c0_114, %c0_115] : memref<1x64xf32, #tpu.memory_space<vmem>>, vector<1x64xf32>
    %231 = vector.broadcast %230 : vector<1x64xf32> to vector<32x64xf32>
    %232 = arith.addf %229, %231 : vector<32x64xf32>
    %cst_116 = arith.constant 0.000000e+00 : f32
    %233 = vector.broadcast %cst_116 : f32 to vector<32x64xf32>
    %234 = arith.maximumf %232, %233 : vector<32x64xf32>
    %c0_117 = arith.constant 0 : index
    %c0_118 = arith.constant 0 : index
    %235 = vector.load %arg57[%c0_117, %c0_118] : memref<64x32xf32, #tpu.memory_space<vmem>>, vector<64x32xf32>
    %cst_119 = arith.constant dense<0.000000e+00> : vector<32x32xf32>
    %236 = tpu.matmul %234, %235, %cst_119 {dimension_numbers = #tpu.dot_dimension_numbers<[1], [0], [0], [1], [0, 0, 1, 1], [], []>} : vector<32x64xf32>, vector<64x32xf32>, vector<32x32xf32> -> vector<32x32xf32>
    %c0_120 = arith.constant 0 : index
    %c0_121 = arith.constant 0 : index
    %237 = vector.load %arg58[%c0_120, %c0_121] : memref<1x32xf32, #tpu.memory_space<vmem>>, vector<1x32xf32>
    %238 = vector.broadcast %237 : vector<1x32xf32> to vector<32x32xf32>
    %239 = arith.addf %236, %238 : vector<32x32xf32>
    %240 = vector.broadcast %1 : vector<32x1xf32> to vector<32x32xf32>
    %241 = arith.mulf %239, %240 : vector<32x32xf32>
    %c0_122 = arith.constant 0 : index
    %c0_123 = arith.constant 0 : index
    %242 = vector.load %arg23[%c0_122, %c0_123] : memref<32x32xf32, #tpu.memory_space<vmem>>, vector<32x32xf32>
    %cst_124 = arith.constant dense<0.000000e+00> : vector<32x32xf32>
    %243 = tpu.matmul %241, %242, %cst_124 {dimension_numbers = #tpu.dot_dimension_numbers<[1], [0], [0], [1], [0, 0, 1, 1], [], []>} : vector<32x32xf32>, vector<32x32xf32>, vector<32x32xf32> -> vector<32x32xf32>
    %c0_125 = arith.constant 0 : index
    %c0_126 = arith.constant 0 : index
    %244 = vector.load %arg24[%c0_125, %c0_126] : memref<32x64xf32, #tpu.memory_space<vmem>>, vector<32x64xf32>
    %cst_127 = arith.constant dense<0.000000e+00> : vector<32x64xf32>
    %245 = tpu.matmul %241, %244, %cst_127 {dimension_numbers = #tpu.dot_dimension_numbers<[1], [0], [0], [1], [0, 0, 1, 1], [], []>} : vector<32x32xf32>, vector<32x64xf32>, vector<32x64xf32> -> vector<32x64xf32>
    %246 = vector.extract_strided_slice %245 {offsets = [0, 0], sizes = [32, 32], strides = [1, 1]} : vector<32x64xf32> to vector<32x32xf32>
    %247 = vector.extract_strided_slice %245 {offsets = [0, 32], sizes = [32, 32], strides = [1, 1]} : vector<32x64xf32> to vector<32x32xf32>
    %c0_128 = arith.constant 0 : index
    %c0_129 = arith.constant 0 : index
    %248 = vector.load %arg25[%c0_128, %c0_129] : memref<32x32xf32, #tpu.memory_space<vmem>>, vector<32x32xf32>
    %249 = vector.extract_strided_slice %243 {offsets = [0, 0], sizes = [32, 8], strides = [1, 1]} : vector<32x32xf32> to vector<32x8xf32>
    %cst_130 = arith.constant 0.353553385 : f32
    %250 = vector.broadcast %cst_130 : f32 to vector<32x8xf32>
    %251 = arith.mulf %249, %250 : vector<32x8xf32>
    %252 = vector.extract_strided_slice %246 {offsets = [0, 0], sizes = [32, 8], strides = [1, 1]} : vector<32x32xf32> to vector<32x8xf32>
    %253 = vector.extract_strided_slice %247 {offsets = [0, 0], sizes = [32, 8], strides = [1, 1]} : vector<32x32xf32> to vector<32x8xf32>
    %cst_131 = arith.constant dense<0.000000e+00> : vector<32x32xf32>
    %254 = tpu.matmul %251, %252, %cst_131 {dimension_numbers = #tpu.dot_dimension_numbers<[1], [1], [0], [0], [0, 0, 1, 0], [], []>} : vector<32x8xf32>, vector<32x8xf32>, vector<32x32xf32> -> vector<32x32xf32>
    %255 = arith.addf %254, %4 : vector<32x32xf32>
    %cst_132 = arith.constant dense<0xFF800000> : vector<32xf32>
    %256 = vector.multi_reduction <maximumf>, %255, %cst_132 [1] : vector<32x32xf32> to vector<32xf32>
    %257 = vector.shape_cast %256 : vector<32xf32> to vector<32x1xf32>
    %258 = vector.broadcast %257 : vector<32x1xf32> to vector<32x32xf32>
    %259 = arith.subf %255, %258 : vector<32x32xf32>
    %260 = math.exp %259 : vector<32x32xf32>
    %cst_133 = arith.constant dense<0.000000e+00> : vector<32xf32>
    %261 = vector.multi_reduction <add>, %260, %cst_133 [1] : vector<32x32xf32> to vector<32xf32>
    %262 = vector.shape_cast %261 : vector<32xf32> to vector<32x1xf32>
    %263 = tpu.reciprocal %262 {approx = true} : vector<32x1xf32> -> vector<32x1xf32>
    %264 = vector.broadcast %263 : vector<32x1xf32> to vector<32x32xf32>
    %265 = arith.mulf %260, %264 : vector<32x32xf32>
    %cst_134 = arith.constant dense<0.000000e+00> : vector<32x8xf32>
    %266 = tpu.matmul %265, %253, %cst_134 {dimension_numbers = #tpu.dot_dimension_numbers<[1], [0], [0], [1], [0, 0, 1, 1], [], []>} : vector<32x32xf32>, vector<32x8xf32>, vector<32x8xf32> -> vector<32x8xf32>
    %267 = vector.extract_strided_slice %248 {offsets = [0, 0], sizes = [8, 32], strides = [1, 1]} : vector<32x32xf32> to vector<8x32xf32>
    %cst_135 = arith.constant dense<0.000000e+00> : vector<32x32xf32>
    %268 = tpu.matmul %266, %267, %cst_135 {dimension_numbers = #tpu.dot_dimension_numbers<[1], [0], [0], [1], [0, 0, 1, 1], [], []>} : vector<32x8xf32>, vector<8x32xf32>, vector<32x32xf32> -> vector<32x32xf32>
    %269 = vector.extract_strided_slice %243 {offsets = [0, 8], sizes = [32, 8], strides = [1, 1]} : vector<32x32xf32> to vector<32x8xf32>
    %cst_136 = arith.constant 0.353553385 : f32
    %270 = vector.broadcast %cst_136 : f32 to vector<32x8xf32>
    %271 = arith.mulf %269, %270 : vector<32x8xf32>
    %272 = vector.extract_strided_slice %246 {offsets = [0, 8], sizes = [32, 8], strides = [1, 1]} : vector<32x32xf32> to vector<32x8xf32>
    %273 = vector.extract_strided_slice %247 {offsets = [0, 8], sizes = [32, 8], strides = [1, 1]} : vector<32x32xf32> to vector<32x8xf32>
    %cst_137 = arith.constant dense<0.000000e+00> : vector<32x32xf32>
    %274 = tpu.matmul %271, %272, %cst_137 {dimension_numbers = #tpu.dot_dimension_numbers<[1], [1], [0], [0], [0, 0, 1, 0], [], []>} : vector<32x8xf32>, vector<32x8xf32>, vector<32x32xf32> -> vector<32x32xf32>
    %275 = arith.addf %274, %4 : vector<32x32xf32>
    %cst_138 = arith.constant dense<0xFF800000> : vector<32xf32>
    %276 = vector.multi_reduction <maximumf>, %275, %cst_138 [1] : vector<32x32xf32> to vector<32xf32>
    %277 = vector.shape_cast %276 : vector<32xf32> to vector<32x1xf32>
    %278 = vector.broadcast %277 : vector<32x1xf32> to vector<32x32xf32>
    %279 = arith.subf %275, %278 : vector<32x32xf32>
    %280 = math.exp %279 : vector<32x32xf32>
    %cst_139 = arith.constant dense<0.000000e+00> : vector<32xf32>
    %281 = vector.multi_reduction <add>, %280, %cst_139 [1] : vector<32x32xf32> to vector<32xf32>
    %282 = vector.shape_cast %281 : vector<32xf32> to vector<32x1xf32>
    %283 = tpu.reciprocal %282 {approx = true} : vector<32x1xf32> -> vector<32x1xf32>
    %284 = vector.broadcast %283 : vector<32x1xf32> to vector<32x32xf32>
    %285 = arith.mulf %280, %284 : vector<32x32xf32>
    %cst_140 = arith.constant dense<0.000000e+00> : vector<32x8xf32>
    %286 = tpu.matmul %285, %273, %cst_140 {dimension_numbers = #tpu.dot_dimension_numbers<[1], [0], [0], [1], [0, 0, 1, 1], [], []>} : vector<32x32xf32>, vector<32x8xf32>, vector<32x8xf32> -> vector<32x8xf32>
    %287 = vector.extract_strided_slice %248 {offsets = [8, 0], sizes = [8, 32], strides = [1, 1]} : vector<32x32xf32> to vector<8x32xf32>
    %cst_141 = arith.constant dense<0.000000e+00> : vector<32x32xf32>
    %288 = tpu.matmul %286, %287, %cst_141 {dimension_numbers = #tpu.dot_dimension_numbers<[1], [0], [0], [1], [0, 0, 1, 1], [], []>} : vector<32x8xf32>, vector<8x32xf32>, vector<32x32xf32> -> vector<32x32xf32>
    %289 = arith.addf %268, %288 : vector<32x32xf32>
    %290 = vector.extract_strided_slice %243 {offsets = [0, 16], sizes = [32, 8], strides = [1, 1]} : vector<32x32xf32> to vector<32x8xf32>
    %cst_142 = arith.constant 0.353553385 : f32
    %291 = vector.broadcast %cst_142 : f32 to vector<32x8xf32>
    %292 = arith.mulf %290, %291 : vector<32x8xf32>
    %293 = vector.extract_strided_slice %246 {offsets = [0, 16], sizes = [32, 8], strides = [1, 1]} : vector<32x32xf32> to vector<32x8xf32>
    %294 = vector.extract_strided_slice %247 {offsets = [0, 16], sizes = [32, 8], strides = [1, 1]} : vector<32x32xf32> to vector<32x8xf32>
    %cst_143 = arith.constant dense<0.000000e+00> : vector<32x32xf32>
    %295 = tpu.matmul %292, %293, %cst_143 {dimension_numbers = #tpu.dot_dimension_numbers<[1], [1], [0], [0], [0, 0, 1, 0], [], []>} : vector<32x8xf32>, vector<32x8xf32>, vector<32x32xf32> -> vector<32x32xf32>
    %296 = arith.addf %295, %4 : vector<32x32xf32>
    %cst_144 = arith.constant dense<0xFF800000> : vector<32xf32>
    %297 = vector.multi_reduction <maximumf>, %296, %cst_144 [1] : vector<32x32xf32> to vector<32xf32>
    %298 = vector.shape_cast %297 : vector<32xf32> to vector<32x1xf32>
    %299 = vector.broadcast %298 : vector<32x1xf32> to vector<32x32xf32>
    %300 = arith.subf %296, %299 : vector<32x32xf32>
    %301 = math.exp %300 : vector<32x32xf32>
    %cst_145 = arith.constant dense<0.000000e+00> : vector<32xf32>
    %302 = vector.multi_reduction <add>, %301, %cst_145 [1] : vector<32x32xf32> to vector<32xf32>
    %303 = vector.shape_cast %302 : vector<32xf32> to vector<32x1xf32>
    %304 = tpu.reciprocal %303 {approx = true} : vector<32x1xf32> -> vector<32x1xf32>
    %305 = vector.broadcast %304 : vector<32x1xf32> to vector<32x32xf32>
    %306 = arith.mulf %301, %305 : vector<32x32xf32>
    %cst_146 = arith.constant dense<0.000000e+00> : vector<32x8xf32>
    %307 = tpu.matmul %306, %294, %cst_146 {dimension_numbers = #tpu.dot_dimension_numbers<[1], [0], [0], [1], [0, 0, 1, 1], [], []>} : vector<32x32xf32>, vector<32x8xf32>, vector<32x8xf32> -> vector<32x8xf32>
    %308 = vector.extract_strided_slice %248 {offsets = [16, 0], sizes = [8, 32], strides = [1, 1]} : vector<32x32xf32> to vector<8x32xf32>
    %cst_147 = arith.constant dense<0.000000e+00> : vector<32x32xf32>
    %309 = tpu.matmul %307, %308, %cst_147 {dimension_numbers = #tpu.dot_dimension_numbers<[1], [0], [0], [1], [0, 0, 1, 1], [], []>} : vector<32x8xf32>, vector<8x32xf32>, vector<32x32xf32> -> vector<32x32xf32>
    %310 = arith.addf %289, %309 : vector<32x32xf32>
    %311 = vector.extract_strided_slice %243 {offsets = [0, 24], sizes = [32, 8], strides = [1, 1]} : vector<32x32xf32> to vector<32x8xf32>
    %cst_148 = arith.constant 0.353553385 : f32
    %312 = vector.broadcast %cst_148 : f32 to vector<32x8xf32>
    %313 = arith.mulf %311, %312 : vector<32x8xf32>
    %314 = vector.extract_strided_slice %246 {offsets = [0, 24], sizes = [32, 8], strides = [1, 1]} : vector<32x32xf32> to vector<32x8xf32>
    %315 = vector.extract_strided_slice %247 {offsets = [0, 24], sizes = [32, 8], strides = [1, 1]} : vector<32x32xf32> to vector<32x8xf32>
    %cst_149 = arith.constant dense<0.000000e+00> : vector<32x32xf32>
    %316 = tpu.matmul %313, %314, %cst_149 {dimension_numbers = #tpu.dot_dimension_numbers<[1], [1], [0], [0], [0, 0, 1, 0], [], []>} : vector<32x8xf32>, vector<32x8xf32>, vector<32x32xf32> -> vector<32x32xf32>
    %317 = arith.addf %316, %4 : vector<32x32xf32>
    %cst_150 = arith.constant dense<0xFF800000> : vector<32xf32>
    %318 = vector.multi_reduction <maximumf>, %317, %cst_150 [1] : vector<32x32xf32> to vector<32xf32>
    %319 = vector.shape_cast %318 : vector<32xf32> to vector<32x1xf32>
    %320 = vector.broadcast %319 : vector<32x1xf32> to vector<32x32xf32>
    %321 = arith.subf %317, %320 : vector<32x32xf32>
    %322 = math.exp %321 : vector<32x32xf32>
    %cst_151 = arith.constant dense<0.000000e+00> : vector<32xf32>
    %323 = vector.multi_reduction <add>, %322, %cst_151 [1] : vector<32x32xf32> to vector<32xf32>
    %324 = vector.shape_cast %323 : vector<32xf32> to vector<32x1xf32>
    %325 = tpu.reciprocal %324 {approx = true} : vector<32x1xf32> -> vector<32x1xf32>
    %326 = vector.broadcast %325 : vector<32x1xf32> to vector<32x32xf32>
    %327 = arith.mulf %322, %326 : vector<32x32xf32>
    %cst_152 = arith.constant dense<0.000000e+00> : vector<32x8xf32>
    %328 = tpu.matmul %327, %315, %cst_152 {dimension_numbers = #tpu.dot_dimension_numbers<[1], [0], [0], [1], [0, 0, 1, 1], [], []>} : vector<32x32xf32>, vector<32x8xf32>, vector<32x8xf32> -> vector<32x8xf32>
    %329 = vector.extract_strided_slice %248 {offsets = [24, 0], sizes = [8, 32], strides = [1, 1]} : vector<32x32xf32> to vector<8x32xf32>
    %cst_153 = arith.constant dense<0.000000e+00> : vector<32x32xf32>
    %330 = tpu.matmul %328, %329, %cst_153 {dimension_numbers = #tpu.dot_dimension_numbers<[1], [0], [0], [1], [0, 0, 1, 1], [], []>} : vector<32x8xf32>, vector<8x32xf32>, vector<32x32xf32> -> vector<32x32xf32>
    %331 = arith.addf %310, %330 : vector<32x32xf32>
    %332 = arith.addf %241, %331 : vector<32x32xf32>
    %c0_154 = arith.constant 0 : index
    %c0_155 = arith.constant 0 : index
    %333 = vector.load %arg26[%c0_154, %c0_155] : memref<1x32xf32, #tpu.memory_space<vmem>>, vector<1x32xf32>
    %c0_156 = arith.constant 0 : index
    %c0_157 = arith.constant 0 : index
    %334 = vector.load %arg27[%c0_156, %c0_157] : memref<1x32xf32, #tpu.memory_space<vmem>>, vector<1x32xf32>
    %cst_158 = arith.constant dense<0.000000e+00> : vector<32xf32>
    %335 = vector.multi_reduction <add>, %332, %cst_158 [1] : vector<32x32xf32> to vector<32xf32>
    %336 = vector.shape_cast %335 : vector<32xf32> to vector<32x1xf32>
    %cst_159 = arith.constant 3.200000e+01 : f32
    %337 = vector.broadcast %cst_159 : f32 to vector<32x1xf32>
    %338 = arith.divf %336, %337 : vector<32x1xf32>
    %339 = vector.broadcast %338 : vector<32x1xf32> to vector<32x32xf32>
    %340 = arith.subf %332, %339 : vector<32x32xf32>
    %341 = arith.mulf %340, %340 : vector<32x32xf32>
    %cst_160 = arith.constant dense<0.000000e+00> : vector<32xf32>
    %342 = vector.multi_reduction <add>, %341, %cst_160 [1] : vector<32x32xf32> to vector<32xf32>
    %343 = vector.shape_cast %342 : vector<32xf32> to vector<32x1xf32>
    %cst_161 = arith.constant 3.200000e+01 : f32
    %344 = vector.broadcast %cst_161 : f32 to vector<32x1xf32>
    %345 = arith.divf %343, %344 : vector<32x1xf32>
    %346 = vector.broadcast %338 : vector<32x1xf32> to vector<32x32xf32>
    %347 = arith.subf %332, %346 : vector<32x32xf32>
    %cst_162 = arith.constant 9.99999974E-6 : f32
    %348 = vector.broadcast %cst_162 : f32 to vector<32x1xf32>
    %349 = arith.addf %345, %348 : vector<32x1xf32>
    %350 = math.rsqrt %349 : vector<32x1xf32>
    %351 = vector.broadcast %350 : vector<32x1xf32> to vector<32x32xf32>
    %352 = arith.mulf %347, %351 : vector<32x32xf32>
    %353 = vector.broadcast %333 : vector<1x32xf32> to vector<32x32xf32>
    %354 = arith.mulf %352, %353 : vector<32x32xf32>
    %355 = vector.broadcast %334 : vector<1x32xf32> to vector<32x32xf32>
    %356 = arith.addf %354, %355 : vector<32x32xf32>
    %c0_163 = arith.constant 0 : index
    %c0_164 = arith.constant 0 : index
    %357 = vector.load %arg28[%c0_163, %c0_164] : memref<32x128xf32, #tpu.memory_space<vmem>>, vector<32x128xf32>
    %cst_165 = arith.constant dense<0.000000e+00> : vector<32x128xf32>
    %358 = tpu.matmul %356, %357, %cst_165 {dimension_numbers = #tpu.dot_dimension_numbers<[1], [0], [0], [1], [0, 0, 1, 1], [], []>} : vector<32x32xf32>, vector<32x128xf32>, vector<32x128xf32> -> vector<32x128xf32>
    %c0_166 = arith.constant 0 : index
    %c0_167 = arith.constant 0 : index
    %359 = vector.load %arg29[%c0_166, %c0_167] : memref<1x128xf32, #tpu.memory_space<vmem>>, vector<1x128xf32>
    %360 = vector.broadcast %359 : vector<1x128xf32> to vector<32x128xf32>
    %361 = arith.addf %358, %360 : vector<32x128xf32>
    %cst_168 = arith.constant 0.000000e+00 : f32
    %362 = vector.broadcast %cst_168 : f32 to vector<32x128xf32>
    %363 = arith.maximumf %361, %362 : vector<32x128xf32>
    %c0_169 = arith.constant 0 : index
    %c0_170 = arith.constant 0 : index
    %364 = vector.load %arg30[%c0_169, %c0_170] : memref<128x32xf32, #tpu.memory_space<vmem>>, vector<128x32xf32>
    %cst_171 = arith.constant dense<0.000000e+00> : vector<32x32xf32>
    %365 = tpu.matmul %363, %364, %cst_171 {dimension_numbers = #tpu.dot_dimension_numbers<[1], [0], [0], [1], [0, 0, 1, 1], [], []>} : vector<32x128xf32>, vector<128x32xf32>, vector<32x32xf32> -> vector<32x32xf32>
    %c0_172 = arith.constant 0 : index
    %c0_173 = arith.constant 0 : index
    %366 = vector.load %arg31[%c0_172, %c0_173] : memref<1x32xf32, #tpu.memory_space<vmem>>, vector<1x32xf32>
    %367 = vector.broadcast %366 : vector<1x32xf32> to vector<32x32xf32>
    %368 = arith.addf %365, %367 : vector<32x32xf32>
    %369 = arith.addf %356, %368 : vector<32x32xf32>
    %c0_174 = arith.constant 0 : index
    %c0_175 = arith.constant 0 : index
    %370 = vector.load %arg32[%c0_174, %c0_175] : memref<1x32xf32, #tpu.memory_space<vmem>>, vector<1x32xf32>
    %c0_176 = arith.constant 0 : index
    %c0_177 = arith.constant 0 : index
    %371 = vector.load %arg33[%c0_176, %c0_177] : memref<1x32xf32, #tpu.memory_space<vmem>>, vector<1x32xf32>
    %cst_178 = arith.constant dense<0.000000e+00> : vector<32xf32>
    %372 = vector.multi_reduction <add>, %369, %cst_178 [1] : vector<32x32xf32> to vector<32xf32>
    %373 = vector.shape_cast %372 : vector<32xf32> to vector<32x1xf32>
    %cst_179 = arith.constant 3.200000e+01 : f32
    %374 = vector.broadcast %cst_179 : f32 to vector<32x1xf32>
    %375 = arith.divf %373, %374 : vector<32x1xf32>
    %376 = vector.broadcast %375 : vector<32x1xf32> to vector<32x32xf32>
    %377 = arith.subf %369, %376 : vector<32x32xf32>
    %378 = arith.mulf %377, %377 : vector<32x32xf32>
    %cst_180 = arith.constant dense<0.000000e+00> : vector<32xf32>
    %379 = vector.multi_reduction <add>, %378, %cst_180 [1] : vector<32x32xf32> to vector<32xf32>
    %380 = vector.shape_cast %379 : vector<32xf32> to vector<32x1xf32>
    %cst_181 = arith.constant 3.200000e+01 : f32
    %381 = vector.broadcast %cst_181 : f32 to vector<32x1xf32>
    %382 = arith.divf %380, %381 : vector<32x1xf32>
    %383 = vector.broadcast %375 : vector<32x1xf32> to vector<32x32xf32>
    %384 = arith.subf %369, %383 : vector<32x32xf32>
    %cst_182 = arith.constant 9.99999974E-6 : f32
    %385 = vector.broadcast %cst_182 : f32 to vector<32x1xf32>
    %386 = arith.addf %382, %385 : vector<32x1xf32>
    %387 = math.rsqrt %386 : vector<32x1xf32>
    %388 = vector.broadcast %387 : vector<32x1xf32> to vector<32x32xf32>
    %389 = arith.mulf %384, %388 : vector<32x32xf32>
    %390 = vector.broadcast %370 : vector<1x32xf32> to vector<32x32xf32>
    %391 = arith.mulf %389, %390 : vector<32x32xf32>
    %392 = vector.broadcast %371 : vector<1x32xf32> to vector<32x32xf32>
    %393 = arith.addf %391, %392 : vector<32x32xf32>
    %c0_183 = arith.constant 0 : index
    %c0_184 = arith.constant 0 : index
    %394 = vector.load %arg34[%c0_183, %c0_184] : memref<32x32xf32, #tpu.memory_space<vmem>>, vector<32x32xf32>
    %cst_185 = arith.constant dense<0.000000e+00> : vector<32x32xf32>
    %395 = tpu.matmul %393, %394, %cst_185 {dimension_numbers = #tpu.dot_dimension_numbers<[1], [0], [0], [1], [0, 0, 1, 1], [], []>} : vector<32x32xf32>, vector<32x32xf32>, vector<32x32xf32> -> vector<32x32xf32>
    %c0_186 = arith.constant 0 : index
    %c0_187 = arith.constant 0 : index
    %396 = vector.load %arg35[%c0_186, %c0_187] : memref<32x64xf32, #tpu.memory_space<vmem>>, vector<32x64xf32>
    %cst_188 = arith.constant dense<0.000000e+00> : vector<64x64xf32>
    %397 = tpu.matmul %0, %396, %cst_188 {dimension_numbers = #tpu.dot_dimension_numbers<[1], [0], [0], [1], [0, 0, 1, 1], [], []>} : vector<64x32xf32>, vector<32x64xf32>, vector<64x64xf32> -> vector<64x64xf32>
    %398 = vector.extract_strided_slice %397 {offsets = [0, 0], sizes = [64, 32], strides = [1, 1]} : vector<64x64xf32> to vector<64x32xf32>
    %399 = vector.extract_strided_slice %397 {offsets = [0, 32], sizes = [64, 32], strides = [1, 1]} : vector<64x64xf32> to vector<64x32xf32>
    %c0_189 = arith.constant 0 : index
    %c0_190 = arith.constant 0 : index
    %400 = vector.load %arg36[%c0_189, %c0_190] : memref<32x32xf32, #tpu.memory_space<vmem>>, vector<32x32xf32>
    %401 = vector.extract_strided_slice %395 {offsets = [0, 0], sizes = [32, 8], strides = [1, 1]} : vector<32x32xf32> to vector<32x8xf32>
    %cst_191 = arith.constant 0.353553385 : f32
    %402 = vector.broadcast %cst_191 : f32 to vector<32x8xf32>
    %403 = arith.mulf %401, %402 : vector<32x8xf32>
    %404 = vector.extract_strided_slice %398 {offsets = [0, 0], sizes = [64, 8], strides = [1, 1]} : vector<64x32xf32> to vector<64x8xf32>
    %405 = vector.extract_strided_slice %399 {offsets = [0, 0], sizes = [64, 8], strides = [1, 1]} : vector<64x32xf32> to vector<64x8xf32>
    %cst_192 = arith.constant dense<0.000000e+00> : vector<32x64xf32>
    %406 = tpu.matmul %403, %404, %cst_192 {dimension_numbers = #tpu.dot_dimension_numbers<[1], [1], [0], [0], [0, 0, 1, 0], [], []>} : vector<32x8xf32>, vector<64x8xf32>, vector<32x64xf32> -> vector<32x64xf32>
    %407 = arith.addf %406, %3 : vector<32x64xf32>
    %cst_193 = arith.constant dense<0xFF800000> : vector<32xf32>
    %408 = vector.multi_reduction <maximumf>, %407, %cst_193 [1] : vector<32x64xf32> to vector<32xf32>
    %409 = vector.shape_cast %408 : vector<32xf32> to vector<32x1xf32>
    %410 = vector.broadcast %409 : vector<32x1xf32> to vector<32x64xf32>
    %411 = arith.subf %407, %410 : vector<32x64xf32>
    %412 = math.exp %411 : vector<32x64xf32>
    %cst_194 = arith.constant dense<0.000000e+00> : vector<32xf32>
    %413 = vector.multi_reduction <add>, %412, %cst_194 [1] : vector<32x64xf32> to vector<32xf32>
    %414 = vector.shape_cast %413 : vector<32xf32> to vector<32x1xf32>
    %415 = tpu.reciprocal %414 {approx = true} : vector<32x1xf32> -> vector<32x1xf32>
    %416 = vector.broadcast %415 : vector<32x1xf32> to vector<32x64xf32>
    %417 = arith.mulf %412, %416 : vector<32x64xf32>
    %cst_195 = arith.constant dense<0.000000e+00> : vector<32x8xf32>
    %418 = tpu.matmul %417, %405, %cst_195 {dimension_numbers = #tpu.dot_dimension_numbers<[1], [0], [0], [1], [0, 0, 1, 1], [], []>} : vector<32x64xf32>, vector<64x8xf32>, vector<32x8xf32> -> vector<32x8xf32>
    %419 = vector.extract_strided_slice %400 {offsets = [0, 0], sizes = [8, 32], strides = [1, 1]} : vector<32x32xf32> to vector<8x32xf32>
    %cst_196 = arith.constant dense<0.000000e+00> : vector<32x32xf32>
    %420 = tpu.matmul %418, %419, %cst_196 {dimension_numbers = #tpu.dot_dimension_numbers<[1], [0], [0], [1], [0, 0, 1, 1], [], []>} : vector<32x8xf32>, vector<8x32xf32>, vector<32x32xf32> -> vector<32x32xf32>
    %421 = vector.extract_strided_slice %395 {offsets = [0, 8], sizes = [32, 8], strides = [1, 1]} : vector<32x32xf32> to vector<32x8xf32>
    %cst_197 = arith.constant 0.353553385 : f32
    %422 = vector.broadcast %cst_197 : f32 to vector<32x8xf32>
    %423 = arith.mulf %421, %422 : vector<32x8xf32>
    %424 = vector.extract_strided_slice %398 {offsets = [0, 8], sizes = [64, 8], strides = [1, 1]} : vector<64x32xf32> to vector<64x8xf32>
    %425 = vector.extract_strided_slice %399 {offsets = [0, 8], sizes = [64, 8], strides = [1, 1]} : vector<64x32xf32> to vector<64x8xf32>
    %cst_198 = arith.constant dense<0.000000e+00> : vector<32x64xf32>
    %426 = tpu.matmul %423, %424, %cst_198 {dimension_numbers = #tpu.dot_dimension_numbers<[1], [1], [0], [0], [0, 0, 1, 0], [], []>} : vector<32x8xf32>, vector<64x8xf32>, vector<32x64xf32> -> vector<32x64xf32>
    %427 = arith.addf %426, %3 : vector<32x64xf32>
    %cst_199 = arith.constant dense<0xFF800000> : vector<32xf32>
    %428 = vector.multi_reduction <maximumf>, %427, %cst_199 [1] : vector<32x64xf32> to vector<32xf32>
    %429 = vector.shape_cast %428 : vector<32xf32> to vector<32x1xf32>
    %430 = vector.broadcast %429 : vector<32x1xf32> to vector<32x64xf32>
    %431 = arith.subf %427, %430 : vector<32x64xf32>
    %432 = math.exp %431 : vector<32x64xf32>
    %cst_200 = arith.constant dense<0.000000e+00> : vector<32xf32>
    %433 = vector.multi_reduction <add>, %432, %cst_200 [1] : vector<32x64xf32> to vector<32xf32>
    %434 = vector.shape_cast %433 : vector<32xf32> to vector<32x1xf32>
    %435 = tpu.reciprocal %434 {approx = true} : vector<32x1xf32> -> vector<32x1xf32>
    %436 = vector.broadcast %435 : vector<32x1xf32> to vector<32x64xf32>
    %437 = arith.mulf %432, %436 : vector<32x64xf32>
    %cst_201 = arith.constant dense<0.000000e+00> : vector<32x8xf32>
    %438 = tpu.matmul %437, %425, %cst_201 {dimension_numbers = #tpu.dot_dimension_numbers<[1], [0], [0], [1], [0, 0, 1, 1], [], []>} : vector<32x64xf32>, vector<64x8xf32>, vector<32x8xf32> -> vector<32x8xf32>
    %439 = vector.extract_strided_slice %400 {offsets = [8, 0], sizes = [8, 32], strides = [1, 1]} : vector<32x32xf32> to vector<8x32xf32>
    %cst_202 = arith.constant dense<0.000000e+00> : vector<32x32xf32>
    %440 = tpu.matmul %438, %439, %cst_202 {dimension_numbers = #tpu.dot_dimension_numbers<[1], [0], [0], [1], [0, 0, 1, 1], [], []>} : vector<32x8xf32>, vector<8x32xf32>, vector<32x32xf32> -> vector<32x32xf32>
    %441 = arith.addf %420, %440 : vector<32x32xf32>
    %442 = vector.extract_strided_slice %395 {offsets = [0, 16], sizes = [32, 8], strides = [1, 1]} : vector<32x32xf32> to vector<32x8xf32>
    %cst_203 = arith.constant 0.353553385 : f32
    %443 = vector.broadcast %cst_203 : f32 to vector<32x8xf32>
    %444 = arith.mulf %442, %443 : vector<32x8xf32>
    %445 = vector.extract_strided_slice %398 {offsets = [0, 16], sizes = [64, 8], strides = [1, 1]} : vector<64x32xf32> to vector<64x8xf32>
    %446 = vector.extract_strided_slice %399 {offsets = [0, 16], sizes = [64, 8], strides = [1, 1]} : vector<64x32xf32> to vector<64x8xf32>
    %cst_204 = arith.constant dense<0.000000e+00> : vector<32x64xf32>
    %447 = tpu.matmul %444, %445, %cst_204 {dimension_numbers = #tpu.dot_dimension_numbers<[1], [1], [0], [0], [0, 0, 1, 0], [], []>} : vector<32x8xf32>, vector<64x8xf32>, vector<32x64xf32> -> vector<32x64xf32>
    %448 = arith.addf %447, %3 : vector<32x64xf32>
    %cst_205 = arith.constant dense<0xFF800000> : vector<32xf32>
    %449 = vector.multi_reduction <maximumf>, %448, %cst_205 [1] : vector<32x64xf32> to vector<32xf32>
    %450 = vector.shape_cast %449 : vector<32xf32> to vector<32x1xf32>
    %451 = vector.broadcast %450 : vector<32x1xf32> to vector<32x64xf32>
    %452 = arith.subf %448, %451 : vector<32x64xf32>
    %453 = math.exp %452 : vector<32x64xf32>
    %cst_206 = arith.constant dense<0.000000e+00> : vector<32xf32>
    %454 = vector.multi_reduction <add>, %453, %cst_206 [1] : vector<32x64xf32> to vector<32xf32>
    %455 = vector.shape_cast %454 : vector<32xf32> to vector<32x1xf32>
    %456 = tpu.reciprocal %455 {approx = true} : vector<32x1xf32> -> vector<32x1xf32>
    %457 = vector.broadcast %456 : vector<32x1xf32> to vector<32x64xf32>
    %458 = arith.mulf %453, %457 : vector<32x64xf32>
    %cst_207 = arith.constant dense<0.000000e+00> : vector<32x8xf32>
    %459 = tpu.matmul %458, %446, %cst_207 {dimension_numbers = #tpu.dot_dimension_numbers<[1], [0], [0], [1], [0, 0, 1, 1], [], []>} : vector<32x64xf32>, vector<64x8xf32>, vector<32x8xf32> -> vector<32x8xf32>
    %460 = vector.extract_strided_slice %400 {offsets = [16, 0], sizes = [8, 32], strides = [1, 1]} : vector<32x32xf32> to vector<8x32xf32>
    %cst_208 = arith.constant dense<0.000000e+00> : vector<32x32xf32>
    %461 = tpu.matmul %459, %460, %cst_208 {dimension_numbers = #tpu.dot_dimension_numbers<[1], [0], [0], [1], [0, 0, 1, 1], [], []>} : vector<32x8xf32>, vector<8x32xf32>, vector<32x32xf32> -> vector<32x32xf32>
    %462 = arith.addf %441, %461 : vector<32x32xf32>
    %463 = vector.extract_strided_slice %395 {offsets = [0, 24], sizes = [32, 8], strides = [1, 1]} : vector<32x32xf32> to vector<32x8xf32>
    %cst_209 = arith.constant 0.353553385 : f32
    %464 = vector.broadcast %cst_209 : f32 to vector<32x8xf32>
    %465 = arith.mulf %463, %464 : vector<32x8xf32>
    %466 = vector.extract_strided_slice %398 {offsets = [0, 24], sizes = [64, 8], strides = [1, 1]} : vector<64x32xf32> to vector<64x8xf32>
    %467 = vector.extract_strided_slice %399 {offsets = [0, 24], sizes = [64, 8], strides = [1, 1]} : vector<64x32xf32> to vector<64x8xf32>
    %cst_210 = arith.constant dense<0.000000e+00> : vector<32x64xf32>
    %468 = tpu.matmul %465, %466, %cst_210 {dimension_numbers = #tpu.dot_dimension_numbers<[1], [1], [0], [0], [0, 0, 1, 0], [], []>} : vector<32x8xf32>, vector<64x8xf32>, vector<32x64xf32> -> vector<32x64xf32>
    %469 = arith.addf %468, %3 : vector<32x64xf32>
    %cst_211 = arith.constant dense<0xFF800000> : vector<32xf32>
    %470 = vector.multi_reduction <maximumf>, %469, %cst_211 [1] : vector<32x64xf32> to vector<32xf32>
    %471 = vector.shape_cast %470 : vector<32xf32> to vector<32x1xf32>
    %472 = vector.broadcast %471 : vector<32x1xf32> to vector<32x64xf32>
    %473 = arith.subf %469, %472 : vector<32x64xf32>
    %474 = math.exp %473 : vector<32x64xf32>
    %cst_212 = arith.constant dense<0.000000e+00> : vector<32xf32>
    %475 = vector.multi_reduction <add>, %474, %cst_212 [1] : vector<32x64xf32> to vector<32xf32>
    %476 = vector.shape_cast %475 : vector<32xf32> to vector<32x1xf32>
    %477 = tpu.reciprocal %476 {approx = true} : vector<32x1xf32> -> vector<32x1xf32>
    %478 = vector.broadcast %477 : vector<32x1xf32> to vector<32x64xf32>
    %479 = arith.mulf %474, %478 : vector<32x64xf32>
    %cst_213 = arith.constant dense<0.000000e+00> : vector<32x8xf32>
    %480 = tpu.matmul %479, %467, %cst_213 {dimension_numbers = #tpu.dot_dimension_numbers<[1], [0], [0], [1], [0, 0, 1, 1], [], []>} : vector<32x64xf32>, vector<64x8xf32>, vector<32x8xf32> -> vector<32x8xf32>
    %481 = vector.extract_strided_slice %400 {offsets = [24, 0], sizes = [8, 32], strides = [1, 1]} : vector<32x32xf32> to vector<8x32xf32>
    %cst_214 = arith.constant dense<0.000000e+00> : vector<32x32xf32>
    %482 = tpu.matmul %480, %481, %cst_214 {dimension_numbers = #tpu.dot_dimension_numbers<[1], [0], [0], [1], [0, 0, 1, 1], [], []>} : vector<32x8xf32>, vector<8x32xf32>, vector<32x32xf32> -> vector<32x32xf32>
    %483 = arith.addf %462, %482 : vector<32x32xf32>
    %484 = arith.addf %393, %483 : vector<32x32xf32>
    %c0_215 = arith.constant 0 : index
    %c0_216 = arith.constant 0 : index
    %485 = vector.load %arg37[%c0_215, %c0_216] : memref<1x32xf32, #tpu.memory_space<vmem>>, vector<1x32xf32>
    %c0_217 = arith.constant 0 : index
    %c0_218 = arith.constant 0 : index
    %486 = vector.load %arg38[%c0_217, %c0_218] : memref<1x32xf32, #tpu.memory_space<vmem>>, vector<1x32xf32>
    %cst_219 = arith.constant dense<0.000000e+00> : vector<32xf32>
    %487 = vector.multi_reduction <add>, %484, %cst_219 [1] : vector<32x32xf32> to vector<32xf32>
    %488 = vector.shape_cast %487 : vector<32xf32> to vector<32x1xf32>
    %cst_220 = arith.constant 3.200000e+01 : f32
    %489 = vector.broadcast %cst_220 : f32 to vector<32x1xf32>
    %490 = arith.divf %488, %489 : vector<32x1xf32>
    %491 = vector.broadcast %490 : vector<32x1xf32> to vector<32x32xf32>
    %492 = arith.subf %484, %491 : vector<32x32xf32>
    %493 = arith.mulf %492, %492 : vector<32x32xf32>
    %cst_221 = arith.constant dense<0.000000e+00> : vector<32xf32>
    %494 = vector.multi_reduction <add>, %493, %cst_221 [1] : vector<32x32xf32> to vector<32xf32>
    %495 = vector.shape_cast %494 : vector<32xf32> to vector<32x1xf32>
    %cst_222 = arith.constant 3.200000e+01 : f32
    %496 = vector.broadcast %cst_222 : f32 to vector<32x1xf32>
    %497 = arith.divf %495, %496 : vector<32x1xf32>
    %498 = vector.broadcast %490 : vector<32x1xf32> to vector<32x32xf32>
    %499 = arith.subf %484, %498 : vector<32x32xf32>
    %cst_223 = arith.constant 9.99999974E-6 : f32
    %500 = vector.broadcast %cst_223 : f32 to vector<32x1xf32>
    %501 = arith.addf %497, %500 : vector<32x1xf32>
    %502 = math.rsqrt %501 : vector<32x1xf32>
    %503 = vector.broadcast %502 : vector<32x1xf32> to vector<32x32xf32>
    %504 = arith.mulf %499, %503 : vector<32x32xf32>
    %505 = vector.broadcast %485 : vector<1x32xf32> to vector<32x32xf32>
    %506 = arith.mulf %504, %505 : vector<32x32xf32>
    %507 = vector.broadcast %486 : vector<1x32xf32> to vector<32x32xf32>
    %508 = arith.addf %506, %507 : vector<32x32xf32>
    %c0_224 = arith.constant 0 : index
    %c0_225 = arith.constant 0 : index
    %509 = vector.load %arg39[%c0_224, %c0_225] : memref<32x128xf32, #tpu.memory_space<vmem>>, vector<32x128xf32>
    %cst_226 = arith.constant dense<0.000000e+00> : vector<32x128xf32>
    %510 = tpu.matmul %508, %509, %cst_226 {dimension_numbers = #tpu.dot_dimension_numbers<[1], [0], [0], [1], [0, 0, 1, 1], [], []>} : vector<32x32xf32>, vector<32x128xf32>, vector<32x128xf32> -> vector<32x128xf32>
    %c0_227 = arith.constant 0 : index
    %c0_228 = arith.constant 0 : index
    %511 = vector.load %arg40[%c0_227, %c0_228] : memref<1x128xf32, #tpu.memory_space<vmem>>, vector<1x128xf32>
    %512 = vector.broadcast %511 : vector<1x128xf32> to vector<32x128xf32>
    %513 = arith.addf %510, %512 : vector<32x128xf32>
    %cst_229 = arith.constant 0.000000e+00 : f32
    %514 = vector.broadcast %cst_229 : f32 to vector<32x128xf32>
    %515 = arith.maximumf %513, %514 : vector<32x128xf32>
    %c0_230 = arith.constant 0 : index
    %c0_231 = arith.constant 0 : index
    %516 = vector.load %arg41[%c0_230, %c0_231] : memref<128x32xf32, #tpu.memory_space<vmem>>, vector<128x32xf32>
    %cst_232 = arith.constant dense<0.000000e+00> : vector<32x32xf32>
    %517 = tpu.matmul %515, %516, %cst_232 {dimension_numbers = #tpu.dot_dimension_numbers<[1], [0], [0], [1], [0, 0, 1, 1], [], []>} : vector<32x128xf32>, vector<128x32xf32>, vector<32x32xf32> -> vector<32x32xf32>
    %c0_233 = arith.constant 0 : index
    %c0_234 = arith.constant 0 : index
    %518 = vector.load %arg42[%c0_233, %c0_234] : memref<1x32xf32, #tpu.memory_space<vmem>>, vector<1x32xf32>
    %519 = vector.broadcast %518 : vector<1x32xf32> to vector<32x32xf32>
    %520 = arith.addf %517, %519 : vector<32x32xf32>
    %521 = arith.addf %508, %520 : vector<32x32xf32>
    %c0_235 = arith.constant 0 : index
    %c0_236 = arith.constant 0 : index
    %522 = vector.load %arg43[%c0_235, %c0_236] : memref<1x32xf32, #tpu.memory_space<vmem>>, vector<1x32xf32>
    %c0_237 = arith.constant 0 : index
    %c0_238 = arith.constant 0 : index
    %523 = vector.load %arg44[%c0_237, %c0_238] : memref<1x32xf32, #tpu.memory_space<vmem>>, vector<1x32xf32>
    %cst_239 = arith.constant dense<0.000000e+00> : vector<32xf32>
    %524 = vector.multi_reduction <add>, %521, %cst_239 [1] : vector<32x32xf32> to vector<32xf32>
    %525 = vector.shape_cast %524 : vector<32xf32> to vector<32x1xf32>
    %cst_240 = arith.constant 3.200000e+01 : f32
    %526 = vector.broadcast %cst_240 : f32 to vector<32x1xf32>
    %527 = arith.divf %525, %526 : vector<32x1xf32>
    %528 = vector.broadcast %527 : vector<32x1xf32> to vector<32x32xf32>
    %529 = arith.subf %521, %528 : vector<32x32xf32>
    %530 = arith.mulf %529, %529 : vector<32x32xf32>
    %cst_241 = arith.constant dense<0.000000e+00> : vector<32xf32>
    %531 = vector.multi_reduction <add>, %530, %cst_241 [1] : vector<32x32xf32> to vector<32xf32>
    %532 = vector.shape_cast %531 : vector<32xf32> to vector<32x1xf32>
    %cst_242 = arith.constant 3.200000e+01 : f32
    %533 = vector.broadcast %cst_242 : f32 to vector<32x1xf32>
    %534 = arith.divf %532, %533 : vector<32x1xf32>
    %535 = vector.broadcast %527 : vector<32x1xf32> to vector<32x32xf32>
    %536 = arith.subf %521, %535 : vector<32x32xf32>
    %cst_243 = arith.constant 9.99999974E-6 : f32
    %537 = vector.broadcast %cst_243 : f32 to vector<32x1xf32>
    %538 = arith.addf %534, %537 : vector<32x1xf32>
    %539 = math.rsqrt %538 : vector<32x1xf32>
    %540 = vector.broadcast %539 : vector<32x1xf32> to vector<32x32xf32>
    %541 = arith.mulf %536, %540 : vector<32x32xf32>
    %542 = vector.broadcast %522 : vector<1x32xf32> to vector<32x32xf32>
    %543 = arith.mulf %541, %542 : vector<32x32xf32>
    %544 = vector.broadcast %523 : vector<1x32xf32> to vector<32x32xf32>
    %545 = arith.addf %543, %544 : vector<32x32xf32>
    %c0_244 = arith.constant 0 : index
    %c0_245 = arith.constant 0 : index
    %546 = vector.load %arg49[%c0_244, %c0_245] : memref<32x32xf32, #tpu.memory_space<vmem>>, vector<32x32xf32>
    %cst_246 = arith.constant dense<0.000000e+00> : vector<32x32xf32>
    %547 = tpu.matmul %545, %546, %cst_246 {dimension_numbers = #tpu.dot_dimension_numbers<[1], [0], [0], [1], [0, 0, 1, 1], [], []>} : vector<32x32xf32>, vector<32x32xf32>, vector<32x32xf32> -> vector<32x32xf32>
    %c0_247 = arith.constant 0 : index
    %c0_248 = arith.constant 0 : index
    %548 = vector.load %arg50[%c0_247, %c0_248] : memref<1x32xf32, #tpu.memory_space<vmem>>, vector<1x32xf32>
    %549 = vector.broadcast %548 : vector<1x32xf32> to vector<32x32xf32>
    %550 = arith.addf %547, %549 : vector<32x32xf32>
    %cst_249 = arith.constant 0.000000e+00 : f32
    %551 = vector.broadcast %cst_249 : f32 to vector<32x32xf32>
    %552 = arith.maximumf %550, %551 : vector<32x32xf32>
    %c0_250 = arith.constant 0 : index
    %c0_251 = arith.constant 0 : index
    %553 = vector.load %arg51[%c0_250, %c0_251] : memref<32x41xf32, #tpu.memory_space<vmem>>, vector<32x41xf32>
    %cst_252 = arith.constant dense<0.000000e+00> : vector<32x41xf32>
    %554 = tpu.matmul %552, %553, %cst_252 {dimension_numbers = #tpu.dot_dimension_numbers<[1], [0], [0], [1], [0, 0, 1, 1], [], []>} : vector<32x32xf32>, vector<32x41xf32>, vector<32x41xf32> -> vector<32x41xf32>
    %c0_253 = arith.constant 0 : index
    %c0_254 = arith.constant 0 : index
    %555 = vector.load %arg52[%c0_253, %c0_254] : memref<1x41xf32, #tpu.memory_space<vmem>>, vector<1x41xf32>
    %556 = vector.broadcast %555 : vector<1x41xf32> to vector<32x41xf32>
    %557 = arith.addf %554, %556 : vector<32x41xf32>
    %c0_255 = arith.constant 0 : index
    %c0_256 = arith.constant 0 : index
    %558 = vector.load %arg61[%c0_255, %c0_256] : memref<32x32xf32, #tpu.memory_space<vmem>>, vector<32x32xf32>
    tpu.vector_store %arg61[%c0_255, %c0_256], %552 {strides = array<i32>} : memref<32x32xf32, #tpu.memory_space<vmem>>, vector<32x32xf32>,
    %c0_257 = arith.constant 0 : index
    %c0_258 = arith.constant 0 : index
    %559 = vector.load %arg62[%c0_257, %c0_258] : memref<32x41xf32, #tpu.memory_space<vmem>>, vector<32x41xf32>
    tpu.vector_store %arg62[%c0_257, %c0_258], %557 {strides = array<i32>} : memref<32x41xf32, #tpu.memory_space<vmem>>, vector<32x41xf32>,
    return
  }
}

</mosaic_0001>

<bundles_post_ra>
// kernel: eq.17
= control target key start
LH: loop header
LB: loop body
LE: loop exit
PB: predicated region body
PF: predicated region fallthrough
CT: control target
= control target key end

     0   :  { %s69_s10 = smov 28   ;;  %s70_s11 = smov 20   ;;  %vm3_vm0 = vcmask 31744   ;;  %vm9_vm1 = vcmask 261344   ;;  %vm15_vm2 = vcmask 228544   ;;  %vm21_vm3 = vcmask 195744   ;;  %s113_s0 = inlined_call_operand.vmem [shape: s32[8,4], index: 0, kind: input, shape index: {}]   ;;  %s114_s1 = inlined_call_operand.vmem [shape: s32[32], index: 1, kind: output, shape index: {}]  }
   0x1   :  { %v55_v0 = vld [vmem:[%s113_s0 + $0x7] sm:$0x1]   ;;  %v57_v1 = vld [vmem:[%s113_s0 + $0x5] sm:$0x1]   ;;  %v56_v2 = vld [vmem:[%s113_s0 + $0x6] sm:$0x1]  }
   0x2   :  { %7 = vrot.lane.b32.xlu0 %v55_v0, %s69_s10  ;;  %19 = vrot.lane.b32.xlu1 %v57_v1, %s70_s11  ;;  %v58_v3 = vld [vmem:[%s113_s0 + $0x4] sm:$0x1]   ;;  %v2_v4 = vld [vmem:[%s113_s0] sm:$0x1]   ;;  %s71_s18 = smov 24   ;;  %s72_s19 = smov 16  }
   0x3   :  { %4 = vst.msk [vmem:[#allocation0] sm:$0x1] %vm3_vm0, %v2_v4   ;;  %v59_v5 = vld [vmem:[%s113_s0 + $0x3] sm:$0x1]   ;;  %v60_v6 = vld [vmem:[%s113_s0 + $0x2] sm:$0x1]  }
   0x4   :  { %s73_s24 = smov 12   ;;  %s74_s25 = smov 8   ;;  %v61_v7 = vld [vmem:[%s113_s0 + $0x1] sm:$0x1]   ;;  %vm27_vm4 = vcmask 162944   ;;  %vm33_vm5 = vcmask 130144  }
   0x5   :  { %s75_s0 = smov 4   ;;  %vm39_vm6 = vcmask 97344   ;;  %vm45_vm7 = vcmask 64544  }
   0x6   :  { %13 = vrot.lane.b32.xlu0 %v56_v2, %s71_s18  ;;  %25 = vrot.lane.b32.xlu1 %v58_v3, %s72_s19 }
   0xa   :  { %31 = vrot.lane.b32.xlu0 %v59_v5, %s73_s24  ;;  %37 = vrot.lane.b32.xlu1 %v60_v6, %s74_s25 }
   0xe   :  { %43 = vrot.lane.b32.xlu0 %v61_v7, %s75_s0 }
  0x74   :  { %v8_v8 = vpop.permute.xlu0 %7   ;;  %v20_v9 = vpop.permute.xlu1 %19  }
  0x75   :  { %10 = vst.msk [vmem:[#allocation0] sm:$0x1] %vm9_vm1, %v8_v8  }
  0x78   :  { %v14_v10 = vpop.permute.xlu0 %13   ;;  %v26_v11 = vpop.permute.xlu1 %25  }
  0x79   :  { %16 = vst.msk [vmem:[#allocation0] sm:$0x1] %vm15_vm2, %v14_v10  }
  0x7a   :  { %22 = vst.msk [vmem:[#allocation0] sm:$0x1] %vm21_vm3, %v20_v9  }
  0x7b   :  { %28 = vst.msk [vmem:[#allocation0] sm:$0x1] %vm27_vm4, %v26_v11  }
  0x7c   :  { %v32_v12 = vpop.permute.xlu0 %31   ;;  %v38_v13 = vpop.permute.xlu1 %37  }
  0x7d   :  { %34 = vst.msk [vmem:[#allocation0] sm:$0x1] %vm33_vm5, %v32_v12  }
  0x7e   :  { %40 = vst.msk [vmem:[#allocation0] sm:$0x1] %vm39_vm6, %v38_v13  }
  0x80   :  { %v44_v14 = vpop.permute.xlu0 %43  }
  0x81   :  { %46 = vst.msk [vmem:[#allocation0] sm:$0x1] %vm45_vm7, %v44_v14  }
  0x88   :  { %v51_v15 = vld [vmem:[#allocation0] sm:$0x1] }
  0x89   :  { %54 = vst [vmem:[%s114_s1] sm:$0x1] %v51_v15 }

// kernel: eq.20
= control target key start
LH: loop header
LB: loop body
LE: loop exit
PB: predicated region body
PF: predicated region fallthrough
CT: control target
= control target key end

     0   :  { %s69_s10 = smov 56   ;;  %s70_s11 = smov 40   ;;  %vm3_vm0 = vcmask 64512   ;;  %vm9_vm1 = vcmask 523712   ;;  %vm15_vm2 = vcmask 458112   ;;  %vm21_vm3 = vcmask 392512   ;;  %s113_s0 = inlined_call_operand.vmem [shape: s32[8,8], index: 0, kind: input, shape index: {}]   ;;  %s114_s1 = inlined_call_operand.vmem [shape: s32[64], index: 1, kind: output, shape index: {}]  }
   0x1   :  { %v55_v0 = vld [vmem:[%s113_s0 + $0x7] sm:$0x1]   ;;  %v57_v1 = vld [vmem:[%s113_s0 + $0x5] sm:$0x1]   ;;  %v56_v2 = vld [vmem:[%s113_s0 + $0x6] sm:$0x1]  }
   0x2   :  { %7 = vrot.lane.b32.xlu0 %v55_v0, %s69_s10  ;;  %19 = vrot.lane.b32.xlu1 %v57_v1, %s70_s11  ;;  %v58_v3 = vld [vmem:[%s113_s0 + $0x4] sm:$0x1]   ;;  %v2_v4 = vld [vmem:[%s113_s0] sm:$0x1]   ;;  %s71_s18 = smov 48   ;;  %s72_s19 = smov 32  }
   0x3   :  { %4 = vst.msk [vmem:[#allocation0] sm:$0x1] %vm3_vm0, %v2_v4   ;;  %v59_v5 = vld [vmem:[%s113_s0 + $0x3] sm:$0x1]   ;;  %v60_v6 = vld [vmem:[%s113_s0 + $0x2] sm:$0x1]  }
   0x4   :  { %s73_s24 = smov 24   ;;  %s74_s25 = smov 16   ;;  %v61_v7 = vld [vmem:[%s113_s0 + $0x1] sm:$0x1]   ;;  %vm27_vm4 = vcmask 326912   ;;  %vm33_vm5 = vcmask 261312  }
   0x5   :  { %s75_s0 = smov 8   ;;  %vm39_vm6 = vcmask 195712   ;;  %vm45_vm7 = vcmask 130112  }
   0x6   :  { %13 = vrot.lane.b32.xlu0 %v56_v2, %s71_s18  ;;  %25 = vrot.lane.b32.xlu1 %v58_v3, %s72_s19 }
   0xa   :  { %31 = vrot.lane.b32.xlu0 %v59_v5, %s73_s24  ;;  %37 = vrot.lane.b32.xlu1 %v60_v6, %s74_s25 }
   0xe   :  { %43 = vrot.lane.b32.xlu0 %v61_v7, %s75_s0 }
  0x74   :  { %v8_v8 = vpop.permute.xlu0 %7   ;;  %v20_v9 = vpop.permute.xlu1 %19  }
  0x75   :  { %10 = vst.msk [vmem:[#allocation0] sm:$0x1] %vm9_vm1, %v8_v8  }
  0x78   :  { %v14_v10 = vpop.permute.xlu0 %13   ;;  %v26_v11 = vpop.permute.xlu1 %25  }
  0x79   :  { %16 = vst.msk [vmem:[#allocation0] sm:$0x1] %vm15_vm2, %v14_v10  }
  0x7a   :  { %22 = vst.msk [vmem:[#allocation0] sm:$0x1] %vm21_vm3, %v20_v9  }
  0x7b   :  { %28 = vst.msk [vmem:[#allocation0] sm:$0x1] %vm27_vm4, %v26_v11  }
  0x7c   :  { %v32_v12 = vpop.permute.xlu0 %31   ;;  %v38_v13 = vpop.permute.xlu1 %37  }
  0x7d   :  { %34 = vst.msk [vmem:[#allocation0] sm:$0x1] %vm33_vm5, %v32_v12  }
  0x7e   :  { %40 = vst.msk [vmem:[#allocation0] sm:$0x1] %vm39_vm6, %v38_v13  }
  0x80   :  { %v44_v14 = vpop.permute.xlu0 %43  }
  0x81   :  { %46 = vst.msk [vmem:[#allocation0] sm:$0x1] %vm45_vm7, %v44_v14  }
  0x88   :  { %v51_v15 = vld [vmem:[#allocation0] sm:$0x1] }
  0x89   :  { %54 = vst [vmem:[%s114_s1] sm:$0x1] %v51_v15 }

// kernel: mul.14
= control target key start
LH: loop header
LB: loop body
LE: loop exit
PB: predicated region body
PF: predicated region fallthrough
CT: control target
= control target key end

     0   :  { %s69_s8 = smov 28   ;;  %s70_s11 = smov 20   ;;  %vm3_vm0 = vcmask 31744   ;;  %vm9_vm1 = vcmask 261344   ;;  %vm15_vm2 = vcmask 228544   ;;  %vm21_vm3 = vcmask 195744   ;;  %s113_s0 = inlined_call_operand.vmem [shape: f32[8,4,3], index: 0, kind: input, shape index: {}]   ;;  %s114_s1 = inlined_call_operand.vmem [shape: f32[32,3], index: 1, kind: output, shape index: {}]  }
   0x1   :  { %v55_v0 = vld [vmem:[%s113_s0 + $0x7] ss:$8 sm:$0x7]   ;;  %v57_v1 = vld [vmem:[%s113_s0 + $0x5] ss:$8 sm:$0x7]  }
   0x2   :  { %7 = vrot.lane.b32.xlu0 %v55_v0, %s69_s8  ;;  %19 = vrot.lane.b32.xlu1 %v57_v1, %s70_s11  ;;  %v56_v2 = vld [vmem:[%s113_s0 + $0x6] ss:$8 sm:$0x7]   ;;  %v58_v3 = vld [vmem:[%s113_s0 + $0x4] ss:$8 sm:$0x7]  }
   0x3   :  { %s71_s16 = smov 24   ;;  %v2_v4 = vld [vmem:[%s113_s0] ss:$8 sm:$0x7]   ;;  %s72_s19 = smov 16   ;;  %vm27_vm4 = vcmask 162944  }
   0x4   :  { %v59_v5 = vld [vmem:[%s113_s0 + $0x3] ss:$8 sm:$0x7]   ;;  %4 = vst.msk [vmem:[#allocation0] sm:$0x7] %vm3_vm0, %v2_v4   ;;  %s73_s24 = smov 12  }
   0x5   :  { %v60_v6 = vld [vmem:[%s113_s0 + $0x2] ss:$8 sm:$0x7]   ;;  %s74_s25 = smov 8   ;;  %vm33_vm5 = vcmask 130144   ;;  %vm39_vm6 = vcmask 97344  }
   0x6   :  { %13 = vrot.lane.b32.xlu0 %v56_v2, %s71_s16  ;;  %25 = vrot.lane.b32.xlu1 %v58_v3, %s72_s19  ;;  %v61_v7 = vld [vmem:[%s113_s0 + $0x1] ss:$8 sm:$0x7]   ;;  %s75_s0 = smov 4   ;;  %vm45_vm7 = vcmask 64544  }
   0xa   :  { %31 = vrot.lane.b32.xlu0 %v59_v5, %s73_s24  ;;  %37 = vrot.lane.b32.xlu1 %v60_v6, %s74_s25 }
   0xe   :  { %43 = vrot.lane.b32.xlu0 %v61_v7, %s75_s0 }
  0x74   :  { %v8_v8 = vpop.permute.xlu0 %7   ;;  %v20_v9 = vpop.permute.xlu1 %19  }
  0x75   :  { %10 = vst.msk [vmem:[#allocation0] sm:$0x7] %vm9_vm1, %v8_v8  }
  0x78   :  { %v14_v10 = vpop.permute.xlu0 %13   ;;  %v26_v11 = vpop.permute.xlu1 %25  }
  0x79   :  { %16 = vst.msk [vmem:[#allocation0] sm:$0x7] %vm15_vm2, %v14_v10  }
  0x7a   :  { %22 = vst.msk [vmem:[#allocation0] sm:$0x7] %vm21_vm3, %v20_v9  }
  0x7b   :  { %28 = vst.msk [vmem:[#allocation0] sm:$0x7] %vm27_vm4, %v26_v11  }
  0x7c   :  { %v32_v12 = vpop.permute.xlu0 %31   ;;  %v38_v13 = vpop.permute.xlu1 %37  }
  0x7d   :  { %34 = vst.msk [vmem:[#allocation0] sm:$0x7] %vm33_vm5, %v32_v12  }
  0x7e   :  { %40 = vst.msk [vmem:[#allocation0] sm:$0x7] %vm39_vm6, %v38_v13  }
  0x80   :  { %v44_v14 = vpop.permute.xlu0 %43  }
  0x81   :  { %46 = vst.msk [vmem:[#allocation0] sm:$0x7] %vm45_vm7, %v44_v14  }
  0x88   :  { %v51_v15 = vld [vmem:[#allocation0] sm:$0xf] }
  0x89   :  { %54 = vst [vmem:[%s114_s1] sm:$0xf] %v51_v15 }

// kernel: eq.24
= control target key start
LH: loop header
LB: loop body
LE: loop exit
PB: predicated region body
PF: predicated region fallthrough
CT: control target
= control target key end

     0   :  { %vm8_vm0 = vcmask 130048   ;;  %vm14_vm1 = vcmask 261248   ;;  %s42_s0 = inlined_call_operand.vmem [shape: s32[2,16], index: 0, kind: input, shape index: {}]   ;;  %s43_s1 = inlined_call_operand.vmem [shape: s32[32], index: 1, kind: output, shape index: {}]  }
   0x1   :  { %v5_v0 = vld [vmem:[%s42_s0] sm:$0x3]  ;;  %s25_s0 = smov 16  }
   0x2   :  { %6 = vst [vmem:[#allocation1] sm:$0x3] %v5_v0 }
   0x9   :  { %v11_v1 = vld [vmem:[#allocation1 + $0x1] sm:$0x1]   ;;  %v7_v2 = vld [vmem:[#allocation1] sm:$0x1]  }
   0xa   :  { %12 = vrot.lane.b32.xlu0 %v11_v1, %s25_s0  ;;  %9 = vst.msk [vmem:[#allocation0] sm:$0x1] %vm8_vm0, %v7_v2  }
  0x7c   :  { %v13_v3 = vpop.permute.xlu0 %12  }
  0x7d   :  { %15 = vst.msk [vmem:[#allocation0] sm:$0x1] %vm14_vm1, %v13_v3  }
  0x84   :  { %v20_v4 = vld [vmem:[#allocation0] sm:$0x1] }
  0x85   :  { %23 = vst [vmem:[%s43_s1] sm:$0x1] %v20_v4 }

// kernel: squeeze.3
= control target key start
LH: loop header
LB: loop body
LE: loop exit
PB: predicated region body
PF: predicated region fallthrough
CT: control target
= control target key end

     0   :  { %s139_s0 = inlined_call_operand.vmem [shape: f32[32], index: 0, kind: input, shape index: {}]   ;;  %s140_s1 = inlined_call_operand.hbm [shape: f32[2,4,4], index: 1, kind: output, shape index: {}]  }
   0x1   :  { %v6_v0 = vld [vmem:[%s139_s0] sm:$0x1] }
   0x2   :  { %7 = vst [vmem:[#allocation3] sm:$0x1] %v6_v0 }
   0x3   :  { %2 = vsyncpa [#allocation1], 0  ;;  %s107_s0 = smov 124   ;;  %s108_s8 = smov 116   ;;  %vm9_vm0 = vcmask 31744  }
   0x4   :  { %s109_s9 = smov 120   ;;  %s110_s10 = smov 112  }
   0x5   :  { %s111_s11 = smov 108   ;;  %s112_s12 = smov 104  }
   0x6   :  { %s113_s13 = smov 100   ;;  %s114_s14 = smov [#allocation0]  }
   0x7   :  { %s71_s15 = sshll.u32 %s114_s14, 4  ;;  %s72_s15 = int_to_ptr.vmem [resolvable:$true] %s71_s15 }
   0x8   :  { %s85_s16 = scalar_lea.vmem %s72_s15, 128  ;;  %p90_p1 = scmp.lt.s32.totalorder %s72_s15, %s72_s15 }
   0x9   :  { %v11_v1 = vld [vmem:[#allocation3] sm:$0x1]   ;;  %p86_p0 = scmp.ne.s32.totalorder %s72_s15, %s85_s16  ;;  %p91_p2 = scmp.lt.s32.totalorder %s85_s16, %s85_s16 }
   0xa   :  { %v23_v2 = vld [vmem:[#allocation3] sm:$0x1]   ;;  %12 = vrot.lane.b32.xlu0 %v11_v1, %s107_s0 }
   0xb   :  { %24 = vrot.lane.b32.xlu1 %v23_v2, %s108_s8  ;;  %v17_v3 = vld [vmem:[#allocation3] sm:$0x1]   ;;  %p92_p3 = por %p91_p2, %p90_p1 }
   0xc   :  { %v29_v4 = vld [vmem:[#allocation3] sm:$0x1]  }
   0xd   :  { %v8_v5 = vld [vmem:[#allocation3] sm:$0x1]   ;;  %p93_p4 = pnand %p92_p3, %p86_p0 }
   0xe   :  { %10 = vst.msk [vmem:[#allocation2] sm:$0x1] %vm9_vm0, %v8_v5   ;;  %18 = vrot.lane.b32.xlu0 %v17_v3, %s109_s9  ;;  %v35_v6 = vld [vmem:[#allocation3] sm:$0x1]  }
   0xf   :  { %30 = vrot.lane.b32.xlu1 %v29_v4, %s110_s10  ;;  %v41_v7 = vld [vmem:[#allocation3] sm:$0x1]  }
  0x10   :  { %v47_v8 = vld [vmem:[#allocation3] sm:$0x1]  }
  0x12   :  { %36 = vrot.lane.b32.xlu0 %v35_v6, %s111_s11 }
  0x13   :  { %42 = vrot.lane.b32.xlu1 %v41_v7, %s112_s12 }
  0x16   :  { %48 = vrot.lane.b32.xlu0 %v47_v8, %s113_s13 }
  0x7c   :  { %v13_v9 = vpop.permute.xlu0 %12  }
  0x7d   :  { %v25_v10 = vpop.permute.xlu1 %24   ;;  %16 = vst.msk [vmem:[#allocation2 + $0x1] sm:$0x1] %vm9_vm0, %v13_v9  }
  0x7e   :  { %28 = vst.msk [vmem:[#allocation2 + $0x3] sm:$0x1] %vm9_vm0, %v25_v10  }
  0x80   :  { %v19_v11 = vpop.permute.xlu0 %18  }
  0x81   :  { %v31_v12 = vpop.permute.xlu1 %30   ;;  %22 = vst.msk [vmem:[#allocation2 + $0x2] sm:$0x1] %vm9_vm0, %v19_v11  }
  0x82   :  { %34 = vst.msk [vmem:[#allocation2 + $0x8] sm:$0x1] %vm9_vm0, %v31_v12  }
  0x84   :  { %v37_v13 = vpop.permute.xlu0 %36  }
  0x85   :  { %v43_v14 = vpop.permute.xlu1 %42   ;;  %40 = vst.msk [vmem:[#allocation2 + $0x9] sm:$0x1] %vm9_vm0, %v37_v13  }
  0x86   :  { %46 = vst.msk [vmem:[#allocation2 + $0xa] sm:$0x1] %vm9_vm0, %v43_v14  }
  0x88   :  { %v49_v15 = vpop.permute.xlu0 %48   ;;  %v57_v16 = vld [vmem:[#allocation2] sm:$0xf] }
  0x89   :  { %52 = vst.msk [vmem:[#allocation2 + $0xb] sm:$0x1] %vm9_vm0, %v49_v15   ;;  %60 = vst [vmem:[#allocation0] sm:$0xf] %v57_v16 }
  0x90   :  { %v62_v17 = vld [vmem:[#allocation2 + $0x8] sm:$0xf] }
  0x91   :  { %66 = vst [vmem:[#allocation0 + $0x4] sm:$0xf] %v62_v17 }
  0x92   :  { %96 = shalt.err (!%p93_p4)
}
  0x93   :  { %74 = dma.vmem_to_hbm [thread:$0]  %s72_s15, 128, %s140_s1, [#allocation1]  }
  0x94   :  { %105 = dma.done.wait [#allocation1], 128  }
  0x95   :  { %106 = vsyncadd [#allocation1], 4294967168 }
  0x96   :  { %76 = vsyncpa [#allocation1], 1 }

// kernel: dual_decoder_forward.1
= control target key start
LH: loop header
LB: loop body
LE: loop exit
PB: predicated region body
PF: predicated region fallthrough
CT: control target
= control target key end

     0   :  { %s11272_s6 = smov 1   ;;  %s11273_s10 = smov 2   ;;  %s13368_s0 = inlined_call_operand.smem [shape: u32[63], index: -1, kind: input, shape index: {}] }
   0x1   :  { %s11375_s5 = sld [smem:[%s13368_s0]]   ;;  %s11274_s14 = smov 3  }
   0x2   :  { %s11380_s9 = sld [smem:[%s13368_s0 + %s11272_s6]]   ;;  %s11275_s18 = smov 4  }
   0x3   :  { %s11385_s13 = sld [smem:[%s13368_s0 + %s11273_s10]]   ;;  %s11276_s22 = smov 5  }
   0x4   :  { %s11390_s17 = sld [smem:[%s13368_s0 + %s11274_s14]]   ;;  %s11277_s26 = smov 6  }
   0x5   :  { %s11395_s21 = sld [smem:[%s13368_s0 + %s11275_s18]]   ;;  %s11278_s30 = smov 7  }
   0x6   :  { %s11400_s25 = sld [smem:[%s13368_s0 + %s11276_s22]]   ;;  %s11279_s4 = smov 8  }
   0x7   :  { %13401 = sst [smem:[#allocation42_spill]] %s11375_s5  ;;  %s11280_s10 = smov 9  }
   0x8   :  { %13402 = sst [smem:[#allocation43_spill]] %s11380_s9  ;;  %s11281_s15 = smov 10  }
   0x9   :  { %13403 = sst [smem:[#allocation44_spill]] %s11385_s13  ;;  %s11282_s20 = smov 11  }
   0xa   :  { %13404 = sst [smem:[#allocation45_spill]] %s11390_s17  ;;  %s11284_s1 = smov 13  }
   0xb   :  { %13405 = sst [smem:[#allocation46_spill]] %s11395_s21  ;;  %s11285_s7 = smov 14  }
   0xc   :  { %13406 = sst [smem:[#allocation47_spill]] %s11400_s25  ;;  %s11287_s22 = smov 16  }
   0xd   :  { %s11405_s29 = sld [smem:[%s13368_s0 + %s11277_s26]]   ;;  %s11283_s26 = smov 12  }
   0xe   :  { %s11410_s3 = sld [smem:[%s13368_s0 + %s11278_s30]]   ;;  %s11288_s28 = smov 17  }
   0xf   :  { %s11415_s8 = sld [smem:[%s13368_s0 + %s11279_s4]]  }
  0x10   :  { %s11420_s14 = sld [smem:[%s13368_s0 + %s11280_s10]]  }
  0x11   :  { %s11425_s19 = sld [smem:[%s13368_s0 + %s11281_s15]]   ;;  %s11286_s15 = smov 15  }
  0x12   :  { %s11430_s24 = sld [smem:[%s13368_s0 + %s11282_s20]]  }
  0x13   :  { %13407 = sst [smem:[#allocation48_spill]] %s11405_s29 }
  0x14   :  { %13408 = sst [smem:[#allocation49_spill]] %s11410_s3 }
  0x15   :  { %13409 = sst [smem:[#allocation50_spill]] %s11415_s8 }
  0x16   :  { %13410 = sst [smem:[#allocation51_spill]] %s11420_s14 }
  0x17   :  { %13411 = sst [smem:[#allocation52_spill]] %s11425_s19 }
  0x18   :  { %13412 = sst [smem:[#allocation53_spill]] %s11430_s24 }
  0x19   :  { %s11435_s30 = sld [smem:[%s13368_s0 + %s11283_s26]]  }
  0x1a   :  { %s11440_s6 = sld [smem:[%s13368_s0 + %s11284_s1]]  }
  0x1b   :  { %s11445_s12 = sld [smem:[%s13368_s0 + %s11285_s7]]   ;;  %s11289_s7 = smov 18  }
  0x1c   :  { %s11450_s20 = sld [smem:[%s13368_s0 + %s11286_s15]]   ;;  %s11290_s15 = smov 19  }
  0x1d   :  { %s11455_s27 = sld [smem:[%s13368_s0 + %s11287_s22]]   ;;  %s11291_s22 = smov 20  }
  0x1e   :  { %s11460_s4 = sld [smem:[%s13368_s0 + %s11288_s28]]   ;;  %s11292_s28 = smov 21  }
  0x1f   :  { %13413 = sst [smem:[#allocation54_spill]] %s11435_s30 }
  0x20   :  { %13414 = sst [smem:[#allocation55_spill]] %s11440_s6 }
  0x21   :  { %13415 = sst [smem:[#allocation56_spill]] %s11445_s12 }
  0x22   :  { %13416 = sst [smem:[#allocation57_spill]] %s11450_s20 }
  0x23   :  { %13417 = sst [smem:[#allocation58_spill]] %s11455_s27 }
  0x24   :  { %13418 = sst [smem:[#allocation59_spill]] %s11460_s4 }
  0x25   :  { %s11465_s21 = sld [smem:[%s13368_s0 + %s11289_s7]]   ;;  %s11293_s7 = smov 22  }
  0x26   :  { %s11470_s25 = sld [smem:[%s13368_s0 + %s11290_s15]]   ;;  %s11294_s15 = smov 23  }
  0x27   :  { %s11475_s27 = sld [smem:[%s13368_s0 + %s11291_s22]]   ;;  %s11295_s22 = smov 24  }
  0x28   :  { %s11480_s20 = sld [smem:[%s13368_s0 + %s11292_s28]]   ;;  %s11296_s28 = smov 25  }
  0x2b   :  { %13419 = sst [smem:[#allocation60_spill]] %s11465_s21 }
  0x2c   :  { %13420 = sst [smem:[#allocation61_spill]] %s11470_s25 }
  0x2d   :  { %13421 = sst [smem:[#allocation62_spill]] %s11475_s27 }
  0x2e   :  { %13422 = sst [smem:[#allocation63_spill]] %s11480_s20 }
  0x2f   :  { %s11485_s21 = sld [smem:[%s13368_s0 + %s11293_s7]]   ;;  %s11297_s7 = smov 26  }
  0x30   :  { %s11490_s25 = sld [smem:[%s13368_s0 + %s11294_s15]]   ;;  %s11298_s15 = smov 27  }
  0x31   :  { %s11495_s27 = sld [smem:[%s13368_s0 + %s11295_s22]]   ;;  %s11299_s22 = smov 28  }
  0x32   :  { %s11500_s20 = sld [smem:[%s13368_s0 + %s11296_s28]]   ;;  %s11300_s28 = smov 29  }
  0x35   :  { %13423 = sst [smem:[#allocation64_spill]] %s11485_s21 }
  0x36   :  { %13424 = sst [smem:[#allocation65_spill]] %s11490_s25 }
  0x37   :  { %13425 = sst [smem:[#allocation66_spill]] %s11495_s27 }
  0x38   :  { %13426 = sst [smem:[#allocation67_spill]] %s11500_s20 }
  0x39   :  { %s11505_s21 = sld [smem:[%s13368_s0 + %s11297_s7]]   ;;  %s11301_s7 = smov 30  }
  0x3a   :  { %s11510_s25 = sld [smem:[%s13368_s0 + %s11298_s15]]   ;;  %s11302_s15 = smov 31  }
  0x3b   :  { %s11515_s27 = sld [smem:[%s13368_s0 + %s11299_s22]]   ;;  %s11303_s22 = smov 32  }
  0x3c   :  { %s11520_s20 = sld [smem:[%s13368_s0 + %s11300_s28]]   ;;  %s11304_s28 = smov 33  }
  0x3f   :  { %13427 = sst [smem:[#allocation68_spill]] %s11505_s21 }
  0x40   :  { %13428 = sst [smem:[#allocation69_spill]] %s11510_s25 }
  0x41   :  { %13429 = sst [smem:[#allocation70_spill]] %s11515_s27 }
  0x42   :  { %13430 = sst [smem:[#allocation71_spill]] %s11520_s20 }
  0x43   :  { %s11525_s21 = sld [smem:[%s13368_s0 + %s11301_s7]]   ;;  %s11305_s7 = smov 34  }
  0x44   :  { %s11530_s25 = sld [smem:[%s13368_s0 + %s11302_s15]]   ;;  %s11306_s15 = smov 35  }
  0x45   :  { %s11535_s27 = sld [smem:[%s13368_s0 + %s11303_s22]]   ;;  %s11307_s22 = smov 36  }
  0x46   :  { %s11540_s20 = sld [smem:[%s13368_s0 + %s11304_s28]]   ;;  %s11308_s28 = smov 37  }
  0x47   :  { %s11550_s4 = sld [smem:[%s13368_s0 + %s11306_s15]]   ;;  %s11310_s15 = smov 39  }
  0x48   :  { %s11555_s12 = sld [smem:[%s13368_s0 + %s11307_s22]]   ;;  %s11311_s22 = smov 40  }
  0x49   :  { %13431 = sst [smem:[#allocation72_spill]] %s11525_s21 }
  0x4a   :  { %s11545_s21 = sld [smem:[%s13368_s0 + %s11305_s7]]   ;;  %s11309_s7 = smov 38  }
  0x4b   :  { %s11560_s17 = sld [smem:[%s13368_s0 + %s11308_s28]]   ;;  %s11312_s28 = smov 41  }
  0x4c   :  { %s11580_s24 = sld [smem:[%s13368_s0 + %s11312_s28]]   ;;  %s11316_s28 = smov 45  }
  0x4d   :  { %13433 = sst [smem:[#allocation74_spill]] %s11550_s4 }
  0x4e   :  { %13434 = sst [smem:[#allocation75_spill]] %s11555_s12 }
  0x4f   :  { %s11570_s4 = sld [smem:[%s13368_s0 + %s11310_s15]]   ;;  %s11314_s15 = smov 43  }
  0x50   :  { %13432 = sst [smem:[#allocation73_spill]] %s11545_s21 }
  0x51   :  { %s11565_s21 = sld [smem:[%s13368_s0 + %s11309_s7]]   ;;  %s11313_s7 = smov 42  }
  0x52   :  { %s11575_s12 = sld [smem:[%s13368_s0 + %s11311_s22]]   ;;  %s11315_s22 = smov 44  }
  0x53   :  { %13436 = sst [smem:[#allocation77_spill]] %s11580_s24 }
  0x54   :  { %s11585_s30 = sld [smem:[%s13368_s0 + %s11313_s7]]   ;;  %s11317_s7 = smov 46  }
  0x55   :  { %13435 = sst [smem:[#allocation76_spill]] %s11570_s4 }
  0x56   :  { %s11590_s4 = sld [smem:[%s13368_s0 + %s11314_s15]]   ;;  %s11318_s15 = smov 47  }
  0x57   :  { %s11595_s14 = sld [smem:[%s13368_s0 + %s11315_s22]]   ;;  %s11319_s22 = smov 48  }
  0x58   :  { %s11600_s24 = sld [smem:[%s13368_s0 + %s11316_s28]]   ;;  %s11320_s28 = smov 49  }
  0x59   :  { %s11605_s6 = sld [smem:[%s13368_s0 + %s11317_s7]]   ;;  %s11321_s7 = smov 50  }
  0x5a   :  { %s11610_s29 = sld [smem:[%s13368_s0 + %s11318_s15]]   ;;  %s11322_s15 = smov 51  }
  0x5b   :  { %s11615_s19 = sld [smem:[%s13368_s0 + %s11319_s22]]   ;;  %s11323_s22 = smov 52  }
  0x5c   :  { %s11625_s5 = sld [smem:[%s13368_s0 + %s11321_s7]]   ;;  %s11325_s7 = smov 54  }
  0x5d   :  { %s11635_s3 = sld [smem:[%s13368_s0 + %s11323_s22]]   ;;  %s11327_s22 = smov 56  }
  0x5e   :  { %13437 = sst [smem:[#allocation78_spill]] %s11600_s24 }
  0x5f   :  { %s11620_s24 = sld [smem:[%s13368_s0 + %s11320_s28]]   ;;  %s11324_s28 = smov 53  }
  0x60   :  { %13438 = sst [smem:[#allocation79_spill]] %s11610_s29 }
  0x61   :  { %s11630_s29 = sld [smem:[%s13368_s0 + %s11322_s15]]   ;;  %s11326_s15 = smov 55  }
  0x62   :  { %s11645_s8 = sld [smem:[%s13368_s0 + %s11325_s7]]   ;;  %s11329_s7 = smov 58  }
  0x63   :  { %s11655_s9 = sld [smem:[%s13368_s0 + %s11327_s22]]   ;;  %s11331_s22 = smov 60  }
  0x64   :  { %s11665_s13 = sld [smem:[%s13368_s0 + %s11329_s7]]   ;;  %s11333_s7 = smov 62  }
  0x65   :  { %13439 = sst [smem:[#allocation80_spill]] %s11620_s24 }
  0x66   :  { %s11640_s24 = sld [smem:[%s13368_s0 + %s11324_s28]]   ;;  %s11328_s28 = smov 57  }
  0x67   :  { %13440 = sst [smem:[#allocation81_spill]] %s11630_s29 }
  0x68   :  { %s11650_s29 = sld [smem:[%s13368_s0 + %s11326_s15]]   ;;  %s11330_s15 = smov 59  }
  0x69   :  { %13443 = sst [smem:[#allocation84_spill]] %s11655_s9 }
  0x6a   :  { %13445 = sst [smem:[#allocation86_spill]] %s11665_s13 }
  0x6b   :  { %s11675_s9 = sld [smem:[%s13368_s0 + %s11331_s22]]  }
  0x6c   :  { %13441 = sst [smem:[#allocation82_spill]] %s11640_s24 }
  0x6d   :  { %s11660_s24 = sld [smem:[%s13368_s0 + %s11328_s28]]   ;;  %s11332_s28 = smov 61  }
  0x6e   :  { %13442 = sst [smem:[#allocation83_spill]] %s11650_s29 }
  0x6f   :  { %s11670_s29 = sld [smem:[%s13368_s0 + %s11330_s15]]  }
  0x70   :  { %s11685_s13 = sld [smem:[%s13368_s0 + %s11333_s7]]  }
  0x73   :  { %13444 = sst [smem:[#allocation85_spill]] %s11660_s24 }
  0x74   :  { %s11680_s24 = sld [smem:[%s13368_s0 + %s11332_s28]]  }
  0x75   :  { %131 = vsyncpa [#allocation3], 0 }
  0x76   :  { %132 = vsyncpa [#allocation6], 0 }
  0x77   :  { %133 = vsyncpa [#allocation9], 0 }
  0x78   :  { %134 = vsyncpa [#allocation12], 0 }
  0x79   :  { %135 = vsyncpa [#allocation15], 0 }
  0x7a   :  { %136 = vsyncpa [#allocation18], 0 }
  0x7b   :  { %137 = vsyncpa [#allocation21], 0 }
  0x7c   :  { %138 = vsyncpa [#allocation24], 0 }
  0x7d   :  { %139 = vsyncpa [#allocation27], 0 }
  0x7e   :  { %140 = vsyncpa [#allocation4], 0 }
  0x7f   :  { %141 = vsyncpa [#allocation30], 0  ;;  %s11334_s15 = smov [#allocation5]   ;;  %s11335_s18 = smov [#allocation8]  }
  0x80   :  { %s220_s16 = sshll.u32 %s11334_s15, 4  ;;  %s246_s22 = sshll.u32 %s11335_s18, 4  ;;  %s221_s16 = int_to_ptr.vmem [resolvable:$true] %s220_s16  ;;  %s247_s22 = int_to_ptr.vmem [resolvable:$true] %s246_s22 }
  0x81   :  { %s10898_s23 = scalar_lea.vmem %s221_s16, 16  ;;  %s10902_s0 = scalar_lea.vmem %s221_s16, 32 }
  0x82   :  { %p10899_p0 = scmp.ne.s32.totalorder %s221_s16, %s10898_s23  ;;  %p10903_p1 = scmp.lt.s32.totalorder %s221_s16, %s221_s16 }
  0x83   :  { %p10904_p2 = scmp.lt.s32.totalorder %s10902_s0, %s10898_s23 }
  0x85   :  { %p10905_p3 = por %p10904_p2, %p10903_p1 }
  0x87   :  { %p10906_p4 = pnand %p10905_p3, %p10899_p0 }
  0x89   :  { %10909 = shalt.err (!%p10906_p4)
}
  0x8a   :  { %223 = dma.hbm_to_vmem [thread:$0]  %s11535_s27, 16, %s221_s16, [#allocation6]  }
  0x8b   :  { %s10918_s26 = scalar_lea.vmem %s247_s22, 16  ;;  %s10922_s28 = scalar_lea.vmem %s247_s22, 32 }
  0x8c   :  { %p10919_p5 = scmp.ne.s32.totalorder %s247_s22, %s10918_s26  ;;  %p10923_p6 = scmp.lt.s32.totalorder %s247_s22, %s247_s22 }
  0x8d   :  { %p10924_p7 = scmp.lt.s32.totalorder %s10922_s28, %s10918_s26 }
  0x8f   :  { %p10925_p8 = por %p10924_p7, %p10923_p6 }
  0x91   :  { %p10926_p9 = pnand %p10925_p8, %p10919_p5 }
  0x93   :  { %10929 = shalt.err (!%p10926_p9)
}
  0x94   :  { %249 = dma.hbm_to_vmem [thread:$0]  %s11560_s17, 16, %s247_s22, [#allocation9]  }
  0x95   :  { %s11336_s1 = smov [#allocation11]   ;;  %s11337_s7 = smov [#allocation14]  }
  0x96   :  { %s268_s2 = sshll.u32 %s11336_s1, 4  ;;  %s290_s10 = sshll.u32 %s11337_s7, 4  ;;  %s269_s2 = int_to_ptr.vmem [resolvable:$true] %s268_s2  ;;  %s291_s10 = int_to_ptr.vmem [resolvable:$true] %s290_s10 }
  0x97   :  { %s10938_s11 = scalar_lea.vmem %s269_s2, 16  ;;  %s10942_s15 = scalar_lea.vmem %s269_s2, 32 }
  0x98   :  { %p10939_p10 = scmp.ne.s32.totalorder %s269_s2, %s10938_s11  ;;  %p10943_p11 = scmp.lt.s32.totalorder %s269_s2, %s269_s2 }
  0x99   :  { %p10944_p12 = scmp.lt.s32.totalorder %s10942_s15, %s10938_s11 }
  0x9b   :  { %p10945_p13 = por %p10944_p12, %p10943_p11 }
  0x9d   :  { %p10946_p0 = pnand %p10945_p13, %p10939_p10 }
  0x9f   :  { %10949 = shalt.err (!%p10946_p0)
}
  0xa0   :  { %271 = dma.hbm_to_vmem [thread:$0]  %s11575_s12, 16, %s269_s2, [#allocation12]  }
  0xa1   :  { %s10958_s27 = scalar_lea.vmem %s291_s10, 16  ;;  %s10962_s16 = scalar_lea.vmem %s291_s10, 32 }
  0xa2   :  { %p10959_p1 = scmp.ne.s32.totalorder %s291_s10, %s10958_s27  ;;  %p10963_p2 = scmp.lt.s32.totalorder %s291_s10, %s291_s10 }
  0xa3   :  { %p10964_p3 = scmp.lt.s32.totalorder %s10962_s16, %s10958_s27 }
  0xa5   :  { %p10965_p4 = por %p10964_p3, %p10963_p2 }
  0xa7   :  { %p10966_p5 = pnand %p10965_p4, %p10959_p1 }
  0xa9   :  { %10969 = shalt.err (!%p10966_p5)
}
  0xaa   :  { %293 = dma.hbm_to_vmem [thread:$0]  %s11590_s4, 16, %s291_s10, [#allocation15]  }
  0xab   :  { %s11338_s17 = smov [#allocation17]   ;;  %s11339_s22 = smov [#allocation20]  }
  0xac   :  { %s312_s18 = sshll.u32 %s11338_s17, 4  ;;  %s336_s23 = sshll.u32 %s11339_s22, 4  ;;  %s313_s18 = int_to_ptr.vmem [resolvable:$true] %s312_s18  ;;  %s337_s23 = int_to_ptr.vmem [resolvable:$true] %s336_s23 }
  0xad   :  { %s10978_s0 = scalar_lea.vmem %s313_s18, 16  ;;  %s10982_s26 = scalar_lea.vmem %s313_s18, 32 }
  0xae   :  { %p10979_p6 = scmp.ne.s32.totalorder %s313_s18, %s10978_s0  ;;  %p10983_p7 = scmp.lt.s32.totalorder %s313_s18, %s313_s18 }
  0xaf   :  { %p10984_p8 = scmp.lt.s32.totalorder %s10982_s26, %s10978_s0 }
  0xb1   :  { %p10985_p9 = por %p10984_p8, %p10983_p7 }
  0xb3   :  { %p10986_p10 = pnand %p10985_p9, %p10979_p6 }
  0xb5   :  { %10989 = shalt.err (!%p10986_p10)
}
  0xb6   :  { %315 = dma.hbm_to_vmem [thread:$0]  %s11605_s6, 16, %s313_s18, [#allocation18]  }
  0xb7   :  { %s10998_s12 = scalar_lea.vmem %s337_s23, 16  ;;  %s11002_s28 = scalar_lea.vmem %s337_s23, 32 }
  0xb8   :  { %p10999_p11 = scmp.ne.s32.totalorder %s337_s23, %s10998_s12  ;;  %p11003_p12 = scmp.lt.s32.totalorder %s337_s23, %s337_s23 }
  0xb9   :  { %p11004_p13 = scmp.lt.s32.totalorder %s11002_s28, %s10998_s12 }
  0xbb   :  { %p11005_p0 = por %p11004_p13, %p11003_p12 }
  0xbd   :  { %p11006_p1 = pnand %p11005_p0, %p10999_p11 }
  0xbf   :  { %11009 = shalt.err (!%p11006_p1)
}
  0xc0   :  { %339 = dma.hbm_to_vmem [thread:$0]  %s11625_s5, 16, %s337_s23, [#allocation21]  }
  0xc1   :  { %s11340_s4 = smov [#allocation23]   ;;  %s11341_s2 = smov [#allocation2]  }
  0xc2   :  { %s360_s1 = sshll.u32 %s11340_s4, 4  ;;  %s210_s7 = sshll.u32 %s11341_s2, 4  ;;  %s361_s1 = int_to_ptr.vmem [resolvable:$true] %s360_s1  ;;  %s211_s7 = int_to_ptr.vmem [resolvable:$true] %s210_s7 }
  0xc3   :  { %s11018_s10 = scalar_lea.vmem %s361_s1, 16  ;;  %s11022_s11 = scalar_lea.vmem %s361_s1, 32 }
  0xc4   :  { %p11019_p2 = scmp.ne.s32.totalorder %s361_s1, %s11018_s10  ;;  %p11023_p3 = scmp.lt.s32.totalorder %s361_s1, %s361_s1 }
  0xc5   :  { %p11024_p4 = scmp.lt.s32.totalorder %s11022_s11, %s11018_s10 }
  0xc7   :  { %p11025_p5 = por %p11024_p4, %p11023_p3 }
  0xc9   :  { %p11026_p6 = pnand %p11025_p5, %p11019_p2 }
  0xcb   :  { %11029 = shalt.err (!%p11026_p6)
}
  0xcc   :  { %363 = dma.hbm_to_vmem [thread:$0]  %s11645_s8, 16, %s361_s1, [#allocation24]  }
  0xcd   :  { %s11038_s6 = scalar_lea.vmem %s211_s7, 16  ;;  %s11042_s15 = scalar_lea.vmem %s211_s7, 32 }
  0xce   :  { %p11039_p7 = scmp.ne.s32.totalorder %s211_s7, %s11038_s6  ;;  %p11043_p8 = scmp.lt.s32.totalorder %s211_s7, %s211_s7 }
  0xcf   :  { %p11044_p9 = scmp.lt.s32.totalorder %s11042_s15, %s11038_s6 }
  0xd1   :  { %p11045_p10 = por %p11044_p9, %p11043_p8 }
  0xd3   :  { %p11046_p11 = pnand %p11045_p10, %p11039_p7 }
  0xd5   :  { %11049 = shalt.err (!%p11046_p11)
}
  0xd6   :  { %213 = dma.hbm_to_vmem [thread:$0]  %s11530_s25, 16, %s211_s7, [#allocation3]  }
  0xd7   :  { %s11342_s5 = smov [#allocation7]   ;;  %s11343_s16 = smov [#allocation10]  }
  0xd8   :  { %s230_s27 = sshll.u32 %s11342_s5, 4  ;;  %s256_s17 = sshll.u32 %s11343_s16, 4  ;;  %s231_s27 = int_to_ptr.vmem [resolvable:$true] %s230_s27  ;;  %s257_s17 = int_to_ptr.vmem [resolvable:$true] %s256_s17 }
  0xd9   :  { %s11058_s18 = scalar_lea.vmem %s231_s27, 16  ;;  %s11062_s22 = scalar_lea.vmem %s231_s27, 32 }
  0xda   :  { %p11059_p12 = scmp.ne.s32.totalorder %s231_s27, %s11058_s18  ;;  %p11063_p13 = scmp.lt.s32.totalorder %s231_s27, %s231_s27 }
  0xdb   :  { %p11064_p0 = scmp.lt.s32.totalorder %s11062_s22, %s11058_s18 }
  0xdd   :  { %p11065_p1 = por %p11064_p0, %p11063_p13 }
  0xdf   :  { %p11066_p2 = pnand %p11065_p1, %p11059_p12 }
  0xe1   :  { %11069 = shalt.err (!%p11066_p2)
}
  0xe2   :  { %233 = dma.hbm_to_vmem [thread:$0]  %s11540_s20, 16, %s231_s27, [#allocation6]  }
  0xe3   :  { %s11078_s8 = scalar_lea.vmem %s257_s17, 16  ;;  %s11082_s23 = scalar_lea.vmem %s257_s17, 32 }
  0xe4   :  { %p11079_p3 = scmp.ne.s32.totalorder %s257_s17, %s11078_s8  ;;  %p11083_p4 = scmp.lt.s32.totalorder %s257_s17, %s257_s17 }
  0xe5   :  { %p11084_p5 = scmp.lt.s32.totalorder %s11082_s23, %s11078_s8 }
  0xe7   :  { %p11085_p6 = por %p11084_p5, %p11083_p4 }
  0xe9   :  { %p11086_p7 = pnand %p11085_p6, %p11079_p3 }
  0xeb   :  { %11089 = shalt.err (!%p11086_p7)
}
  0xec   :  { %259 = dma.hbm_to_vmem [thread:$0]  %s11565_s21, 16, %s257_s17, [#allocation9]  }
  0xed   :  { %s11344_s25 = smov [#allocation13]   ;;  %s11345_s26 = smov [#allocation16]  }
  0xee   :  { %s280_s0 = sshll.u32 %s11344_s25, 4  ;;  %s300_s12 = sshll.u32 %s11345_s26, 4  ;;  %s281_s0 = int_to_ptr.vmem [resolvable:$true] %s280_s0  ;;  %s301_s12 = int_to_ptr.vmem [resolvable:$true] %s300_s12 }
  0xef   :  { %s11098_s28 = scalar_lea.vmem %s281_s0, 16  ;;  %s11102_s4 = scalar_lea.vmem %s281_s0, 32 }
  0xf0   :  { %p11099_p8 = scmp.ne.s32.totalorder %s281_s0, %s11098_s28  ;;  %p11103_p9 = scmp.lt.s32.totalorder %s281_s0, %s281_s0 }
  0xf1   :  { %p11104_p10 = scmp.lt.s32.totalorder %s11102_s4, %s11098_s28 }
  0xf3   :  { %p11105_p11 = por %p11104_p10, %p11103_p9 }
  0xf5   :  { %p11106_p12 = pnand %p11105_p11, %p11099_p8 }
  0xf7   :  { %11109 = shalt.err (!%p11106_p12)
}
  0xf8   :  { %283 = dma.hbm_to_vmem [thread:$0]  %s11585_s30, 16, %s281_s0, [#allocation12]  }
  0xf9   :  { %s11118_s20 = scalar_lea.vmem %s301_s12, 16  ;;  %s11122_s1 = scalar_lea.vmem %s301_s12, 32 }
  0xfa   :  { %p11119_p13 = scmp.ne.s32.totalorder %s301_s12, %s11118_s20  ;;  %p11123_p0 = scmp.lt.s32.totalorder %s301_s12, %s301_s12 }
  0xfb   :  { %p11124_p1 = scmp.lt.s32.totalorder %s11122_s1, %s11118_s20 }
  0xfd   :  { %p11125_p2 = por %p11124_p1, %p11123_p0 }
  0xff   :  { %p11126_p3 = pnand %p11125_p2, %p11119_p13 }
 0x101   :  { %11129 = shalt.err (!%p11126_p3)
}
 0x102   :  { %303 = dma.hbm_to_vmem [thread:$0]  %s11595_s14, 16, %s301_s12, [#allocation15]  }
 0x103   :  { %s11346_s21 = smov [#allocation19]   ;;  %s11347_s7 = smov [#allocation22]  }
 0x104   :  { %s324_s2 = sshll.u32 %s11346_s21, 4  ;;  %s348_s10 = sshll.u32 %s11347_s7, 4  ;;  %s325_s2 = int_to_ptr.vmem [resolvable:$true] %s324_s2  ;;  %s349_s10 = int_to_ptr.vmem [resolvable:$true] %s348_s10 }
 0x105   :  { %s11138_s11 = scalar_lea.vmem %s325_s2, 16  ;;  %s11142_s6 = scalar_lea.vmem %s325_s2, 32 }
 0x106   :  { %p11139_p4 = scmp.ne.s32.totalorder %s325_s2, %s11138_s11  ;;  %p11143_p5 = scmp.lt.s32.totalorder %s325_s2, %s325_s2 }
 0x107   :  { %p11144_p6 = scmp.lt.s32.totalorder %s11142_s6, %s11138_s11 }
 0x109   :  { %p11145_p7 = por %p11144_p6, %p11143_p5 }
 0x10b   :  { %p11146_p8 = pnand %p11145_p7, %p11139_p4 }
 0x10d   :  { %11149 = shalt.err (!%p11146_p8)
}
 0x10e   :  { %327 = dma.hbm_to_vmem [thread:$0]  %s11615_s19, 16, %s325_s2, [#allocation18]  }
 0x10f   :  { %s11158_s30 = scalar_lea.vmem %s349_s10, 16  ;;  %s11162_s15 = scalar_lea.vmem %s349_s10, 32 }
 0x110   :  { %p11159_p9 = scmp.ne.s32.totalorder %s349_s10, %s11158_s30  ;;  %p11163_p10 = scmp.lt.s32.totalorder %s349_s10, %s349_s10 }
 0x111   :  { %p11164_p11 = scmp.lt.s32.totalorder %s11162_s15, %s11158_s30 }
 0x113   :  { %p11165_p12 = por %p11164_p11, %p11163_p10 }
 0x115   :  { %p11166_p13 = pnand %p11165_p12, %p11159_p9 }
 0x117   :  { %11169 = shalt.err (!%p11166_p13)
}
 0x118   :  { %351 = dma.hbm_to_vmem [thread:$0]  %s11635_s3, 16, %s349_s10, [#allocation21]  }
 0x119   :  { %s11348_s14 = smov [#allocation25]   ;;  %s11349_s27 = smov [#allocation26]  }
 0x11a   :  { %s372_s5 = sshll.u32 %s11348_s14, 4  ;;  %s384_s16 = sshll.u32 %s11349_s27, 4  ;;  %s373_s5 = int_to_ptr.vmem [resolvable:$true] %s372_s5  ;;  %s385_s16 = int_to_ptr.vmem [resolvable:$true] %s384_s16 }
 0x11b   :  { %s11178_s17 = scalar_lea.vmem %s373_s5, 16  ;;  %s11182_s18 = scalar_lea.vmem %s373_s5, 32 }
 0x11c   :  { %p11179_p0 = scmp.ne.s32.totalorder %s373_s5, %s11178_s17  ;;  %p11183_p1 = scmp.lt.s32.totalorder %s373_s5, %s373_s5 }
 0x11d   :  { %p11184_p2 = scmp.lt.s32.totalorder %s11182_s18, %s11178_s17 }
 0x11f   :  { %p11185_p3 = por %p11184_p2, %p11183_p1 }
 0x121   :  { %p11186_p4 = pnand %p11185_p3, %p11179_p0 }
 0x123   :  { %11189 = shalt.err (!%p11186_p4)
}
 0x124   :  { %s13446_s19 = sld [smem:[#allocation84_spill]]  ;;  %s11198_s22 = scalar_lea.vmem %s385_s16, 16 }
 0x125   :  { %p11199_p5 = scmp.ne.s32.totalorder %s385_s16, %s11198_s22  ;;  %s11202_s8 = scalar_lea.vmem %s385_s16, 32 }
 0x126   :  { %p11203_p6 = scmp.lt.s32.totalorder %s385_s16, %s385_s16  ;;  %p11204_p7 = scmp.lt.s32.totalorder %s11202_s8, %s11198_s22 }
 0x128   :  { %p11205_p8 = por %p11204_p7, %p11203_p6 }
 0x12a   :  { %375 = dma.hbm_to_vmem [thread:$0]  %s13446_s19, 16, %s373_s5, [#allocation24]  }
 0x12b   :  { %p11206_p9 = pnand %p11205_p8, %p11199_p5 }
 0x12d   :  { %11209 = shalt.err (!%p11206_p9)
}
 0x12e   :  { %s13447_s3 = sld [smem:[#allocation86_spill]] }
 0x134   :  { %387 = dma.hbm_to_vmem [thread:$0]  %s13447_s3, 16, %s385_s16, [#allocation27]  }
 0x135   :  { %11250 = dma.done.wait [#allocation3], 16  }
 0x136   :  { %11251 = vsyncadd [#allocation3], 4294967280 }
 0x137   :  { %11252 = dma.done.wait [#allocation6], 32  }
 0x138   :  { %11253 = vsyncadd [#allocation6], 4294967264 }
 0x139   :  { %11254 = dma.done.wait [#allocation9], 32  }
 0x13a   :  { %11255 = vsyncadd [#allocation9], 4294967264 }
 0x13b   :  { %11256 = dma.done.wait [#allocation12], 32  }
 0x13c   :  { %11257 = vsyncadd [#allocation12], 4294967264 }
 0x13d   :  { %11258 = dma.done.wait [#allocation15], 32  }
 0x13e   :  { %11259 = vsyncadd [#allocation15], 4294967264 }
 0x13f   :  { %11260 = dma.done.wait [#allocation18], 32  }
 0x140   :  { %11261 = vsyncadd [#allocation18], 4294967264 }
 0x141   :  { %11262 = dma.done.wait [#allocation21], 32  }
 0x142   :  { %11263 = vsyncadd [#allocation21], 4294967264 }
 0x143   :  { %11264 = dma.done.wait [#allocation24], 32  }
 0x144   :  { %11265 = vsyncadd [#allocation24], 4294967264 }
 0x145   :  { %11266 = dma.done.wait [#allocation27], 16  }
 0x146   :  { %11267 = vsyncadd [#allocation27], 4294967280  ;;  %s13448_s23 = sld [smem:[#allocation44_spill]]  ;;  %vm470_vm0 = vcmask 523264   ;;  %vm579_vm1 = vcmask 261120   ;;  %vm677_vm2 = vcmask 130048  }
 0x147   :  { %s13449_s25 = sld [smem:[#allocation43_spill]]  ;;  %v11350_v32 = vmov 0   ;;  %s11351_s7 = smov 96   ;;  %vm1153_vm3 = vcmask 64512   ;;  %vm3331_vm4 = vcmask 334848   ;;  %vm3711_vm5 = vcmask 195584  }
 0x148   :  { %s13450_s0 = sld [smem:[#allocation50_spill]]  ;;  %10620 = vset.pattern.permute.xlu0 %v11350_v32  ;;  %10621 = vset.pattern.permute.xlu1 %v11350_v32  ;;  %s11352_s10 = smov 120  }
 0x149   :  { %s13451_s26 = sld [smem:[#allocation49_spill]]  ;;  %s11353_s6 = smov 88  }
 0x14a   :  { %s13452_s12 = sld [smem:[#allocation42_spill]]  ;;  %s11354_s15 = smov 112  }
 0x14b   :  { %s13453_s28 = sld [smem:[#allocation52_spill]]  ;;  %s11355_s14 = smov 80  }
 0x14c   :  { %v11704_v0 = vld [vmem:[%s13448_s23 + $0x38] sm:$0xff]  ;;  %v11707_v1 = vld [vmem:[%s13448_s23 + $0x30] sm:$0xff]  ;;  %v11712_v2 = vld [vmem:[%s13448_s23 + $0x28] sm:$0xff]  ;;  %s13454_s4 = sld [smem:[#allocation48_spill]]  ;;  %s11356_s5 = smov 104  }
 0x14d   :  { %9517 = vmatprep.subr.mxu0 %v11704_v0  ;;  %v466_v3 = vld [vmem:[%s13449_s25] sm:$0xff]  ;;  %v11726_v7 = vld [vmem:[%s13448_s23 + $0x18] sm:$0xff]  ;;  %v11731_v8 = vld [vmem:[%s13448_s23 + $0x10] sm:$0xff]  ;;  %s13455_s20 = sld [smem:[#allocation55_spill]]  ;;  %s11357_s27 = smov 72  }
 0x14e   :  { %9518 = vmatpush3.msra.mxu0 %v11704_v0  ;;  %9533 = vmatprep.mubr.msk.f32.mxu0 %vm470_vm0, %v466_v3  ;;  %v11719_v4 = vld [vmem:[%s13448_s23 + $0x20] sm:$0xff]  ;;  %v571_v5 = vld [vmem:[%s13450_s0 + $0x18] sm:$0xff]  ;;  %v570_v6 = vld [vmem:[%s13450_s0 + $0x10] sm:$0xff]  ;;  %s13456_s1 = sld [smem:[#allocation51_spill]] }
 0x14f   :  { %9519 = vmatprep.subr.mxu0 %v11707_v1  ;;  %9539 = vmatprep.subr.mxu1 %v571_v5  ;;  %v11736_v9 = vld [vmem:[%s13448_s23 + $0x8] sm:$0xff]  ;;  %v11741_v10 = vld [vmem:[%s13448_s23] sm:$0xff]  ;;  %v468_v12 = vld [vmem:[%s13449_s25 + $0x10] sm:$0xff]  ;;  %s13457_s21 = sld [smem:[#allocation54_spill]] }
 0x150   :  { %9520 = vmatpush3.msra.mxu0 %v11707_v1  ;;  %9540 = vmatpush3.msra.mxu1 %v571_v5  ;;  %v467_v11 = vld [vmem:[%s13449_s25 + $0x8] sm:$0xff]  ;;  %v469_v13 = vld [vmem:[%s13449_s25 + $0x18] sm:$0xff]  ;;  %v568_v15 = vld [vmem:[%s13450_s0] sm:$0xff]  ;;  %s13458_s2 = sld [smem:[#allocation53_spill]] }
 0x151   :  { %9521 = vmatprep.subr.mxu0 %v11712_v2  ;;  %9541 = vmatprep.subr.mxu1 %v570_v6  ;;  %v569_v14 = vld [vmem:[%s13450_s0 + $0x8] sm:$0xff]  ;;  %v464_v19 = vld [vmem:[%s13451_s26] sm:$0xff]  ;;  %v462_v24 = vld [vmem:[%s13452_s12 + $0x10] sm:$0xff]  ;;  %s13459_s11 = sld [smem:[#allocation45_spill]] }
 0x152   :  { %9522 = vmatpush3.msra.mxu0 %v11712_v2  ;;  %9542 = vmatpush3.msra.mxu1 %v570_v6  ;;  %v465_v16 = vld [vmem:[%s13451_s26 + $0x8] sm:$0xff]  ;;  %v460_v22 = vld [vmem:[%s13452_s12] sm:$0xff]  ;;  %v463_v25 = vld [vmem:[%s13452_s12 + $0x18] sm:$0xff]  ;;  %s13460_s30 = sld [smem:[#allocation56_spill]] }
 0x153   :  { %9523 = vmatprep.subr.mxu0 %v11719_v4  ;;  %9543 = vmatprep.subr.mxu1 %v569_v14  ;;  %v461_v23 = vld [vmem:[%s13452_s12 + $0x8] sm:$0xff]  ;;  %v778_v26 = vld [vmem:[%s13453_s28 + $0x18] sm:$0xff]  ;;  %v777_v27 = vld [vmem:[%s13453_s28 + $0x10] sm:$0xff]  ;;  %s13461_s16 = sld [smem:[#allocation59_spill]] }
 0x154   :  { %9524 = vmatpush3.msra.mxu0 %v11719_v4  ;;  %9544 = vmatpush3.msra.mxu1 %v569_v14  ;;  %v776_v28 = vld [vmem:[%s13453_s28 + $0x8] sm:$0xff]  ;;  %v775_v29 = vld [vmem:[%s13453_s28] sm:$0xff]  ;;  %v446_v31 = vld [vmem:[%s13454_s4 + $0x10] sm:$0xff]  ;;  %s13462_s17 = sld [smem:[#allocation61_spill]] }
 0x155   :  { %9525 = vmatprep.subr.mxu0 %v11726_v7  ;;  %9545 = vmatprep.subr.mxu1 %v568_v15  ;;  %v444_v30 = vld [vmem:[%s13454_s4] sm:$0xff]  ;;  %v1015_v33 = vld [vmem:[%s13455_s20 + $0x18] sm:$0xff]  ;;  %v445_v34 = vld [vmem:[%s13454_s4 + $0x8] sm:$0xff]  ;;  %s13463_s18 = sld [smem:[#allocation57_spill]] }
 0x156   :  { %9526 = vmatpush3.msra.mxu0 %v11726_v7  ;;  %9546 = vmatpush3.msra.mxu1 %v568_v15  ;;  %v447_v35 = vld [vmem:[%s13454_s4 + $0x18] sm:$0xff]  ;;  %v8611_v40 = vld [vmem:[%s13456_s1] ss:$0 sm:$0xff]  ;;  %v1014_v49 = vld [vmem:[%s13455_s20 + $0x10] sm:$0xff]  ;;  %s13464_s19 = sld [smem:[#allocation58_spill]] }
 0x157   :  { %9527 = vmatprep.subr.mxu0 %v11731_v8  ;;  %9553 = vmatprep.subr.mxu1 %v465_v16  ;;  %v1013_v53 = vld [vmem:[%s13455_s20 + $0x8] sm:$0xff]  ;;  %v1012_v55 = vld [vmem:[%s13455_s20] sm:$0xff]  ;;  %v914_v56 = vld [vmem:[%s13457_s21 + $0x18] sm:$0xff]  ;;  %s13465_s22 = sld [smem:[#allocation60_spill]] }
 0x158   :  { %9528 = vmatpush3.msra.mxu0 %v11731_v8  ;;  %889 = vperm.xlu0 %10620, %v444_v30   ;;  %v913_v57 = vld [vmem:[%s13457_s21 + $0x10] sm:$0xff]  ;;  %v912_v58 = vld [vmem:[%s13457_s21 + $0x8] sm:$0xff]  ;;  %v911_v59 = vld [vmem:[%s13457_s21] sm:$0xff]  ;;  %s13466_s8 = sld [smem:[#allocation62_spill]] }
 0x159   :  { %9529 = vmatprep.subr.mxu0 %v11736_v9  ;;  %899 = vperm.xlu1 %10621, %v446_v31   ;;  %v8620_v60 = vld [vmem:[%s13458_s2] ss:$0 sm:$0xff]  ;;  %s13467_s3 = sld [smem:[#allocation78_spill]] }
 0x15a   :  { %9530 = vmatpush3.msra.mxu0 %v11736_v9  ;;  %s13468_s25 = sld [smem:[#allocation63_spill]] }
 0x15b   :  { %9531 = vmatprep.subr.mxu0 %v11741_v10  ;;  %s13469_s0 = sld [smem:[#allocation64_spill]] }
 0x15c   :  { %9532 = vmatpush3.msra.mxu0 %v11741_v10  ;;  %894 = vperm.xlu0 %10620, %v445_v34   ;;  %s13470_s26 = sld [smem:[#allocation79_spill]] }
 0x15d   :  { %9534 = vmatmul.mubr.msk.f32.vlgmr.msra.gmra.mxu0 %vm470_vm0, %v467_v11  ;;  %9563 = vmatprep.subr.mxu0 %v778_v26  ;;  %s13471_s12 = sld [smem:[#allocation47_spill]] }
 0x15e   :  { %9536 = vmatprep.mubr.msk.f32.mxu0 %vm470_vm0, %v468_v12  ;;  %9564 = vmatpush3.msra.mxu0 %v778_v26  ;;  %s13472_s28 = sld [smem:[#allocation82_spill]] }
 0x15f   :  { %9565 = vmatprep.subr.mxu0 %v777_v27  ;;  %904 = vperm.xlu1 %10621, %v447_v35   ;;  %s13474_s4 = sld [smem:[#allocation85_spill]] }
 0x160   :  { %9566 = vmatpush3.msra.mxu0 %v777_v27  ;;  %s13475_s20 = sld [smem:[#allocation65_spill]] }
 0x161   :  { %9537 = vmatmul.mubr.msk.f32.gmra.mxu0 %vm470_vm0, %v469_v13  ;;  %9567 = vmatprep.subr.mxu0 %v776_v28  ;;  %s13476_s1 = sld [smem:[#allocation66_spill]] }
 0x162   :  { %9568 = vmatpush3.msra.mxu0 %v776_v28  ;;  %s13477_s21 = sld [smem:[#allocation46_spill]] }
 0x163   :  { %9569 = vmatprep.subr.mxu0 %v775_v29  ;;  %s13478_s2 = sld [smem:[#allocation67_spill]] }
 0x164   :  { %9570 = vmatpush3.msra.mxu0 %v775_v29 }
 0x165   :  { %9591 = vmatprep.subr.mxu0 %v1015_v33 }
 0x1d3   :  { %v11805_v61 = vpop.permute.xlu0 %889 }
 0x1d7   :  { %v11809_v6 = vpop.permute.xlu0 %894 }
 0x21d   :  { %v9535_v17 = vpop.f32.mrf.mxu0 }
 0x21f   :  { %v549_v18 = vpop.f32.mrf.mxu0 }
 0x220   :  { %9547 = vmatprep.mubr.msk.f32.mxu1 %vm579_vm1, %v549_v18 }
 0x221   :  { %v9538_v20 = vpop.f32.mrf.mxu0  ;;  %9548 = vmatmul.mubr.msk.f32.vlgmr.msra.gmra.mxu1 %vm579_vm1, %v9535_v17 }
 0x222   :  { %9554 = vmatpush3.msra.mxu1 %v465_v16 }
 0x223   :  { %v559_v21 = vpop.f32.mrf.mxu0  ;;  %9555 = vmatprep.subr.mxu1 %v464_v19 }
 0x224   :  { %9550 = vmatprep.mubr.msk.f32.mxu1 %vm579_vm1, %v559_v21  ;;  %9556 = vmatpush3.msra.mxu1 %v464_v19 }
 0x225   :  { %9551 = vmatmul.mubr.msk.f32.gmra.mxu1 %vm579_vm1, %v9538_v20  ;;  %9577 = vmatprep.subr.mxu1 %v914_v56 }
 0x226   :  { %9557 = vmatprep.mubr.msk.f32.mxu1 %vm677_vm2, %v460_v22 }
 0x229   :  { %9558 = vmatmul.mubr.msk.f32.vlgmr.msra.gmra.mxu1 %vm677_vm2, %v461_v23 }
 0x22a   :  { %9560 = vmatprep.mubr.msk.f32.mxu1 %vm677_vm2, %v462_v24  ;;  %9578 = vmatpush3.msra.mxu1 %v914_v56 }
 0x22b   :  { %9579 = vmatprep.subr.mxu1 %v913_v57 }
 0x22c   :  { %9580 = vmatpush3.msra.mxu1 %v913_v57 }
 0x22d   :  { %9561 = vmatmul.mubr.msk.f32.gmra.mxu1 %vm677_vm2, %v463_v25  ;;  %9581 = vmatprep.subr.mxu1 %v912_v58 }
 0x22e   :  { %9582 = vmatpush3.msra.mxu1 %v912_v58 }
 0x22f   :  { %9583 = vmatprep.subr.mxu1 %v911_v59 }
 0x230   :  { %9584 = vmatpush3.msra.mxu1 %v911_v59 }
 0x2e1   :  { %v9549_v36 = vpop.f32.mrf.mxu1 }
 0x2e2   :  { %v664_v43 = vadd.f32 %v9549_v36, %v8611_v40 }
 0x2e3   :  { %v658_v37 = vpop.f32.mrf.mxu1 }
 0x2e4   :  { %v659_v42 = vadd.f32 %v8611_v40, %v658_v37 }
 0x2e5   :  { %v9552_v38 = vpop.f32.mrf.mxu1 }
 0x2e6   :  { %v674_v50 = vadd.f32 %v9552_v38, %v8611_v40 }
 0x2e7   :  { %v668_v39 = vpop.f32.mrf.mxu1 }
 0x2e8   :  { %v669_v48 = vadd.f32 %v8611_v40, %v668_v39 }
 0x2e9   :  { %v9559_v41 = vpop.f32.mrf.mxu1 }
 0x2ea   :  { %v762_v46 = vadd.f32 %v9559_v41, %v664_v43  ;;  %v11920_v43 = vld [vmem:[%s13459_s11 + $0x8] sm:$0xff] }
 0x2eb   :  { %v756_v44 = vpop.f32.mrf.mxu1 }
 0x2ec   :  { %v757_v45 = vadd.f32 %v756_v44, %v659_v42 }
 0x2ed   :  { %v9562_v47 = vpop.f32.mrf.mxu1 }
 0x2ee   :  { %9571 = vmatprep.mubr.msk.f32.mxu0 %vm579_vm1, %v757_v45  ;;  %v772_v54 = vadd.f32 %v9562_v47, %v674_v50  ;;  %v11923_v45 = vld [vmem:[%s13459_s11] sm:$0xff] }
 0x2ef   :  { %v766_v51 = vpop.f32.mrf.mxu1  ;;  %9572 = vmatmul.mubr.msk.f32.vlgmr.msra.gmra.mxu0 %vm579_vm1, %v762_v46 }
 0x2f0   :  { %v767_v52 = vadd.f32 %v766_v51, %v669_v48  ;;  %9592 = vmatpush3.msra.mxu0 %v1015_v33  ;;  %v11927_v48 = vld [vmem:[%s13459_s11 + $0x18] sm:$0xff] }
 0x2f1   :  { %9593 = vmatprep.subr.mxu0 %v1014_v49 }
 0x2f2   :  { %9574 = vmatprep.mubr.msk.f32.mxu0 %vm579_vm1, %v767_v52  ;;  %9594 = vmatpush3.msra.mxu0 %v1014_v49 }
 0x2f3   :  { %9575 = vmatmul.mubr.msk.f32.gmra.mxu0 %vm579_vm1, %v772_v54  ;;  %9595 = vmatprep.subr.mxu0 %v1013_v53 }
 0x2f4   :  { %9596 = vmatpush3.msra.mxu0 %v1013_v53  ;;  %9599 = vmatprep.mubr.msk.f32.mxu0 %vm579_vm1, %v11741_v10 }
 0x2f5   :  { %9597 = vmatprep.subr.mxu0 %v1012_v55 }
 0x2f6   :  { %9598 = vmatpush3.msra.mxu0 %v1012_v55  ;;  %v11934_v55 = vld [vmem:[%s13459_s11 + $0x10] sm:$0xff] }
 0x2f7   :  { %9600 = vmatmul.mubr.msk.f32.vlgmr.msra.gmra.mxu0 %vm579_vm1, %v11736_v9 }
 0x2f8   :  { %9602 = vmatprep.mubr.msk.f32.mxu0 %vm579_vm1, %v11731_v8 }
 0x2fb   :  { %9603 = vmatmul.mubr.msk.f32.gmra.mxu0 %vm579_vm1, %v11726_v7 }
 0x2fc   :  { %9605 = vmatprep.mubr.msk.f32.mxu0 %vm579_vm1, %v11719_v4 }
 0x2ff   :  { %9606 = vmatmul.mubr.msk.f32.gmra.mxu0 %vm579_vm1, %v11712_v2 }
 0x300   :  { %9608 = vmatprep.mubr.msk.f32.mxu0 %vm579_vm1, %v11707_v1 }
 0x303   :  { %9609 = vmatmul.mubr.msk.f32.gmra.mxu0 %vm579_vm1, %v11704_v0  ;;  %v11807_v0 = vpop.permute.xlu1 %899 }
 0x307   :  { %v11819_v15 = vpop.permute.xlu1 %904 }
 0x3af   :  { %v9573_v62 = vpop.f32.mrf.mxu0 }
 0x3b0   :  { %v870_v63 = vadd.f32 %v9573_v62, %v8620_v60 }
 0x3b1   :  { %v864_v1 = vpop.f32.mrf.mxu0 }
 0x3b2   :  { %v865_v2 = vadd.f32 %v8620_v60, %v864_v1  ;;  %v884_v3 = vmax.f32 %v870_v63, 0.0 }
 0x3b3   :  { %v9576_v4 = vpop.f32.mrf.mxu0 }
 0x3b4   :  { %v883_v5 = vmax.f32 %v865_v2, 0.0  ;;  %v880_v7 = vadd.f32 %v9576_v4, %v8620_v60  ;;  %v11815_v11 = vmul.f32 %v11809_v6, %v884_v3 }
 0x3b5   :  { %v874_v8 = vpop.f32.mrf.mxu0 }
 0x3b6   :  { %v11812_v9 = vmul.f32 %v11805_v61, %v883_v5  ;;  %v875_v10 = vadd.f32 %v8620_v60, %v874_v8  ;;  %v886_v12 = vmax.f32 %v880_v7, 0.0 }
 0x3b7   :  { %v11817_v13 = vpop.f32.mrf.mxu0 }
 0x3b8   :  { %v885_v14 = vmax.f32 %v875_v10, 0.0  ;;  %9585 = vmatprep.mubr.msk.f32.mxu1 %vm579_vm1, %v11812_v9  ;;  %1321 = vrot.lane.b32.xlu0 %v11817_v13, %s11351_s7  ;;  %v11835_v18 = vmul.f32 %v11819_v15, %v886_v12 }
 0x3b9   :  { %9586 = vmatmul.mubr.msk.f32.vlgmr.msra.gmra.mxu1 %vm579_vm1, %v11815_v11  ;;  %v11827_v16 = vpop.f32.mrf.mxu0 }
 0x3ba   :  { %v11830_v17 = vmul.f32 %v11807_v0, %v885_v14  ;;  %1319 = vrot.lane.b32.xlu1 %v11827_v16, %s11351_s7 }
 0x3bb   :  { %v11837_v19 = vpop.f32.mrf.mxu0 }
 0x3bc   :  { %9588 = vmatprep.mubr.msk.f32.mxu1 %vm579_vm1, %v11830_v17  ;;  %1325 = vrot.lane.b32.xlu0 %v11837_v19, %s11351_s7 }
 0x3bd   :  { %9589 = vmatmul.mubr.msk.f32.gmra.mxu1 %vm579_vm1, %v11835_v18  ;;  %v11845_v20 = vpop.f32.mrf.mxu0 }
 0x3be   :  { %1323 = vrot.lane.b32.xlu1 %v11845_v20, %s11351_s7 }
 0x3bf   :  { %v11849_v21 = vpop.f32.mrf.mxu0 }
 0x3c1   :  { %v11851_v22 = vpop.f32.mrf.mxu0 }
 0x3c2   :  { %1329 = vrot.lane.b32.xlu1 %v11849_v21, %s11351_s7 }
 0x3c3   :  { %v11855_v23 = vpop.f32.mrf.mxu0 }
 0x3c4   :  { %9611 = vmatprep.subr.msk.mxu1 %vm1153_vm3, %v11855_v23  ;;  %1462 = vrot.lane.b32.xlu0 %v11855_v23, %s11352_s10 }
 0x3c5   :  { %9612 = vmatpush3.xpose.msk.msra.mxu1 %vm1153_vm3, %v11855_v23  ;;  %v11863_v24 = vpop.f32.mrf.mxu0 }
 0x3c6   :  { %9613 = vmatprep.subr.msk.mxu1 %vm1153_vm3, %v11863_v24  ;;  %1327 = vrot.lane.b32.xlu1 %v11851_v22, %s11351_s7 }
 0x3c8   :  { %1331 = vrot.lane.b32.xlu0 %v11863_v24, %s11351_s7 }
 0x3c9   :  { %9614 = vmatpush3.xpose.msk.msra.mxu1 %vm1153_vm3, %v11863_v24 }
 0x3ca   :  { %9615 = vmatprep.subr.msk.mxu1 %vm1153_vm3, %v11849_v21  ;;  %1333 = vrot.lane.b32.xlu1 %v11855_v23, %s11351_s7 }
 0x3cd   :  { %9616 = vmatpush3.xpose.msk.msra.mxu1 %vm1153_vm3, %v11849_v21 }
 0x3ce   :  { %9617 = vmatprep.subr.msk.mxu1 %vm1153_vm3, %v11851_v22 }
 0x3d1   :  { %9618 = vmatpush3.xpose.msk.msra.mxu1 %vm1153_vm3, %v11851_v22 }
 0x3d2   :  { %9619 = vmatprep.subr.msk.mxu1 %vm1153_vm3, %v11837_v19 }
 0x3d5   :  { %9620 = vmatpush3.xpose.msk.msra.mxu1 %vm1153_vm3, %v11837_v19 }
 0x3d6   :  { %9621 = vmatprep.subr.msk.mxu1 %vm1153_vm3, %v11845_v20 }
 0x3d9   :  { %9622 = vmatpush3.xpose.msk.msra.mxu1 %vm1153_vm3, %v11845_v20 }
 0x3da   :  { %9623 = vmatprep.subr.msk.mxu1 %vm1153_vm3, %v11817_v13 }
 0x3dd   :  { %9624 = vmatpush3.xpose.msk.msra.mxu1 %vm1153_vm3, %v11817_v13 }
 0x3de   :  { %9625 = vmatprep.subr.msk.mxu1 %vm1153_vm3, %v11827_v16 }
 0x3e1   :  { %9626 = vmatpush3.xpose.msk.msra.mxu1 %vm1153_vm3, %v11827_v16 }
 0x42a   :  { %v1322_v25 = vpop.permute.xlu0 %1321 }
 0x42c   :  { %v1320_v26 = vpop.permute.xlu1 %1319 }
 0x42e   :  { %v1326_v28 = vpop.permute.xlu0 %1325 }
 0x430   :  { %v1324_v27 = vpop.permute.xlu1 %1323 }
 0x434   :  { %v1330_v29 = vpop.permute.xlu1 %1329 }
 0x436   :  { %v11899_v30 = vpop.permute.xlu0 %1462 }
 0x438   :  { %v1328_v31 = vpop.permute.xlu1 %1327 }
 0x43a   :  { %v1332_v34 = vpop.permute.xlu0 %1331 }
 0x43c   :  { %v1334_v33 = vpop.permute.xlu1 %1333 }
 0x43d   :  { %9633 = vmatprep.subr.mxu0 %v1334_v33 }
 0x43e   :  { %9634 = vmatpush3.msra.mxu0 %v1334_v33 }
 0x43f   :  { %9635 = vmatprep.subr.mxu0 %v1332_v34 }
 0x440   :  { %9636 = vmatpush3.msra.mxu0 %v1332_v34 }
 0x441   :  { %9637 = vmatprep.subr.mxu0 %v1330_v29 }
 0x442   :  { %9638 = vmatpush3.msra.mxu0 %v1330_v29 }
 0x443   :  { %9639 = vmatprep.subr.mxu0 %v1328_v31 }
 0x444   :  { %9640 = vmatpush3.msra.mxu0 %v1328_v31 }
 0x445   :  { %9641 = vmatprep.subr.mxu0 %v1326_v28 }
 0x446   :  { %9642 = vmatpush3.msra.mxu0 %v1326_v28 }
 0x447   :  { %9643 = vmatprep.subr.mxu0 %v1324_v27 }
 0x448   :  { %9644 = vmatpush3.msra.mxu0 %v1324_v27 }
 0x449   :  { %9645 = vmatprep.subr.mxu0 %v1322_v25 }
 0x44a   :  { %9646 = vmatpush3.msra.mxu0 %v1322_v25 }
 0x44b   :  { %9647 = vmatprep.subr.mxu0 %v1320_v26 }
 0x44c   :  { %9648 = vmatpush3.msra.mxu0 %v1320_v26 }
 0x44d   :  { %9655 = vmatprep.subr.msk.mxu0 %vm1153_vm3, %v11899_v30 }
 0x479   :  { %v9587_v35 = vpop.f32.mrf.mxu1 }
 0x47a   :  { %v11905_v38 = vmul.f32 0.35355338, %v9587_v35 }
 0x47b   :  { %v993_v36 = vpop.f32.mrf.mxu1 }
 0x47c   :  { %v11903_v37 = vmul.f32 0.35355338, %v993_v36 }
 0x47d   :  { %v9590_v39 = vpop.f32.mrf.mxu1 }
 0x47e   :  { %9627 = vmatprep.mubr.msk.f32.mxu1 %vm1153_vm3, %v11903_v37  ;;  %v11913_v42 = vmul.f32 0.35355338, %v9590_v39 }
 0x47f   :  { %v1003_v40 = vpop.f32.mrf.mxu1  ;;  %9628 = vmatmul.mubr.msk.f32.vlgmr.msra.gmra.mxu1 %vm1153_vm3, %v11905_v38 }
 0x480   :  { %v11911_v41 = vmul.f32 0.35355338, %v1003_v40 }
 0x482   :  { %9630 = vmatprep.mubr.msk.f32.mxu1 %vm1153_vm3, %v11911_v41 }
 0x483   :  { %9631 = vmatmul.mubr.msk.f32.gmra.mxu1 %vm1153_vm3, %v11913_v42 }
 0x53f   :  { %v9629_v44 = vpop.f32.mrf.mxu1 }
 0x540   :  { %v1262_v46 = vadd.f32 %v9629_v44, %v11920_v43 }
 0x541   :  { %v1256_v47 = vpop.f32.mrf.mxu1 }
 0x542   :  { %v1257_v49 = vadd.f32 %v1256_v47, %v11923_v45  ;;  %v1278_v50 = vsel %vm470_vm0, %v1262_v46, -inf }
 0x543   :  { %1279 = vmax.xlane.f32.xlu1 %v1278_v50  ;;  %v9632_v51 = vpop.f32.mrf.mxu1 }
 0x544   :  { %v1272_v52 = vadd.f32 %v9632_v51, %v11927_v48  ;;  %v1275_v53 = vsel %vm470_vm0, %v1257_v49, -inf }
 0x545   :  { %1276 = vmax.xlane.f32.xlu0 %v1275_v53  ;;  %v1266_v54 = vpop.f32.mrf.mxu1 }
 0x546   :  { %v1267_v56 = vadd.f32 %v1266_v54, %v11934_v55  ;;  %v1284_v57 = vsel %vm470_vm0, %v1272_v52, -inf }
 0x548   :  { %v1281_v58 = vsel %vm470_vm0, %v1267_v56, -inf }
 0x549   :  { %1285 = vmax.xlane.f32.xlu0 %v1284_v57 }
 0x54d   :  { %1282 = vmax.xlane.f32.xlu0 %v1281_v58 }
 0x554   :  { %1460 = vrot.lane.b32.xlu1 %v11863_v24, %s11352_s10 }
 0x558   :  { %1456 = vrot.lane.b32.xlu1 %v11851_v22, %s11352_s10 }
 0x563   :  { %1458 = vrot.lane.b32.xlu0 %v11849_v21, %s11352_s10 }
 0x5cc   :  { %v1280_v59 = vpop.xlane.xlu1 %1279 }
 0x5cd   :  { %v1288_v60 = vsub.f32 %v1262_v46, %v1280_v59 }
 0x5ce   :  { %v1277_v62 = vpop.xlane.xlu0 %1276 }
 0x5cf   :  { %v1293_v63 = vmul.f32 1.442695, %v1288_v60  ;;  %v1287_v1 = vsub.f32 %v1257_v49, %v1277_v62 }
 0x5d0   :  { %v1461_v33 = vpop.permute.xlu1 %1460 }
 0x5d1   :  { %10638 = vpow2.f32 %v1293_v63  ;;  %v1291_v2 = vmul.f32 1.442695, %v1287_v1  ;;  %v1145_v1 = vld [vmem:[%s13460_s30] sm:$0xff] }
 0x5d2   :  { %v1286_v8 = vpop.xlane.xlu0 %1285 }
 0x5d3   :  { %10640 = vpow2.f32 %v1291_v2  ;;  %v1290_v14 = vsub.f32 %v1272_v52, %v1286_v8 }
 0x5d4   :  { %v1457_v35 = vpop.permute.xlu1 %1456 }
 0x5d5   :  { %v1297_v26 = vmul.f32 1.442695, %v1290_v14 }
 0x5d6   :  { %v1283_v10 = vpop.xlane.xlu0 %1282 }
 0x5d7   :  { %v1289_v12 = vsub.f32 %v1267_v56, %v1283_v10 }
 0x5d9   :  { %v1295_v25 = vmul.f32 1.442695, %v1289_v12 }
 0x5da   :  { %v1459_v34 = vpop.permute.xlu0 %1458 }
 0x5db   :  { %10642 = vpow2.f32 %v1295_v25 }
 0x5dc   :  { %10644 = vpow2.f32 %v1297_v26 }
 0x5de   :  { %v10639_v3 = vpop.eup %10638 }
 0x5df   :  { %v1302_v4 = vsel %vm470_vm0, %v10639_v3, 0.0 }
 0x5e0   :  { %v10641_v5 = vpop.eup %10640  ;;  %1303 = vadd.xlane.f32.xlu0 %v1302_v4 }
 0x5e1   :  { %v1299_v7 = vsel %vm470_vm0, %v10641_v5, 0.0 }
 0x5e2   :  { %1300 = vadd.xlane.f32.xlu1 %v1299_v7 }
 0x5e8   :  { %v10643_v27 = vpop.eup %10642 }
 0x5e9   :  { %v10645_v28 = vpop.eup %10644  ;;  %v1305_v29 = vsel %vm470_vm0, %v10643_v27, 0.0 }
 0x5ea   :  { %v1308_v31 = vsel %vm470_vm0, %v10645_v28, 0.0 }
 0x5f3   :  { %1452 = vrot.lane.b32.xlu1 %v11845_v20, %s11352_s10 }
 0x5f6   :  { %1454 = vrot.lane.b32.xlu0 %v11837_v19, %s11352_s10 }
 0x615   :  { %1306 = vadd.xlane.f32.xlu0 %v1305_v29 }
 0x617   :  { %1309 = vadd.xlane.f32.xlu1 %v1308_v31 }
 0x628   :  { %1448 = vrot.lane.b32.xlu1 %v11827_v16, %s11352_s10 }
 0x62b   :  { %1450 = vrot.lane.b32.xlu0 %v11817_v13, %s11352_s10 }
 0x62c   :  { %1442 = vrot.lane.b32.xlu1 %v11905_v38, %s11352_s10 }
 0x62f   :  { %1440 = vrot.lane.b32.xlu0 %v11903_v37, %s11352_s10 }
 0x630   :  { %1446 = vrot.lane.b32.xlu1 %v11913_v42, %s11352_s10 }
 0x633   :  { %1444 = vrot.lane.b32.xlu0 %v11911_v41, %s11352_s10 }
 0x637   :  { %1629 = vrot.lane.b32.xlu0 %v11863_v24, %s11353_s6 }
 0x669   :  { %v1304_v36 = vpop.xlane.xlu0 %1303 }
 0x66a   :  { %10646 = vrcp.f32 %v1304_v36 }
 0x66b   :  { %v1301_v39 = vpop.xlane.xlu1 %1300 }
 0x66c   :  { %10648 = vrcp.f32 %v1301_v39 }
 0x66d   :  { %v1455_v49 = vpop.permute.xlu0 %1454 }
 0x66f   :  { %v1453_v50 = vpop.permute.xlu1 %1452 }
 0x677   :  { %v10647_v40 = vpop.eup %10646 }
 0x678   :  { %v1316_v47 = vmul.f32 %v10647_v40, %v10639_v3 }
 0x679   :  { %v10649_v44 = vpop.eup %10648 }
 0x67a   :  { %v1315_v46 = vmul.f32 %v10649_v44, %v10641_v5 }
 0x67c   :  { %9649 = vmatprep.mubr.msk.f32.mxu0 %vm470_vm0, %v1315_v46 }
 0x67d   :  { %9650 = vmatmul.mubr.msk.f32.vlgmr.msra.gmra.mxu0 %vm470_vm0, %v1316_v47 }
 0x67e   :  { %9656 = vmatpush3.xpose.msk.msra.mxu0 %vm1153_vm3, %v11899_v30 }
 0x67f   :  { %9657 = vmatprep.subr.msk.mxu0 %vm1153_vm3, %v1461_v33 }
 0x682   :  { %9658 = vmatpush3.xpose.msk.msra.mxu0 %vm1153_vm3, %v1461_v33 }
 0x683   :  { %9659 = vmatprep.subr.msk.mxu0 %vm1153_vm3, %v1459_v34 }
 0x686   :  { %9660 = vmatpush3.xpose.msk.msra.mxu0 %vm1153_vm3, %v1459_v34 }
 0x687   :  { %9661 = vmatprep.subr.msk.mxu0 %vm1153_vm3, %v1457_v35 }
 0x68a   :  { %9662 = vmatpush3.xpose.msk.msra.mxu0 %vm1153_vm3, %v1457_v35 }
 0x68b   :  { %9663 = vmatprep.subr.msk.mxu0 %vm1153_vm3, %v1455_v49 }
 0x68e   :  { %9664 = vmatpush3.xpose.msk.msra.mxu0 %vm1153_vm3, %v1455_v49 }
 0x68f   :  { %9665 = vmatprep.subr.msk.mxu0 %vm1153_vm3, %v1453_v50 }
 0x692   :  { %9666 = vmatpush3.xpose.msk.msra.mxu0 %vm1153_vm3, %v1453_v50 }
 0x69e   :  { %v1307_v30 = vpop.xlane.xlu0 %1306 }
 0x69f   :  { %10650 = vrcp.f32 %v1307_v30 }
 0x6a0   :  { %v1310_v51 = vpop.xlane.xlu1 %1309 }
 0x6a1   :  { %10652 = vrcp.f32 %v1310_v51 }
 0x6a2   :  { %v1451_v52 = vpop.permute.xlu0 %1450 }
 0x6a3   :  { %9667 = vmatprep.subr.msk.mxu0 %vm1153_vm3, %v1451_v52 }
 0x6a4   :  { %v1449_v53 = vpop.permute.xlu1 %1448  ;;  %9668 = vmatpush3.xpose.msk.msra.mxu0 %vm1153_vm3, %v1451_v52 }
 0x6a5   :  { %9669 = vmatprep.subr.msk.mxu0 %vm1153_vm3, %v1449_v53 }
 0x6a6   :  { %v1441_v58 = vpop.permute.xlu0 %1440 }
 0x6a8   :  { %9670 = vmatpush3.xpose.msk.msra.mxu0 %vm1153_vm3, %v1449_v53  ;;  %v1443_v60 = vpop.permute.xlu1 %1442 }
 0x6a9   :  { %9707 = vmatprep.subr.mxu0 %v1145_v1 }
 0x6aa   :  { %v1445_v62 = vpop.permute.xlu0 %1444 }
 0x6ac   :  { %v10651_v54 = vpop.eup %10650  ;;  %v1447_v63 = vpop.permute.xlu1 %1446 }
 0x6ad   :  { %v1317_v56 = vmul.f32 %v10651_v54, %v10643_v27 }
 0x6ae   :  { %v10653_v57 = vpop.eup %10652  ;;  %v1630_v34 = vpop.permute.xlu0 %1629 }
 0x6af   :  { %9652 = vmatprep.mubr.msk.f32.mxu0 %vm470_vm0, %v1317_v56  ;;  %v1318_v59 = vmul.f32 %v10653_v57, %v10645_v28 }
 0x6b1   :  { %9653 = vmatmul.mubr.msk.f32.gmra.mxu0 %vm470_vm0, %v1318_v59 }
 0x6b2   :  { %9671 = vmatprep.mubr.msk.f32.mxu0 %vm1153_vm3, %v1441_v58 }
 0x6b5   :  { %9672 = vmatmul.mubr.msk.f32.vlgmr.msra.gmra.mxu0 %vm1153_vm3, %v1443_v60 }
 0x6b6   :  { %9674 = vmatprep.mubr.msk.f32.mxu0 %vm1153_vm3, %v1445_v62  ;;  %9708 = vmatpush3.msra.mxu0 %v1145_v1 }
 0x6b9   :  { %9675 = vmatmul.mubr.msk.f32.gmra.mxu0 %vm1153_vm3, %v1447_v63 }
 0x73d   :  { %v9651_v2 = vpop.f32.mrf.mxu0 }
 0x73f   :  { %v1421_v3 = vpop.f32.mrf.mxu0 }
 0x740   :  { %9709 = vmatprep.mubr.msk.f32.mxu0 %vm1153_vm3, %v1421_v3 }
 0x741   :  { %9710 = vmatmul.mubr.msk.f32.vlgmr.msra.gmra.mxu0 %vm1153_vm3, %v9651_v2 }
 0x771   :  { %v9654_v4 = vpop.f32.mrf.mxu0 }
 0x773   :  { %v1431_v5 = vpop.f32.mrf.mxu0 }
 0x774   :  { %9712 = vmatprep.mubr.msk.f32.mxu0 %vm1153_vm3, %v1431_v5 }
 0x775   :  { %v9673_v7 = vpop.f32.mrf.mxu0  ;;  %9713 = vmatmul.mubr.msk.f32.gmra.mxu0 %vm1153_vm3, %v9654_v4 }
 0x776   :  { %v1560_v8 = vadd.f32 %v9673_v7, %v11920_v43 }
 0x777   :  { %v1554_v10 = vpop.f32.mrf.mxu0 }
 0x778   :  { %v1555_v12 = vadd.f32 %v1554_v10, %v11923_v45  ;;  %v1576_v14 = vsel %vm470_vm0, %v1560_v8, -inf }
 0x779   :  { %1577 = vmax.xlane.f32.xlu1 %v1576_v14  ;;  %v9676_v25 = vpop.f32.mrf.mxu0 }
 0x77a   :  { %v1570_v26 = vadd.f32 %v9676_v25, %v11927_v48  ;;  %v1573_v27 = vsel %vm470_vm0, %v1555_v12, -inf }
 0x77b   :  { %1574 = vmax.xlane.f32.xlu0 %v1573_v27  ;;  %v1564_v28 = vpop.f32.mrf.mxu0 }
 0x77c   :  { %v1565_v29 = vadd.f32 %v1564_v28, %v11934_v55  ;;  %v1582_v31 = vsel %vm470_vm0, %v1570_v26, -inf }
 0x77e   :  { %v1579_v33 = vsel %vm470_vm0, %v1565_v29, -inf }
 0x77f   :  { %1583 = vmax.xlane.f32.xlu0 %v1582_v31 }
 0x783   :  { %1580 = vmax.xlane.f32.xlu0 %v1579_v33 }
 0x78a   :  { %1631 = vrot.lane.b32.xlu1 %v11855_v23, %s11353_s6 }
 0x78e   :  { %1627 = vrot.lane.b32.xlu1 %v11849_v21, %s11353_s6 }
 0x792   :  { %1625 = vrot.lane.b32.xlu1 %v11851_v22, %s11353_s6 }
 0x799   :  { %1623 = vrot.lane.b32.xlu0 %v11837_v19, %s11353_s6 }
 0x802   :  { %v1578_v35 = vpop.xlane.xlu1 %1577 }
 0x803   :  { %v1586_v36 = vsub.f32 %v1560_v8, %v1578_v35 }
 0x804   :  { %v1575_v39 = vpop.xlane.xlu0 %1574 }
 0x805   :  { %v1591_v40 = vmul.f32 1.442695, %v1586_v36  ;;  %v1585_v44 = vsub.f32 %v1555_v12, %v1575_v39  ;;  %v1146_v12 = vld [vmem:[%s13460_s30 + $0x8] sm:$0xff] }
 0x806   :  { %v1632_v46 = vpop.permute.xlu1 %1631 }
 0x807   :  { %10654 = vpow2.f32 %v1591_v40  ;;  %v1589_v47 = vmul.f32 1.442695, %v1585_v44  ;;  %9677 = vmatprep.subr.mxu1 %v1632_v46 }
 0x808   :  { %9678 = vmatpush3.msra.mxu1 %v1632_v46  ;;  %v1584_v49 = vpop.xlane.xlu0 %1583 }
 0x809   :  { %10656 = vpow2.f32 %v1589_v47  ;;  %9679 = vmatprep.subr.mxu1 %v1630_v34  ;;  %v1588_v59 = vsub.f32 %v1570_v26, %v1584_v49 }
 0x80a   :  { %v1628_v50 = vpop.permute.xlu1 %1627  ;;  %9680 = vmatpush3.msra.mxu1 %v1630_v34 }
 0x80b   :  { %9681 = vmatprep.subr.mxu1 %v1628_v50  ;;  %v1595_v62 = vmul.f32 1.442695, %v1588_v59 }
 0x80c   :  { %9682 = vmatpush3.msra.mxu1 %v1628_v50  ;;  %v1581_v30 = vpop.xlane.xlu0 %1580 }
 0x80d   :  { %v1587_v58 = vsub.f32 %v1565_v29, %v1581_v30 }
 0x80e   :  { %v1626_v51 = vpop.permute.xlu1 %1625 }
 0x80f   :  { %9683 = vmatprep.subr.mxu1 %v1626_v51  ;;  %v1593_v60 = vmul.f32 1.442695, %v1587_v58 }
 0x810   :  { %9684 = vmatpush3.msra.mxu1 %v1626_v51  ;;  %v1624_v52 = vpop.permute.xlu0 %1623 }
 0x811   :  { %9685 = vmatprep.subr.mxu1 %v1624_v52  ;;  %10658 = vpow2.f32 %v1593_v60 }
 0x812   :  { %9686 = vmatpush3.msra.mxu1 %v1624_v52  ;;  %10660 = vpow2.f32 %v1595_v62 }
 0x814   :  { %v10655_v53 = vpop.eup %10654 }
 0x815   :  { %v1600_v54 = vsel %vm470_vm0, %v10655_v53, 0.0 }
 0x816   :  { %v10657_v56 = vpop.eup %10656  ;;  %1601 = vadd.xlane.f32.xlu0 %v1600_v54 }
 0x817   :  { %v1597_v57 = vsel %vm470_vm0, %v10657_v56, 0.0 }
 0x818   :  { %1598 = vadd.xlane.f32.xlu1 %v1597_v57 }
 0x81e   :  { %v10659_v63 = vpop.eup %10658 }
 0x81f   :  { %v10661_v1 = vpop.eup %10660  ;;  %v1603_v2 = vsel %vm470_vm0, %v10659_v63, 0.0 }
 0x820   :  { %v1606_v3 = vsel %vm470_vm0, %v10661_v1, 0.0 }
 0x829   :  { %1621 = vrot.lane.b32.xlu1 %v11845_v20, %s11353_s6 }
 0x82c   :  { %1619 = vrot.lane.b32.xlu0 %v11817_v13, %s11353_s6 }
 0x830   :  { %1617 = vrot.lane.b32.xlu0 %v11827_v16, %s11353_s6 }
 0x84d   :  { %1604 = vadd.xlane.f32.xlu1 %v1603_v2 }
 0x84f   :  { %1607 = vadd.xlane.f32.xlu0 %v1606_v3 }
 0x85e   :  { %1954 = vrot.lane.b32.xlu1 %v11855_v23, %s11354_s15 }
 0x862   :  { %1950 = vrot.lane.b32.xlu1 %v11849_v21, %s11354_s15 }
 0x865   :  { %1952 = vrot.lane.b32.xlu0 %v11863_v24, %s11354_s15 }
 0x866   :  { %1948 = vrot.lane.b32.xlu1 %v11851_v22, %s11354_s15 }
 0x869   :  { %1946 = vrot.lane.b32.xlu0 %v11837_v19, %s11354_s15 }
 0x86a   :  { %1944 = vrot.lane.b32.xlu1 %v11845_v20, %s11354_s15 }
 0x86d   :  { %1942 = vrot.lane.b32.xlu0 %v11817_v13, %s11354_s15 }
 0x86e   :  { %1940 = vrot.lane.b32.xlu1 %v11827_v16, %s11354_s15 }
 0x871   :  { %1932 = vrot.lane.b32.xlu0 %v11903_v37, %s11354_s15 }
 0x872   :  { %1934 = vrot.lane.b32.xlu1 %v11905_v38, %s11354_s15 }
 0x875   :  { %1936 = vrot.lane.b32.xlu0 %v11911_v41, %s11354_s15 }
 0x876   :  { %1938 = vrot.lane.b32.xlu1 %v11913_v42, %s11354_s15 }
 0x879   :  { %2121 = vrot.lane.b32.xlu0 %v11863_v24, %s11355_s14 }
 0x89f   :  { %v1602_v4 = vpop.xlane.xlu0 %1601 }
 0x8a0   :  { %10662 = vrcp.f32 %v1602_v4 }
 0x8a1   :  { %v1599_v5 = vpop.xlane.xlu1 %1598 }
 0x8a2   :  { %10664 = vrcp.f32 %v1599_v5 }
 0x8a3   :  { %v1620_v7 = vpop.permute.xlu0 %1619 }
 0x8a5   :  { %v1622_v8 = vpop.permute.xlu1 %1621 }
 0x8a6   :  { %9687 = vmatprep.subr.mxu1 %v1622_v8 }
 0x8a7   :  { %9688 = vmatpush3.msra.mxu1 %v1622_v8  ;;  %v1618_v10 = vpop.permute.xlu0 %1617 }
 0x8a8   :  { %9689 = vmatprep.subr.mxu1 %v1620_v7 }
 0x8a9   :  { %9690 = vmatpush3.msra.mxu1 %v1620_v7 }
 0x8aa   :  { %9691 = vmatprep.subr.mxu1 %v1618_v10 }
 0x8ab   :  { %9692 = vmatpush3.msra.mxu1 %v1618_v10 }
 0x8ac   :  { %9699 = vmatprep.subr.mxu1 %v1146_v12 }
 0x8ad   :  { %v10663_v14 = vpop.eup %10662 }
 0x8ae   :  { %v1614_v27 = vmul.f32 %v10663_v14, %v10655_v53 }
 0x8af   :  { %v10665_v25 = vpop.eup %10664 }
 0x8b0   :  { %v1613_v26 = vmul.f32 %v10665_v25, %v10657_v56 }
 0x8b2   :  { %9693 = vmatprep.mubr.msk.f32.mxu1 %vm470_vm0, %v1613_v26 }
 0x8b3   :  { %9694 = vmatmul.mubr.msk.f32.vlgmr.msra.gmra.mxu1 %vm470_vm0, %v1614_v27 }
 0x8b4   :  { %9700 = vmatpush3.msra.mxu1 %v1146_v12 }
 0x8d6   :  { %v1605_v28 = vpop.xlane.xlu1 %1604 }
 0x8d7   :  { %10666 = vrcp.f32 %v1605_v28 }
 0x8d8   :  { %v1608_v29 = vpop.xlane.xlu0 %1607 }
 0x8d9   :  { %10668 = vrcp.f32 %v1608_v29 }
 0x8da   :  { %v1955_v31 = vpop.permute.xlu1 %1954 }
 0x8db   :  { %9715 = vmatprep.subr.msk.mxu1 %vm1153_vm3, %v1955_v31 }
 0x8dc   :  { %v1953_v44 = vpop.permute.xlu0 %1952 }
 0x8de   :  { %v1951_v46 = vpop.permute.xlu1 %1950 }
 0x8e0   :  { %v1947_v49 = vpop.permute.xlu0 %1946 }
 0x8e2   :  { %v1949_v47 = vpop.permute.xlu1 %1948 }
 0x8e4   :  { %v10667_v33 = vpop.eup %10666  ;;  %v1943_v30 = vpop.permute.xlu0 %1942 }
 0x8e5   :  { %v1615_v34 = vmul.f32 %v10667_v33, %v10659_v63 }
 0x8e6   :  { %v10669_v35 = vpop.eup %10668  ;;  %v1945_v50 = vpop.permute.xlu1 %1944 }
 0x8e7   :  { %9696 = vmatprep.mubr.msk.f32.mxu1 %vm470_vm0, %v1615_v34  ;;  %v1616_v36 = vmul.f32 %v10669_v35, %v10661_v1 }
 0x8e8   :  { %v1933_v53 = vpop.permute.xlu0 %1932 }
 0x8e9   :  { %9697 = vmatmul.mubr.msk.f32.gmra.mxu1 %vm470_vm0, %v1616_v36 }
 0x8ea   :  { %v1941_v51 = vpop.permute.xlu1 %1940 }
 0x8ec   :  { %v1937_v57 = vpop.permute.xlu0 %1936 }
 0x8ee   :  { %v1935_v56 = vpop.permute.xlu1 %1934 }
 0x8f0   :  { %v2122_v27 = vpop.permute.xlu0 %2121 }
 0x8f2   :  { %v1939_v58 = vpop.permute.xlu1 %1938 }
 0x973   :  { %v9695_v39 = vpop.f32.mrf.mxu1 }
 0x975   :  { %v1719_v40 = vpop.f32.mrf.mxu1 }
 0x976   :  { %9701 = vmatprep.mubr.msk.f32.mxu1 %vm1153_vm3, %v1719_v40 }
 0x977   :  { %9702 = vmatmul.mubr.msk.f32.vlgmr.msra.gmra.mxu1 %vm1153_vm3, %v9695_v39 }
 0x978   :  { %9716 = vmatpush3.xpose.msk.msra.mxu1 %vm1153_vm3, %v1955_v31 }
 0x979   :  { %9717 = vmatprep.subr.msk.mxu1 %vm1153_vm3, %v1953_v44 }
 0x97c   :  { %9718 = vmatpush3.xpose.msk.msra.mxu1 %vm1153_vm3, %v1953_v44 }
 0x97d   :  { %9719 = vmatprep.subr.msk.mxu1 %vm1153_vm3, %v1951_v46 }
 0x980   :  { %9720 = vmatpush3.xpose.msk.msra.mxu1 %vm1153_vm3, %v1951_v46 }
 0x981   :  { %9721 = vmatprep.subr.msk.mxu1 %vm1153_vm3, %v1949_v47 }
 0x984   :  { %9722 = vmatpush3.xpose.msk.msra.mxu1 %vm1153_vm3, %v1949_v47 }
 0x985   :  { %9723 = vmatprep.subr.msk.mxu1 %vm1153_vm3, %v1947_v49 }
 0x988   :  { %9724 = vmatpush3.xpose.msk.msra.mxu1 %vm1153_vm3, %v1947_v49 }
 0x989   :  { %9725 = vmatprep.subr.msk.mxu1 %vm1153_vm3, %v1945_v50 }
 0x98c   :  { %9726 = vmatpush3.xpose.msk.msra.mxu1 %vm1153_vm3, %v1945_v50 }
 0x98d   :  { %9727 = vmatprep.subr.msk.mxu1 %vm1153_vm3, %v1943_v30 }
 0x990   :  { %9728 = vmatpush3.xpose.msk.msra.mxu1 %vm1153_vm3, %v1943_v30 }
 0x991   :  { %9729 = vmatprep.subr.msk.mxu1 %vm1153_vm3, %v1941_v51 }
 0x994   :  { %9730 = vmatpush3.xpose.msk.msra.mxu1 %vm1153_vm3, %v1941_v51 }
 0x9a9   :  { %v9698_v52 = vpop.f32.mrf.mxu1 }
 0x9ab   :  { %v1729_v54 = vpop.f32.mrf.mxu1 }
 0x9ac   :  { %9704 = vmatprep.mubr.msk.f32.mxu1 %vm1153_vm3, %v1729_v54 }
 0x9ad   :  { %9705 = vmatmul.mubr.msk.f32.gmra.mxu1 %vm1153_vm3, %v9698_v52 }
 0x9ae   :  { %9731 = vmatprep.mubr.msk.f32.mxu1 %vm1153_vm3, %v1933_v53 }
 0x9b1   :  { %9732 = vmatmul.mubr.msk.f32.vlgmr.msra.gmra.mxu1 %vm1153_vm3, %v1935_v56 }
 0x9b2   :  { %9734 = vmatprep.mubr.msk.f32.mxu1 %vm1153_vm3, %v1937_v57 }
 0x9b5   :  { %9735 = vmatmul.mubr.msk.f32.gmra.mxu1 %vm1153_vm3, %v1939_v58 }
 0xa37   :  { %v12077_v59 = vpop.f32.mrf.mxu1 }
 0xa39   :  { %v12079_v60 = vpop.f32.mrf.mxu1 }
 0xa6d   :  { %v12081_v62 = vpop.f32.mrf.mxu1 }
 0xa6f   :  { %v12083_v63 = vpop.f32.mrf.mxu1 }
 0xa71   :  { %v9733_v1 = vpop.f32.mrf.mxu1 }
 0xa72   :  { %v2052_v2 = vadd.f32 %v9733_v1, %v11920_v43 }
 0xa73   :  { %v2046_v3 = vpop.f32.mrf.mxu1 }
 0xa74   :  { %v2047_v4 = vadd.f32 %v2046_v3, %v11923_v45  ;;  %v2068_v5 = vsel %vm470_vm0, %v2052_v2, -inf }
 0xa75   :  { %2069 = vmax.xlane.f32.xlu1 %v2068_v5  ;;  %v9736_v7 = vpop.f32.mrf.mxu1 }
 0xa76   :  { %v2062_v8 = vadd.f32 %v9736_v7, %v11927_v48  ;;  %v2065_v10 = vsel %vm470_vm0, %v2047_v4, -inf }
 0xa77   :  { %2066 = vmax.xlane.f32.xlu0 %v2065_v10  ;;  %v2056_v12 = vpop.f32.mrf.mxu1 }
 0xa78   :  { %v2057_v14 = vadd.f32 %v2056_v12, %v11934_v55  ;;  %v2074_v25 = vsel %vm470_vm0, %v2062_v8, -inf }
 0xa7a   :  { %v2071_v26 = vsel %vm470_vm0, %v2057_v14, -inf }
 0xa7b   :  { %2075 = vmax.xlane.f32.xlu0 %v2074_v25 }
 0xa7f   :  { %2072 = vmax.xlane.f32.xlu0 %v2071_v26 }
 0xa86   :  { %2123 = vrot.lane.b32.xlu1 %v11855_v23, %s11355_s14 }
 0xa8a   :  { %2119 = vrot.lane.b32.xlu1 %v11849_v21, %s11355_s14 }
 0xa8e   :  { %2117 = vrot.lane.b32.xlu1 %v11851_v22, %s11355_s14 }
 0xa95   :  { %2115 = vrot.lane.b32.xlu0 %v11837_v19, %s11355_s14 }
 0xafe   :  { %v2070_v28 = vpop.xlane.xlu1 %2069 }
 0xaff   :  { %v2078_v29 = vsub.f32 %v2052_v2, %v2070_v28 }
 0xb00   :  { %v2067_v31 = vpop.xlane.xlu0 %2066 }
 0xb01   :  { %v2083_v33 = vmul.f32 1.442695, %v2078_v29  ;;  %v2077_v34 = vsub.f32 %v2047_v4, %v2067_v31  ;;  %v9711_v31 = vpop.f32.mrf.mxu0 }
 0xb02   :  { %v2124_v35 = vpop.permute.xlu1 %2123 }
 0xb03   :  { %10670 = vpow2.f32 %v2083_v33  ;;  %v2081_v36 = vmul.f32 1.442695, %v2077_v34  ;;  %9737 = vmatprep.subr.mxu0 %v2124_v35  ;;  %v1913_v33 = vpop.f32.mrf.mxu0 }
 0xb04   :  { %9738 = vmatpush3.msra.mxu0 %v2124_v35  ;;  %v2076_v39 = vpop.xlane.xlu0 %2075 }
 0xb05   :  { %10672 = vpow2.f32 %v2081_v36  ;;  %9739 = vmatprep.subr.mxu0 %v2122_v27  ;;  %v2080_v53 = vsub.f32 %v2062_v8, %v2076_v39  ;;  %v9714_v34 = vpop.f32.mrf.mxu0 }
 0xb06   :  { %v2120_v40 = vpop.permute.xlu1 %2119  ;;  %9740 = vmatpush3.msra.mxu0 %v2122_v27 }
 0xb07   :  { %9741 = vmatprep.subr.mxu0 %v2120_v40  ;;  %v2087_v56 = vmul.f32 1.442695, %v2080_v53  ;;  %v1923_v35 = vpop.f32.mrf.mxu0 }
 0xb08   :  { %9742 = vmatpush3.msra.mxu0 %v2120_v40  ;;  %v2073_v44 = vpop.xlane.xlu0 %2072 }
 0xb09   :  { %v2079_v52 = vsub.f32 %v2057_v14, %v2073_v44 }
 0xb0a   :  { %v2118_v46 = vpop.permute.xlu1 %2117 }
 0xb0b   :  { %9743 = vmatprep.subr.mxu0 %v2118_v46  ;;  %v2085_v54 = vmul.f32 1.442695, %v2079_v52 }
 0xb0c   :  { %9744 = vmatpush3.msra.mxu0 %v2118_v46  ;;  %v2116_v47 = vpop.permute.xlu0 %2115 }
 0xb0d   :  { %9745 = vmatprep.subr.mxu0 %v2116_v47  ;;  %10674 = vpow2.f32 %v2085_v54 }
 0xb0e   :  { %9746 = vmatpush3.msra.mxu0 %v2116_v47  ;;  %10676 = vpow2.f32 %v2087_v56 }
 0xb10   :  { %v10671_v49 = vpop.eup %10670 }
 0xb11   :  { %v2092_v50 = vsel %vm470_vm0, %v10671_v49, 0.0 }
 0xb12   :  { %v10673_v30 = vpop.eup %10672  ;;  %2093 = vadd.xlane.f32.xlu0 %v2092_v50 }
 0xb13   :  { %v2089_v51 = vsel %vm470_vm0, %v10673_v30, 0.0 }
 0xb14   :  { %2090 = vadd.xlane.f32.xlu1 %v2089_v51 }
 0xb1a   :  { %v10675_v57 = vpop.eup %10674 }
 0xb1b   :  { %v10677_v58 = vpop.eup %10676  ;;  %v2095_v1 = vsel %vm470_vm0, %v10675_v57, 0.0 }
 0xb1c   :  { %v2098_v2 = vsel %vm470_vm0, %v10677_v58, 0.0 }
 0xb25   :  { %2113 = vrot.lane.b32.xlu1 %v11845_v20, %s11355_s14 }
 0xb28   :  { %2111 = vrot.lane.b32.xlu0 %v11817_v13, %s11355_s14 }
 0xb2c   :  { %2109 = vrot.lane.b32.xlu0 %v11827_v16, %s11355_s14 }
 0xb49   :  { %2096 = vadd.xlane.f32.xlu1 %v2095_v1 }
 0xb4b   :  { %2099 = vadd.xlane.f32.xlu0 %v2098_v2  ;;  %v1914_v2 = vadd.f32 %v1913_v33, %v12079_v60 }
 0xb5a   :  { %2353 = vrot.lane.b32.xlu1 %v11855_v23, %s11356_s5 }
 0xb5e   :  { %2349 = vrot.lane.b32.xlu1 %v11849_v21, %s11356_s5 }
 0xb61   :  { %2351 = vrot.lane.b32.xlu0 %v11863_v24, %s11356_s5 }
 0xb62   :  { %2347 = vrot.lane.b32.xlu1 %v11851_v22, %s11356_s5 }
 0xb65   :  { %2345 = vrot.lane.b32.xlu0 %v11837_v19, %s11356_s5 }
 0xb66   :  { %2343 = vrot.lane.b32.xlu1 %v11845_v20, %s11356_s5 }
 0xb69   :  { %2341 = vrot.lane.b32.xlu0 %v11817_v13, %s11356_s5 }
 0xb6a   :  { %2339 = vrot.lane.b32.xlu1 %v11827_v16, %s11356_s5 }
 0xb6d   :  { %2331 = vrot.lane.b32.xlu0 %v11903_v37, %s11356_s5  ;;  %v1147_v37 = vld [vmem:[%s13460_s30 + $0x10] sm:$0xff] }
 0xb6e   :  { %2333 = vrot.lane.b32.xlu1 %v11905_v38, %s11356_s5 }
 0xb71   :  { %2335 = vrot.lane.b32.xlu0 %v11911_v41, %s11356_s5 }
 0xb72   :  { %2337 = vrot.lane.b32.xlu1 %v11913_v42, %s11356_s5 }
 0xb9b   :  { %v2094_v3 = vpop.xlane.xlu0 %2093 }
 0xb9c   :  { %10678 = vrcp.f32 %v2094_v3 }
 0xb9d   :  { %v2091_v4 = vpop.xlane.xlu1 %2090 }
 0xb9e   :  { %10680 = vrcp.f32 %v2091_v4 }
 0xb9f   :  { %v2112_v5 = vpop.permute.xlu0 %2111 }
 0xba1   :  { %v2114_v7 = vpop.permute.xlu1 %2113 }
 0xba2   :  { %9747 = vmatprep.subr.mxu0 %v2114_v7 }
 0xba3   :  { %9748 = vmatpush3.msra.mxu0 %v2114_v7  ;;  %v2110_v8 = vpop.permute.xlu0 %2109  ;;  %v1929_v7 = vadd.f32 %v9714_v34, %v12081_v62 }
 0xba4   :  { %9749 = vmatprep.subr.mxu0 %v2112_v5 }
 0xba5   :  { %9750 = vmatpush3.msra.mxu0 %v2112_v5 }
 0xba6   :  { %9751 = vmatprep.subr.mxu0 %v2110_v8 }
 0xba7   :  { %9752 = vmatpush3.msra.mxu0 %v2110_v8 }
 0xba8   :  { %9759 = vmatprep.subr.mxu0 %v1147_v37 }
 0xba9   :  { %v10679_v38 = vpop.eup %10678 }
 0xbaa   :  { %v2106_v12 = vmul.f32 %v10679_v38, %v10671_v49 }
 0xbab   :  { %v10681_v41 = vpop.eup %10680 }
 0xbac   :  { %v2105_v10 = vmul.f32 %v10681_v41, %v10673_v30 }
 0xbae   :  { %9753 = vmatprep.mubr.msk.f32.mxu0 %vm470_vm0, %v2105_v10 }
 0xbaf   :  { %9754 = vmatmul.mubr.msk.f32.vlgmr.msra.gmra.mxu0 %vm470_vm0, %v2106_v12 }
 0xbb0   :  { %9760 = vmatpush3.msra.mxu0 %v1147_v37  ;;  %v1924_v37 = vadd.f32 %v1923_v35, %v12083_v63 }
 0xbd2   :  { %v2097_v42 = vpop.xlane.xlu1 %2096 }
 0xbd3   :  { %10682 = vrcp.f32 %v2097_v42 }
 0xbd4   :  { %v2100_v14 = vpop.xlane.xlu0 %2099 }
 0xbd5   :  { %10684 = vrcp.f32 %v2100_v14 }
 0xbd6   :  { %v2354_v25 = vpop.permute.xlu1 %2353 }
 0xbd7   :  { %9767 = vmatprep.subr.msk.mxu0 %vm1153_vm3, %v2354_v25 }
 0xbd8   :  { %v2352_v40 = vpop.permute.xlu0 %2351 }
 0xbda   :  { %v2350_v44 = vpop.permute.xlu1 %2349 }
 0xbdc   :  { %v2346_v47 = vpop.permute.xlu0 %2345 }
 0xbde   :  { %v2348_v46 = vpop.permute.xlu1 %2347 }
 0xbe0   :  { %v10683_v26 = vpop.eup %10682  ;;  %v2342_v50 = vpop.permute.xlu0 %2341 }
 0xbe1   :  { %v2107_v27 = vmul.f32 %v10683_v26, %v10675_v57 }
 0xbe2   :  { %v10685_v28 = vpop.eup %10684  ;;  %v2344_v49 = vpop.permute.xlu1 %2343 }
 0xbe3   :  { %9756 = vmatprep.mubr.msk.f32.mxu0 %vm470_vm0, %v2107_v27  ;;  %v2108_v29 = vmul.f32 %v10685_v28, %v10677_v58  ;;  %v1919_v58 = vadd.f32 %v9711_v31, %v12077_v59 }
 0xbe4   :  { %v2332_v52 = vpop.permute.xlu0 %2331 }
 0xbe5   :  { %9757 = vmatmul.mubr.msk.f32.gmra.mxu0 %vm470_vm0, %v2108_v29 }
 0xbe6   :  { %v2340_v30 = vpop.permute.xlu1 %2339 }
 0xbe8   :  { %v2336_v56 = vpop.permute.xlu0 %2335 }
 0xbea   :  { %v2334_v54 = vpop.permute.xlu1 %2333 }
 0xbee   :  { %v2338_v57 = vpop.permute.xlu1 %2337 }
 0xc6f   :  { %v9755_v36 = vpop.f32.mrf.mxu0 }
 0xc71   :  { %v2211_v39 = vpop.f32.mrf.mxu0 }
 0xc72   :  { %9761 = vmatprep.mubr.msk.f32.mxu0 %vm1153_vm3, %v2211_v39 }
 0xc73   :  { %9762 = vmatmul.mubr.msk.f32.vlgmr.msra.gmra.mxu0 %vm1153_vm3, %v9755_v36 }
 0xc74   :  { %9768 = vmatpush3.xpose.msk.msra.mxu0 %vm1153_vm3, %v2354_v25 }
 0xc75   :  { %9769 = vmatprep.subr.msk.mxu0 %vm1153_vm3, %v2352_v40 }
 0xc78   :  { %9770 = vmatpush3.xpose.msk.msra.mxu0 %vm1153_vm3, %v2352_v40 }
 0xc79   :  { %9771 = vmatprep.subr.msk.mxu0 %vm1153_vm3, %v2350_v44 }
 0xc7c   :  { %9772 = vmatpush3.xpose.msk.msra.mxu0 %vm1153_vm3, %v2350_v44 }
 0xc7d   :  { %9773 = vmatprep.subr.msk.mxu0 %vm1153_vm3, %v2348_v46 }
 0xc80   :  { %9774 = vmatpush3.xpose.msk.msra.mxu0 %vm1153_vm3, %v2348_v46 }
 0xc81   :  { %9775 = vmatprep.subr.msk.mxu0 %vm1153_vm3, %v2346_v47 }
 0xc84   :  { %9776 = vmatpush3.xpose.msk.msra.mxu0 %vm1153_vm3, %v2346_v47 }
 0xc85   :  { %9777 = vmatprep.subr.msk.mxu0 %vm1153_vm3, %v2344_v49 }
 0xc88   :  { %9778 = vmatpush3.xpose.msk.msra.mxu0 %vm1153_vm3, %v2344_v49 }
 0xc89   :  { %9779 = vmatprep.subr.msk.mxu0 %vm1153_vm3, %v2342_v50 }
 0xc8c   :  { %9780 = vmatpush3.xpose.msk.msra.mxu0 %vm1153_vm3, %v2342_v50 }
 0xc8d   :  { %9781 = vmatprep.subr.msk.mxu0 %vm1153_vm3, %v2340_v30 }
 0xc90   :  { %9782 = vmatpush3.xpose.msk.msra.mxu0 %vm1153_vm3, %v2340_v30 }
 0xca5   :  { %v9758_v51 = vpop.f32.mrf.mxu0 }
 0xca7   :  { %v2221_v53 = vpop.f32.mrf.mxu0 }
 0xca8   :  { %9764 = vmatprep.mubr.msk.f32.mxu0 %vm1153_vm3, %v2221_v53 }
 0xca9   :  { %9765 = vmatmul.mubr.msk.f32.gmra.mxu0 %vm1153_vm3, %v9758_v51 }
 0xcaa   :  { %9783 = vmatprep.mubr.msk.f32.mxu0 %vm1153_vm3, %v2332_v52 }
 0xcad   :  { %9784 = vmatmul.mubr.msk.f32.vlgmr.msra.gmra.mxu0 %vm1153_vm3, %v2334_v54 }
 0xcae   :  { %9786 = vmatprep.mubr.msk.f32.mxu0 %vm1153_vm3, %v2336_v56 }
 0xcb1   :  { %9787 = vmatmul.mubr.msk.f32.gmra.mxu0 %vm1153_vm3, %v2338_v57 }
 0xd33   :  { %v9763_v1 = vpop.f32.mrf.mxu0 }
 0xd34   :  { %v12166_v3 = vadd.f32 %v9763_v1, %v1919_v58 }
 0xd35   :  { %v2308_v4 = vpop.f32.mrf.mxu0 }
 0xd36   :  { %v12168_v5 = vadd.f32 %v2308_v4, %v1914_v2 }
 0xd69   :  { %v9766_v8 = vpop.f32.mrf.mxu0 }
 0xd6a   :  { %v12172_v38 = vadd.f32 %v9766_v8, %v1929_v7  ;;  %v1148_v8 = vld [vmem:[%s13460_s30 + $0x18] sm:$0xff]  ;;  %s13479_s30 = sld [smem:[#allocation70_spill]] }
 0xd6b   :  { %v2318_v41 = vpop.f32.mrf.mxu0 }
 0xd6c   :  { %v12174_v10 = vadd.f32 %v2318_v41, %v1924_v37 }
 0xd6d   :  { %v9785_v12 = vpop.f32.mrf.mxu0 }
 0xd6e   :  { %v2451_v59 = vadd.f32 %v9785_v12, %v11920_v43 }
 0xd6f   :  { %v2445_v42 = vpop.f32.mrf.mxu0 }
 0xd70   :  { %v2446_v60 = vadd.f32 %v2445_v42, %v11923_v45  ;;  %v2467_v14 = vsel %vm470_vm0, %v2451_v59, -inf }
 0xd71   :  { %2468 = vmax.xlane.f32.xlu1 %v2467_v14  ;;  %v9788_v25 = vpop.f32.mrf.mxu0 }
 0xd72   :  { %v2464_v62 = vsel %vm470_vm0, %v2446_v60, -inf  ;;  %v2461_v27 = vadd.f32 %v9788_v25, %v11927_v48 }
 0xd73   :  { %2465 = vmax.xlane.f32.xlu0 %v2464_v62  ;;  %v2455_v26 = vpop.f32.mrf.mxu0 }
 0xd74   :  { %v2456_v63 = vadd.f32 %v2455_v26, %v11934_v55  ;;  %v2473_v43 = vsel %vm470_vm0, %v2461_v27, -inf }
 0xd76   :  { %v2470_v28 = vsel %vm470_vm0, %v2456_v63, -inf }
 0xd77   :  { %2471 = vmax.xlane.f32.xlu0 %v2470_v28 }
 0xd7b   :  { %2474 = vmax.xlane.f32.xlu0 %v2473_v43 }
 0xd82   :  { %2522 = vrot.lane.b32.xlu1 %v11855_v23, %s11357_s27 }
 0xd86   :  { %2518 = vrot.lane.b32.xlu1 %v11849_v21, %s11357_s27 }
 0xd8a   :  { %2516 = vrot.lane.b32.xlu1 %v11851_v22, %s11357_s27 }
 0xd8e   :  { %2512 = vrot.lane.b32.xlu1 %v11845_v20, %s11357_s27 }
 0xd91   :  { %2520 = vrot.lane.b32.xlu0 %v11863_v24, %s11357_s27 }
 0xd95   :  { %2514 = vrot.lane.b32.xlu0 %v11837_v19, %s11357_s27 }
 0xdfa   :  { %v2469_v45 = vpop.xlane.xlu1 %2468 }
 0xdfb   :  { %v2477_v48 = vsub.f32 %v2451_v59, %v2469_v45 }
 0xdfc   :  { %v2466_v55 = vpop.xlane.xlu0 %2465 }
 0xdfd   :  { %v2482_v29 = vmul.f32 1.442695, %v2477_v48  ;;  %v2476_v23 = vsub.f32 %v2446_v60, %v2466_v55 }
 0xdfe   :  { %v2523_v31 = vpop.permute.xlu1 %2522 }
 0xdff   :  { %10686 = vpow2.f32 %v2482_v29  ;;  %v2480_v21 = vmul.f32 1.442695, %v2476_v23  ;;  %9789 = vmatprep.subr.mxu1 %v2523_v31 }
 0xe00   :  { %9790 = vmatpush3.msra.mxu1 %v2523_v31  ;;  %v2472_v22 = vpop.xlane.xlu0 %2471 }
 0xe01   :  { %10688 = vpow2.f32 %v2480_v21  ;;  %v2478_v33 = vsub.f32 %v2456_v63, %v2472_v22 }
 0xe02   :  { %v2519_v34 = vpop.permute.xlu1 %2518 }
 0xe03   :  { %v2484_v20 = vmul.f32 1.442695, %v2478_v33 }
 0xe04   :  { %v2475_v35 = vpop.xlane.xlu0 %2474 }
 0xe05   :  { %10690 = vpow2.f32 %v2484_v20  ;;  %v2479_v24 = vsub.f32 %v2461_v27, %v2475_v35 }
 0xe06   :  { %v2517_v39 = vpop.permute.xlu1 %2516 }
 0xe07   :  { %v2486_v36 = vmul.f32 1.442695, %v2479_v24 }
 0xe08   :  { %v2521_v19 = vpop.permute.xlu0 %2520 }
 0xe09   :  { %10692 = vpow2.f32 %v2486_v36  ;;  %9791 = vmatprep.subr.mxu1 %v2521_v19 }
 0xe0a   :  { %9792 = vmatpush3.msra.mxu1 %v2521_v19  ;;  %v2513_v50 = vpop.permute.xlu1 %2512 }
 0xe0b   :  { %9793 = vmatprep.subr.mxu1 %v2519_v34 }
 0xe0c   :  { %v10687_v40 = vpop.eup %10686  ;;  %9794 = vmatpush3.msra.mxu1 %v2519_v34  ;;  %v2515_v47 = vpop.permute.xlu0 %2514 }
 0xe0d   :  { %9795 = vmatprep.subr.mxu1 %v2517_v39  ;;  %v2491_v44 = vsel %vm470_vm0, %v10687_v40, 0.0 }
 0xe0e   :  { %v10689_v46 = vpop.eup %10688  ;;  %2492 = vadd.xlane.f32.xlu0 %v2491_v44  ;;  %9796 = vmatpush3.msra.mxu1 %v2517_v39 }
 0xe0f   :  { %9797 = vmatprep.subr.mxu1 %v2515_v47  ;;  %v2488_v49 = vsel %vm470_vm0, %v10689_v46, 0.0 }
 0xe10   :  { %2489 = vadd.xlane.f32.xlu1 %v2488_v49  ;;  %9798 = vmatpush3.msra.mxu1 %v2515_v47 }
 0xe11   :  { %9799 = vmatprep.subr.mxu1 %v2513_v50 }
 0xe12   :  { %v10691_v30 = vpop.eup %10690  ;;  %9800 = vmatpush3.msra.mxu1 %v2513_v50 }
 0xe13   :  { %v2494_v51 = vsel %vm470_vm0, %v10691_v30, 0.0 }
 0xe14   :  { %2495 = vadd.xlane.f32.xlu1 %v2494_v51  ;;  %v2811_v51 = vld [vmem:[%s13461_s16 + $0x10] sm:$0xff] }
 0xe16   :  { %v10693_v52 = vpop.eup %10692 }
 0xe17   :  { %v2497_v53 = vsel %vm470_vm0, %v10693_v52, 0.0 }
 0xe18   :  { %2498 = vadd.xlane.f32.xlu0 %v2497_v53  ;;  %v2809_v53 = vld [vmem:[%s13461_s16] sm:$0xff] }
 0xe25   :  { %2508 = vrot.lane.b32.xlu1 %v11827_v16, %s11357_s27 }
 0xe2e   :  { %2510 = vrot.lane.b32.xlu0 %v11817_v13, %s11357_s27 }
 0xe97   :  { %v2493_v54 = vpop.xlane.xlu0 %2492 }
 0xe98   :  { %10694 = vrcp.f32 %v2493_v54  ;;  %v2936_v54 = vld [vmem:[%s13462_s17 + $0x78] sm:$0xff] }
 0xe99   :  { %v2490_v56 = vpop.xlane.xlu1 %2489  ;;  %9833 = vmatprep.subr.mxu0 %v2936_v54 }
 0xe9a   :  { %10696 = vrcp.f32 %v2490_v56  ;;  %v2935_v56 = vld [vmem:[%s13462_s17 + $0x70] sm:$0xff]  ;;  %9834 = vmatpush3.msra.mxu0 %v2936_v54  ;;  %v8724_v54 = vld [vmem:[%s13466_s8] ss:$0 sm:$0xff]  ;;  %s13485_s8 = sld [smem:[#allocation74_spill]] }
 0xe9b   :  { %9835 = vmatprep.subr.mxu0 %v2935_v56 }
 0xe9c   :  { %9836 = vmatpush3.msra.mxu0 %v2935_v56 }
 0xe9d   :  { %v2496_v57 = vpop.xlane.xlu1 %2495 }
 0xe9e   :  { %10698 = vrcp.f32 %v2496_v57  ;;  %v2934_v57 = vld [vmem:[%s13462_s17 + $0x68] sm:$0xff] }
 0xe9f   :  { %9837 = vmatprep.subr.mxu0 %v2934_v57 }
 0xea0   :  { %9838 = vmatpush3.msra.mxu0 %v2934_v57 }
 0xea1   :  { %v2499_v58 = vpop.xlane.xlu0 %2498  ;;  %v2509_v7 = vpop.permute.xlu1 %2508 }
 0xea2   :  { %10700 = vrcp.f32 %v2499_v58  ;;  %v2933_v58 = vld [vmem:[%s13462_s17 + $0x60] sm:$0xff] }
 0xea3   :  { %9839 = vmatprep.subr.mxu0 %v2933_v58 }
 0xea4   :  { %9840 = vmatpush3.msra.mxu0 %v2933_v58 }
 0xea5   :  { %v2511_v1 = vpop.permute.xlu0 %2510  ;;  %v10695_v2 = vpop.eup %10694 }
 0xea6   :  { %9801 = vmatprep.subr.mxu1 %v2511_v1  ;;  %v2505_v37 = vmul.f32 %v10695_v2, %v10687_v40  ;;  %v2931_v2 = vld [vmem:[%s13462_s17 + $0x50] sm:$0xff] }
 0xea7   :  { %v10697_v4 = vpop.eup %10696  ;;  %9802 = vmatpush3.msra.mxu1 %v2511_v1  ;;  %v2932_v1 = vld [vmem:[%s13462_s17 + $0x58] sm:$0xff] }
 0xea8   :  { %9803 = vmatprep.subr.mxu1 %v2509_v7  ;;  %v2504_v16 = vmul.f32 %v10697_v4, %v10689_v46  ;;  %9841 = vmatprep.subr.mxu0 %v2932_v1  ;;  %v2930_v4 = vld [vmem:[%s13462_s17 + $0x48] sm:$0xff] }
 0xea9   :  { %9804 = vmatpush3.msra.mxu1 %v2509_v7  ;;  %9842 = vmatpush3.msra.mxu0 %v2932_v1  ;;  %v2929_v7 = vld [vmem:[%s13462_s17 + $0x40] sm:$0xff] }
 0xeaa   :  { %9805 = vmatprep.mubr.msk.f32.mxu1 %vm470_vm0, %v2504_v16  ;;  %9811 = vmatprep.subr.mxu1 %v1148_v8  ;;  %v2927_v16 = vld [vmem:[%s13462_s17 + $0x30] sm:$0xff] }
 0xeab   :  { %v10699_v13 = vpop.eup %10698  ;;  %9806 = vmatmul.mubr.msk.f32.vlgmr.msra.gmra.mxu1 %vm470_vm0, %v2505_v37  ;;  %9843 = vmatprep.subr.mxu0 %v2931_v2  ;;  %v2926_v37 = vld [vmem:[%s13462_s17 + $0x28] sm:$0xff] }
 0xeac   :  { %v2506_v41 = vmul.f32 %v10699_v13, %v10691_v30  ;;  %9812 = vmatpush3.msra.mxu1 %v1148_v8  ;;  %v2812_v30 = vld [vmem:[%s13461_s16 + $0x18] sm:$0xff]  ;;  %9844 = vmatpush3.msra.mxu0 %v2931_v2  ;;  %v2925_v13 = vld [vmem:[%s13462_s17 + $0x20] sm:$0xff] }
 0xead   :  { %9819 = vmatprep.subr.mxu1 %v2812_v30  ;;  %9845 = vmatprep.subr.mxu0 %v2930_v4  ;;  %v2928_v8 = vld [vmem:[%s13462_s17 + $0x38] sm:$0xff] }
 0xeae   :  { %9808 = vmatprep.mubr.msk.f32.mxu1 %vm470_vm0, %v2506_v41  ;;  %9846 = vmatpush3.msra.mxu0 %v2930_v4 }
 0xeaf   :  { %v10701_v12 = vpop.eup %10700  ;;  %9847 = vmatprep.subr.mxu0 %v2929_v7 }
 0xeb0   :  { %v2507_v59 = vmul.f32 %v10701_v12, %v10693_v52  ;;  %v2810_v52 = vld [vmem:[%s13461_s16 + $0x8] sm:$0xff]  ;;  %9848 = vmatpush3.msra.mxu0 %v2929_v7  ;;  %s13480_s16 = sld [smem:[#allocation72_spill]] }
 0xeb1   :  { %9849 = vmatprep.subr.mxu0 %v2928_v8 }
 0xeb2   :  { %9809 = vmatmul.mubr.msk.f32.gmra.mxu1 %vm470_vm0, %v2507_v59  ;;  %9850 = vmatpush3.msra.mxu0 %v2928_v8 }
 0xeb3   :  { %9851 = vmatprep.subr.mxu0 %v2927_v16 }
 0xeb4   :  { %9852 = vmatpush3.msra.mxu0 %v2927_v16 }
 0xeb5   :  { %9853 = vmatprep.subr.mxu0 %v2926_v37 }
 0xeb6   :  { %9854 = vmatpush3.msra.mxu0 %v2926_v37 }
 0xeb7   :  { %9855 = vmatprep.subr.mxu0 %v2925_v13 }
 0xeb8   :  { %9856 = vmatpush3.msra.mxu0 %v2925_v13 }
 0xf6b   :  { %v9807_v42 = vpop.f32.mrf.mxu1 }
 0xf6d   :  { %v2610_v60 = vpop.f32.mrf.mxu1 }
 0xf6e   :  { %9813 = vmatprep.mubr.msk.f32.mxu1 %vm1153_vm3, %v2610_v60 }
 0xf6f   :  { %9814 = vmatmul.mubr.msk.f32.vlgmr.msra.gmra.mxu1 %vm1153_vm3, %v9807_v42 }
 0xf70   :  { %9820 = vmatpush3.msra.mxu1 %v2812_v30 }
 0xf71   :  { %9821 = vmatprep.subr.mxu1 %v2811_v51 }
 0xf72   :  { %v9810_v14 = vpop.f32.mrf.mxu1  ;;  %9822 = vmatpush3.msra.mxu1 %v2811_v51 }
 0xf73   :  { %9823 = vmatprep.subr.mxu1 %v2810_v52 }
 0xf74   :  { %v2620_v25 = vpop.f32.mrf.mxu1  ;;  %9824 = vmatpush3.msra.mxu1 %v2810_v52 }
 0xf75   :  { %9816 = vmatprep.mubr.msk.f32.mxu1 %vm1153_vm3, %v2620_v25  ;;  %9825 = vmatprep.subr.mxu1 %v2809_v53 }
 0xf76   :  { %9817 = vmatmul.mubr.msk.f32.gmra.mxu1 %vm1153_vm3, %v9810_v14 }
 0xf77   :  { %9826 = vmatpush3.msra.mxu1 %v2809_v53 }
0x102f   :  { %v9815_v62 = vpop.f32.mrf.mxu1 }
0x1030   :  { %v2727_v26 = vadd.f32 %v9815_v62, %v12166_v3 }
0x1031   :  { %v2707_v63 = vpop.f32.mrf.mxu1 }
0x1032   :  { %v2731_v27 = vadd.f32 %v2727_v26, %v11815_v11  ;;  %v2726_v28 = vadd.f32 %v2707_v63, %v12168_v5 }
0x1034   :  { %v2730_v43 = vadd.f32 %v2726_v28, %v11812_v9  ;;  %v2739_v45 = vsel %vm579_vm1, %v2731_v27, 0.0 }
0x1035   :  { %2740 = vadd.xlane.f32.xlu1 %v2739_v45 }
0x1036   :  { %v9818_v48 = vpop.f32.mrf.mxu1  ;;  %v2736_v55 = vsel %vm579_vm1, %v2730_v43, 0.0 }
0x1037   :  { %2737 = vadd.xlane.f32.xlu0 %v2736_v55  ;;  %v2729_v23 = vadd.f32 %v9818_v48, %v12172_v38  ;;  %v8717_v48 = vld [vmem:[%s13463_s18] ss:$0 sm:$0xff]  ;;  %s13482_s18 = sld [smem:[#allocation69_spill]] }
0x1038   :  { %v2717_v29 = vpop.f32.mrf.mxu1 }
0x1039   :  { %v2728_v31 = vadd.f32 %v2717_v29, %v12174_v10  ;;  %v2733_v11 = vadd.f32 %v2729_v23, %v11835_v18 }
0x103b   :  { %v2732_v3 = vadd.f32 %v2728_v31, %v11830_v17  ;;  %v2745_v9 = vsel %vm579_vm1, %v2733_v11, 0.0  ;;  %v8718_v31 = vld [vmem:[%s13464_s19] ss:$0 sm:$0xff]  ;;  %s13483_s19 = sld [smem:[#allocation71_spill]] }
0x103d   :  { %v2742_v5 = vsel %vm579_vm1, %v2732_v3, 0.0 }
0x103e   :  { %2743 = vadd.xlane.f32.xlu0 %v2742_v5 }
0x1042   :  { %2746 = vadd.xlane.f32.xlu0 %v2745_v9 }
0x10be   :  { %v2741_v21 = vpop.xlane.xlu1 %2740 }
0x10bf   :  { %v2750_v22 = vmul.f32 0.03125, %v2741_v21 }
0x10c0   :  { %v2738_v33 = vpop.xlane.xlu0 %2737 }
0x10c1   :  { %v12225_v20 = vsub.f32 %v2731_v27, %v2750_v22  ;;  %v2749_v34 = vmul.f32 0.03125, %v2738_v33 }
0x10c3   :  { %v12227_v35 = vsub.f32 %v2730_v43, %v2749_v34  ;;  %v2758_v38 = vmul.f32 %v12225_v20, %v12225_v20 }
0x10c5   :  { %v2764_v17 = vsel %vm579_vm1, %v2758_v38, 0.0  ;;  %v2757_v18 = vmul.f32 %v12227_v35, %v12227_v35 }
0x10c6   :  { %2765 = vadd.xlane.f32.xlu0 %v2764_v17  ;;  %v2924_v17 = vld [vmem:[%s13462_s17 + $0x18] sm:$0xff] }
0x10c7   :  { %v2744_v10 = vpop.xlane.xlu0 %2743  ;;  %v2761_v24 = vsel %vm579_vm1, %v2757_v18, 0.0  ;;  %9857 = vmatprep.subr.mxu0 %v2924_v17  ;;  %v2923_v18 = vld [vmem:[%s13462_s17 + $0x10] sm:$0xff] }
0x10c8   :  { %v2751_v36 = vmul.f32 0.03125, %v2744_v10  ;;  %2762 = vadd.xlane.f32.xlu1 %v2761_v24  ;;  %9858 = vmatpush3.msra.mxu0 %v2924_v17  ;;  %v2922_v10 = vld [vmem:[%s13462_s17 + $0x8] sm:$0xff]  ;;  %v2921_v24 = vld [vmem:[%s13462_s17] sm:$0xff]  ;;  %s13481_s17 = sld [smem:[#allocation68_spill]] }
0x10c9   :  { %9859 = vmatprep.subr.mxu0 %v2923_v18 }
0x10ca   :  { %v12235_v19 = vsub.f32 %v2732_v3, %v2751_v36  ;;  %9860 = vmatpush3.msra.mxu0 %v2923_v18  ;;  %v8719_v36 = vld [vmem:[%s13465_s22] ss:$0 sm:$0xff]  ;;  %s13484_s22 = sld [smem:[#allocation73_spill]] }
0x10cb   :  { %v2747_v39 = vpop.xlane.xlu0 %2746  ;;  %9861 = vmatprep.subr.mxu0 %v2922_v10 }
0x10cc   :  { %v2752_v40 = vmul.f32 0.03125, %v2747_v39  ;;  %v2759_v44 = vmul.f32 %v12235_v19, %v12235_v19  ;;  %9862 = vmatpush3.msra.mxu0 %v2922_v10 }
0x10cd   :  { %9863 = vmatprep.subr.mxu0 %v2921_v24 }
0x10ce   :  { %v12239_v46 = vsub.f32 %v2733_v11, %v2752_v40  ;;  %v2767_v47 = vsel %vm579_vm1, %v2759_v44, 0.0  ;;  %9864 = vmatpush3.msra.mxu0 %v2921_v24 }
0x10cf   :  { %2768 = vadd.xlane.f32.xlu1 %v2767_v47 }
0x10d0   :  { %v2760_v49 = vmul.f32 %v12239_v46, %v12239_v46 }
0x10d2   :  { %v2770_v50 = vsel %vm579_vm1, %v2760_v49, 0.0 }
0x10d3   :  { %2771 = vadd.xlane.f32.xlu0 %v2770_v50 }
0x114f   :  { %v2766_v41 = vpop.xlane.xlu0 %2765 }
0x1150   :  { %v2774_v12 = vmul.f32 0.03125, %v2766_v41 }
0x1151   :  { %v2763_v59 = vpop.xlane.xlu1 %2762 }
0x1152   :  { %v2778_v42 = vadd.f32 1e-05, %v2774_v12  ;;  %v2773_v60 = vmul.f32 0.03125, %v2763_v59 }
0x1154   :  { %10702 = vrsqrt.f32 %v2778_v42  ;;  %v2777_v14 = vadd.f32 1e-05, %v2773_v60 }
0x1156   :  { %10704 = vrsqrt.f32 %v2777_v14 }
0x1158   :  { %v2769_v25 = vpop.xlane.xlu1 %2768 }
0x1159   :  { %v2775_v62 = vmul.f32 0.03125, %v2769_v25 }
0x115b   :  { %v2779_v26 = vadd.f32 1e-05, %v2775_v62 }
0x115c   :  { %v2772_v63 = vpop.xlane.xlu0 %2771 }
0x115d   :  { %10706 = vrsqrt.f32 %v2779_v26  ;;  %v2776_v27 = vmul.f32 0.03125, %v2772_v63 }
0x115f   :  { %v2780_v28 = vadd.f32 1e-05, %v2776_v27 }
0x1161   :  { %v10703_v43 = vpop.eup %10702  ;;  %10708 = vrsqrt.f32 %v2780_v28 }
0x1162   :  { %v2786_v45 = vmul.f32 %v10703_v43, %v12225_v20 }
0x1163   :  { %v10705_v55 = vpop.eup %10704 }
0x1164   :  { %v2785_v29 = vmul.f32 %v10705_v55, %v12227_v35  ;;  %v2796_v23 = vmul.f32 %v8717_v48, %v2786_v45 }
0x1166   :  { %v2795_v3 = vmul.f32 %v8717_v48, %v2785_v29  ;;  %v2806_v5 = vadd.f32 %v8718_v31, %v2796_v23 }
0x1168   :  { %v2805_v11 = vadd.f32 %v8718_v31, %v2795_v3 }
0x116a   :  { %v10707_v9 = vpop.eup %10706  ;;  %9827 = vmatprep.mubr.msk.f32.mxu1 %vm579_vm1, %v2805_v11 }
0x116b   :  { %9828 = vmatmul.mubr.msk.f32.vlgmr.msra.gmra.mxu1 %vm579_vm1, %v2806_v5  ;;  %v2787_v21 = vmul.f32 %v10707_v9, %v12235_v19 }
0x116d   :  { %v2797_v22 = vmul.f32 %v8717_v48, %v2787_v21 }
0x116e   :  { %v10709_v33 = vpop.eup %10708 }
0x116f   :  { %v2807_v20 = vadd.f32 %v8718_v31, %v2797_v22  ;;  %v2788_v34 = vmul.f32 %v10709_v33, %v12239_v46  ;;  %v3110_v33 = vld [vmem:[%s13467_s3 + $0x18] sm:$0xff] }
0x1170   :  { %9871 = vmatprep.subr.mxu1 %v3110_v33 }
0x1171   :  { %9830 = vmatprep.mubr.msk.f32.mxu1 %vm579_vm1, %v2807_v20  ;;  %v2798_v35 = vmul.f32 %v8717_v48, %v2788_v34  ;;  %9872 = vmatpush3.msra.mxu1 %v3110_v33  ;;  %v3108_v34 = vld [vmem:[%s13467_s3 + $0x8] sm:$0xff] }
0x1173   :  { %v2808_v38 = vadd.f32 %v8718_v31, %v2798_v35  ;;  %v3107_v35 = vld [vmem:[%s13467_s3] sm:$0xff] }
0x1175   :  { %9831 = vmatmul.mubr.msk.f32.gmra.mxu1 %vm579_vm1, %v2808_v38 }
0x122b   :  { %v9829_v19 = vpop.f32.mrf.mxu1 }
0x122c   :  { %v2904_v39 = vadd.f32 %v9829_v19, %v8719_v36 }
0x122d   :  { %v2898_v40 = vpop.f32.mrf.mxu1 }
0x122e   :  { %v2899_v44 = vadd.f32 %v8719_v36, %v2898_v40  ;;  %v2918_v47 = vmax.f32 %v2904_v39, 0.0 }
0x1230   :  { %v2917_v46 = vmax.f32 %v2899_v44, 0.0 }
0x1232   :  { %9865 = vmatprep.mubr.f32.mxu0 %v2917_v46 }
0x1233   :  { %9866 = vmatmul.mubr.f32.vlgmr.msra.gmra.mxu0 %v2918_v47 }
0x1235   :  { %v9832_v49 = vpop.f32.mrf.mxu1 }
0x1236   :  { %v2914_v50 = vadd.f32 %v9832_v49, %v8719_v36 }
0x1237   :  { %v2908_v30 = vpop.f32.mrf.mxu1 }
0x1238   :  { %v2909_v51 = vadd.f32 %v8719_v36, %v2908_v30  ;;  %v2920_v53 = vmax.f32 %v2914_v50, 0.0  ;;  %v8725_v30 = vld [vmem:[%s13468_s25] ss:$0 sm:$0xff] }
0x123a   :  { %v2919_v52 = vmax.f32 %v2909_v51, 0.0 }
0x123c   :  { %9868 = vmatprep.mubr.f32.mxu0 %v2919_v52 }
0x123d   :  { %9869 = vmatmul.mubr.f32.gmra.mxu0 %v2920_v53 }
0x12f3   :  { %v9867_v56 = vpop.f32.mrf.mxu0 }
0x12f4   :  { %v3016_v57 = vadd.f32 %v9867_v56, %v8724_v54 }
0x12f5   :  { %v3010_v58 = vpop.f32.mrf.mxu0 }
0x12f6   :  { %v3030_v1 = vadd.f32 %v3016_v57, %v2806_v5  ;;  %v3011_v2 = vadd.f32 %v8724_v54, %v3010_v58 }
0x12f8   :  { %v3029_v4 = vadd.f32 %v3011_v2, %v2805_v11  ;;  %v3038_v7 = vsel %vm579_vm1, %v3030_v1, 0.0 }
0x12f9   :  { %3039 = vadd.xlane.f32.xlu0 %v3038_v7 }
0x12fa   :  { %v3035_v8 = vsel %vm579_vm1, %v3029_v4, 0.0 }
0x12fb   :  { %3036 = vadd.xlane.f32.xlu1 %v3035_v8 }
0x12fd   :  { %v9870_v16 = vpop.f32.mrf.mxu0 }
0x12fe   :  { %v3026_v37 = vadd.f32 %v9870_v16, %v8724_v54 }
0x12ff   :  { %v3020_v13 = vpop.f32.mrf.mxu0 }
0x1300   :  { %v3032_v41 = vadd.f32 %v3026_v37, %v2808_v38  ;;  %v3021_v12 = vadd.f32 %v8724_v54, %v3020_v13  ;;  %v8726_v54 = vld [vmem:[%s13469_s0] ss:$0 sm:$0xff] }
0x1302   :  { %v3031_v59 = vadd.f32 %v3021_v12, %v2807_v20  ;;  %v3044_v42 = vsel %vm579_vm1, %v3032_v41, 0.0  ;;  %v3109_v20 = vld [vmem:[%s13467_s3 + $0x10] sm:$0xff] }
0x1303   :  { %3045 = vadd.xlane.f32.xlu0 %v3044_v42  ;;  %9873 = vmatprep.subr.mxu1 %v3109_v20  ;;  %v3221_v12 = vld [vmem:[%s13470_s26 + $0x10] sm:$0xff]  ;;  %v3219_v42 = vld [vmem:[%s13470_s26] sm:$0xff] }
0x1304   :  { %v3041_v60 = vsel %vm579_vm1, %v3031_v59, 0.0  ;;  %9874 = vmatpush3.msra.mxu1 %v3109_v20 }
0x1305   :  { %3042 = vadd.xlane.f32.xlu1 %v3041_v60  ;;  %9875 = vmatprep.subr.mxu1 %v3108_v34  ;;  %v448_v60 = vld [vmem:[%s13471_s12] sm:$0xff] }
0x1306   :  { %9876 = vmatpush3.msra.mxu1 %v3108_v34 }
0x1307   :  { %9877 = vmatprep.subr.mxu1 %v3107_v35 }
0x1308   :  { %9878 = vmatpush3.msra.mxu1 %v3107_v35 }
0x1382   :  { %v3040_v14 = vpop.xlane.xlu0 %3039 }
0x1383   :  { %v3048_v25 = vmul.f32 0.03125, %v3040_v14  ;;  %v11358_v14 = vmov 3  }
0x1384   :  { %v3037_v62 = vpop.xlane.xlu1 %3036  ;;  %10622 = vset.pattern.permute.xlu1 %v11358_v14  ;;  %10623 = vset.pattern.permute.xlu0 %v11358_v14 }
0x1385   :  { %v3052_v26 = vsub.f32 %v3030_v1, %v3048_v25  ;;  %v3047_v63 = vmul.f32 0.03125, %v3037_v62  ;;  %v449_v25 = vld [vmem:[%s13471_s12 + $0x8] sm:$0xff]  ;;  %v12302_v62 = vld [vmem:[%s13471_s12 + $0x10] sm:$0xff] }
0x1387   :  { %v3051_v27 = vsub.f32 %v3029_v4, %v3047_v63  ;;  %v3056_v28 = vmul.f32 %v3052_v26, %v3052_v26  ;;  %v12306_v63 = vld [vmem:[%s13471_s12 + $0x18] sm:$0xff] }
0x1389   :  { %v3062_v43 = vsel %vm579_vm1, %v3056_v28, 0.0  ;;  %v3055_v45 = vmul.f32 %v3051_v27, %v3051_v27  ;;  %v11361_v28 = vmov 2  }
0x138a   :  { %3063 = vadd.xlane.f32.xlu0 %v3062_v43  ;;  %v11362_v43 = vmov 4  }
0x138b   :  { %v3059_v48 = vsel %vm579_vm1, %v3055_v45, 0.0  ;;  %v8727_v45 = vld [vmem:[#allocation17] ss:$0 sm:$0xff] }
0x138c   :  { %3060 = vadd.xlane.f32.xlu1 %v3059_v48  ;;  %v3046_v55 = vpop.xlane.xlu0 %3045 }
0x138d   :  { %v3050_v29 = vmul.f32 0.03125, %v3046_v55 }
0x138e   :  { %v3043_v23 = vpop.xlane.xlu1 %3042 }
0x138f   :  { %v3054_v31 = vsub.f32 %v3032_v41, %v3050_v29  ;;  %v3049_v3 = vmul.f32 0.03125, %v3043_v23  ;;  %v3222_v41 = vld [vmem:[%s13470_s26 + $0x18] sm:$0xff] }
0x1390   :  { %9885 = vmatprep.subr.mxu1 %v3222_v41 }
0x1391   :  { %v3053_v11 = vsub.f32 %v3031_v59, %v3049_v3  ;;  %v3058_v5 = vmul.f32 %v3054_v31, %v3054_v31  ;;  %v3220_v59 = vld [vmem:[%s13470_s26 + $0x8] sm:$0xff] }
0x1393   :  { %v3068_v9 = vsel %vm579_vm1, %v3058_v5, 0.0  ;;  %v3057_v21 = vmul.f32 %v3053_v11, %v3053_v11 }
0x1394   :  { %3069 = vadd.xlane.f32.xlu0 %v3068_v9 }
0x1395   :  { %v3065_v22 = vsel %vm579_vm1, %v3057_v21, 0.0 }
0x1396   :  { %3066 = vadd.xlane.f32.xlu1 %v3065_v22 }
0x13a7   :  { %3441 = vperm.xlu1 %10622, %v448_v60  }
0x13aa   :  { %3445 = vperm.xlu0 %10623, %v449_v25  }
0x13ab   :  { %3449 = vperm.xlu1 %10622, %v12302_v62  }
0x13af   :  { %3453 = vperm.xlu1 %10622, %v12306_v63  }
0x13b3   :  { %10624 = vset.pattern.permute.xlu1 %v11361_v28 }
0x13b4   :  { %3361 = vperm.xlu1 %10624, %v448_v60  }
0x13b8   :  { %3365 = vperm.xlu1 %10624, %v449_v25  }
0x13bc   :  { %3369 = vperm.xlu1 %10624, %v12302_v62  }
0x13c0   :  { %3373 = vperm.xlu1 %10624, %v12306_v63  }
0x1413   :  { %v3064_v38 = vpop.xlane.xlu0 %3063 }
0x1414   :  { %v3072_v17 = vmul.f32 0.03125, %v3064_v38  ;;  %v8732_v38 = vld [vmem:[#allocation19] ss:$0 sm:$0xff] }
0x1415   :  { %v3061_v18 = vpop.xlane.xlu1 %3060 }
0x1416   :  { %v3076_v10 = vadd.f32 1e-05, %v3072_v17  ;;  %v3071_v24 = vmul.f32 0.03125, %v3061_v18  ;;  %v3501_v17 = vld [vmem:[%s13472_s28 + $0x8] sm:$0xff] }
0x1418   :  { %10710 = vrsqrt.f32 %v3076_v10  ;;  %v3075_v36 = vadd.f32 1e-05, %v3071_v24 }
0x141a   :  { %10712 = vrsqrt.f32 %v3075_v36 }
0x141d   :  { %v3070_v19 = vpop.xlane.xlu0 %3069 }
0x141e   :  { %v3074_v39 = vmul.f32 0.03125, %v3070_v19 }
0x141f   :  { %v3067_v40 = vpop.xlane.xlu1 %3066 }
0x1420   :  { %v3078_v44 = vadd.f32 1e-05, %v3074_v39  ;;  %v3073_v46 = vmul.f32 0.03125, %v3067_v40 }
0x1422   :  { %10714 = vrsqrt.f32 %v3078_v44  ;;  %v3077_v47 = vadd.f32 1e-05, %v3073_v46 }
0x1423   :  { %v3442_v33 = vpop.permute.xlu1 %3441 }
0x1424   :  { %10716 = vrsqrt.f32 %v3077_v47 }
0x1425   :  { %v10711_v49 = vpop.eup %10710  ;;  %v3446_v10 = vpop.permute.xlu0 %3445 }
0x1426   :  { %v3084_v50 = vmul.f32 %v10711_v49, %v3052_v26  ;;  %v11359_v26 = vmov 1   ;;  %v12349_v49 = vld [vmem:[%s13472_s28] sm:$0xff] }
0x1427   :  { %v10713_v51 = vpop.eup %10712  ;;  %10626 = vset.pattern.permute.xlu0 %v11359_v26  ;;  %10625 = vset.pattern.permute.xlu1 %v11359_v26  ;;  %v3450_v20 = vpop.permute.xlu1 %3449 }
0x1428   :  { %v3083_v52 = vmul.f32 %v10713_v51, %v3051_v27  ;;  %v3094_v53 = vmul.f32 %v8725_v30, %v3084_v50  ;;  %3429 = vperm.xlu0 %10626, %v12302_v62   ;;  %v11360_v27 = vmov 5   ;;  %3421 = vperm.xlu1 %10625, %v448_v60  }
0x142a   :  { %v3093_v56 = vmul.f32 %v8725_v30, %v3083_v52  ;;  %v3104_v58 = vadd.f32 %v8726_v54, %v3094_v53 }
0x142b   :  { %v3454_v34 = vpop.permute.xlu1 %3453 }
0x142c   :  { %v3103_v57 = vadd.f32 %v8726_v54, %v3093_v56  ;;  %10629 = vset.pattern.permute.xlu0 %v11360_v27  ;;  %3425 = vperm.xlu1 %10625, %v449_v25  }
0x142d   :  { %3485 = vperm.xlu0 %10629, %v449_v25  }
0x142e   :  { %9879 = vmatprep.mubr.msk.f32.mxu1 %vm579_vm1, %v3103_v57  ;;  %v3504_v57 = vld [vmem:[%s13472_s28 + $0x20] sm:$0xff] }
0x142f   :  { %v10715_v1 = vpop.eup %10714  ;;  %9880 = vmatmul.mubr.msk.f32.vlgmr.msra.gmra.mxu1 %vm579_vm1, %v3104_v58  ;;  %v3362_v35 = vpop.permute.xlu1 %3361  ;;  %9915 = vmatprep.subr.mxu0 %v3504_v57 }
0x1430   :  { %v3086_v2 = vmul.f32 %v10715_v1, %v3054_v31  ;;  %9886 = vmatpush3.msra.mxu1 %v3222_v41  ;;  %10627 = vset.pattern.permute.xlu1 %v11360_v27  ;;  %v3503_v1 = vld [vmem:[%s13472_s28 + $0x18] sm:$0xff] }
0x1431   :  { %v10717_v4 = vpop.eup %10716  ;;  %9887 = vmatprep.subr.mxu1 %v3221_v12  ;;  %10632 = vset.pattern.permute.xlu0 %v11350_v32 }
0x1432   :  { %v3085_v7 = vmul.f32 %v10717_v4, %v3053_v11  ;;  %v3096_v8 = vmul.f32 %v8725_v30, %v3086_v2  ;;  %9888 = vmatpush3.msra.mxu1 %v3221_v12  ;;  %3343 = vperm.xlu0 %10632, %v449_v25  }
0x1433   :  { %9889 = vmatprep.subr.mxu1 %v3220_v59  ;;  %3481 = vperm.xlu1 %10627, %v448_v60   ;;  %v3366_v36 = vpop.permute.xlu1 %3365 }
0x1434   :  { %v3095_v16 = vmul.f32 %v8725_v30, %v3085_v7  ;;  %v3106_v13 = vadd.f32 %v8726_v54, %v3096_v8  ;;  %9890 = vmatpush3.msra.mxu1 %v3220_v59  ;;  %9916 = vmatpush3.msra.mxu0 %v3504_v57  ;;  %v3502_v7 = vld [vmem:[%s13472_s28 + $0x10] sm:$0xff] }
0x1435   :  { %9891 = vmatprep.subr.mxu1 %v3219_v42  ;;  %9917 = vmatprep.subr.mxu0 %v3503_v1 }
0x1436   :  { %v3105_v37 = vadd.f32 %v8726_v54, %v3095_v16  ;;  %9892 = vmatpush3.msra.mxu1 %v3219_v42  ;;  %3348 = vperm.xlu0 %10632, %v12302_v62  }
0x1437   :  { %10628 = vset.pattern.permute.xlu1 %v11359_v26  ;;  %9899 = vmatprep.subr.mxu1 %v3501_v17  ;;  %v3370_v56 = vpop.permute.xlu1 %3369 }
0x1438   :  { %9882 = vmatprep.mubr.msk.f32.mxu1 %vm579_vm1, %v3105_v37  ;;  %3433 = vperm.xlu1 %10628, %v12306_v63  }
0x1439   :  { %9883 = vmatmul.mubr.msk.f32.gmra.mxu1 %vm579_vm1, %v3106_v13  ;;  %9918 = vmatpush3.msra.mxu0 %v3503_v1 }
0x143a   :  { %10635 = vset.pattern.permute.xlu0 %v11362_v43  ;;  %9919 = vmatprep.subr.mxu0 %v3502_v7 }
0x143b   :  { %3405 = vperm.xlu0 %10635, %v449_v25   ;;  %v3374_v2 = vpop.permute.xlu1 %3373  ;;  %9920 = vmatpush3.msra.mxu0 %v3502_v7 }
0x143c   :  { %10630 = vset.pattern.permute.xlu1 %v11350_v32 }
0x143d   :  { %3338 = vperm.xlu1 %10630, %v448_v60  }
0x1441   :  { %10631 = vset.pattern.permute.xlu1 %v11360_v27 }
0x1442   :  { %3489 = vperm.xlu1 %10631, %v12302_v62  }
0x1446   :  { %3493 = vperm.xlu1 %10631, %v12306_v63  }
0x144a   :  { %10633 = vset.pattern.permute.xlu1 %v11362_v43 }
0x144b   :  { %3401 = vperm.xlu1 %10633, %v448_v60  }
0x144f   :  { %10634 = vset.pattern.permute.xlu1 %v11350_v32 }
0x1450   :  { %3353 = vperm.xlu1 %10634, %v12306_v63  }
0x1454   :  { %10636 = vset.pattern.permute.xlu1 %v11362_v43 }
0x14a3   :  { %v3422_v8 = vpop.permute.xlu1 %3421  ;;  %v3430_v12 = vpop.permute.xlu0 %3429 }
0x14a7   :  { %v3426_v16 = vpop.permute.xlu1 %3425 }
0x14a8   :  { %v3486_v42 = vpop.permute.xlu0 %3485 }
0x14ad   :  { %v3344_v14 = vpop.permute.xlu0 %3343 }
0x14ae   :  { %v3482_v37 = vpop.permute.xlu1 %3481 }
0x14b3   :  { %v3434_v13 = vpop.permute.xlu1 %3433 }
0x14b8   :  { %v3339_v41 = vpop.permute.xlu1 %3338 }
0x14bd   :  { %v3490_v59 = vpop.permute.xlu1 %3489 }
0x14c1   :  { %v3494_v60 = vpop.permute.xlu1 %3493 }
0x14c6   :  { %v3402_v25 = vpop.permute.xlu1 %3401 }
0x14ef   :  { %v9881_v48 = vpop.f32.mrf.mxu1 }
0x14f0   :  { %v3202_v55 = vadd.f32 %v9881_v48, %v8727_v45 }
0x14f1   :  { %v3196_v29 = vpop.f32.mrf.mxu1 }
0x14f2   :  { %v3216_v23 = vmax.f32 %v3202_v55, 0.0  ;;  %v3197_v31 = vadd.f32 %v8727_v45, %v3196_v29 }
0x14f4   :  { %3328 = vst.msk [vmem:[#allocation28 + $0x8] sm:$0xff] %vm579_vm1, %v3216_v23  ;;  %v3215_v3 = vmax.f32 %v3197_v31, 0.0 }
0x14f6   :  { %3327 = vst.msk [vmem:[#allocation28] sm:$0xff] %vm579_vm1, %v3215_v3  ;;  %9893 = vmatprep.mubr.msk.f32.mxu1 %vm579_vm1, %v3215_v3 }
0x14f7   :  { %9894 = vmatmul.mubr.msk.f32.vlgmr.msra.gmra.mxu1 %vm579_vm1, %v3216_v23 }
0x14f8   :  { %9900 = vmatpush3.msra.mxu1 %v3501_v17 }
0x14f9   :  { %v9884_v32 = vpop.f32.mrf.mxu1  ;;  %9907 = vmatprep.subr.mxu1 %v12349_v49 }
0x14fa   :  { %v3212_v11 = vadd.f32 %v9884_v32, %v8727_v45 }
0x14fb   :  { %v3206_v5 = vpop.f32.mrf.mxu1 }
0x14fc   :  { %v3218_v9 = vmax.f32 %v3212_v11, 0.0  ;;  %v3207_v21 = vadd.f32 %v8727_v45, %v3206_v5 }
0x14fe   :  { %3330 = vst.msk [vmem:[#allocation28 + $0x18] sm:$0xff] %vm579_vm1, %v3218_v9  ;;  %v3217_v22 = vmax.f32 %v3207_v21, 0.0 }
0x1500   :  { %3329 = vst.msk [vmem:[#allocation28 + $0x10] sm:$0xff] %vm579_vm1, %v3217_v22  ;;  %9896 = vmatprep.mubr.msk.f32.mxu1 %vm579_vm1, %v3217_v22 }
0x1501   :  { %9897 = vmatmul.mubr.msk.f32.gmra.mxu1 %vm579_vm1, %v3218_v9 }
0x15b7   :  { %v9895_v18 = vpop.f32.mrf.mxu1 }
0x15b8   :  { %v12332_v24 = vadd.f32 %v9895_v18, %v8732_v38 }
0x15b9   :  { %v3308_v19 = vpop.f32.mrf.mxu1 }
0x15ba   :  { %3333 = vst.msk [vmem:[%s11675_s9 + $0x8] sm:$0xff] %vm3331_vm4, %v12332_v24  ;;  %v12337_v39 = vadd.f32 %v8732_v38, %v3308_v19  ;;  %v3377_v40 = vmul.f32 %v3366_v36, %v12332_v24  ;;  %v3457_v44 = vmul.f32 %v3446_v10, %v12332_v24  ;;  %v3437_v43 = vmul.f32 %v3426_v16, %v12332_v24  ;;  %v3946_v16 = vld [vmem:[%s13474_s4 + $0x30] sm:$0xff] }
0x15bc   :  { %3332 = vst.msk [vmem:[%s11675_s9] sm:$0xff] %vm3331_vm4, %v12337_v39  ;;  %3386 = vrot.lane.b32.xlu1 %v3377_v40, %s11352_s10  ;;  %3466 = vrot.lane.b32.xlu0 %v3457_v44, %s11352_s10  ;;  %v3456_v46 = vmul.f32 %v3442_v33, %v12337_v39  ;;  %v3376_v30 = vmul.f32 %v3362_v35, %v12337_v39 }
0x15bd   :  { %v3436_v45 = vmul.f32 %v3422_v8, %v12337_v39  ;;  %v3356_v5 = vmul.f32 %v3339_v41, %v12337_v39  ;;  %v3947_v8 = vld [vmem:[%s13474_s4 + $0x38] sm:$0xff] }
0x15be   :  { %9949 = vmatprep.subr.mxu0 %v3947_v8 }
0x15c0   :  { %3464 = vrot.lane.b32.xlu1 %v3456_v46, %s11352_s10 }
0x15c1   :  { %v9898_v47 = vpop.f32.mrf.mxu1 }
0x15c2   :  { %v12351_v50 = vadd.f32 %v9898_v47, %v8732_v38 }
0x15c3   :  { %v3318_v51 = vpop.f32.mrf.mxu1 }
0x15c4   :  { %3335 = vst.msk [vmem:[%s11675_s9 + $0x18] sm:$0xff] %vm3331_vm4, %v12351_v50  ;;  %v12358_v52 = vadd.f32 %v8732_v38, %v3318_v51  ;;  %3384 = vrot.lane.b32.xlu1 %v3376_v30, %s11352_s10  ;;  %v3459_v53 = vmul.f32 %v3454_v34, %v12351_v50  ;;  %v3379_v4 = vmul.f32 %v3374_v2, %v12351_v50 }
0x15c5   :  { %v3439_v32 = vmul.f32 %v3434_v13, %v12351_v50  ;;  %v3357_v34 = vmul.f32 %v3344_v14, %v12332_v24  ;;  %v3944_v13 = vld [vmem:[%s13474_s4 + $0x20] sm:$0xff] }
0x15c6   :  { %3334 = vst.msk [vmem:[%s11675_s9 + $0x10] sm:$0xff] %vm3331_vm4, %v12358_v52  ;;  %3470 = vrot.lane.b32.xlu0 %v3459_v53, %s11352_s10  ;;  %v3458_v54 = vmul.f32 %v3450_v20, %v12358_v52  ;;  %v3378_v58 = vmul.f32 %v3370_v56, %v12358_v52  ;;  %v3438_v9 = vmul.f32 %v3430_v12, %v12358_v52  ;;  %s13473_s9 = sld [smem:[#allocation83_spill]] }
0x15c8   :  { %3468 = vrot.lane.b32.xlu1 %v3458_v54, %s11352_s10 }
0x15ca   :  { %3409 = vperm.xlu0 %10635, %v12302_v62   ;;  %v3349_v62 = vpop.permute.xlu0 %3348 }
0x15cc   :  { %3413 = vperm.xlu1 %10636, %v12306_v63   ;;  %v3354_v63 = vpop.permute.xlu1 %3353  ;;  %v3831_v54 = vld [vmem:[%s13473_s9 + $0x38] sm:$0xff]  ;;  %v3830_v56 = vld [vmem:[%s13473_s9 + $0x30] sm:$0xff]  ;;  %v3829_v57 = vld [vmem:[%s13473_s9 + $0x28] sm:$0xff] }
0x15cd   :  { %v3827_v1 = vld [vmem:[%s13473_s9 + $0x18] sm:$0xff]  ;;  %v3826_v2 = vld [vmem:[%s13473_s9 + $0x10] sm:$0xff]  ;;  %v3824_v7 = vld [vmem:[%s13473_s9] sm:$0xff] }
0x15ce   :  { %3388 = vrot.lane.b32.xlu0 %v3378_v58, %s11352_s10  ;;  %v3406_v26 = vpop.permute.xlu0 %3405  ;;  %v3828_v58 = vld [vmem:[%s13473_s9 + $0x20] sm:$0xff] }
0x15cf   :  { %10637 = vset.pattern.permute.xlu0 %v11360_v27 }
0x15d0   :  { %3390 = vrot.lane.b32.xlu1 %v3379_v4, %s11352_s10  ;;  %v3825_v4 = vld [vmem:[%s13473_s9 + $0x8] sm:$0xff] }
0x15d2   :  { %3703 = vrot.lane.b32.xlu0 %v12337_v39, %s11354_s15  ;;  %v3358_v39 = vmul.f32 %v3349_v62, %v12358_v52 }
0x15d4   :  { %3705 = vrot.lane.b32.xlu1 %v12332_v24, %s11354_s15  ;;  %v3359_v24 = vmul.f32 %v3354_v63, %v12351_v50 }
0x15d6   :  { %3707 = vrot.lane.b32.xlu0 %v12358_v52, %s11354_s15 }
0x15d8   :  { %3709 = vrot.lane.b32.xlu1 %v12351_v50, %s11354_s15 }
0x162e   :  { %v3387_v27 = vpop.permute.xlu1 %3386  ;;  %v3467_v28 = vpop.permute.xlu0 %3466 }
0x162f   :  { %v3477_v48 = vadd.f32 %v3467_v28, %v3437_v43  ;;  %v3397_v38 = vadd.f32 %v3387_v27, %v3357_v34  ;;  %v8749_v28 = vld [vmem:[#allocation23] ss:$0 sm:$0xff] }
0x1631   :  { %v3497_v31 = vadd.f32 %v3486_v42, %v3477_v48  ;;  %v3417_v10 = vadd.f32 %v3406_v26, %v3397_v38  ;;  %v3942_v38 = vld [vmem:[%s13474_s4 + $0x10] sm:$0xff] }
0x1632   :  { %v3465_v55 = vpop.permute.xlu1 %3464 }
0x1633   :  { %v3476_v29 = vadd.f32 %v3465_v55, %v3436_v45 }
0x1635   :  { %v3496_v23 = vadd.f32 %v3482_v37, %v3476_v29  ;;  %v3945_v37 = vld [vmem:[%s13474_s4 + $0x28] sm:$0xff] }
0x1636   :  { %v3385_v3 = vpop.permute.xlu1 %3384 }
0x1637   :  { %9901 = vmatprep.mubr.msk.f32.mxu1 %vm1153_vm3, %v3496_v23  ;;  %v3396_v33 = vadd.f32 %v3385_v3, %v3356_v5 }
0x1638   :  { %9902 = vmatmul.mubr.msk.f32.vlgmr.msra.gmra.mxu1 %vm1153_vm3, %v3497_v31  ;;  %v3471_v11 = vpop.permute.xlu0 %3470 }
0x1639   :  { %9908 = vmatpush3.msra.mxu1 %v12349_v49  ;;  %v3479_v21 = vadd.f32 %v3471_v11, %v3439_v32  ;;  %v3416_v18 = vadd.f32 %v3402_v25, %v3396_v33 }
0x163a   :  { %v3469_v22 = vpop.permute.xlu1 %3468  ;;  %9927 = vmatprep.subr.mxu1 %v3831_v54 }
0x163b   :  { %v3478_v20 = vadd.f32 %v3469_v22, %v3438_v9  ;;  %v3499_v17 = vadd.f32 %v3494_v60, %v3479_v21 }
0x163d   :  { %v3498_v35 = vadd.f32 %v3490_v59, %v3478_v20 }
0x163f   :  { %9904 = vmatprep.mubr.msk.f32.mxu1 %vm1153_vm3, %v3498_v35  ;;  %v3943_v35 = vld [vmem:[%s13474_s4 + $0x18] sm:$0xff] }
0x1640   :  { %9905 = vmatmul.mubr.msk.f32.gmra.mxu1 %vm1153_vm3, %v3499_v17  ;;  %v3941_v17 = vld [vmem:[%s13474_s4 + $0x8] sm:$0xff] }
0x1641   :  { %9909 = vmatprep.mubr.msk.f32.mxu1 %vm1153_vm3, %v3416_v18  ;;  %v3940_v18 = vld [vmem:[%s13474_s4] sm:$0xff] }
0x1644   :  { %9910 = vmatmul.mubr.msk.f32.vlgmr.msra.gmra.mxu1 %vm1153_vm3, %v3417_v10  ;;  %v8750_v10 = vld [vmem:[#allocation25] ss:$0 sm:$0xff] }
0x1645   :  { %v3410_v36 = vpop.permute.xlu0 %3409  ;;  %9928 = vmatpush3.msra.mxu1 %v3831_v54  ;;  %v4058_v54 = vld [vmem:[%s13475_s20 + $0x10] sm:$0xff] }
0x1646   :  { %9929 = vmatprep.subr.mxu1 %v3830_v56 }
0x1647   :  { %v3414_v19 = vpop.permute.xlu1 %3413  ;;  %9930 = vmatpush3.msra.mxu1 %v3830_v56  ;;  %v4159_v56 = vld [vmem:[%s13476_s1 + $0x10] sm:$0xff] }
0x1648   :  { %9931 = vmatprep.subr.mxu1 %v3829_v57 }
0x1649   :  { %v3389_v40 = vpop.permute.xlu0 %3388  ;;  %9932 = vmatpush3.msra.mxu1 %v3829_v57  ;;  %v4057_v57 = vld [vmem:[%s13475_s20 + $0x8] sm:$0xff] }
0x164a   :  { %v3398_v44 = vadd.f32 %v3389_v40, %v3358_v39  ;;  %9933 = vmatprep.subr.mxu1 %v3828_v58 }
0x164b   :  { %v3391_v46 = vpop.permute.xlu1 %3390  ;;  %9934 = vmatpush3.msra.mxu1 %v3828_v58  ;;  %v4158_v58 = vld [vmem:[%s13476_s1 + $0x8] sm:$0xff] }
0x164c   :  { %v3418_v47 = vadd.f32 %v3410_v36, %v3398_v44  ;;  %v3399_v49 = vadd.f32 %v3391_v46, %v3359_v24  ;;  %9935 = vmatprep.subr.mxu1 %v3827_v1 }
0x164d   :  { %v3704_v30 = vpop.permute.xlu0 %3703  ;;  %9936 = vmatpush3.msra.mxu1 %v3827_v1  ;;  %v4056_v1 = vld [vmem:[%s13475_s20] sm:$0xff] }
0x164e   :  { %v3419_v51 = vadd.f32 %v3414_v19, %v3399_v49  ;;  %9912 = vmatprep.mubr.msk.f32.mxu1 %vm1153_vm3, %v3418_v47  ;;  %9921 = vmatprep.mubr.msk.f32.mxu0 %vm3711_vm5, %v3704_v30 }
0x164f   :  { %v3706_v53 = vpop.permute.xlu1 %3705  ;;  %9937 = vmatprep.subr.mxu1 %v3826_v2 }
0x1650   :  { %9913 = vmatmul.mubr.msk.f32.gmra.mxu1 %vm1153_vm3, %v3419_v51  ;;  %9922 = vmatmul.mubr.msk.f32.vlgmr.msra.gmra.mxu0 %vm3711_vm5, %v3706_v53 }
0x1651   :  { %v3708_v52 = vpop.permute.xlu0 %3707  ;;  %9938 = vmatpush3.msra.mxu1 %v3826_v2  ;;  %9950 = vmatpush3.msra.mxu0 %v3947_v8  ;;  %v4157_v2 = vld [vmem:[%s13476_s1] sm:$0xff] }
0x1652   :  { %9924 = vmatprep.mubr.msk.f32.mxu0 %vm3711_vm5, %v3708_v52  ;;  %9939 = vmatprep.subr.mxu1 %v3825_v4  ;;  %v4059_v52 = vld [vmem:[%s13475_s20 + $0x18] sm:$0xff] }
0x1653   :  { %v3710_v50 = vpop.permute.xlu1 %3709  ;;  %9940 = vmatpush3.msra.mxu1 %v3825_v4  ;;  %9951 = vmatprep.subr.mxu0 %v3946_v16  ;;  %v8755_v4 = vld [vmem:[#allocation26] ss:$0 sm:$0xff] }
0x1654   :  { %9925 = vmatmul.mubr.msk.f32.gmra.mxu0 %vm3711_vm5, %v3710_v50  ;;  %9941 = vmatprep.subr.mxu1 %v3824_v7  ;;  %v4160_v50 = vld [vmem:[%s13476_s1 + $0x18] sm:$0xff] }
0x1655   :  { %9942 = vmatpush3.msra.mxu1 %v3824_v7  ;;  %9952 = vmatpush3.msra.mxu0 %v3946_v16 }
0x1656   :  { %9953 = vmatprep.subr.mxu0 %v3945_v37  ;;  %9971 = vmatprep.subr.mxu1 %v4059_v52 }
0x1657   :  { %9954 = vmatpush3.msra.mxu0 %v3945_v37 }
0x1658   :  { %9955 = vmatprep.subr.mxu0 %v3944_v13 }
0x1659   :  { %9956 = vmatpush3.msra.mxu0 %v3944_v13 }
0x165a   :  { %9957 = vmatprep.subr.mxu0 %v3943_v35 }
0x165b   :  { %9958 = vmatpush3.msra.mxu0 %v3943_v35 }
0x165c   :  { %9959 = vmatprep.subr.mxu0 %v3942_v38 }
0x165d   :  { %9960 = vmatpush3.msra.mxu0 %v3942_v38 }
0x165e   :  { %9961 = vmatprep.subr.mxu0 %v3941_v17 }
0x165f   :  { %9962 = vmatpush3.msra.mxu0 %v3941_v17  ;;  %v12526_v17 = vld [vmem:[%s13477_s21 + $0x10] sm:$0xff] }
0x1660   :  { %9963 = vmatprep.subr.mxu0 %v3940_v18 }
0x1661   :  { %9964 = vmatpush3.msra.mxu0 %v3940_v18 }
0x1662   :  { %9985 = vmatprep.subr.mxu0 %v4160_v50 }
0x16f8   :  { %v9903_v41 = vpop.f32.mrf.mxu1 }
0x16fa   :  { %v3583_v12 = vpop.f32.mrf.mxu1 }
0x1700   :  { %v9906_v59 = vpop.f32.mrf.mxu1 }
0x1702   :  { %v3593_v42 = vpop.f32.mrf.mxu1 }
0x1704   :  { %v9911_v60 = vpop.f32.mrf.mxu1 }
0x1705   :  { %v3686_v25 = vadd.f32 %v9911_v60, %v9903_v41 }
0x1706   :  { %v3680_v14 = vpop.f32.mrf.mxu1 }
0x1707   :  { %v3681_v63 = vadd.f32 %v3680_v14, %v3583_v12 }
0x1710   :  { %v9914_v62 = vpop.f32.mrf.mxu1  ;;  %v9923_v26 = vpop.f32.mrf.mxu0 }
0x1711   :  { %v3806_v27 = vadd.f32 %v9923_v26, %v3686_v25  ;;  %v3696_v48 = vadd.f32 %v9914_v62, %v9906_v59 }
0x1712   :  { %v3690_v43 = vpop.f32.mrf.mxu1  ;;  %v3786_v45 = vpop.f32.mrf.mxu0 }
0x1713   :  { %v3805_v55 = vadd.f32 %v3786_v45, %v3681_v63  ;;  %v3817_v29 = vadd.f32 %v8749_v28, %v3806_v27  ;;  %v3691_v31 = vadd.f32 %v3690_v43, %v3593_v42 }
0x1714   :  { %v9926_v23 = vpop.f32.mrf.mxu0 }
0x1715   :  { %v3816_v3 = vadd.f32 %v8749_v28, %v3805_v55  ;;  %v3808_v32 = vadd.f32 %v9926_v23, %v3696_v48  ;;  %v3821_v21 = vmax.f32 %v3817_v29, 0.0 }
0x1716   :  { %v3796_v11 = vpop.f32.mrf.mxu0 }
0x1717   :  { %v3820_v5 = vmax.f32 %v3816_v3, 0.0  ;;  %v3807_v9 = vadd.f32 %v3796_v11, %v3691_v31  ;;  %v3819_v22 = vadd.f32 %v8749_v28, %v3808_v32  ;;  %v12512_v3 = vld [vmem:[%s13477_s21 + $0x8] sm:$0xff]  ;;  %v12515_v11 = vld [vmem:[%s13477_s21] sm:$0xff] }
0x1719   :  { %v3818_v33 = vadd.f32 %v8749_v28, %v3807_v9  ;;  %9943 = vmatprep.mubr.msk.f32.mxu1 %vm470_vm0, %v3820_v5  ;;  %v3823_v34 = vmax.f32 %v3819_v22, 0.0 }
0x171a   :  { %9944 = vmatmul.mubr.msk.f32.vlgmr.msra.gmra.mxu1 %vm470_vm0, %v3821_v21  ;;  %v12519_v21 = vld [vmem:[%s13477_s21 + $0x18] sm:$0xff] }
0x171b   :  { %v3822_v20 = vmax.f32 %v3818_v33, 0.0  ;;  %9972 = vmatpush3.msra.mxu1 %v4059_v52 }
0x171c   :  { %9973 = vmatprep.subr.mxu1 %v4058_v54 }
0x171d   :  { %9946 = vmatprep.mubr.msk.f32.mxu1 %vm470_vm0, %v3822_v20  ;;  %9974 = vmatpush3.msra.mxu1 %v4058_v54 }
0x171e   :  { %9947 = vmatmul.mubr.msk.f32.gmra.mxu1 %vm470_vm0, %v3823_v34  ;;  %9975 = vmatprep.subr.mxu1 %v4057_v57 }
0x171f   :  { %9976 = vmatpush3.msra.mxu1 %v4057_v57 }
0x1720   :  { %9977 = vmatprep.subr.mxu1 %v4056_v1 }
0x1721   :  { %9978 = vmatpush3.msra.mxu1 %v4056_v1 }
0x17da   :  { %v9945_v36 = vpop.f32.mrf.mxu1 }
0x17db   :  { %v3923_v19 = vadd.f32 %v9945_v36, %v8750_v10 }
0x17dc   :  { %v3917_v39 = vpop.f32.mrf.mxu1 }
0x17dd   :  { %v3918_v40 = vadd.f32 %v8750_v10, %v3917_v39  ;;  %v3937_v46 = vmax.f32 %v3923_v19, 0.0 }
0x17de   :  { %v9948_v24 = vpop.f32.mrf.mxu1 }
0x17df   :  { %v3936_v44 = vmax.f32 %v3918_v40, 0.0  ;;  %v3933_v47 = vadd.f32 %v9948_v24, %v8750_v10 }
0x17e0   :  { %v3927_v49 = vpop.f32.mrf.mxu1 }
0x17e1   :  { %v3928_v30 = vadd.f32 %v8750_v10, %v3927_v49  ;;  %9965 = vmatprep.mubr.msk.f32.mxu0 %vm470_vm0, %v3936_v44  ;;  %v3939_v53 = vmax.f32 %v3933_v47, 0.0 }
0x17e2   :  { %9966 = vmatmul.mubr.msk.f32.vlgmr.msra.gmra.mxu0 %vm470_vm0, %v3937_v46 }
0x17e3   :  { %v3938_v51 = vmax.f32 %v3928_v30, 0.0  ;;  %9986 = vmatpush3.msra.mxu0 %v4160_v50 }
0x17e4   :  { %9987 = vmatprep.subr.mxu0 %v4159_v56 }
0x17e5   :  { %9968 = vmatprep.mubr.msk.f32.mxu0 %vm470_vm0, %v3938_v51  ;;  %9988 = vmatpush3.msra.mxu0 %v4159_v56 }
0x17e6   :  { %9969 = vmatmul.mubr.msk.f32.gmra.mxu0 %vm470_vm0, %v3939_v53  ;;  %9989 = vmatprep.subr.mxu0 %v4158_v58 }
0x17e7   :  { %9990 = vmatpush3.msra.mxu0 %v4158_v58 }
0x17e8   :  { %9991 = vmatprep.subr.mxu0 %v4157_v2 }
0x17e9   :  { %9992 = vmatpush3.msra.mxu0 %v4157_v2 }
0x18a2   :  { %v9967_v7 = vpop.f32.mrf.mxu0 }
0x18a3   :  { %v4039_v8 = vadd.f32 %v9967_v7, %v8755_v4 }
0x18a4   :  { %v4033_v16 = vpop.f32.mrf.mxu0 }
0x18a5   :  { %v4034_v37 = vadd.f32 %v8755_v4, %v4033_v16  ;;  %v12439_v12 = vmul.f32 %v4039_v8, %v11809_v6 }
0x18a6   :  { %v9970_v13 = vpop.f32.mrf.mxu0 }
0x18a7   :  { %v12436_v41 = vmul.f32 %v4034_v37, %v11805_v61  ;;  %v4049_v59 = vadd.f32 %v9970_v13, %v8755_v4 }
0x18a8   :  { %v4043_v42 = vpop.f32.mrf.mxu0 }
0x18a9   :  { %v4044_v60 = vadd.f32 %v8755_v4, %v4043_v42  ;;  %9979 = vmatprep.mubr.msk.f32.mxu1 %vm579_vm1, %v12436_v41  ;;  %9993 = vmatprep.mubr.msk.f32.mxu0 %vm579_vm1, %v12436_v41  ;;  %v12453_v6 = vmul.f32 %v4049_v59, %v11819_v15 }
0x18aa   :  { %9980 = vmatmul.mubr.msk.f32.vlgmr.msra.gmra.mxu1 %vm579_vm1, %v12439_v12  ;;  %9994 = vmatmul.mubr.msk.f32.vlgmr.msra.gmra.mxu0 %vm579_vm1, %v12439_v12 }
0x18ab   :  { %v12450_v61 = vmul.f32 %v4044_v60, %v11807_v0 }
0x18ad   :  { %9982 = vmatprep.mubr.msk.f32.mxu1 %vm579_vm1, %v12450_v61  ;;  %9996 = vmatprep.mubr.msk.f32.mxu0 %vm579_vm1, %v12450_v61 }
0x18ae   :  { %9983 = vmatmul.mubr.msk.f32.gmra.mxu1 %vm579_vm1, %v12453_v6  ;;  %9997 = vmatmul.mubr.msk.f32.gmra.mxu0 %vm579_vm1, %v12453_v6 }
0x196a   :  { %v9981_v14 = vpop.f32.mrf.mxu1  ;;  %v12463_v25 = vpop.f32.mrf.mxu0 }
0x196b   :  { %4409 = vrot.lane.b32.xlu1 %v12463_v25, %s11351_s7  ;;  %v12499_v43 = vmul.f32 0.35355338, %v9981_v14 }
0x196c   :  { %v4138_v0 = vpop.f32.mrf.mxu1  ;;  %v12467_v15 = vpop.f32.mrf.mxu0 }
0x196d   :  { %v12469_v62 = vmul.f32 0.35355338, %v4138_v0 }
0x196e   :  { %v12471_v26 = vpop.f32.mrf.mxu0  ;;  %v9984_v27 = vpop.f32.mrf.mxu1 }
0x196f   :  { %4407 = vrot.lane.b32.xlu1 %v12467_v15, %s11351_s7  ;;  %9999 = vmatprep.subr.msk.mxu1 %vm1153_vm3, %v12471_v26  ;;  %v12507_v48 = vmul.f32 0.35355338, %v9984_v27 }
0x1970   :  { %10007 = vmatprep.mubr.msk.f32.mxu1 %vm1153_vm3, %v12469_v62  ;;  %v12479_v63 = vpop.f32.mrf.mxu0  ;;  %10000 = vmatpush3.xpose.msk.msra.mxu1 %vm1153_vm3, %v12471_v26  ;;  %v4148_v28 = vpop.f32.mrf.mxu1 }
0x1971   :  { %4411 = vrot.lane.b32.xlu0 %v12479_v63, %s11351_s7  ;;  %10001 = vmatprep.subr.msk.mxu1 %vm1153_vm3, %v12479_v63  ;;  %v12501_v45 = vmul.f32 0.35355338, %v4148_v28 }
0x1973   :  { %4413 = vrot.lane.b32.xlu1 %v12471_v26, %s11351_s7 }
0x1974   :  { %10002 = vmatpush3.xpose.msk.msra.mxu1 %vm1153_vm3, %v12479_v63 }
0x1975   :  { %10003 = vmatprep.subr.msk.mxu1 %vm1153_vm3, %v12463_v25 }
0x1978   :  { %10004 = vmatpush3.xpose.msk.msra.mxu1 %vm1153_vm3, %v12463_v25 }
0x1979   :  { %10005 = vmatprep.subr.msk.mxu1 %vm1153_vm3, %v12467_v15 }
0x197c   :  { %10006 = vmatpush3.xpose.msk.msra.mxu1 %vm1153_vm3, %v12467_v15 }
0x197f   :  { %10008 = vmatmul.mubr.msk.f32.vlgmr.msra.gmra.mxu1 %vm1153_vm3, %v12499_v43 }
0x1980   :  { %10010 = vmatprep.mubr.msk.f32.mxu1 %vm1153_vm3, %v12501_v45 }
0x1983   :  { %10011 = vmatmul.mubr.msk.f32.gmra.mxu1 %vm1153_vm3, %v12507_v48 }
0x19dd   :  { %v4410_v55 = vpop.permute.xlu1 %4409 }
0x19e1   :  { %v4408_v29 = vpop.permute.xlu1 %4407 }
0x19e3   :  { %v4412_v31 = vpop.permute.xlu0 %4411 }
0x19e5   :  { %v4414_v23 = vpop.permute.xlu1 %4413 }
0x19e6   :  { %10013 = vmatprep.subr.mxu0 %v4414_v23 }
0x19e7   :  { %10014 = vmatpush3.msra.mxu0 %v4414_v23 }
0x19e8   :  { %10015 = vmatprep.subr.mxu0 %v4412_v31 }
0x19e9   :  { %10016 = vmatpush3.msra.mxu0 %v4412_v31 }
0x19ea   :  { %10017 = vmatprep.subr.mxu0 %v4410_v55 }
0x19eb   :  { %10018 = vmatpush3.msra.mxu0 %v4410_v55 }
0x19ec   :  { %10019 = vmatprep.subr.mxu0 %v4408_v29 }
0x19ed   :  { %10020 = vmatpush3.msra.mxu0 %v4408_v29 }
0x1a3f   :  { %v10009_v32 = vpop.f32.mrf.mxu1 }
0x1a40   :  { %v4350_v5 = vadd.f32 %v10009_v32, %v12512_v3 }
0x1a41   :  { %v4344_v9 = vpop.f32.mrf.mxu1 }
0x1a42   :  { %v4345_v22 = vadd.f32 %v4344_v9, %v12515_v11  ;;  %v4366_v33 = vsel %vm579_vm1, %v4350_v5, -inf }
0x1a43   :  { %4367 = vmax.xlane.f32.xlu1 %v4366_v33  ;;  %v10012_v20 = vpop.f32.mrf.mxu1 }
0x1a44   :  { %v4360_v34 = vadd.f32 %v10012_v20, %v12519_v21  ;;  %v4363_v35 = vsel %vm579_vm1, %v4345_v22, -inf }
0x1a45   :  { %4364 = vmax.xlane.f32.xlu0 %v4363_v35  ;;  %v4354_v38 = vpop.f32.mrf.mxu1 }
0x1a46   :  { %v4355_v18 = vadd.f32 %v4354_v38, %v12526_v17  ;;  %v4372_v10 = vsel %vm579_vm1, %v4360_v34, -inf }
0x1a48   :  { %v4369_v36 = vsel %vm579_vm1, %v4355_v18, -inf }
0x1a49   :  { %4373 = vmax.xlane.f32.xlu0 %v4372_v10 }
0x1a4d   :  { %4370 = vmax.xlane.f32.xlu0 %v4369_v36 }
0x1a54   :  { %4528 = vrot.lane.b32.xlu1 %v12479_v63, %s11352_s10 }
0x1a63   :  { %4530 = vrot.lane.b32.xlu0 %v12471_v26, %s11352_s10 }
0x1acc   :  { %v4368_v19 = vpop.xlane.xlu1 %4367 }
0x1acd   :  { %v4376_v39 = vsub.f32 %v4350_v5, %v4368_v19 }
0x1ace   :  { %v4365_v40 = vpop.xlane.xlu0 %4364 }
0x1acf   :  { %v4381_v24 = vmul.f32 1.442695, %v4376_v39  ;;  %v4375_v44 = vsub.f32 %v4345_v22, %v4365_v40 }
0x1ad0   :  { %v4529_v8 = vpop.permute.xlu1 %4528 }
0x1ad1   :  { %10718 = vpow2.f32 %v4381_v24  ;;  %v4379_v46 = vmul.f32 1.442695, %v4375_v44 }
0x1ad2   :  { %v4374_v47 = vpop.xlane.xlu0 %4373 }
0x1ad3   :  { %10720 = vpow2.f32 %v4379_v46  ;;  %v4378_v54 = vsub.f32 %v4360_v34, %v4374_v47 }
0x1ad5   :  { %v4385_v57 = vmul.f32 1.442695, %v4378_v54 }
0x1ad6   :  { %v4371_v49 = vpop.xlane.xlu0 %4370 }
0x1ad7   :  { %v4377_v56 = vsub.f32 %v4355_v18, %v4371_v49  ;;  %10722 = vpow2.f32 %v4385_v57 }
0x1ad9   :  { %v4383_v58 = vmul.f32 1.442695, %v4377_v56 }
0x1ada   :  { %v4531_v30 = vpop.permute.xlu0 %4530 }
0x1adb   :  { %10027 = vmatprep.subr.msk.mxu0 %vm1153_vm3, %v4531_v30  ;;  %10724 = vpow2.f32 %v4383_v58 }
0x1ade   :  { %v10719_v51 = vpop.eup %10718 }
0x1adf   :  { %v4390_v53 = vsel %vm579_vm1, %v10719_v51, 0.0 }
0x1ae0   :  { %v10721_v52 = vpop.eup %10720  ;;  %4391 = vadd.xlane.f32.xlu0 %v4390_v53 }
0x1ae1   :  { %v4387_v50 = vsel %vm579_vm1, %v10721_v52, 0.0 }
0x1ae2   :  { %4388 = vadd.xlane.f32.xlu1 %v4387_v50 }
0x1ae4   :  { %v10723_v1 = vpop.eup %10722 }
0x1ae5   :  { %v4396_v4 = vsel %vm579_vm1, %v10723_v1, 0.0 }
0x1ae8   :  { %v10725_v2 = vpop.eup %10724 }
0x1ae9   :  { %v4393_v7 = vsel %vm579_vm1, %v10725_v2, 0.0 }
0x1af3   :  { %4524 = vrot.lane.b32.xlu1 %v12467_v15, %s11352_s10 }
0x1af6   :  { %4526 = vrot.lane.b32.xlu0 %v12463_v25, %s11352_s10 }
0x1b15   :  { %4397 = vadd.xlane.f32.xlu0 %v4396_v4 }
0x1b17   :  { %4394 = vadd.xlane.f32.xlu1 %v4393_v7 }
0x1b28   :  { %4518 = vrot.lane.b32.xlu1 %v12499_v43, %s11352_s10 }
0x1b2b   :  { %4516 = vrot.lane.b32.xlu0 %v12469_v62, %s11352_s10 }
0x1b2c   :  { %4522 = vrot.lane.b32.xlu1 %v12507_v48, %s11352_s10 }
0x1b2f   :  { %4520 = vrot.lane.b32.xlu0 %v12501_v45, %s11352_s10 }
0x1b69   :  { %v4392_v16 = vpop.xlane.xlu0 %4391 }
0x1b6a   :  { %10726 = vrcp.f32 %v4392_v16 }
0x1b6b   :  { %v4389_v37 = vpop.xlane.xlu1 %4388 }
0x1b6c   :  { %10728 = vrcp.f32 %v4389_v37 }
0x1b6d   :  { %v4527_v14 = vpop.permute.xlu0 %4526 }
0x1b6f   :  { %v4525_v0 = vpop.permute.xlu1 %4524 }
0x1b77   :  { %v10727_v13 = vpop.eup %10726 }
0x1b78   :  { %v4404_v60 = vmul.f32 %v10727_v13, %v10719_v51 }
0x1b79   :  { %v10729_v59 = vpop.eup %10728 }
0x1b7a   :  { %v4403_v42 = vmul.f32 %v10729_v59, %v10721_v52 }
0x1b7c   :  { %10021 = vmatprep.mubr.msk.f32.mxu0 %vm579_vm1, %v4403_v42 }
0x1b7d   :  { %10022 = vmatmul.mubr.msk.f32.vlgmr.msra.gmra.mxu0 %vm579_vm1, %v4404_v60 }
0x1b7e   :  { %10028 = vmatpush3.xpose.msk.msra.mxu0 %vm1153_vm3, %v4531_v30 }
0x1b7f   :  { %10029 = vmatprep.subr.msk.mxu0 %vm1153_vm3, %v4529_v8 }
0x1b82   :  { %10030 = vmatpush3.xpose.msk.msra.mxu0 %vm1153_vm3, %v4529_v8 }
0x1b83   :  { %10031 = vmatprep.subr.msk.mxu0 %vm1153_vm3, %v4527_v14 }
0x1b86   :  { %10032 = vmatpush3.xpose.msk.msra.mxu0 %vm1153_vm3, %v4527_v14 }
0x1b87   :  { %10033 = vmatprep.subr.msk.mxu0 %vm1153_vm3, %v4525_v0 }
0x1b8a   :  { %10034 = vmatpush3.xpose.msk.msra.mxu0 %vm1153_vm3, %v4525_v0 }
0x1b9e   :  { %v4398_v27 = vpop.xlane.xlu0 %4397 }
0x1b9f   :  { %10730 = vrcp.f32 %v4398_v27 }
0x1ba0   :  { %v4395_v28 = vpop.xlane.xlu1 %4394 }
0x1ba1   :  { %10732 = vrcp.f32 %v4395_v28 }
0x1ba2   :  { %v4517_v31 = vpop.permute.xlu0 %4516 }
0x1ba4   :  { %v4519_v5 = vpop.permute.xlu1 %4518 }
0x1ba6   :  { %v4521_v9 = vpop.permute.xlu0 %4520 }
0x1ba8   :  { %v4523_v22 = vpop.permute.xlu1 %4522 }
0x1bac   :  { %v10731_v55 = vpop.eup %10730 }
0x1bad   :  { %v4406_v32 = vmul.f32 %v10731_v55, %v10723_v1 }
0x1bae   :  { %v10733_v29 = vpop.eup %10732 }
0x1baf   :  { %v4405_v23 = vmul.f32 %v10733_v29, %v10725_v2 }
0x1bb1   :  { %10024 = vmatprep.mubr.msk.f32.mxu0 %vm579_vm1, %v4405_v23 }
0x1bb2   :  { %10025 = vmatmul.mubr.msk.f32.gmra.mxu0 %vm579_vm1, %v4406_v32 }
0x1bb3   :  { %10035 = vmatprep.mubr.msk.f32.mxu0 %vm1153_vm3, %v4517_v31  ;;  %v4246_v31 = vld [vmem:[%s13478_s2] sm:$0xff] }
0x1bb6   :  { %10036 = vmatmul.mubr.msk.f32.vlgmr.msra.gmra.mxu0 %vm1153_vm3, %v4519_v5  ;;  %v4247_v5 = vld [vmem:[%s13478_s2 + $0x8] sm:$0xff] }
0x1bb7   :  { %10038 = vmatprep.mubr.msk.f32.mxu0 %vm1153_vm3, %v4521_v9 }
0x1bba   :  { %10039 = vmatmul.mubr.msk.f32.gmra.mxu0 %vm1153_vm3, %v4523_v22 }
0x1c3d   :  { %v12567_v33 = vpop.f32.mrf.mxu0 }
0x1c3f   :  { %v12569_v20 = vpop.f32.mrf.mxu0 }
0x1c72   :  { %v12571_v34 = vpop.f32.mrf.mxu0 }
0x1c74   :  { %v12573_v35 = vpop.f32.mrf.mxu0 }
0x1c76   :  { %v10037_v38 = vpop.f32.mrf.mxu0 }
0x1c77   :  { %v4620_v18 = vadd.f32 %v10037_v38, %v12512_v3 }
0x1c78   :  { %v4614_v10 = vpop.f32.mrf.mxu0 }
0x1c79   :  { %v4615_v36 = vadd.f32 %v4614_v10, %v12515_v11  ;;  %v4636_v19 = vsel %vm579_vm1, %v4620_v18, -inf }
0x1c7a   :  { %4637 = vmax.xlane.f32.xlu1 %v4636_v19  ;;  %v10040_v39 = vpop.f32.mrf.mxu0 }
0x1c7b   :  { %v4633_v40 = vsel %vm579_vm1, %v4615_v36, -inf  ;;  %v4630_v46 = vadd.f32 %v10040_v39, %v12519_v21 }
0x1c7c   :  { %4634 = vmax.xlane.f32.xlu0 %v4633_v40  ;;  %v4624_v24 = vpop.f32.mrf.mxu0 }
0x1c7d   :  { %v4625_v44 = vadd.f32 %v4624_v24, %v12526_v17  ;;  %v4642_v49 = vsel %vm579_vm1, %v4630_v46, -inf }
0x1c7f   :  { %v4639_v47 = vsel %vm579_vm1, %v4625_v44, -inf }
0x1c80   :  { %4640 = vmax.xlane.f32.xlu0 %v4639_v47 }
0x1c84   :  { %4643 = vmax.xlane.f32.xlu0 %v4642_v49 }
0x1c8b   :  { %4683 = vrot.lane.b32.xlu1 %v12471_v26, %s11353_s6 }
0x1d03   :  { %v4638_v30 = vpop.xlane.xlu1 %4637 }
0x1d04   :  { %v4646_v51 = vsub.f32 %v4620_v18, %v4638_v30 }
0x1d05   :  { %v4635_v53 = vpop.xlane.xlu0 %4634 }
0x1d06   :  { %v4651_v52 = vmul.f32 1.442695, %v4646_v51  ;;  %v4645_v50 = vsub.f32 %v4615_v36, %v4635_v53 }
0x1d07   :  { %v4684_v54 = vpop.permute.xlu1 %4683 }
0x1d08   :  { %10734 = vpow2.f32 %v4651_v52  ;;  %v4649_v56 = vmul.f32 1.442695, %v4645_v50  ;;  %10041 = vmatprep.subr.mxu0 %v4684_v54  ;;  %10517 = vmatprep.subr.mxu1 %v4684_v54 }
0x1d09   :  { %10042 = vmatpush3.msra.mxu0 %v4684_v54  ;;  %10521 = vmatpush3.msra.mxu1 %v4684_v54  ;;  %v4641_v57 = vpop.xlane.xlu0 %4640 }
0x1d0a   :  { %10736 = vpow2.f32 %v4649_v56  ;;  %v4647_v59 = vsub.f32 %v4625_v44, %v4641_v57 }
0x1d0c   :  { %v4653_v42 = vmul.f32 1.442695, %v4647_v59 }
0x1d0d   :  { %v4644_v58 = vpop.xlane.xlu0 %4643 }
0x1d0e   :  { %v4648_v1 = vsub.f32 %v4630_v46, %v4644_v58 }
0x1d10   :  { %v4655_v2 = vmul.f32 1.442695, %v4648_v1 }
0x1d12   :  { %10738 = vpow2.f32 %v4655_v2 }
0x1d13   :  { %10740 = vpow2.f32 %v4653_v42 }
0x1d15   :  { %v10735_v4 = vpop.eup %10734 }
0x1d16   :  { %v4660_v7 = vsel %vm579_vm1, %v10735_v4, 0.0 }
0x1d17   :  { %v10737_v8 = vpop.eup %10736  ;;  %4661 = vadd.xlane.f32.xlu0 %v4660_v7 }
0x1d18   :  { %v4657_v16 = vsel %vm579_vm1, %v10737_v8, 0.0 }
0x1d19   :  { %4658 = vadd.xlane.f32.xlu1 %v4657_v16 }
0x1d1f   :  { %v12587_v37 = vpop.eup %10738 }
0x1d20   :  { %v4666_v13 = vsel %vm579_vm1, %v12587_v37, 0.0  ;;  %v10741_v60 = vpop.eup %10740 }
0x1d21   :  { %4667 = vadd.xlane.f32.xlu0 %v4666_v13  ;;  %v4663_v14 = vsel %vm579_vm1, %v10741_v60, 0.0 }
0x1d2a   :  { %4679 = vrot.lane.b32.xlu1 %v12463_v25, %s11353_s6 }
0x1d37   :  { %4681 = vrot.lane.b32.xlu0 %v12479_v63, %s11353_s6 }
0x1d3b   :  { %4994 = vrot.lane.b32.xlu0 %v12471_v26, %s11354_s15 }
0x1d3f   :  { %4990 = vrot.lane.b32.xlu0 %v12463_v25, %s11354_s15 }
0x1d43   :  { %4980 = vrot.lane.b32.xlu0 %v12469_v62, %s11354_s15 }
0x1d47   :  { %4984 = vrot.lane.b32.xlu0 %v12501_v45, %s11354_s15 }
0x1d4b   :  { %5365 = vrot.lane.b32.xlu0 %v12471_v26, %s11356_s5 }
0x1d4e   :  { %4664 = vadd.xlane.f32.xlu1 %v4663_v14 }
0x1d4f   :  { %5361 = vrot.lane.b32.xlu0 %v12463_v25, %s11356_s5 }
0x1d53   :  { %5351 = vrot.lane.b32.xlu0 %v12469_v62, %s11356_s5 }
0x1d57   :  { %5355 = vrot.lane.b32.xlu0 %v12501_v45, %s11356_s5 }
0x1d5f   :  { %4677 = vrot.lane.b32.xlu1 %v12467_v15, %s11353_s6 }
0x1d63   :  { %4992 = vrot.lane.b32.xlu1 %v12479_v63, %s11354_s15 }
0x1d67   :  { %4988 = vrot.lane.b32.xlu1 %v12467_v15, %s11354_s15 }
0x1d6b   :  { %4982 = vrot.lane.b32.xlu1 %v12499_v43, %s11354_s15 }
0x1d6f   :  { %4986 = vrot.lane.b32.xlu1 %v12507_v48, %s11354_s15 }
0x1d73   :  { %5363 = vrot.lane.b32.xlu1 %v12479_v63, %s11356_s5 }
0x1d77   :  { %5359 = vrot.lane.b32.xlu1 %v12467_v15, %s11356_s5 }
0x1d7b   :  { %5353 = vrot.lane.b32.xlu1 %v12499_v43, %s11356_s5 }
0x1d7f   :  { %5357 = vrot.lane.b32.xlu1 %v12507_v48, %s11356_s5 }
0x1da0   :  { %v4662_v45 = vpop.xlane.xlu0 %4661 }
0x1da2   :  { %v4659_v62 = vpop.xlane.xlu1 %4658 }
0x1da3   :  { %10742 = vrcp.f32 %v4659_v62 }
0x1da4   :  { %10744 = vrcp.f32 %v4662_v45 }
0x1da6   :  { %v4680_v55 = vpop.permute.xlu1 %4679 }
0x1daa   :  { %v4668_v0 = vpop.xlane.xlu0 %4667 }
0x1dab   :  { %10746 = vrcp.f32 %v4668_v0 }
0x1dae   :  { %v4682_v27 = vpop.permute.xlu0 %4681 }
0x1daf   :  { %10043 = vmatprep.subr.mxu0 %v4682_v27  ;;  %10518 = vmatprep.subr.mxu1 %v4682_v27 }
0x1db0   :  { %v10743_v28 = vpop.eup %10742  ;;  %10044 = vmatpush3.msra.mxu0 %v4682_v27  ;;  %10522 = vmatpush3.msra.mxu1 %v4682_v27 }
0x1db1   :  { %10045 = vmatprep.subr.mxu0 %v4680_v55  ;;  %10519 = vmatprep.subr.mxu1 %v4680_v55  ;;  %v4673_v29 = vmul.f32 %v10743_v28, %v10737_v8  ;;  %v10745_v48 = vpop.eup %10744 }
0x1db2   :  { %10046 = vmatpush3.msra.mxu0 %v4680_v55  ;;  %10523 = vmatpush3.msra.mxu1 %v4680_v55  ;;  %v4674_v32 = vmul.f32 %v10745_v48, %v10735_v4 }
0x1db3   :  { %10049 = vmatprep.mubr.msk.f32.mxu0 %vm579_vm1, %v4673_v29 }
0x1db8   :  { %v10747_v9 = vpop.eup %10746 }
0x1db9   :  { %v4676_v18 = vmul.f32 %v10747_v9, %v12587_v37 }
0x1dd7   :  { %v4665_v43 = vpop.xlane.xlu1 %4664 }
0x1dd8   :  { %10748 = vrcp.f32 %v4665_v43 }
0x1ddb   :  { %v4678_v23 = vpop.permute.xlu1 %4677 }
0x1ddc   :  { %10047 = vmatprep.subr.mxu0 %v4678_v23  ;;  %10520 = vmatprep.subr.mxu1 %v4678_v23 }
0x1ddd   :  { %10048 = vmatpush3.msra.mxu0 %v4678_v23  ;;  %10524 = vmatpush3.msra.mxu1 %v4678_v23 }
0x1dde   :  { %10050 = vmatmul.mubr.msk.f32.vlgmr.msra.gmra.mxu0 %vm579_vm1, %v4674_v32  ;;  %10063 = vmatprep.subr.mxu0 %v4246_v31 }
0x1ddf   :  { %10065 = vmatprep.mubr.msk.f32.mxu0 %vm1153_vm3, %v12569_v20  ;;  %10064 = vmatpush3.msra.mxu0 %v4246_v31  ;;  %v4995_v20 = vpop.permute.xlu0 %4994  ;;  %v4993_v10 = vpop.permute.xlu1 %4992 }
0x1de0   :  { %10055 = vmatprep.subr.mxu1 %v4247_v5 }
0x1de2   :  { %10066 = vmatmul.mubr.msk.f32.vlgmr.msra.gmra.mxu0 %vm1153_vm3, %v12567_v33 }
0x1de3   :  { %10068 = vmatprep.mubr.msk.f32.mxu0 %vm1153_vm3, %v12573_v35  ;;  %v4991_v33 = vpop.permute.xlu0 %4990  ;;  %v4989_v39 = vpop.permute.xlu1 %4988 }
0x1de5   :  { %v10749_v22 = vpop.eup %10748 }
0x1de6   :  { %10069 = vmatmul.mubr.msk.f32.gmra.mxu0 %vm1153_vm3, %v12571_v34  ;;  %v4675_v38 = vmul.f32 %v10749_v22, %v10741_v60 }
0x1de7   :  { %v4981_v36 = vpop.permute.xlu0 %4980  ;;  %v4983_v40 = vpop.permute.xlu1 %4982 }
0x1de8   :  { %10052 = vmatprep.mubr.msk.f32.mxu1 %vm579_vm1, %v4675_v38 }
0x1de9   :  { %10053 = vmatmul.mubr.msk.f32.vlgmr.msra.gmra.mxu1 %vm579_vm1, %v4676_v18 }
0x1dea   :  { %10056 = vmatpush3.msra.mxu1 %v4247_v5 }
0x1deb   :  { %10071 = vmatprep.subr.msk.mxu1 %vm1153_vm3, %v4995_v20  ;;  %v4985_v34 = vpop.permute.xlu0 %4984  ;;  %v4987_v47 = vpop.permute.xlu1 %4986 }
0x1def   :  { %v5366_v44 = vpop.permute.xlu0 %5365  ;;  %v5364_v30 = vpop.permute.xlu1 %5363 }
0x1df3   :  { %v5362_v49 = vpop.permute.xlu0 %5361  ;;  %v5360_v53 = vpop.permute.xlu1 %5359 }
0x1df7   :  { %v5352_v51 = vpop.permute.xlu0 %5351  ;;  %v5354_v52 = vpop.permute.xlu1 %5353 }
0x1dfb   :  { %v5356_v50 = vpop.permute.xlu0 %5355  ;;  %v5358_v54 = vpop.permute.xlu1 %5357 }
0x1e9e   :  { %v10051_v35 = vpop.f32.mrf.mxu0 }
0x1ea0   :  { %v4767_v19 = vpop.f32.mrf.mxu0 }
0x1ea1   :  { %10057 = vmatprep.mubr.msk.f32.mxu1 %vm1153_vm3, %v4767_v19 }
0x1ea2   :  { %10058 = vmatmul.mubr.msk.f32.vlgmr.msra.gmra.mxu1 %vm1153_vm3, %v10051_v35 }
0x1ea3   :  { %10072 = vmatpush3.xpose.msk.msra.mxu1 %vm1153_vm3, %v4995_v20 }
0x1ea4   :  { %10073 = vmatprep.subr.msk.mxu1 %vm1153_vm3, %v4993_v10 }
0x1ea7   :  { %10074 = vmatpush3.xpose.msk.msra.mxu1 %vm1153_vm3, %v4993_v10 }
0x1ea8   :  { %10075 = vmatprep.subr.msk.mxu1 %vm1153_vm3, %v4991_v33 }
0x1ea9   :  { %v10054_v24 = vpop.f32.mrf.mxu1 }
0x1eab   :  { %10076 = vmatpush3.xpose.msk.msra.mxu1 %vm1153_vm3, %v4991_v33  ;;  %v4777_v46 = vpop.f32.mrf.mxu1 }
0x1eac   :  { %10077 = vmatprep.subr.msk.mxu1 %vm1153_vm3, %v4989_v39  ;;  %10060 = vmatprep.mubr.msk.f32.mxu1 %vm1153_vm3, %v4777_v46 }
0x1ead   :  { %10061 = vmatmul.mubr.msk.f32.gmra.mxu1 %vm1153_vm3, %v10054_v24 }
0x1eae   :  { %10079 = vmatprep.mubr.msk.f32.mxu1 %vm1153_vm3, %v4981_v36 }
0x1eaf   :  { %10078 = vmatpush3.xpose.msk.msra.mxu1 %vm1153_vm3, %v4989_v39 }
0x1eb0   :  { %10107 = vmatprep.subr.msk.mxu1 %vm1153_vm3, %v5366_v44 }
0x1eb2   :  { %10080 = vmatmul.mubr.msk.f32.vlgmr.msra.gmra.mxu1 %vm1153_vm3, %v4983_v40 }
0x1eb3   :  { %10082 = vmatprep.mubr.msk.f32.mxu1 %vm1153_vm3, %v4985_v34  ;;  %10108 = vmatpush3.xpose.msk.msra.mxu1 %vm1153_vm3, %v5366_v44 }
0x1eb4   :  { %10109 = vmatprep.subr.msk.mxu1 %vm1153_vm3, %v5364_v30 }
0x1eb6   :  { %10083 = vmatmul.mubr.msk.f32.gmra.mxu1 %vm1153_vm3, %v4987_v47 }
0x1eb7   :  { %10110 = vmatpush3.xpose.msk.msra.mxu1 %vm1153_vm3, %v5364_v30  ;;  %10115 = vmatprep.mubr.msk.f32.mxu1 %vm1153_vm3, %v5352_v51 }
0x1eb8   :  { %10111 = vmatprep.subr.msk.mxu1 %vm1153_vm3, %v5362_v49 }
0x1ebb   :  { %10112 = vmatpush3.xpose.msk.msra.mxu1 %vm1153_vm3, %v5362_v49 }
0x1ebc   :  { %10113 = vmatprep.subr.msk.mxu1 %vm1153_vm3, %v5360_v53 }
0x1ebf   :  { %10114 = vmatpush3.xpose.msk.msra.mxu1 %vm1153_vm3, %v5360_v53 }
0x1ec2   :  { %10116 = vmatmul.mubr.msk.f32.vlgmr.msra.gmra.mxu1 %vm1153_vm3, %v5354_v52 }
0x1ec3   :  { %10118 = vmatprep.mubr.msk.f32.mxu1 %vm1153_vm3, %v5356_v50 }
0x1ec6   :  { %10119 = vmatmul.mubr.msk.f32.gmra.mxu1 %vm1153_vm3, %v5358_v54 }
0x1f62   :  { %v12673_v56 = vpop.f32.mrf.mxu1 }
0x1f64   :  { %v12675_v57 = vpop.f32.mrf.mxu1 }
0x1f6d   :  { %v12677_v58 = vpop.f32.mrf.mxu1 }
0x1f6f   :  { %v12679_v1 = vpop.f32.mrf.mxu1 }
0x1f72   :  { %v10081_v2 = vpop.f32.mrf.mxu1 }
0x1f73   :  { %v5084_v4 = vadd.f32 %v10081_v2, %v12512_v3 }
0x1f74   :  { %v5078_v7 = vpop.f32.mrf.mxu1 }
0x1f75   :  { %v5079_v8 = vadd.f32 %v5078_v7, %v12515_v11  ;;  %v5100_v16 = vsel %vm579_vm1, %v5084_v4, -inf  ;;  %v4248_v7 = vld [vmem:[%s13478_s2 + $0x10] sm:$0xff] }
0x1f76   :  { %5101 = vmax.xlane.f32.xlu1 %v5100_v16  ;;  %v10084_v37 = vpop.f32.mrf.mxu1 }
0x1f77   :  { %v5097_v13 = vsel %vm579_vm1, %v5079_v8, -inf  ;;  %v5094_v60 = vadd.f32 %v10084_v37, %v12519_v21 }
0x1f78   :  { %5098 = vmax.xlane.f32.xlu0 %v5097_v13  ;;  %v5088_v59 = vpop.f32.mrf.mxu1 }
0x1f79   :  { %v5089_v42 = vadd.f32 %v5088_v59, %v12526_v17  ;;  %v5106_v62 = vsel %vm579_vm1, %v5094_v60, -inf }
0x1f7b   :  { %v5103_v14 = vsel %vm579_vm1, %v5089_v42, -inf }
0x1f7c   :  { %5104 = vmax.xlane.f32.xlu0 %v5103_v14 }
0x1f80   :  { %5107 = vmax.xlane.f32.xlu0 %v5106_v62 }
0x1f82   :  { %v10117_v36 = vpop.f32.mrf.mxu1 }
0x1f84   :  { %v5449_v19 = vpop.f32.mrf.mxu1 }
0x1f85   :  { %v5450_v40 = vadd.f32 %v5449_v19, %v12515_v11  ;;  %v5455_v11 = vadd.f32 %v10117_v36, %v12512_v3 }
0x1f86   :  { %v10120_v34 = vpop.f32.mrf.mxu1 }
0x1f87   :  { %5147 = vrot.lane.b32.xlu1 %v12471_v26, %s11355_s14  ;;  %v5468_v46 = vsel %vm579_vm1, %v5450_v40, -inf  ;;  %v5465_v47 = vadd.f32 %v10120_v34, %v12519_v21 }
0x1f88   :  { %v5459_v24 = vpop.f32.mrf.mxu1 }
0x1f89   :  { %v12701_v44 = vadd.f32 %v5459_v24, %v12526_v17  ;;  %v5477_v30 = vsel %vm579_vm1, %v5465_v47, -inf  ;;  %v5471_v17 = vsel %vm579_vm1, %v5455_v11, -inf }
0x1f8b   :  { %v5474_v49 = vsel %vm579_vm1, %v12701_v44, -inf }
0x1fff   :  { %v5102_v45 = vpop.xlane.xlu1 %5101 }
0x2000   :  { %v5110_v0 = vsub.f32 %v5084_v4, %v5102_v45 }
0x2001   :  { %v5099_v27 = vpop.xlane.xlu0 %5098 }
0x2002   :  { %v5115_v28 = vmul.f32 1.442695, %v5110_v0  ;;  %v5109_v55 = vsub.f32 %v5079_v8, %v5099_v27 }
0x2003   :  { %v5148_v29 = vpop.permute.xlu1 %5147 }
0x2004   :  { %10750 = vpow2.f32 %v5115_v28  ;;  %v5113_v43 = vmul.f32 1.442695, %v5109_v55  ;;  %10085 = vmatprep.subr.mxu0 %v5148_v29 }
0x2005   :  { %10086 = vmatpush3.msra.mxu0 %v5148_v29  ;;  %v5105_v48 = vpop.xlane.xlu0 %5104 }
0x2006   :  { %10752 = vpow2.f32 %v5113_v43  ;;  %v5111_v33 = vsub.f32 %v5089_v42, %v5105_v48 }
0x2008   :  { %v5117_v10 = vmul.f32 1.442695, %v5111_v33 }
0x2009   :  { %v5108_v23 = vpop.xlane.xlu0 %5107 }
0x200a   :  { %v5112_v31 = vsub.f32 %v5094_v60, %v5108_v23 }
0x200c   :  { %v5119_v32 = vmul.f32 1.442695, %v5112_v31 }
0x200e   :  { %10754 = vpow2.f32 %v5119_v32 }
0x200f   :  { %10756 = vpow2.f32 %v5117_v10 }
0x2011   :  { %v10751_v5 = vpop.eup %10750 }
0x2012   :  { %v5124_v9 = vsel %vm579_vm1, %v10751_v5, 0.0 }
0x2013   :  { %v10753_v22 = vpop.eup %10752  ;;  %5125 = vadd.xlane.f32.xlu0 %v5124_v9 }
0x2014   :  { %v5121_v38 = vsel %vm579_vm1, %v10753_v22, 0.0 }
0x2015   :  { %5122 = vadd.xlane.f32.xlu1 %v5121_v38 }
0x201b   :  { %v10755_v18 = vpop.eup %10754 }
0x201c   :  { %v5130_v20 = vsel %vm579_vm1, %v10755_v18, 0.0  ;;  %v10757_v35 = vpop.eup %10756 }
0x201d   :  { %5131 = vadd.xlane.f32.xlu0 %v5130_v20  ;;  %v5127_v39 = vsel %vm579_vm1, %v10757_v35, 0.0  ;;  %v10067_v20 = vpop.f32.mrf.mxu0 }
0x201f   :  { %v4961_v33 = vpop.f32.mrf.mxu0 }
0x2021   :  { %v10070_v10 = vpop.f32.mrf.mxu0 }
0x2026   :  { %5143 = vrot.lane.b32.xlu1 %v12463_v25, %s11355_s14 }
0x2033   :  { %5145 = vrot.lane.b32.xlu0 %v12479_v63, %s11355_s14 }
0x204a   :  { %5128 = vadd.xlane.f32.xlu1 %v5127_v39 }
0x2052   :  { %5469 = vmax.xlane.f32.xlu0 %v5468_v46 }
0x2056   :  { %5475 = vmax.xlane.f32.xlu0 %v5474_v49 }
0x205a   :  { %5478 = vmax.xlane.f32.xlu0 %v5477_v30 }
0x205b   :  { %5141 = vrot.lane.b32.xlu1 %v12467_v15, %s11355_s14 }
0x207f   :  { %5472 = vmax.xlane.f32.xlu1 %v5471_v17 }
0x2090   :  { %5518 = vrot.lane.b32.xlu1 %v12471_v26, %s11357_s27 }
0x209c   :  { %v5126_v21 = vpop.xlane.xlu0 %5125 }
0x209e   :  { %v5123_v51 = vpop.xlane.xlu1 %5122 }
0x209f   :  { %10758 = vrcp.f32 %v5123_v51 }
0x20a0   :  { %10760 = vrcp.f32 %v5126_v21 }
0x20a2   :  { %v5144_v54 = vpop.permute.xlu1 %5143 }
0x20a6   :  { %v5132_v53 = vpop.xlane.xlu0 %5131 }
0x20a7   :  { %10762 = vrcp.f32 %v5132_v53 }
0x20aa   :  { %v5146_v52 = vpop.permute.xlu0 %5145 }
0x20ab   :  { %10087 = vmatprep.subr.mxu0 %v5146_v52 }
0x20ac   :  { %v10759_v50 = vpop.eup %10758  ;;  %10088 = vmatpush3.msra.mxu0 %v5146_v52 }
0x20ad   :  { %10089 = vmatprep.subr.mxu0 %v5144_v54  ;;  %v5137_v2 = vmul.f32 %v10759_v50, %v10753_v22  ;;  %v10761_v26 = vpop.eup %10760  ;;  %v4249_v50 = vld [vmem:[%s13478_s2 + $0x18] sm:$0xff] }
0x20ae   :  { %10090 = vmatpush3.msra.mxu0 %v5144_v54  ;;  %v5138_v8 = vmul.f32 %v10761_v26, %v10751_v5  ;;  %v4967_v54 = vadd.f32 %v10067_v20, %v12673_v56 }
0x20af   :  { %10093 = vmatprep.mubr.msk.f32.mxu0 %vm579_vm1, %v5137_v2 }
0x20b4   :  { %v10763_v59 = vpop.eup %10762 }
0x20b5   :  { %v5140_v14 = vmul.f32 %v10763_v59, %v10755_v18 }
0x20d3   :  { %v5129_v3 = vpop.xlane.xlu1 %5128 }
0x20d4   :  { %10764 = vrcp.f32 %v5129_v3  ;;  %v4962_v3 = vadd.f32 %v4961_v33, %v12675_v57 }
0x20d7   :  { %v5142_v4 = vpop.permute.xlu1 %5141 }
0x20d8   :  { %10091 = vmatprep.subr.mxu0 %v5142_v4 }
0x20d9   :  { %10092 = vmatpush3.msra.mxu0 %v5142_v4 }
0x20da   :  { %10094 = vmatmul.mubr.msk.f32.vlgmr.msra.gmra.mxu0 %vm579_vm1, %v5138_v8  ;;  %10099 = vmatprep.subr.mxu0 %v4248_v7  ;;  %v4977_v8 = vadd.f32 %v10070_v10, %v12677_v58 }
0x20db   :  { %v5470_v16 = vpop.xlane.xlu0 %5469  ;;  %10100 = vmatpush3.msra.mxu0 %v4248_v7 }
0x20dc   :  { %v5480_v37 = vsub.f32 %v5450_v40, %v5470_v16 }
0x20de   :  { %v5484_v13 = vmul.f32 1.442695, %v5480_v37 }
0x20df   :  { %v5476_v0 = vpop.xlane.xlu0 %5475 }
0x20e0   :  { %10766 = vpow2.f32 %v5484_v13  ;;  %v5482_v43 = vsub.f32 %v12701_v44, %v5476_v0 }
0x20e1   :  { %v10765_v42 = vpop.eup %10764 }
0x20e2   :  { %v5139_v60 = vmul.f32 %v10765_v42, %v10757_v35  ;;  %v5488_v32 = vmul.f32 1.442695, %v5482_v43  ;;  %v4971_v35 = vpop.f32.mrf.mxu0 }
0x20e3   :  { %v5479_v27 = vpop.xlane.xlu0 %5478  ;;  %v4972_v37 = vadd.f32 %v4971_v35, %v12679_v1 }
0x20e4   :  { %10096 = vmatprep.mubr.msk.f32.mxu0 %vm579_vm1, %v5139_v60  ;;  %v5483_v28 = vsub.f32 %v5465_v47, %v5479_v27 }
0x20e5   :  { %10097 = vmatmul.mubr.msk.f32.gmra.mxu0 %vm579_vm1, %v5140_v14 }
0x20e6   :  { %v5490_v48 = vmul.f32 1.442695, %v5483_v28 }
0x20ed   :  { %v10767_v62 = vpop.eup %10766 }
0x20ee   :  { %v5492_v45 = vsel %vm579_vm1, %v10767_v62, 0.0 }
0x20ef   :  { %5493 = vadd.xlane.f32.xlu1 %v5492_v45 }
0x2100   :  { %5514 = vrot.lane.b32.xlu1 %v12463_v25, %s11357_s27 }
0x2108   :  { %v5473_v55 = vpop.xlane.xlu1 %5472 }
0x2109   :  { %v5481_v29 = vsub.f32 %v5455_v11, %v5473_v55 }
0x210b   :  { %v5486_v23 = vmul.f32 1.442695, %v5481_v29 }
0x210c   :  { %v5519_v31 = vpop.permute.xlu1 %5518 }
0x210d   :  { %10768 = vpow2.f32 %v5486_v23  ;;  %10121 = vmatprep.subr.mxu0 %v5519_v31 }
0x210e   :  { %10770 = vpow2.f32 %v5490_v48 }
0x210f   :  { %10772 = vpow2.f32 %v5488_v32 }
0x211a   :  { %v10769_v5 = vpop.eup %10768 }
0x211b   :  { %v5495_v9 = vsel %vm579_vm1, %v10769_v5, 0.0  ;;  %v10771_v22 = vpop.eup %10770 }
0x211c   :  { %5496 = vadd.xlane.f32.xlu0 %v5495_v9  ;;  %v5501_v25 = vsel %vm579_vm1, %v10771_v22, 0.0  ;;  %v10773_v38 = vpop.eup %10772 }
0x211d   :  { %v5498_v18 = vsel %vm579_vm1, %v10773_v38, 0.0 }
0x2120   :  { %5502 = vadd.xlane.f32.xlu0 %v5501_v25 }
0x2124   :  { %5499 = vadd.xlane.f32.xlu1 %v5498_v18 }
0x2135   :  { %5512 = vrot.lane.b32.xlu1 %v12467_v15, %s11357_s27 }
0x2136   :  { %5516 = vrot.lane.b32.xlu0 %v12479_v63, %s11357_s27 }
0x2178   :  { %v5494_v36 = vpop.xlane.xlu1 %5493 }
0x2179   :  { %10774 = vrcp.f32 %v5494_v36 }
0x217c   :  { %v5515_v44 = vpop.permute.xlu1 %5514 }
0x2186   :  { %v10775_v34 = vpop.eup %10774 }
0x2187   :  { %v5508_v63 = vmul.f32 %v10775_v34, %v10767_v62 }
0x219a   :  { %v10095_v19 = vpop.f32.mrf.mxu0 }
0x219c   :  { %v5231_v39 = vpop.f32.mrf.mxu0 }
0x219d   :  { %10101 = vmatprep.mubr.msk.f32.mxu0 %vm1153_vm3, %v5231_v39 }
0x219e   :  { %10102 = vmatmul.mubr.msk.f32.vlgmr.msra.gmra.mxu0 %vm1153_vm3, %v10095_v19 }
0x219f   :  { %10122 = vmatpush3.msra.mxu0 %v5519_v31 }
0x21a5   :  { %v10098_v40 = vpop.f32.mrf.mxu0  ;;  %v5497_v24 = vpop.xlane.xlu0 %5496 }
0x21a6   :  { %10776 = vrcp.f32 %v5497_v24 }
0x21a7   :  { %v5241_v15 = vpop.f32.mrf.mxu0 }
0x21a8   :  { %10104 = vmatprep.mubr.msk.f32.mxu0 %vm1153_vm3, %v5241_v15 }
0x21a9   :  { %10105 = vmatmul.mubr.msk.f32.gmra.mxu0 %vm1153_vm3, %v10098_v40  ;;  %v5503_v46 = vpop.xlane.xlu0 %5502 }
0x21aa   :  { %10129 = vmatprep.mubr.msk.f32.mxu0 %vm579_vm1, %v5508_v63  ;;  %10778 = vrcp.f32 %v5503_v46  ;;  %v5802_v46 = vld [vmem:[%s13479_s30 + $0x10] sm:$0xff] }
0x21ad   :  { %v5500_v47 = vpop.xlane.xlu1 %5499  ;;  %v5517_v49 = vpop.permute.xlu0 %5516 }
0x21ae   :  { %10780 = vrcp.f32 %v5500_v47  ;;  %10123 = vmatprep.subr.mxu0 %v5517_v49  ;;  %v5801_v47 = vld [vmem:[%s13479_s30 + $0x8] sm:$0xff] }
0x21af   :  { %10124 = vmatpush3.msra.mxu0 %v5517_v49  ;;  %v5800_v49 = vld [vmem:[%s13479_s30] sm:$0xff] }
0x21b0   :  { %10125 = vmatprep.subr.mxu0 %v5515_v44 }
0x21b1   :  { %v5513_v30 = vpop.permute.xlu1 %5512  ;;  %10126 = vmatpush3.msra.mxu0 %v5515_v44  ;;  %v5803_v44 = vld [vmem:[%s13479_s30 + $0x18] sm:$0xff] }
0x21b2   :  { %10127 = vmatprep.subr.mxu0 %v5513_v30  ;;  %10143 = vmatprep.subr.mxu1 %v5803_v44 }
0x21b3   :  { %v10777_v11 = vpop.eup %10776  ;;  %10128 = vmatpush3.msra.mxu0 %v5513_v30  ;;  %10144 = vmatpush3.msra.mxu1 %v5803_v44  ;;  %v5927_v30 = vld [vmem:[%s13480_s16 + $0x78] sm:$0xff] }
0x21b4   :  { %v5509_v17 = vmul.f32 %v10777_v11, %v10769_v5  ;;  %10135 = vmatprep.subr.mxu0 %v4249_v50  ;;  %10145 = vmatprep.subr.mxu1 %v5802_v46  ;;  %v5926_v11 = vld [vmem:[%s13480_s16 + $0x70] sm:$0xff] }
0x21b5   :  { %10146 = vmatpush3.msra.mxu1 %v5802_v46 }
0x21b6   :  { %10130 = vmatmul.mubr.msk.f32.vlgmr.msra.gmra.mxu0 %vm579_vm1, %v5509_v17  ;;  %10147 = vmatprep.subr.mxu1 %v5801_v47  ;;  %v5925_v17 = vld [vmem:[%s13480_s16 + $0x68] sm:$0xff] }
0x21b7   :  { %v10779_v51 = vpop.eup %10778  ;;  %10136 = vmatpush3.msra.mxu0 %v4249_v50  ;;  %10148 = vmatpush3.msra.mxu1 %v5801_v47  ;;  %v5920_v50 = vld [vmem:[%s13480_s16 + $0x40] sm:$0xff] }
0x21b8   :  { %v5511_v52 = vmul.f32 %v10779_v51, %v10771_v22  ;;  %10149 = vmatprep.subr.mxu1 %v5800_v49  ;;  %10157 = vmatprep.subr.mxu0 %v5927_v30  ;;  %v5924_v51 = vld [vmem:[%s13480_s16 + $0x60] sm:$0xff] }
0x21b9   :  { %10150 = vmatpush3.msra.mxu1 %v5800_v49 }
0x21bb   :  { %v10781_v21 = vpop.eup %10780 }
0x21bc   :  { %v5510_v53 = vmul.f32 %v10781_v21, %v10773_v38  ;;  %v5923_v21 = vld [vmem:[%s13480_s16 + $0x58] sm:$0xff] }
0x21be   :  { %10132 = vmatprep.mubr.msk.f32.mxu0 %vm579_vm1, %v5510_v53  ;;  %v5922_v53 = vld [vmem:[%s13480_s16 + $0x50] sm:$0xff] }
0x21bf   :  { %10133 = vmatmul.mubr.msk.f32.gmra.mxu0 %vm579_vm1, %v5511_v52  ;;  %v5921_v52 = vld [vmem:[%s13480_s16 + $0x48] sm:$0xff] }
0x225e   :  { %v10103_v2 = vpop.f32.mrf.mxu0 }
0x225f   :  { %v5348_v26 = vadd.f32 %v10103_v2, %v4967_v54  ;;  %v5919_v54 = vld [vmem:[%s13480_s16 + $0x38] sm:$0xff]  ;;  %v5918_v2 = vld [vmem:[%s13480_s16 + $0x30] sm:$0xff] }
0x2260   :  { %v5328_v4 = vpop.f32.mrf.mxu0 }
0x2261   :  { %v5347_v7 = vadd.f32 %v5328_v4, %v4962_v3  ;;  %v5917_v3 = vld [vmem:[%s13480_s16 + $0x28] sm:$0xff] }
0x2269   :  { %v10106_v16 = vpop.f32.mrf.mxu0 }
0x226a   :  { %v5350_v13 = vadd.f32 %v10106_v16, %v4977_v8 }
0x226b   :  { %v5338_v59 = vpop.f32.mrf.mxu0 }
0x226c   :  { %v5349_v42 = vadd.f32 %v5338_v59, %v4972_v37 }
0x2276   :  { %v10131_v60 = vpop.f32.mrf.mxu0 }
0x2278   :  { %v5602_v14 = vpop.f32.mrf.mxu0 }
0x2279   :  { %10137 = vmatprep.mubr.msk.f32.mxu0 %vm1153_vm3, %v5602_v14 }
0x227a   :  { %10138 = vmatmul.mubr.msk.f32.vlgmr.msra.gmra.mxu0 %vm1153_vm3, %v10131_v60 }
0x227b   :  { %10158 = vmatpush3.msra.mxu0 %v5927_v30 }
0x227c   :  { %10159 = vmatprep.subr.mxu0 %v5926_v11 }
0x227d   :  { %10160 = vmatpush3.msra.mxu0 %v5926_v11 }
0x227e   :  { %10161 = vmatprep.subr.mxu0 %v5925_v17 }
0x227f   :  { %v10134_v56 = vpop.f32.mrf.mxu0  ;;  %10162 = vmatpush3.msra.mxu0 %v5925_v17 }
0x2280   :  { %10163 = vmatprep.subr.mxu0 %v5924_v51 }
0x2281   :  { %v5612_v62 = vpop.f32.mrf.mxu0  ;;  %10164 = vmatpush3.msra.mxu0 %v5924_v51 }
0x2282   :  { %10140 = vmatprep.mubr.msk.f32.mxu0 %vm1153_vm3, %v5612_v62  ;;  %10165 = vmatprep.subr.mxu0 %v5923_v21 }
0x2283   :  { %10141 = vmatmul.mubr.msk.f32.gmra.mxu0 %vm1153_vm3, %v10134_v56 }
0x2284   :  { %10166 = vmatpush3.msra.mxu0 %v5923_v21 }
0x2285   :  { %10167 = vmatprep.subr.mxu0 %v5922_v53 }
0x2286   :  { %10168 = vmatpush3.msra.mxu0 %v5922_v53 }
0x2287   :  { %10169 = vmatprep.subr.mxu0 %v5921_v52 }
0x2288   :  { %10170 = vmatpush3.msra.mxu0 %v5921_v52 }
0x2289   :  { %10171 = vmatprep.subr.mxu0 %v5920_v50 }
0x228a   :  { %10172 = vmatpush3.msra.mxu0 %v5920_v50 }
0x228b   :  { %10173 = vmatprep.subr.mxu0 %v5919_v54 }
0x228c   :  { %10174 = vmatpush3.msra.mxu0 %v5919_v54 }
0x228d   :  { %10175 = vmatprep.subr.mxu0 %v5918_v2 }
0x228e   :  { %10176 = vmatpush3.msra.mxu0 %v5918_v2 }
0x228f   :  { %10177 = vmatprep.subr.mxu0 %v5917_v3 }
0x2290   :  { %10178 = vmatpush3.msra.mxu0 %v5917_v3 }
0x233a   :  { %v10139_v57 = vpop.f32.mrf.mxu0 }
0x233b   :  { %v5719_v58 = vadd.f32 %v10139_v57, %v5348_v26  ;;  %v5916_v26 = vld [vmem:[%s13480_s16 + $0x20] sm:$0xff] }
0x233c   :  { %v5699_v45 = vpop.f32.mrf.mxu0  ;;  %10179 = vmatprep.subr.mxu0 %v5916_v26 }
0x233d   :  { %v5723_v1 = vadd.f32 %v5719_v58, %v12439_v12  ;;  %v5718_v0 = vadd.f32 %v5699_v45, %v5347_v7  ;;  %10180 = vmatpush3.msra.mxu0 %v5916_v26  ;;  %v8832_v45 = vld [vmem:[%s13481_s17] ss:$0 sm:$0xff] }
0x233f   :  { %v5722_v27 = vadd.f32 %v5718_v0, %v12436_v41  ;;  %v5731_v28 = vsel %vm579_vm1, %v5723_v1, 0.0 }
0x2340   :  { %5732 = vadd.xlane.f32.xlu1 %v5731_v28  ;;  %v8833_v28 = vld [vmem:[%s13482_s18] ss:$0 sm:$0xff] }
0x2341   :  { %v5728_v55 = vsel %vm579_vm1, %v5722_v27, 0.0 }
0x2342   :  { %5729 = vadd.xlane.f32.xlu0 %v5728_v55 }
0x2343   :  { %v10142_v29 = vpop.f32.mrf.mxu0 }
0x2344   :  { %v5721_v48 = vadd.f32 %v10142_v29, %v5350_v13 }
0x2345   :  { %v5709_v43 = vpop.f32.mrf.mxu0 }
0x2346   :  { %v5720_v23 = vadd.f32 %v5709_v43, %v5349_v42  ;;  %v5725_v32 = vadd.f32 %v5721_v48, %v12453_v6 }
0x2348   :  { %v5724_v31 = vadd.f32 %v5720_v23, %v12450_v61  ;;  %v5737_v12 = vsel %vm579_vm1, %v5725_v32, 0.0 }
0x234a   :  { %v5734_v5 = vsel %vm579_vm1, %v5724_v31, 0.0 }
0x234b   :  { %5735 = vadd.xlane.f32.xlu0 %v5734_v5 }
0x234f   :  { %5738 = vadd.xlane.f32.xlu0 %v5737_v12 }
0x23c9   :  { %v5733_v41 = vpop.xlane.xlu1 %5732 }
0x23ca   :  { %v5741_v9 = vmul.f32 0.03125, %v5733_v41 }
0x23cb   :  { %v5730_v22 = vpop.xlane.xlu0 %5729 }
0x23cc   :  { %v12755_v25 = vsub.f32 %v5723_v1, %v5741_v9  ;;  %v5740_v38 = vmul.f32 0.03125, %v5730_v22  ;;  %v5915_v22 = vld [vmem:[%s13480_s16 + $0x18] sm:$0xff] }
0x23cd   :  { %10181 = vmatprep.subr.mxu0 %v5915_v22 }
0x23ce   :  { %v12757_v18 = vsub.f32 %v5722_v27, %v5740_v38  ;;  %v5749_v20 = vmul.f32 %v12755_v25, %v12755_v25  ;;  %10182 = vmatpush3.msra.mxu0 %v5915_v22  ;;  %v5913_v38 = vld [vmem:[%s13480_s16 + $0x8] sm:$0xff] }
0x23d0   :  { %v5755_v61 = vsel %vm579_vm1, %v5749_v20, 0.0  ;;  %v5748_v6 = vmul.f32 %v12757_v18, %v12757_v18  ;;  %v8834_v20 = vld [vmem:[%s13483_s19] ss:$0 sm:$0xff] }
0x23d1   :  { %5756 = vadd.xlane.f32.xlu0 %v5755_v61 }
0x23d2   :  { %v5752_v33 = vsel %vm579_vm1, %v5748_v6, 0.0 }
0x23d3   :  { %5753 = vadd.xlane.f32.xlu1 %v5752_v33 }
0x23d4   :  { %v5736_v10 = vpop.xlane.xlu0 %5735 }
0x23d5   :  { %v5742_v36 = vmul.f32 0.03125, %v5736_v10 }
0x23d7   :  { %v12765_v35 = vsub.f32 %v5724_v31, %v5742_v36 }
0x23d8   :  { %v5739_v19 = vpop.xlane.xlu0 %5738 }
0x23d9   :  { %v5743_v39 = vmul.f32 0.03125, %v5739_v19  ;;  %v5750_v34 = vmul.f32 %v12765_v35, %v12765_v35 }
0x23db   :  { %v12769_v40 = vsub.f32 %v5725_v32, %v5743_v39  ;;  %v5758_v24 = vsel %vm579_vm1, %v5750_v34, 0.0 }
0x23dc   :  { %5759 = vadd.xlane.f32.xlu1 %v5758_v24 }
0x23dd   :  { %v5751_v15 = vmul.f32 %v12769_v40, %v12769_v40 }
0x23df   :  { %v5761_v63 = vsel %vm579_vm1, %v5751_v15, 0.0 }
0x23e0   :  { %5762 = vadd.xlane.f32.xlu0 %v5761_v63  ;;  %v8839_v63 = vld [vmem:[#allocation2] ss:$0 sm:$0xff] }
0x245a   :  { %v5757_v4 = vpop.xlane.xlu0 %5756 }
0x245b   :  { %v5765_v7 = vmul.f32 0.03125, %v5757_v4 }
0x245c   :  { %v5754_v8 = vpop.xlane.xlu1 %5753 }
0x245d   :  { %v5769_v16 = vadd.f32 1e-05, %v5765_v7  ;;  %v5764_v37 = vmul.f32 0.03125, %v5754_v8 }
0x245f   :  { %10782 = vrsqrt.f32 %v5769_v16  ;;  %v5768_v13 = vadd.f32 1e-05, %v5764_v37 }
0x2461   :  { %10784 = vrsqrt.f32 %v5768_v13 }
0x2465   :  { %v5760_v59 = vpop.xlane.xlu1 %5759 }
0x2466   :  { %v5766_v42 = vmul.f32 0.03125, %v5760_v59 }
0x2468   :  { %v5770_v60 = vadd.f32 1e-05, %v5766_v42 }
0x2469   :  { %v5763_v14 = vpop.xlane.xlu0 %5762 }
0x246a   :  { %10786 = vrsqrt.f32 %v5770_v60  ;;  %v5767_v56 = vmul.f32 0.03125, %v5763_v14 }
0x246c   :  { %v10783_v62 = vpop.eup %10782  ;;  %v5771_v57 = vadd.f32 1e-05, %v5767_v56 }
0x246d   :  { %v5777_v58 = vmul.f32 %v10783_v62, %v12755_v25  ;;  %v5914_v25 = vld [vmem:[%s13480_s16 + $0x10] sm:$0xff] }
0x246e   :  { %v10785_v1 = vpop.eup %10784  ;;  %10788 = vrsqrt.f32 %v5771_v57  ;;  %10183 = vmatprep.subr.mxu0 %v5914_v25 }
0x246f   :  { %v5776_v0 = vmul.f32 %v10785_v1, %v12757_v18  ;;  %v5787_v27 = vmul.f32 %v8832_v45, %v5777_v58  ;;  %10184 = vmatpush3.msra.mxu0 %v5914_v25  ;;  %v5912_v18 = vld [vmem:[%s13480_s16] sm:$0xff] }
0x2470   :  { %10185 = vmatprep.subr.mxu0 %v5913_v38 }
0x2471   :  { %v5786_v55 = vmul.f32 %v8832_v45, %v5776_v0  ;;  %v5797_v43 = vadd.f32 %v8833_v28, %v5787_v27  ;;  %10186 = vmatpush3.msra.mxu0 %v5913_v38 }
0x2472   :  { %10187 = vmatprep.subr.mxu0 %v5912_v18 }
0x2473   :  { %v5796_v29 = vadd.f32 %v8833_v28, %v5786_v55  ;;  %10188 = vmatpush3.msra.mxu0 %v5912_v18 }
0x2475   :  { %10151 = vmatprep.mubr.msk.f32.mxu1 %vm579_vm1, %v5796_v29 }
0x2476   :  { %10152 = vmatmul.mubr.msk.f32.vlgmr.msra.gmra.mxu1 %vm579_vm1, %v5797_v43 }
0x2477   :  { %v10787_v48 = vpop.eup %10786 }
0x2478   :  { %v5778_v23 = vmul.f32 %v10787_v48, %v12765_v35  ;;  %v6099_v48 = vld [vmem:[%s13484_s22 + $0x8] sm:$0xff] }
0x247a   :  { %v5788_v31 = vmul.f32 %v8832_v45, %v5778_v23  ;;  %v6098_v23 = vld [vmem:[%s13484_s22] sm:$0xff] }
0x247b   :  { %v10789_v32 = vpop.eup %10788 }
0x247c   :  { %v5798_v5 = vadd.f32 %v8833_v28, %v5788_v31  ;;  %v5779_v12 = vmul.f32 %v10789_v32, %v12769_v40  ;;  %v6202_v31 = vld [vmem:[%s13485_s8 + $0x18] sm:$0xff] }
0x247e   :  { %10154 = vmatprep.mubr.msk.f32.mxu1 %vm579_vm1, %v5798_v5  ;;  %v5789_v41 = vmul.f32 %v8832_v45, %v5779_v12 }
0x2480   :  { %v5799_v9 = vadd.f32 %v8833_v28, %v5789_v41 }
0x2482   :  { %10155 = vmatmul.mubr.msk.f32.gmra.mxu1 %vm579_vm1, %v5799_v9 }
0x2536   :  { %v10153_v61 = vpop.f32.mrf.mxu1 }
0x2537   :  { %v5895_v6 = vadd.f32 %v10153_v61, %v8834_v20 }
0x2538   :  { %v5889_v33 = vpop.f32.mrf.mxu1 }
0x2539   :  { %v5890_v10 = vadd.f32 %v8834_v20, %v5889_v33  ;;  %v5909_v35 = vmax.f32 %v5895_v6, 0.0 }
0x253b   :  { %v5908_v36 = vmax.f32 %v5890_v10, 0.0 }
0x253d   :  { %10189 = vmatprep.mubr.f32.mxu0 %v5908_v36  ;;  %v8840_v36 = vld [vmem:[#allocation5] ss:$0 sm:$0xff] }
0x253e   :  { %10190 = vmatmul.mubr.f32.vlgmr.msra.gmra.mxu0 %v5909_v35 }
0x2542   :  { %v10156_v19 = vpop.f32.mrf.mxu1 }
0x2543   :  { %v5905_v39 = vadd.f32 %v10156_v19, %v8834_v20 }
0x2544   :  { %v5899_v34 = vpop.f32.mrf.mxu1 }
0x2545   :  { %v5900_v40 = vadd.f32 %v8834_v20, %v5899_v34  ;;  %v5911_v15 = vmax.f32 %v5905_v39, 0.0  ;;  %v8841_v34 = vld [vmem:[#allocation7] ss:$0 sm:$0xff] }
0x2547   :  { %v5910_v24 = vmax.f32 %v5900_v40, 0.0 }
0x2549   :  { %10192 = vmatprep.mubr.f32.mxu0 %v5910_v24 }
0x254a   :  { %10193 = vmatmul.mubr.f32.gmra.mxu0 %v5911_v15 }
0x25fe   :  { %v10191_v44 = vpop.f32.mrf.mxu0 }
0x25ff   :  { %v6007_v46 = vadd.f32 %v10191_v44, %v8839_v63  ;;  %v6200_v44 = vld [vmem:[%s13485_s8 + $0x8] sm:$0xff] }
0x2600   :  { %v6001_v47 = vpop.f32.mrf.mxu0 }
0x2601   :  { %v6021_v49 = vadd.f32 %v6007_v46, %v5797_v43  ;;  %v6002_v30 = vadd.f32 %v8839_v63, %v6001_v47  ;;  %v6100_v43 = vld [vmem:[%s13484_s22 + $0x10] sm:$0xff] }
0x2603   :  { %v6020_v11 = vadd.f32 %v6002_v30, %v5796_v29  ;;  %v6029_v17 = vsel %vm579_vm1, %v6021_v49, 0.0  ;;  %v6101_v29 = vld [vmem:[%s13484_s22 + $0x18] sm:$0xff] }
0x2604   :  { %6030 = vadd.xlane.f32.xlu0 %v6029_v17  ;;  %10195 = vmatprep.subr.mxu1 %v6101_v29 }
0x2605   :  { %v6026_v51 = vsel %vm579_vm1, %v6020_v11, 0.0  ;;  %10196 = vmatpush3.msra.mxu1 %v6101_v29 }
0x2606   :  { %6027 = vadd.xlane.f32.xlu1 %v6026_v51  ;;  %10197 = vmatprep.subr.mxu1 %v6100_v43 }
0x2607   :  { %10198 = vmatpush3.msra.mxu1 %v6100_v43 }
0x2608   :  { %10199 = vmatprep.subr.mxu1 %v6099_v48 }
0x2609   :  { %10200 = vmatpush3.msra.mxu1 %v6099_v48 }
0x260a   :  { %v10194_v21 = vpop.f32.mrf.mxu0  ;;  %10201 = vmatprep.subr.mxu1 %v6098_v23 }
0x260b   :  { %v6017_v53 = vadd.f32 %v10194_v21, %v8839_v63  ;;  %10202 = vmatpush3.msra.mxu1 %v6098_v23 }
0x260c   :  { %v6011_v52 = vpop.f32.mrf.mxu0  ;;  %10209 = vmatprep.subr.mxu1 %v6202_v31 }
0x260d   :  { %v6023_v50 = vadd.f32 %v6017_v53, %v5799_v9  ;;  %v6012_v54 = vadd.f32 %v8839_v63, %v6011_v52  ;;  %v6201_v63 = vld [vmem:[%s13485_s8 + $0x10] sm:$0xff]  ;;  %v10878_v52 = vld [vmem:[%s13448_s23] sm:$0xff] }
0x260f   :  { %v6022_v2 = vadd.f32 %v6012_v54, %v5798_v5  ;;  %v6035_v3 = vsel %vm579_vm1, %v6023_v50, 0.0  ;;  %v10880_v54 = vld [vmem:[%s13448_s23 + $0x10] sm:$0xff] }
0x2610   :  { %6036 = vadd.xlane.f32.xlu0 %v6035_v3  ;;  %v10882_v3 = vld [vmem:[%s13448_s23 + $0x20] sm:$0xff] }
0x2611   :  { %v6032_v26 = vsel %vm579_vm1, %v6022_v2, 0.0 }
0x2612   :  { %6033 = vadd.xlane.f32.xlu1 %v6032_v26  ;;  %v10883_v26 = vld [vmem:[%s13448_s23 + $0x28] sm:$0xff] }
0x268d   :  { %v6031_v4 = vpop.xlane.xlu0 %6030 }
0x268e   :  { %v6039_v7 = vmul.f32 0.03125, %v6031_v4  ;;  %v10884_v4 = vld [vmem:[%s13448_s23 + $0x30] sm:$0xff] }
0x268f   :  { %v6028_v8 = vpop.xlane.xlu1 %6027 }
0x2690   :  { %v6043_v16 = vsub.f32 %v6021_v49, %v6039_v7  ;;  %v6038_v37 = vmul.f32 0.03125, %v6028_v8  ;;  %v6199_v49 = vld [vmem:[%s13485_s8] sm:$0xff]  ;;  %v10885_v7 = vld [vmem:[%s13448_s23 + $0x38] sm:$0xff] }
0x2692   :  { %v6042_v13 = vsub.f32 %v6020_v11, %v6038_v37  ;;  %v6047_v59 = vmul.f32 %v6043_v16, %v6043_v16 }
0x2694   :  { %v6053_v42 = vsel %vm579_vm1, %v6047_v59, 0.0  ;;  %v6046_v60 = vmul.f32 %v6042_v13, %v6042_v13 }
0x2695   :  { %6054 = vadd.xlane.f32.xlu0 %v6053_v42 }
0x2696   :  { %v6050_v14 = vsel %vm579_vm1, %v6046_v60, 0.0 }
0x2697   :  { %6051 = vadd.xlane.f32.xlu1 %v6050_v14 }
0x2699   :  { %v6037_v56 = vpop.xlane.xlu0 %6036 }
0x269a   :  { %v6041_v62 = vmul.f32 0.03125, %v6037_v56 }
0x269b   :  { %v6034_v57 = vpop.xlane.xlu1 %6033 }
0x269c   :  { %v6045_v58 = vsub.f32 %v6023_v50, %v6041_v62  ;;  %v6040_v45 = vmul.f32 0.03125, %v6034_v57  ;;  %v10879_v50 = vld [vmem:[%s13448_s23 + $0x8] sm:$0xff] }
0x269e   :  { %v6044_v1 = vsub.f32 %v6022_v2, %v6040_v45  ;;  %v6049_v0 = vmul.f32 %v6045_v58, %v6045_v58  ;;  %v10881_v2 = vld [vmem:[%s13448_s23 + $0x18] sm:$0xff]  ;;  %s13486_s23 = sld [smem:[#allocation75_spill]] }
0x26a0   :  { %v6059_v27 = vsel %vm579_vm1, %v6049_v0, 0.0  ;;  %v6048_v28 = vmul.f32 %v6044_v1, %v6044_v1 }
0x26a1   :  { %6060 = vadd.xlane.f32.xlu0 %v6059_v27 }
0x26a2   :  { %v6056_v55 = vsel %vm579_vm1, %v6048_v28, 0.0 }
0x26a3   :  { %6057 = vadd.xlane.f32.xlu1 %v6056_v55 }
0x271e   :  { %v6055_v32 = vpop.xlane.xlu0 %6054 }
0x271f   :  { %v6063_v5 = vmul.f32 0.03125, %v6055_v32 }
0x2720   :  { %v6052_v12 = vpop.xlane.xlu1 %6051 }
0x2721   :  { %v6067_v41 = vadd.f32 1e-05, %v6063_v5  ;;  %v6062_v9 = vmul.f32 0.03125, %v6052_v12 }
0x2723   :  { %10790 = vrsqrt.f32 %v6067_v41  ;;  %v6066_v22 = vadd.f32 1e-05, %v6062_v9  ;;  %v12943_v41 = vld [vmem:[%s13459_s11 + $0x8] sm:$0xff] }
0x2725   :  { %10792 = vrsqrt.f32 %v6066_v22 }
0x272a   :  { %v6061_v25 = vpop.xlane.xlu0 %6060 }
0x272b   :  { %v6065_v38 = vmul.f32 0.03125, %v6061_v25  ;;  %v12947_v25 = vld [vmem:[%s13459_s11] sm:$0xff] }
0x272c   :  { %v6058_v18 = vpop.xlane.xlu1 %6057 }
0x272d   :  { %v6069_v20 = vadd.f32 1e-05, %v6065_v38  ;;  %v6064_v61 = vmul.f32 0.03125, %v6058_v18 }
0x272f   :  { %10794 = vrsqrt.f32 %v6069_v20  ;;  %v6068_v6 = vadd.f32 1e-05, %v6064_v61  ;;  %v12952_v61 = vld [vmem:[%s13459_s11 + $0x18] sm:$0xff] }
0x2730   :  { %v10791_v33 = vpop.eup %10790 }
0x2731   :  { %v6075_v10 = vmul.f32 %v10791_v33, %v6043_v16  ;;  %10796 = vrsqrt.f32 %v6068_v6 }
0x2732   :  { %v10793_v35 = vpop.eup %10792 }
0x2733   :  { %v6074_v19 = vmul.f32 %v10793_v35, %v6042_v13  ;;  %v6085_v39 = vmul.f32 %v8840_v36, %v6075_v10 }
0x2735   :  { %v6084_v40 = vmul.f32 %v8840_v36, %v6074_v19  ;;  %v12821_v15 = vadd.f32 %v8841_v34, %v6085_v39 }
0x2737   :  { %v12819_v24 = vadd.f32 %v8841_v34, %v6084_v40 }
0x2739   :  { %10203 = vmatprep.mubr.msk.f32.mxu1 %vm579_vm1, %v12819_v24 }
0x273a   :  { %10204 = vmatmul.mubr.msk.f32.vlgmr.msra.gmra.mxu1 %vm579_vm1, %v12821_v15 }
0x273b   :  { %10210 = vmatpush3.msra.mxu1 %v6202_v31 }
0x273c   :  { %v10795_v46 = vpop.eup %10794  ;;  %10211 = vmatprep.subr.mxu1 %v6201_v63 }
0x273d   :  { %10212 = vmatpush3.msra.mxu1 %v6201_v63  ;;  %v6077_v47 = vmul.f32 %v10795_v46, %v6045_v58 }
0x273e   :  { %v10797_v30 = vpop.eup %10796  ;;  %10213 = vmatprep.subr.mxu1 %v6200_v44 }
0x273f   :  { %v6076_v11 = vmul.f32 %v10797_v30, %v6044_v1  ;;  %10214 = vmatpush3.msra.mxu1 %v6200_v44  ;;  %v6087_v17 = vmul.f32 %v8840_v36, %v6077_v47 }
0x2740   :  { %10215 = vmatprep.subr.mxu1 %v6199_v49 }
0x2741   :  { %v6086_v51 = vmul.f32 %v8840_v36, %v6076_v11  ;;  %10216 = vmatpush3.msra.mxu1 %v6199_v49  ;;  %v12832_v53 = vadd.f32 %v8841_v34, %v6087_v17  ;;  %v12957_v36 = vld [vmem:[%s13459_s11 + $0x10] sm:$0xff]  ;;  %s13489_s11 = sld [smem:[#allocation80_spill]] }
0x2743   :  { %v12830_v21 = vadd.f32 %v8841_v34, %v6086_v51 }
0x2745   :  { %10206 = vmatprep.mubr.msk.f32.mxu1 %vm579_vm1, %v12830_v21 }
0x2746   :  { %10207 = vmatmul.mubr.msk.f32.gmra.mxu1 %vm579_vm1, %v12832_v53 }
0x2747   :  { %10217 = vmatprep.mubr.msk.f32.mxu1 %vm579_vm1, %v10878_v52 }
0x274a   :  { %10218 = vmatmul.mubr.msk.f32.vlgmr.msra.gmra.mxu1 %vm579_vm1, %v10879_v50 }
0x274b   :  { %10220 = vmatprep.mubr.msk.f32.mxu1 %vm579_vm1, %v10880_v54 }
0x274e   :  { %10221 = vmatmul.mubr.msk.f32.gmra.mxu1 %vm579_vm1, %v10881_v2 }
0x274f   :  { %10223 = vmatprep.mubr.msk.f32.mxu1 %vm579_vm1, %v10882_v3 }
0x2752   :  { %10224 = vmatmul.mubr.msk.f32.gmra.mxu1 %vm579_vm1, %v10883_v26 }
0x2753   :  { %10226 = vmatprep.mubr.msk.f32.mxu1 %vm579_vm1, %v10884_v4 }
0x2756   :  { %10227 = vmatmul.mubr.msk.f32.gmra.mxu1 %vm579_vm1, %v10885_v7 }
0x27fa   :  { %v10205_v8 = vpop.f32.mrf.mxu1 }
0x27fb   :  { %v12926_v1 = vmul.f32 0.35355338, %v10205_v8 }
0x27fc   :  { %v6180_v16 = vpop.f32.mrf.mxu1 }
0x27fd   :  { %v12854_v37 = vmul.f32 0.35355338, %v6180_v16 }
0x27ff   :  { %10245 = vmatprep.mubr.msk.f32.mxu1 %vm1153_vm3, %v12854_v37 }
0x2806   :  { %v10208_v13 = vpop.f32.mrf.mxu1 }
0x2807   :  { %v12934_v27 = vmul.f32 0.35355338, %v10208_v13 }
0x2808   :  { %v6190_v59 = vpop.f32.mrf.mxu1 }
0x2809   :  { %v12928_v0 = vmul.f32 0.35355338, %v6190_v59 }
0x280a   :  { %v12858_v42 = vpop.f32.mrf.mxu1 }
0x280b   :  { %6483 = vrot.lane.b32.xlu0 %v12858_v42, %s11351_s7 }
0x280c   :  { %v12862_v60 = vpop.f32.mrf.mxu1 }
0x280d   :  { %6481 = vrot.lane.b32.xlu1 %v12862_v60, %s11351_s7 }
0x280e   :  { %v12866_v14 = vpop.f32.mrf.mxu1 }
0x280f   :  { %6487 = vrot.lane.b32.xlu0 %v12866_v14, %s11351_s7 }
0x2810   :  { %v12870_v56 = vpop.f32.mrf.mxu1 }
0x2811   :  { %6485 = vrot.lane.b32.xlu1 %v12870_v56, %s11351_s7 }
0x2812   :  { %v12874_v62 = vpop.f32.mrf.mxu1 }
0x2814   :  { %v12876_v57 = vpop.f32.mrf.mxu1 }
0x2815   :  { %6491 = vrot.lane.b32.xlu1 %v12874_v62, %s11351_s7 }
0x2816   :  { %v12880_v58 = vpop.f32.mrf.mxu1 }
0x2817   :  { %6624 = vrot.lane.b32.xlu0 %v12880_v58, %s11352_s10  ;;  %10229 = vmatprep.subr.msk.mxu1 %vm1153_vm3, %v12880_v58 }
0x2818   :  { %v12886_v45 = vpop.f32.mrf.mxu1  ;;  %10230 = vmatpush3.xpose.msk.msra.mxu1 %vm1153_vm3, %v12880_v58 }
0x2819   :  { %6489 = vrot.lane.b32.xlu1 %v12876_v57, %s11351_s7  ;;  %10231 = vmatprep.subr.msk.mxu1 %vm1153_vm3, %v12886_v45 }
0x281b   :  { %6493 = vrot.lane.b32.xlu0 %v12886_v45, %s11351_s7 }
0x281c   :  { %10232 = vmatpush3.xpose.msk.msra.mxu1 %vm1153_vm3, %v12886_v45 }
0x281d   :  { %6495 = vrot.lane.b32.xlu1 %v12880_v58, %s11351_s7  ;;  %10233 = vmatprep.subr.msk.mxu1 %vm1153_vm3, %v12874_v62  ;;  %s13487_s7 = sld [smem:[#allocation76_spill]] }
0x2820   :  { %10234 = vmatpush3.xpose.msk.msra.mxu1 %vm1153_vm3, %v12874_v62 }
0x2821   :  { %6622 = vrot.lane.b32.xlu1 %v12886_v45, %s11352_s10  ;;  %10235 = vmatprep.subr.msk.mxu1 %vm1153_vm3, %v12876_v57 }
0x2824   :  { %10236 = vmatpush3.xpose.msk.msra.mxu1 %vm1153_vm3, %v12876_v57 }
0x2825   :  { %10237 = vmatprep.subr.msk.mxu1 %vm1153_vm3, %v12866_v14 }
0x2828   :  { %10238 = vmatpush3.xpose.msk.msra.mxu1 %vm1153_vm3, %v12866_v14 }
0x2829   :  { %10239 = vmatprep.subr.msk.mxu1 %vm1153_vm3, %v12870_v56 }
0x282c   :  { %10240 = vmatpush3.xpose.msk.msra.mxu1 %vm1153_vm3, %v12870_v56 }
0x282d   :  { %10241 = vmatprep.subr.msk.mxu1 %vm1153_vm3, %v12858_v42 }
0x2830   :  { %10242 = vmatpush3.xpose.msk.msra.mxu1 %vm1153_vm3, %v12858_v42 }
0x2831   :  { %10243 = vmatprep.subr.msk.mxu1 %vm1153_vm3, %v12862_v60 }
0x2834   :  { %10244 = vmatpush3.xpose.msk.msra.mxu1 %vm1153_vm3, %v12862_v60 }
0x2837   :  { %10246 = vmatmul.mubr.msk.f32.vlgmr.msra.gmra.mxu1 %vm1153_vm3, %v12926_v1 }
0x2838   :  { %10248 = vmatprep.mubr.msk.f32.mxu1 %vm1153_vm3, %v12928_v0 }
0x283b   :  { %10249 = vmatmul.mubr.msk.f32.gmra.mxu1 %vm1153_vm3, %v12934_v27 }
0x287d   :  { %v6484_v55 = vpop.permute.xlu0 %6483 }
0x287f   :  { %v6482_v28 = vpop.permute.xlu1 %6481 }
0x2881   :  { %v6488_v43 = vpop.permute.xlu0 %6487 }
0x2883   :  { %v6486_v29 = vpop.permute.xlu1 %6485 }
0x2887   :  { %v6492_v48 = vpop.permute.xlu1 %6491 }
0x2889   :  { %v12938_v23 = vpop.permute.xlu0 %6624 }
0x288b   :  { %v6490_v31 = vpop.permute.xlu1 %6489 }
0x288d   :  { %v6494_v5 = vpop.permute.xlu0 %6493 }
0x288f   :  { %v6496_v32 = vpop.permute.xlu1 %6495 }
0x2890   :  { %10251 = vmatprep.subr.mxu0 %v6496_v32 }
0x2891   :  { %10252 = vmatpush3.msra.mxu0 %v6496_v32 }
0x2892   :  { %10253 = vmatprep.subr.mxu0 %v6494_v5 }
0x2893   :  { %10254 = vmatpush3.msra.mxu0 %v6494_v5  ;;  %v12966_v34 = vpop.permute.xlu1 %6622 }
0x2894   :  { %10255 = vmatprep.subr.mxu0 %v6492_v48 }
0x2895   :  { %10256 = vmatpush3.msra.mxu0 %v6492_v48 }
0x2896   :  { %10257 = vmatprep.subr.mxu0 %v6490_v31 }
0x2897   :  { %10258 = vmatpush3.msra.mxu0 %v6490_v31 }
0x2898   :  { %10259 = vmatprep.subr.mxu0 %v6488_v43 }
0x2899   :  { %10260 = vmatpush3.msra.mxu0 %v6488_v43 }
0x289a   :  { %10261 = vmatprep.subr.mxu0 %v6486_v29 }
0x289b   :  { %10262 = vmatpush3.msra.mxu0 %v6486_v29 }
0x289c   :  { %10263 = vmatprep.subr.mxu0 %v6484_v55 }
0x289d   :  { %10264 = vmatpush3.msra.mxu0 %v6484_v55 }
0x289e   :  { %10265 = vmatprep.subr.mxu0 %v6482_v28 }
0x289f   :  { %10266 = vmatpush3.msra.mxu0 %v6482_v28 }
0x28a0   :  { %10273 = vmatprep.subr.msk.mxu0 %vm1153_vm3, %v12938_v23 }
0x28f7   :  { %v10247_v12 = vpop.f32.mrf.mxu1 }
0x28f8   :  { %v6424_v9 = vadd.f32 %v12943_v41, %v10247_v12 }
0x28f9   :  { %v6418_v22 = vpop.f32.mrf.mxu1 }
0x28fa   :  { %v6419_v38 = vadd.f32 %v12947_v25, %v6418_v22  ;;  %v6440_v18 = vsel %vm470_vm0, %v6424_v9, -inf }
0x28fb   :  { %6441 = vmax.xlane.f32.xlu0 %v6440_v18  ;;  %v10250_v20 = vpop.f32.mrf.mxu1 }
0x28fc   :  { %v6434_v6 = vadd.f32 %v12952_v61, %v10250_v20  ;;  %v6437_v33 = vsel %vm470_vm0, %v6419_v38, -inf }
0x28fd   :  { %v6428_v10 = vpop.f32.mrf.mxu1  ;;  %6438 = vmax.xlane.f32.xlu1 %v6437_v33 }
0x28fe   :  { %v6429_v35 = vadd.f32 %v12957_v36, %v6428_v10  ;;  %v6446_v19 = vsel %vm470_vm0, %v6434_v6, -inf }
0x28ff   :  { %6447 = vmax.xlane.f32.xlu0 %v6446_v19 }
0x2900   :  { %v6443_v39 = vsel %vm470_vm0, %v6429_v35, -inf }
0x2901   :  { %6444 = vmax.xlane.f32.xlu1 %v6443_v39 }
0x2912   :  { %6618 = vrot.lane.b32.xlu1 %v12876_v57, %s11352_s10 }
0x2915   :  { %6620 = vrot.lane.b32.xlu0 %v12874_v62, %s11352_s10 }
0x2984   :  { %v6442_v40 = vpop.xlane.xlu0 %6441 }
0x2985   :  { %v6450_v63 = vsub.f32 %v6424_v9, %v6442_v40 }
0x2986   :  { %v6439_v44 = vpop.xlane.xlu1 %6438 }
0x2987   :  { %v6455_v46 = vmul.f32 1.442695, %v6450_v63  ;;  %v6449_v47 = vsub.f32 %v6419_v38, %v6439_v44 }
0x2988   :  { %v6448_v50 = vpop.xlane.xlu0 %6447 }
0x2989   :  { %10798 = vpow2.f32 %v6455_v46  ;;  %v6453_v49 = vmul.f32 1.442695, %v6449_v47  ;;  %v6452_v2 = vsub.f32 %v6434_v6, %v6448_v50 }
0x298a   :  { %v6445_v52 = vpop.xlane.xlu1 %6444 }
0x298b   :  { %10800 = vpow2.f32 %v6453_v49  ;;  %v6451_v54 = vsub.f32 %v6429_v35, %v6445_v52  ;;  %v6459_v26 = vmul.f32 1.442695, %v6452_v2 }
0x298c   :  { %v6621_v13 = vpop.permute.xlu0 %6620 }
0x298d   :  { %v6457_v3 = vmul.f32 1.442695, %v6451_v54 }
0x298e   :  { %v6619_v59 = vpop.permute.xlu1 %6618 }
0x298f   :  { %10802 = vpow2.f32 %v6457_v3 }
0x2990   :  { %10804 = vpow2.f32 %v6459_v26 }
0x2996   :  { %v10799_v30 = vpop.eup %10798 }
0x2997   :  { %v6464_v11 = vsel %vm470_vm0, %v10799_v30, 0.0 }
0x2998   :  { %v10801_v17 = vpop.eup %10800  ;;  %6465 = vadd.xlane.f32.xlu0 %v6464_v11 }
0x2999   :  { %v6461_v51 = vsel %vm470_vm0, %v10801_v17, 0.0 }
0x299a   :  { %6462 = vadd.xlane.f32.xlu1 %v6461_v51 }
0x299c   :  { %v12974_v4 = vpop.eup %10802 }
0x299d   :  { %v12976_v7 = vpop.eup %10804  ;;  %v6467_v8 = vsel %vm470_vm0, %v12974_v4, 0.0 }
0x299e   :  { %v6470_v16 = vsel %vm470_vm0, %v12976_v7, 0.0 }
0x29ab   :  { %6614 = vrot.lane.b32.xlu1 %v12870_v56, %s11352_s10 }
0x29ae   :  { %6616 = vrot.lane.b32.xlu0 %v12866_v14, %s11352_s10 }
0x29cd   :  { %6468 = vadd.xlane.f32.xlu0 %v6467_v8 }
0x29cf   :  { %6471 = vadd.xlane.f32.xlu1 %v6470_v16 }
0x29e0   :  { %6610 = vrot.lane.b32.xlu1 %v12862_v60, %s11352_s10 }
0x29e3   :  { %6612 = vrot.lane.b32.xlu0 %v12858_v42, %s11352_s10 }
0x29e4   :  { %6604 = vrot.lane.b32.xlu1 %v12926_v1, %s11352_s10 }
0x29e7   :  { %6602 = vrot.lane.b32.xlu0 %v12854_v37, %s11352_s10 }
0x29e8   :  { %6608 = vrot.lane.b32.xlu1 %v12934_v27, %s11352_s10 }
0x29eb   :  { %6606 = vrot.lane.b32.xlu0 %v12928_v0, %s11352_s10  ;;  %s13488_s10 = sld [smem:[#allocation77_spill]] }
0x29ec   :  { %7114 = vrot.lane.b32.xlu1 %v12886_v45, %s11354_s15 }
0x29ef   :  { %7116 = vrot.lane.b32.xlu0 %v12880_v58, %s11354_s15 }
0x29f0   :  { %7110 = vrot.lane.b32.xlu1 %v12876_v57, %s11354_s15 }
0x29f3   :  { %7112 = vrot.lane.b32.xlu0 %v12874_v62, %s11354_s15 }
0x29f4   :  { %7106 = vrot.lane.b32.xlu1 %v12870_v56, %s11354_s15 }
0x29f7   :  { %7108 = vrot.lane.b32.xlu0 %v12866_v14, %s11354_s15 }
0x29f8   :  { %7102 = vrot.lane.b32.xlu1 %v12862_v60, %s11354_s15 }
0x29fb   :  { %7104 = vrot.lane.b32.xlu0 %v12858_v42, %s11354_s15 }
0x29fc   :  { %7096 = vrot.lane.b32.xlu1 %v12926_v1, %s11354_s15 }
0x29ff   :  { %7094 = vrot.lane.b32.xlu0 %v12854_v37, %s11354_s15 }
0x2a00   :  { %7100 = vrot.lane.b32.xlu1 %v12934_v27, %s11354_s15 }
0x2a03   :  { %7098 = vrot.lane.b32.xlu0 %v12928_v0, %s11354_s15  ;;  %s11363_s15 = smov [#allocation28]  }
0x2a21   :  { %v6466_v28 = vpop.xlane.xlu0 %6465 }
0x2a22   :  { %10806 = vrcp.f32 %v6466_v28 }
0x2a23   :  { %v6463_v55 = vpop.xlane.xlu1 %6462 }
0x2a24   :  { %10808 = vrcp.f32 %v6463_v55 }
0x2a25   :  { %v6617_v32 = vpop.permute.xlu0 %6616 }
0x2a27   :  { %v6615_v5 = vpop.permute.xlu1 %6614 }
0x2a2f   :  { %v10807_v29 = vpop.eup %10806 }
0x2a30   :  { %v6478_v31 = vmul.f32 %v10807_v29, %v10799_v30 }
0x2a31   :  { %v10809_v43 = vpop.eup %10808 }
0x2a32   :  { %v6477_v48 = vmul.f32 %v10809_v43, %v10801_v17 }
0x2a34   :  { %10267 = vmatprep.mubr.msk.f32.mxu0 %vm470_vm0, %v6477_v48 }
0x2a35   :  { %10268 = vmatmul.mubr.msk.f32.vlgmr.msra.gmra.mxu0 %vm470_vm0, %v6478_v31 }
0x2a36   :  { %10274 = vmatpush3.xpose.msk.msra.mxu0 %vm1153_vm3, %v12938_v23 }
0x2a37   :  { %10275 = vmatprep.subr.msk.mxu0 %vm1153_vm3, %v12966_v34 }
0x2a3a   :  { %10276 = vmatpush3.xpose.msk.msra.mxu0 %vm1153_vm3, %v12966_v34 }
0x2a3b   :  { %10277 = vmatprep.subr.msk.mxu0 %vm1153_vm3, %v6621_v13 }
0x2a3e   :  { %10278 = vmatpush3.xpose.msk.msra.mxu0 %vm1153_vm3, %v6621_v13 }
0x2a3f   :  { %10279 = vmatprep.subr.msk.mxu0 %vm1153_vm3, %v6619_v59 }
0x2a42   :  { %10280 = vmatpush3.xpose.msk.msra.mxu0 %vm1153_vm3, %v6619_v59 }
0x2a43   :  { %10281 = vmatprep.subr.msk.mxu0 %vm1153_vm3, %v6617_v32 }
0x2a46   :  { %10282 = vmatpush3.xpose.msk.msra.mxu0 %vm1153_vm3, %v6617_v32 }
0x2a47   :  { %10283 = vmatprep.subr.msk.mxu0 %vm1153_vm3, %v6615_v5 }
0x2a4a   :  { %10284 = vmatpush3.xpose.msk.msra.mxu0 %vm1153_vm3, %v6615_v5 }
0x2a56   :  { %v6469_v23 = vpop.xlane.xlu0 %6468 }
0x2a57   :  { %10810 = vrcp.f32 %v6469_v23 }
0x2a58   :  { %v6472_v12 = vpop.xlane.xlu1 %6471 }
0x2a59   :  { %10812 = vrcp.f32 %v6472_v12 }
0x2a5a   :  { %v6613_v9 = vpop.permute.xlu0 %6612 }
0x2a5b   :  { %10285 = vmatprep.subr.msk.mxu0 %vm1153_vm3, %v6613_v9 }
0x2a5c   :  { %10286 = vmatpush3.xpose.msk.msra.mxu0 %vm1153_vm3, %v6613_v9  ;;  %v6611_v22 = vpop.permute.xlu1 %6610 }
0x2a5d   :  { %10287 = vmatprep.subr.msk.mxu0 %vm1153_vm3, %v6611_v22 }
0x2a5e   :  { %v6603_v38 = vpop.permute.xlu0 %6602 }
0x2a60   :  { %10288 = vmatpush3.xpose.msk.msra.mxu0 %vm1153_vm3, %v6611_v22  ;;  %v6605_v18 = vpop.permute.xlu1 %6604 }
0x2a62   :  { %v6607_v20 = vpop.permute.xlu0 %6606 }
0x2a64   :  { %v10811_v6 = vpop.eup %10810  ;;  %v6609_v39 = vpop.permute.xlu1 %6608 }
0x2a65   :  { %v6479_v33 = vmul.f32 %v10811_v6, %v12974_v4 }
0x2a66   :  { %v10813_v10 = vpop.eup %10812  ;;  %v7117_v35 = vpop.permute.xlu0 %7116 }
0x2a67   :  { %10270 = vmatprep.mubr.msk.f32.mxu0 %vm470_vm0, %v6479_v33  ;;  %10333 = vmatprep.subr.msk.mxu0 %vm1153_vm3, %v7117_v35  ;;  %v6480_v19 = vmul.f32 %v10813_v10, %v12976_v7 }
0x2a68   :  { %v7115_v40 = vpop.permute.xlu1 %7114 }
0x2a69   :  { %10271 = vmatmul.mubr.msk.f32.gmra.mxu0 %vm470_vm0, %v6480_v19 }
0x2a6a   :  { %v7113_v34 = vpop.permute.xlu0 %7112  ;;  %10289 = vmatprep.mubr.msk.f32.mxu0 %vm1153_vm3, %v6603_v38 }
0x2a6c   :  { %v7111_v46 = vpop.permute.xlu1 %7110 }
0x2a6d   :  { %10290 = vmatmul.mubr.msk.f32.vlgmr.msra.gmra.mxu0 %vm1153_vm3, %v6605_v18 }
0x2a6e   :  { %10334 = vmatpush3.xpose.msk.msra.mxu0 %vm1153_vm3, %v7117_v35  ;;  %v7109_v63 = vpop.permute.xlu0 %7108  ;;  %10292 = vmatprep.mubr.msk.f32.mxu0 %vm1153_vm3, %v6607_v20 }
0x2a6f   :  { %10335 = vmatprep.subr.msk.mxu0 %vm1153_vm3, %v7115_v40 }
0x2a70   :  { %v7107_v49 = vpop.permute.xlu1 %7106 }
0x2a71   :  { %10293 = vmatmul.mubr.msk.f32.gmra.mxu0 %vm1153_vm3, %v6609_v39 }
0x2a72   :  { %10336 = vmatpush3.xpose.msk.msra.mxu0 %vm1153_vm3, %v7115_v40  ;;  %v7105_v44 = vpop.permute.xlu0 %7104 }
0x2a73   :  { %10337 = vmatprep.subr.msk.mxu0 %vm1153_vm3, %v7113_v34 }
0x2a74   :  { %v7103_v30 = vpop.permute.xlu1 %7102 }
0x2a76   :  { %10338 = vmatpush3.xpose.msk.msra.mxu0 %vm1153_vm3, %v7113_v34  ;;  %v7095_v47 = vpop.permute.xlu0 %7094 }
0x2a77   :  { %10339 = vmatprep.subr.msk.mxu0 %vm1153_vm3, %v7111_v46  ;;  %10349 = vmatprep.mubr.msk.f32.mxu0 %vm1153_vm3, %v7095_v47 }
0x2a78   :  { %v7097_v11 = vpop.permute.xlu1 %7096 }
0x2a7a   :  { %10340 = vmatpush3.xpose.msk.msra.mxu0 %vm1153_vm3, %v7111_v46  ;;  %v7099_v17 = vpop.permute.xlu0 %7098 }
0x2a7b   :  { %10341 = vmatprep.subr.msk.mxu0 %vm1153_vm3, %v7109_v63 }
0x2a7c   :  { %v7101_v51 = vpop.permute.xlu1 %7100 }
0x2a7e   :  { %10342 = vmatpush3.xpose.msk.msra.mxu0 %vm1153_vm3, %v7109_v63 }
0x2a7f   :  { %10343 = vmatprep.subr.msk.mxu0 %vm1153_vm3, %v7107_v49 }
0x2a82   :  { %10344 = vmatpush3.xpose.msk.msra.mxu0 %vm1153_vm3, %v7107_v49 }
0x2a83   :  { %10345 = vmatprep.subr.msk.mxu0 %vm1153_vm3, %v7105_v44 }
0x2a86   :  { %10346 = vmatpush3.xpose.msk.msra.mxu0 %vm1153_vm3, %v7105_v44 }
0x2a87   :  { %10347 = vmatprep.subr.msk.mxu0 %vm1153_vm3, %v7103_v30 }
0x2a8a   :  { %10348 = vmatpush3.xpose.msk.msra.mxu0 %vm1153_vm3, %v7103_v30 }
0x2a8d   :  { %10350 = vmatmul.mubr.msk.f32.vlgmr.msra.gmra.mxu0 %vm1153_vm3, %v7097_v11 }
0x2a8e   :  { %10352 = vmatprep.mubr.msk.f32.mxu0 %vm1153_vm3, %v7099_v17 }
0x2a91   :  { %10353 = vmatmul.mubr.msk.f32.gmra.mxu0 %vm1153_vm3, %v7101_v51 }
0x2af5   :  { %v13066_v52 = vpop.f32.mrf.mxu0 }
0x2af7   :  { %v13068_v50 = vpop.f32.mrf.mxu0 }
0x2b29   :  { %v13070_v54 = vpop.f32.mrf.mxu0 }
0x2b2b   :  { %v13072_v2 = vpop.f32.mrf.mxu0 }
0x2b2d   :  { %v10291_v3 = vpop.f32.mrf.mxu0 }
0x2b2e   :  { %v6722_v26 = vadd.f32 %v12943_v41, %v10291_v3 }
0x2b2f   :  { %v6716_v4 = vpop.f32.mrf.mxu0 }
0x2b30   :  { %v6717_v7 = vadd.f32 %v12947_v25, %v6716_v4  ;;  %v6738_v8 = vsel %vm470_vm0, %v6722_v26, -inf }
0x2b31   :  { %6739 = vmax.xlane.f32.xlu1 %v6738_v8  ;;  %v10294_v16 = vpop.f32.mrf.mxu0 }
0x2b32   :  { %v6735_v13 = vsel %vm470_vm0, %v6717_v7, -inf  ;;  %v6732_v55 = vadd.f32 %v12952_v61, %v10294_v16 }
0x2b33   :  { %6736 = vmax.xlane.f32.xlu0 %v6735_v13  ;;  %v6726_v59 = vpop.f32.mrf.mxu0 }
0x2b34   :  { %v6727_v28 = vadd.f32 %v12957_v36, %v6726_v59  ;;  %v6744_v43 = vsel %vm470_vm0, %v6732_v55, -inf }
0x2b36   :  { %v6741_v29 = vsel %vm470_vm0, %v6727_v28, -inf }
0x2b37   :  { %6742 = vmax.xlane.f32.xlu0 %v6741_v29 }
0x2b3b   :  { %6745 = vmax.xlane.f32.xlu0 %v6744_v43 }
0x2b42   :  { %6793 = vrot.lane.b32.xlu1 %v12880_v58, %s11353_s6 }
0x2b46   :  { %6789 = vrot.lane.b32.xlu1 %v12874_v62, %s11353_s6 }
0x2b4a   :  { %6787 = vrot.lane.b32.xlu1 %v12876_v57, %s11353_s6 }
0x2b4d   :  { %v10351_v17 = vpop.f32.mrf.mxu0 }
0x2b4e   :  { %6783 = vrot.lane.b32.xlu1 %v12870_v56, %s11353_s6  ;;  %v7214_v3 = vadd.f32 %v12943_v41, %v10351_v17 }
0x2b4f   :  { %v7208_v51 = vpop.f32.mrf.mxu0 }
0x2b50   :  { %v7209_v4 = vadd.f32 %v12947_v25, %v7208_v51 }
0x2b51   :  { %6791 = vrot.lane.b32.xlu0 %v12886_v45, %s11353_s6 }
0x2b52   :  { %v7227_v13 = vsel %vm470_vm0, %v7209_v4, -inf }
0x2b55   :  { %6785 = vrot.lane.b32.xlu0 %v12866_v14, %s11353_s6 }
0x2bba   :  { %v6740_v48 = vpop.xlane.xlu1 %6739 }
0x2bbb   :  { %v6748_v31 = vsub.f32 %v6722_v26, %v6740_v48  ;;  %v10354_v26 = vpop.f32.mrf.mxu0 }
0x2bbc   :  { %v6737_v32 = vpop.xlane.xlu0 %6736  ;;  %v13110_v59 = vadd.f32 %v12952_v61, %v10354_v26 }
0x2bbd   :  { %v6753_v5 = vmul.f32 1.442695, %v6748_v31  ;;  %v6747_v23 = vsub.f32 %v6717_v7, %v6737_v32  ;;  %v7230_v7 = vsel %vm470_vm0, %v7214_v3, -inf  ;;  %v7218_v8 = vpop.f32.mrf.mxu0 }
0x2bbe   :  { %v6794_v12 = vpop.permute.xlu1 %6793  ;;  %v13106_v16 = vadd.f32 %v12957_v36, %v7218_v8 }
0x2bbf   :  { %10814 = vpow2.f32 %v6753_v5  ;;  %v6751_v9 = vmul.f32 1.442695, %v6747_v23  ;;  %10295 = vmatprep.subr.mxu1 %v6794_v12 }
0x2bc0   :  { %v6743_v22 = vpop.xlane.xlu0 %6742  ;;  %10296 = vmatpush3.msra.mxu1 %v6794_v12 }
0x2bc1   :  { %10816 = vpow2.f32 %v6751_v9  ;;  %v6749_v38 = vsub.f32 %v6727_v28, %v6743_v22  ;;  %v7233_v28 = vsel %vm470_vm0, %v13106_v16, -inf }
0x2bc2   :  { %v6790_v20 = vpop.permute.xlu1 %6789 }
0x2bc3   :  { %v6755_v18 = vmul.f32 1.442695, %v6749_v38 }
0x2bc4   :  { %v6746_v6 = vpop.xlane.xlu0 %6745 }
0x2bc5   :  { %10818 = vpow2.f32 %v6755_v18  ;;  %v6750_v33 = vsub.f32 %v6732_v55, %v6746_v6  ;;  %v7236_v55 = vsel %vm470_vm0, %v13110_v59, -inf }
0x2bc6   :  { %v6788_v19 = vpop.permute.xlu1 %6787 }
0x2bc7   :  { %v6757_v10 = vmul.f32 1.442695, %v6750_v33 }
0x2bc8   :  { %v6792_v35 = vpop.permute.xlu0 %6791 }
0x2bc9   :  { %10820 = vpow2.f32 %v6757_v10  ;;  %10297 = vmatprep.subr.mxu1 %v6792_v35 }
0x2bca   :  { %10298 = vmatpush3.msra.mxu1 %v6792_v35  ;;  %v6784_v46 = vpop.permute.xlu1 %6783 }
0x2bcb   :  { %10299 = vmatprep.subr.mxu1 %v6790_v20 }
0x2bcc   :  { %v10815_v39 = vpop.eup %10814  ;;  %10300 = vmatpush3.msra.mxu1 %v6790_v20  ;;  %v6786_v63 = vpop.permute.xlu0 %6785 }
0x2bcd   :  { %10301 = vmatprep.subr.mxu1 %v6788_v19  ;;  %v6762_v34 = vsel %vm470_vm0, %v10815_v39, 0.0 }
0x2bce   :  { %v10817_v40 = vpop.eup %10816  ;;  %6763 = vadd.xlane.f32.xlu0 %v6762_v34  ;;  %10302 = vmatpush3.msra.mxu1 %v6788_v19 }
0x2bcf   :  { %10303 = vmatprep.subr.mxu1 %v6786_v63  ;;  %v6759_v44 = vsel %vm470_vm0, %v10817_v40, 0.0 }
0x2bd0   :  { %6760 = vadd.xlane.f32.xlu1 %v6759_v44  ;;  %10304 = vmatpush3.msra.mxu1 %v6786_v63 }
0x2bd1   :  { %10305 = vmatprep.subr.mxu1 %v6784_v46 }
0x2bd2   :  { %v10819_v47 = vpop.eup %10818  ;;  %10306 = vmatpush3.msra.mxu1 %v6784_v46 }
0x2bd3   :  { %v6765_v49 = vsel %vm470_vm0, %v10819_v47, 0.0 }
0x2bd4   :  { %6766 = vadd.xlane.f32.xlu1 %v6765_v49  ;;  %v6308_v49 = vld [vmem:[%s13486_s23] sm:$0xff] }
0x2bd6   :  { %v10821_v30 = vpop.eup %10820 }
0x2bd7   :  { %v6768_v11 = vsel %vm470_vm0, %v10821_v30, 0.0 }
0x2bd8   :  { %6769 = vadd.xlane.f32.xlu0 %v6768_v11 }
0x2be5   :  { %6779 = vrot.lane.b32.xlu1 %v12862_v60, %s11353_s6 }
0x2bee   :  { %6781 = vrot.lane.b32.xlu0 %v12858_v42, %s11353_s6  ;;  %s13490_s6 = sld [smem:[#allocation81_spill]] }
0x2c09   :  { %7231 = vmax.xlane.f32.xlu1 %v7230_v7 }
0x2c0d   :  { %7228 = vmax.xlane.f32.xlu0 %v7227_v13 }
0x2c11   :  { %7234 = vmax.xlane.f32.xlu0 %v7233_v28 }
0x2c15   :  { %7237 = vmax.xlane.f32.xlu0 %v7236_v55 }
0x2c1a   :  { %7285 = vrot.lane.b32.xlu1 %v12880_v58, %s11355_s14 }
0x2c1e   :  { %7281 = vrot.lane.b32.xlu1 %v12874_v62, %s11355_s14 }
0x2c22   :  { %7279 = vrot.lane.b32.xlu1 %v12876_v57, %s11355_s14 }
0x2c2b   :  { %7283 = vrot.lane.b32.xlu0 %v12886_v45, %s11355_s14 }
0x2c2f   :  { %7277 = vrot.lane.b32.xlu0 %v12866_v14, %s11355_s14 }
0x2c57   :  { %v6764_v29 = vpop.xlane.xlu0 %6763 }
0x2c58   :  { %10822 = vrcp.f32 %v6764_v29 }
0x2c59   :  { %v6761_v43 = vpop.xlane.xlu1 %6760 }
0x2c5a   :  { %10824 = vrcp.f32 %v6761_v43 }
0x2c5d   :  { %v6767_v48 = vpop.xlane.xlu1 %6766 }
0x2c5e   :  { %10826 = vrcp.f32 %v6767_v48 }
0x2c61   :  { %v6770_v31 = vpop.xlane.xlu0 %6769  ;;  %v6780_v12 = vpop.permute.xlu1 %6779 }
0x2c62   :  { %10828 = vrcp.f32 %v6770_v31 }
0x2c65   :  { %v6782_v32 = vpop.permute.xlu0 %6781  ;;  %v10823_v5 = vpop.eup %10822 }
0x2c66   :  { %10307 = vmatprep.subr.mxu1 %v6782_v32  ;;  %v6776_v22 = vmul.f32 %v10823_v5, %v10815_v39 }
0x2c67   :  { %v10825_v23 = vpop.eup %10824  ;;  %10308 = vmatpush3.msra.mxu1 %v6782_v32 }
0x2c68   :  { %10309 = vmatprep.subr.mxu1 %v6780_v12  ;;  %v6775_v9 = vmul.f32 %v10825_v23, %v10817_v40 }
0x2c69   :  { %10310 = vmatpush3.msra.mxu1 %v6780_v12 }
0x2c6a   :  { %10311 = vmatprep.mubr.msk.f32.mxu1 %vm470_vm0, %v6775_v9 }
0x2c6b   :  { %v10827_v38 = vpop.eup %10826  ;;  %10312 = vmatmul.mubr.msk.f32.vlgmr.msra.gmra.mxu1 %vm470_vm0, %v6776_v22 }
0x2c6c   :  { %v6777_v18 = vmul.f32 %v10827_v38, %v10819_v47  ;;  %v6309_v47 = vld [vmem:[%s13486_s23 + $0x8] sm:$0xff] }
0x2c6d   :  { %10317 = vmatprep.subr.mxu1 %v6309_v47 }
0x2c6e   :  { %10314 = vmatprep.mubr.msk.f32.mxu1 %vm470_vm0, %v6777_v18  ;;  %10318 = vmatpush3.msra.mxu1 %v6309_v47 }
0x2c6f   :  { %v10829_v20 = vpop.eup %10828  ;;  %10325 = vmatprep.subr.mxu1 %v6308_v49 }
0x2c70   :  { %v6778_v6 = vmul.f32 %v10829_v20, %v10821_v30 }
0x2c72   :  { %10315 = vmatmul.mubr.msk.f32.gmra.mxu1 %vm470_vm0, %v6778_v6 }
0x2c92   :  { %v7232_v33 = vpop.xlane.xlu1 %7231 }
0x2c93   :  { %v7240_v10 = vsub.f32 %v7214_v3, %v7232_v33 }
0x2c95   :  { %v7245_v35 = vmul.f32 1.442695, %v7240_v10 }
0x2c96   :  { %v7229_v19 = vpop.xlane.xlu0 %7228 }
0x2c97   :  { %10830 = vpow2.f32 %v7245_v35  ;;  %v7239_v39 = vsub.f32 %v7209_v4, %v7229_v19 }
0x2c99   :  { %v7243_v34 = vmul.f32 1.442695, %v7239_v39 }
0x2c9a   :  { %v7235_v30 = vpop.xlane.xlu0 %7234 }
0x2c9b   :  { %10832 = vpow2.f32 %v7243_v34  ;;  %v7241_v17 = vsub.f32 %v13106_v16, %v7235_v30  ;;  %v7286_v16 = vpop.permute.xlu1 %7285 }
0x2c9d   :  { %v7247_v3 = vmul.f32 1.442695, %v7241_v17 }
0x2c9e   :  { %v7238_v11 = vpop.xlane.xlu0 %7237 }
0x2c9f   :  { %v7242_v51 = vsub.f32 %v13110_v59, %v7238_v11  ;;  %10834 = vpow2.f32 %v7247_v3  ;;  %v7282_v59 = vpop.permute.xlu1 %7281 }
0x2ca1   :  { %v7249_v26 = vmul.f32 1.442695, %v7242_v51 }
0x2ca2   :  { %v7284_v28 = vpop.permute.xlu0 %7283 }
0x2ca3   :  { %10836 = vpow2.f32 %v7249_v26  ;;  %v7280_v43 = vpop.permute.xlu1 %7279 }
0x2ca4   :  { %v13130_v40 = vpop.eup %10830 }
0x2ca5   :  { %v7254_v63 = vsel %vm470_vm0, %v13130_v40, 0.0 }
0x2ca6   :  { %7255 = vadd.xlane.f32.xlu0 %v7254_v63 }
0x2ca8   :  { %v13134_v44 = vpop.eup %10832 }
0x2ca9   :  { %v7251_v46 = vsel %vm470_vm0, %v13134_v44, 0.0 }
0x2caa   :  { %7252 = vadd.xlane.f32.xlu1 %v7251_v46 }
0x2cac   :  { %v13148_v4 = vpop.eup %10834 }
0x2cad   :  { %v7257_v8 = vsel %vm470_vm0, %v13148_v4, 0.0 }
0x2cb0   :  { %v13150_v7 = vpop.eup %10836 }
0x2cb1   :  { %v7260_v13 = vsel %vm470_vm0, %v13150_v7, 0.0 }
0x2cbb   :  { %7275 = vrot.lane.b32.xlu1 %v12870_v56, %s11355_s14 }
0x2cbc   :  { %7273 = vrot.lane.b32.xlu0 %v12858_v42, %s11355_s14 }
0x2cc0   :  { %7271 = vrot.lane.b32.xlu0 %v12862_v60, %s11355_s14  ;;  %s8501_s14 = sshll.u32 %s11363_s15, 4  ;;  %s8502_s14 = int_to_ptr.vmem [resolvable:$true] %s8501_s14 }
0x2cc1   :  { %s11210_s3 = scalar_lea.vmem %s8502_s14, 512  ;;  %p11215_p11 = scmp.lt.s32.totalorder %s8502_s14, %s8502_s14 }
0x2cc2   :  { %p11211_p10 = scmp.ne.s32.totalorder %s8502_s14, %s11210_s3  ;;  %p11216_p12 = scmp.lt.s32.totalorder %s11210_s3, %s11210_s3 }
0x2cc4   :  { %p11217_p13 = por %p11216_p12, %p11215_p11 }
0x2cc6   :  { %p11218_p0 = pnand %p11217_p13, %p11211_p10 }
0x2cdf   :  { %7258 = vadd.xlane.f32.xlu1 %v7257_v8  ;;  %7261 = vadd.xlane.f32.xlu0 %v7260_v13 }
0x2cf0   :  { %7515 = vrot.lane.b32.xlu1 %v12880_v58, %s11356_s5 }
0x2cf4   :  { %7511 = vrot.lane.b32.xlu1 %v12874_v62, %s11356_s5 }
0x2cf5   :  { %7513 = vrot.lane.b32.xlu0 %v12886_v45, %s11356_s5 }
0x2cf8   :  { %7509 = vrot.lane.b32.xlu1 %v12876_v57, %s11356_s5 }
0x2cf9   :  { %7507 = vrot.lane.b32.xlu0 %v12866_v14, %s11356_s5 }
0x2cfc   :  { %7505 = vrot.lane.b32.xlu1 %v12870_v56, %s11356_s5 }
0x2cfd   :  { %7503 = vrot.lane.b32.xlu0 %v12858_v42, %s11356_s5 }
0x2d00   :  { %7501 = vrot.lane.b32.xlu1 %v12862_v60, %s11356_s5 }
0x2d01   :  { %7493 = vrot.lane.b32.xlu0 %v12854_v37, %s11356_s5  ;;  %v7278_v37 = vpop.permute.xlu0 %7277 }
0x2d04   :  { %7495 = vrot.lane.b32.xlu1 %v12926_v1, %s11356_s5 }
0x2d05   :  { %7497 = vrot.lane.b32.xlu0 %v12928_v0, %s11356_s5 }
0x2d08   :  { %7499 = vrot.lane.b32.xlu1 %v12934_v27, %s11356_s5  ;;  %s11364_s5 = smov [#allocation29]  }
0x2d2b   :  { %v10313_v55 = vpop.f32.mrf.mxu1 }
0x2d2d   :  { %v6881_v29 = vpop.f32.mrf.mxu1 }
0x2d2e   :  { %10319 = vmatprep.mubr.msk.f32.mxu1 %vm1153_vm3, %v6881_v29 }
0x2d2f   :  { %10320 = vmatmul.mubr.msk.f32.vlgmr.msra.gmra.mxu1 %vm1153_vm3, %v10313_v55  ;;  %v7256_v31 = vpop.xlane.xlu0 %7255 }
0x2d30   :  { %10326 = vmatpush3.msra.mxu1 %v6308_v49 }
0x2d31   :  { %10355 = vmatprep.subr.mxu1 %v7286_v16 }
0x2d32   :  { %v10316_v1 = vpop.f32.mrf.mxu1 }
0x2d33   :  { %v7253_v48 = vpop.xlane.xlu1 %7252  ;;  %v7274_v32 = vpop.permute.xlu0 %7273 }
0x2d34   :  { %10838 = vrcp.f32 %v7253_v48  ;;  %v6891_v0 = vpop.f32.mrf.mxu1 }
0x2d35   :  { %10322 = vmatprep.mubr.msk.f32.mxu1 %vm1153_vm3, %v6891_v0  ;;  %10840 = vrcp.f32 %v7256_v31 }
0x2d36   :  { %10323 = vmatmul.mubr.msk.f32.gmra.mxu1 %vm1153_vm3, %v10316_v1 }
0x2d37   :  { %10327 = vmatprep.mubr.msk.f32.mxu1 %vm1153_vm3, %v13068_v50  ;;  %v7272_v5 = vpop.permute.xlu0 %7271 }
0x2d3a   :  { %10328 = vmatmul.mubr.msk.f32.vlgmr.msra.gmra.mxu1 %vm1153_vm3, %v13066_v52  ;;  %v7276_v52 = vpop.permute.xlu1 %7275 }
0x2d3b   :  { %10356 = vmatpush3.msra.mxu1 %v7286_v16  ;;  %10330 = vmatprep.mubr.msk.f32.mxu1 %vm1153_vm3, %v13072_v2 }
0x2d3c   :  { %10357 = vmatprep.subr.mxu1 %v7284_v28 }
0x2d3d   :  { %10358 = vmatpush3.msra.mxu1 %v7284_v28 }
0x2d3e   :  { %10359 = vmatprep.subr.mxu1 %v7282_v59  ;;  %10331 = vmatmul.mubr.msk.f32.gmra.mxu1 %vm1153_vm3, %v13070_v54  ;;  %v6310_v54 = vld [vmem:[%s13486_s23 + $0x10] sm:$0xff] }
0x2d3f   :  { %10360 = vmatpush3.msra.mxu1 %v7282_v59 }
0x2d40   :  { %10361 = vmatprep.subr.mxu1 %v7280_v43 }
0x2d41   :  { %v10839_v27 = vpop.eup %10838  ;;  %10362 = vmatpush3.msra.mxu1 %v7280_v43 }
0x2d42   :  { %10363 = vmatprep.subr.mxu1 %v7278_v37  ;;  %v7267_v50 = vmul.f32 %v10839_v27, %v13134_v44  ;;  %v10841_v2 = vpop.eup %10840 }
0x2d43   :  { %10364 = vmatpush3.msra.mxu1 %v7278_v37  ;;  %v7268_v23 = vmul.f32 %v10841_v2, %v13130_v40 }
0x2d44   :  { %10365 = vmatprep.subr.mxu1 %v7276_v52  ;;  %10371 = vmatprep.mubr.msk.f32.mxu1 %vm470_vm0, %v7267_v50 }
0x2d45   :  { %10366 = vmatpush3.msra.mxu1 %v7276_v52 }
0x2d46   :  { %10367 = vmatprep.subr.mxu1 %v7274_v32 }
0x2d47   :  { %10368 = vmatpush3.msra.mxu1 %v7274_v32 }
0x2d48   :  { %10369 = vmatprep.subr.mxu1 %v7272_v5 }
0x2d49   :  { %10370 = vmatpush3.msra.mxu1 %v7272_v5 }
0x2d4a   :  { %10372 = vmatmul.mubr.msk.f32.vlgmr.msra.gmra.mxu1 %vm470_vm0, %v7268_v23  ;;  %10377 = vmatprep.subr.mxu1 %v6310_v54 }
0x2d4b   :  { %10378 = vmatpush3.msra.mxu1 %v6310_v54 }
0x2d68   :  { %v7262_v12 = vpop.xlane.xlu0 %7261  ;;  %v7259_v9 = vpop.xlane.xlu1 %7258 }
0x2d69   :  { %10842 = vrcp.f32 %v7262_v12 }
0x2d6a   :  { %10844 = vrcp.f32 %v7259_v9 }
0x2d6c   :  { %v7516_v22 = vpop.permute.xlu1 %7515  ;;  %v7514_v17 = vpop.permute.xlu0 %7513 }
0x2d6d   :  { %10385 = vmatprep.subr.msk.mxu1 %vm1153_vm3, %v7516_v22 }
0x2d70   :  { %v7512_v51 = vpop.permute.xlu1 %7511  ;;  %v7508_v26 = vpop.permute.xlu0 %7507 }
0x2d74   :  { %v7510_v3 = vpop.permute.xlu1 %7509 }
0x2d76   :  { %v10843_v38 = vpop.eup %10842 }
0x2d77   :  { %v10845_v18 = vpop.eup %10844  ;;  %v7270_v20 = vmul.f32 %v10843_v38, %v13150_v7  ;;  %v7504_v7 = vpop.permute.xlu0 %7503 }
0x2d78   :  { %v7269_v6 = vmul.f32 %v10845_v18, %v13148_v4  ;;  %v7506_v4 = vpop.permute.xlu1 %7505 }
0x2d7a   :  { %10374 = vmatprep.mubr.msk.f32.mxu1 %vm470_vm0, %v7269_v6 }
0x2d7b   :  { %10375 = vmatmul.mubr.msk.f32.gmra.mxu1 %vm470_vm0, %v7270_v20  ;;  %v7494_v16 = vpop.permute.xlu0 %7493 }
0x2d7c   :  { %v7502_v8 = vpop.permute.xlu1 %7501 }
0x2d7f   :  { %v7498_v55 = vpop.permute.xlu0 %7497 }
0x2d80   :  { %v7496_v28 = vpop.permute.xlu1 %7495 }
0x2d84   :  { %v7500_v29 = vpop.permute.xlu1 %7499 }
0x2def   :  { %v10321_v33 = vpop.f32.mrf.mxu1 }
0x2df1   :  { %v6978_v10 = vpop.f32.mrf.mxu1 }
0x2df6   :  { %v10324_v35 = vpop.f32.mrf.mxu1 }
0x2df8   :  { %v6988_v19 = vpop.f32.mrf.mxu1 }
0x2dfa   :  { %v10329_v39 = vpop.f32.mrf.mxu1 }
0x2dfb   :  { %v7081_v34 = vadd.f32 %v10329_v39, %v10321_v33 }
0x2dfc   :  { %v7075_v40 = vpop.f32.mrf.mxu1 }
0x2dfd   :  { %v7076_v63 = vadd.f32 %v7075_v40, %v6978_v10 }
0x2dfe   :  { %v10332_v44 = vpop.f32.mrf.mxu1 }
0x2dff   :  { %v7091_v46 = vadd.f32 %v10332_v44, %v10324_v35 }
0x2e00   :  { %v7085_v47 = vpop.f32.mrf.mxu1 }
0x2e01   :  { %v7086_v49 = vadd.f32 %v7085_v47, %v6988_v19 }
0x2e0a   :  { %v10373_v30 = vpop.f32.mrf.mxu1 }
0x2e0c   :  { %v7373_v11 = vpop.f32.mrf.mxu1 }
0x2e0d   :  { %10379 = vmatprep.mubr.msk.f32.mxu1 %vm1153_vm3, %v7373_v11 }
0x2e0e   :  { %10380 = vmatmul.mubr.msk.f32.vlgmr.msra.gmra.mxu1 %vm1153_vm3, %v10373_v30 }
0x2e0f   :  { %10386 = vmatpush3.xpose.msk.msra.mxu1 %vm1153_vm3, %v7516_v22 }
0x2e10   :  { %10387 = vmatprep.subr.msk.mxu1 %vm1153_vm3, %v7514_v17 }
0x2e13   :  { %10388 = vmatpush3.xpose.msk.msra.mxu1 %vm1153_vm3, %v7514_v17 }
0x2e14   :  { %10389 = vmatprep.subr.msk.mxu1 %vm1153_vm3, %v7512_v51 }
0x2e17   :  { %10390 = vmatpush3.xpose.msk.msra.mxu1 %vm1153_vm3, %v7512_v51 }
0x2e18   :  { %10391 = vmatprep.subr.msk.mxu1 %vm1153_vm3, %v7510_v3 }
0x2e1b   :  { %10392 = vmatpush3.xpose.msk.msra.mxu1 %vm1153_vm3, %v7510_v3 }
0x2e1c   :  { %10393 = vmatprep.subr.msk.mxu1 %vm1153_vm3, %v7508_v26 }
0x2e1f   :  { %10394 = vmatpush3.xpose.msk.msra.mxu1 %vm1153_vm3, %v7508_v26 }
0x2e20   :  { %10395 = vmatprep.subr.msk.mxu1 %vm1153_vm3, %v7506_v4 }
0x2e23   :  { %10396 = vmatpush3.xpose.msk.msra.mxu1 %vm1153_vm3, %v7506_v4 }
0x2e24   :  { %10397 = vmatprep.subr.msk.mxu1 %vm1153_vm3, %v7504_v7 }
0x2e27   :  { %10398 = vmatpush3.xpose.msk.msra.mxu1 %vm1153_vm3, %v7504_v7 }
0x2e28   :  { %10399 = vmatprep.subr.msk.mxu1 %vm1153_vm3, %v7502_v8 }
0x2e2b   :  { %10400 = vmatpush3.xpose.msk.msra.mxu1 %vm1153_vm3, %v7502_v8 }
0x2e3b   :  { %v10376_v13 = vpop.f32.mrf.mxu1 }
0x2e3d   :  { %v7383_v59 = vpop.f32.mrf.mxu1 }
0x2e3e   :  { %10382 = vmatprep.mubr.msk.f32.mxu1 %vm1153_vm3, %v7383_v59  ;;  %v6311_v59 = vld [vmem:[%s13486_s23 + $0x18] sm:$0xff] }
0x2e3f   :  { %10383 = vmatmul.mubr.msk.f32.gmra.mxu1 %vm1153_vm3, %v10376_v13 }
0x2e40   :  { %10401 = vmatprep.mubr.msk.f32.mxu1 %vm1153_vm3, %v7494_v16 }
0x2e43   :  { %10402 = vmatmul.mubr.msk.f32.vlgmr.msra.gmra.mxu1 %vm1153_vm3, %v7496_v28 }
0x2e44   :  { %10404 = vmatprep.mubr.msk.f32.mxu1 %vm1153_vm3, %v7498_v55 }
0x2e47   :  { %10405 = vmatmul.mubr.msk.f32.gmra.mxu1 %vm1153_vm3, %v7500_v29 }
0x2ece   :  { %v10381_v43 = vpop.f32.mrf.mxu1 }
0x2ecf   :  { %v13225_v37 = vadd.f32 %v10381_v43, %v7081_v34 }
0x2ed0   :  { %v7470_v1 = vpop.f32.mrf.mxu1 }
0x2ed1   :  { %v13227_v48 = vadd.f32 %v7470_v1, %v7076_v63 }
0x2eff   :  { %v10384_v0 = vpop.f32.mrf.mxu1 }
0x2f00   :  { %v13229_v31 = vadd.f32 %v10384_v0, %v7091_v46 }
0x2f01   :  { %v7480_v27 = vpop.f32.mrf.mxu1 }
0x2f02   :  { %v13231_v32 = vadd.f32 %v7480_v27, %v7086_v49 }
0x2f03   :  { %v10403_v50 = vpop.f32.mrf.mxu1 }
0x2f04   :  { %v7613_v52 = vadd.f32 %v12943_v41, %v10403_v50 }
0x2f05   :  { %v7607_v2 = vpop.f32.mrf.mxu1 }
0x2f06   :  { %v7608_v5 = vadd.f32 %v12947_v25, %v7607_v2  ;;  %v7629_v54 = vsel %vm470_vm0, %v7613_v52, -inf }
0x2f07   :  { %7630 = vmax.xlane.f32.xlu1 %v7629_v54  ;;  %v10406_v23 = vpop.f32.mrf.mxu1 }
0x2f08   :  { %v7626_v12 = vsel %vm470_vm0, %v7608_v5, -inf  ;;  %v7623_v38 = vadd.f32 %v12952_v61, %v10406_v23 }
0x2f09   :  { %7627 = vmax.xlane.f32.xlu0 %v7626_v12  ;;  %v7617_v9 = vpop.f32.mrf.mxu1 }
0x2f0a   :  { %v7618_v22 = vadd.f32 %v12957_v36, %v7617_v9  ;;  %v7635_v41 = vsel %vm470_vm0, %v7623_v38, -inf }
0x2f0c   :  { %v7632_v18 = vsel %vm470_vm0, %v7618_v22, -inf }
0x2f0d   :  { %7633 = vmax.xlane.f32.xlu0 %v7632_v18 }
0x2f11   :  { %7636 = vmax.xlane.f32.xlu0 %v7635_v41 }
0x2f18   :  { %7684 = vrot.lane.b32.xlu1 %v12880_v58, %s11357_s27 }
0x2f1c   :  { %7680 = vrot.lane.b32.xlu1 %v12874_v62, %s11357_s27 }
0x2f20   :  { %7678 = vrot.lane.b32.xlu1 %v12876_v57, %s11357_s27 }
0x2f24   :  { %7674 = vrot.lane.b32.xlu1 %v12870_v56, %s11357_s27 }
0x2f27   :  { %7682 = vrot.lane.b32.xlu0 %v12886_v45, %s11357_s27 }
0x2f2b   :  { %7676 = vrot.lane.b32.xlu0 %v12866_v14, %s11357_s27 }
0x2f90   :  { %v7631_v25 = vpop.xlane.xlu1 %7630 }
0x2f91   :  { %v7639_v61 = vsub.f32 %v7613_v52, %v7631_v25 }
0x2f92   :  { %v7628_v36 = vpop.xlane.xlu0 %7627 }
0x2f93   :  { %v7644_v20 = vmul.f32 1.442695, %v7639_v61  ;;  %v7638_v58 = vsub.f32 %v7608_v5, %v7628_v36 }
0x2f94   :  { %v7685_v6 = vpop.permute.xlu1 %7684 }
0x2f95   :  { %10846 = vpow2.f32 %v7644_v20  ;;  %v7642_v62 = vmul.f32 1.442695, %v7638_v58  ;;  %10407 = vmatprep.subr.mxu0 %v7685_v6 }
0x2f96   :  { %v7634_v33 = vpop.xlane.xlu0 %7633  ;;  %10408 = vmatpush3.msra.mxu0 %v7685_v6 }
0x2f97   :  { %10848 = vpow2.f32 %v7642_v62  ;;  %v7640_v57 = vsub.f32 %v7618_v22, %v7634_v33 }
0x2f98   :  { %v7681_v10 = vpop.permute.xlu1 %7680 }
0x2f99   :  { %v7646_v56 = vmul.f32 1.442695, %v7640_v57 }
0x2f9a   :  { %v7637_v35 = vpop.xlane.xlu0 %7636 }
0x2f9b   :  { %10850 = vpow2.f32 %v7646_v56  ;;  %v7641_v45 = vsub.f32 %v7623_v38, %v7637_v35 }
0x2f9c   :  { %v7679_v39 = vpop.permute.xlu1 %7678 }
0x2f9d   :  { %v7648_v19 = vmul.f32 1.442695, %v7641_v45 }
0x2f9e   :  { %v7683_v14 = vpop.permute.xlu0 %7682 }
0x2f9f   :  { %10852 = vpow2.f32 %v7648_v19  ;;  %10409 = vmatprep.subr.mxu0 %v7683_v14 }
0x2fa0   :  { %10410 = vmatpush3.msra.mxu0 %v7683_v14  ;;  %v7675_v47 = vpop.permute.xlu1 %7674 }
0x2fa1   :  { %10411 = vmatprep.subr.mxu0 %v7681_v10 }
0x2fa2   :  { %v10847_v34 = vpop.eup %10846  ;;  %10412 = vmatpush3.msra.mxu0 %v7681_v10  ;;  %v7677_v44 = vpop.permute.xlu0 %7676 }
0x2fa3   :  { %10413 = vmatprep.subr.mxu0 %v7679_v39  ;;  %v7653_v40 = vsel %vm470_vm0, %v10847_v34, 0.0 }
0x2fa4   :  { %v10849_v63 = vpop.eup %10848  ;;  %7654 = vadd.xlane.f32.xlu0 %v7653_v40  ;;  %10414 = vmatpush3.msra.mxu0 %v7679_v39  ;;  %v7973_v40 = vld [vmem:[%s13487_s7 + $0x18] sm:$0xff] }
0x2fa5   :  { %10415 = vmatprep.subr.mxu0 %v7677_v44  ;;  %v7650_v46 = vsel %vm470_vm0, %v10849_v63, 0.0 }
0x2fa6   :  { %7651 = vadd.xlane.f32.xlu1 %v7650_v46  ;;  %10416 = vmatpush3.msra.mxu0 %v7677_v44  ;;  %v7971_v44 = vld [vmem:[%s13487_s7 + $0x8] sm:$0xff]  ;;  %v7970_v46 = vld [vmem:[%s13487_s7] sm:$0xff] }
0x2fa7   :  { %10417 = vmatprep.subr.mxu0 %v7675_v47 }
0x2fa8   :  { %v10851_v49 = vpop.eup %10850  ;;  %10418 = vmatpush3.msra.mxu0 %v7675_v47  ;;  %v8097_v47 = vld [vmem:[%s13488_s10 + $0x78] sm:$0xff] }
0x2fa9   :  { %v7656_v30 = vsel %vm470_vm0, %v10851_v49, 0.0  ;;  %10451 = vmatprep.subr.mxu1 %v8097_v47 }
0x2faa   :  { %7657 = vadd.xlane.f32.xlu1 %v7656_v30  ;;  %10452 = vmatpush3.msra.mxu1 %v8097_v47  ;;  %v8095_v30 = vld [vmem:[%s13488_s10 + $0x68] sm:$0xff] }
0x2fac   :  { %v10853_v11 = vpop.eup %10852 }
0x2fad   :  { %v7659_v17 = vsel %vm470_vm0, %v10853_v11, 0.0 }
0x2fae   :  { %7660 = vadd.xlane.f32.xlu0 %v7659_v17  ;;  %v8093_v17 = vld [vmem:[%s13488_s10 + $0x58] sm:$0xff] }
0x2fbb   :  { %7670 = vrot.lane.b32.xlu1 %v12862_v60, %s11357_s27 }
0x2fc4   :  { %7672 = vrot.lane.b32.xlu0 %v12858_v42, %s11357_s27  ;;  %s8515_s27 = sshll.u32 %s11364_s5, 4  ;;  %s8516_s27 = int_to_ptr.vmem [resolvable:$true] %s8515_s27 }
0x302d   :  { %v7655_v51 = vpop.xlane.xlu0 %7654 }
0x302e   :  { %10854 = vrcp.f32 %v7655_v51  ;;  %v8092_v51 = vld [vmem:[%s13488_s10 + $0x50] sm:$0xff] }
0x302f   :  { %v7652_v3 = vpop.xlane.xlu1 %7651 }
0x3030   :  { %10856 = vrcp.f32 %v7652_v3  ;;  %v8091_v3 = vld [vmem:[%s13488_s10 + $0x48] sm:$0xff] }
0x3033   :  { %v7658_v26 = vpop.xlane.xlu1 %7657 }
0x3034   :  { %10858 = vrcp.f32 %v7658_v26  ;;  %v8090_v26 = vld [vmem:[%s13488_s10 + $0x40] sm:$0xff] }
0x3037   :  { %v7661_v4 = vpop.xlane.xlu0 %7660  ;;  %v7671_v16 = vpop.permute.xlu1 %7670 }
0x3038   :  { %10860 = vrcp.f32 %v7661_v4  ;;  %v8089_v4 = vld [vmem:[%s13488_s10 + $0x38] sm:$0xff] }
0x303b   :  { %v7673_v7 = vpop.permute.xlu0 %7672  ;;  %v10855_v8 = vpop.eup %10854 }
0x303c   :  { %10419 = vmatprep.subr.mxu0 %v7673_v7  ;;  %v7667_v28 = vmul.f32 %v10855_v8, %v10847_v34  ;;  %v8087_v8 = vld [vmem:[%s13488_s10 + $0x28] sm:$0xff] }
0x303d   :  { %v10857_v13 = vpop.eup %10856  ;;  %10420 = vmatpush3.msra.mxu0 %v7673_v7  ;;  %v8088_v7 = vld [vmem:[%s13488_s10 + $0x30] sm:$0xff] }
0x303e   :  { %10421 = vmatprep.subr.mxu0 %v7671_v16  ;;  %v7666_v60 = vmul.f32 %v10857_v13, %v10849_v63  ;;  %v7972_v63 = vld [vmem:[%s13487_s7 + $0x10] sm:$0xff]  ;;  %v8086_v13 = vld [vmem:[%s13488_s10 + $0x20] sm:$0xff] }
0x303f   :  { %10422 = vmatpush3.msra.mxu0 %v7671_v16 }
0x3040   :  { %10423 = vmatprep.mubr.msk.f32.mxu0 %vm470_vm0, %v7666_v60  ;;  %10429 = vmatprep.subr.mxu0 %v6311_v59 }
0x3041   :  { %v10859_v42 = vpop.eup %10858  ;;  %10424 = vmatmul.mubr.msk.f32.vlgmr.msra.gmra.mxu0 %vm470_vm0, %v7667_v28 }
0x3042   :  { %v7668_v55 = vmul.f32 %v10859_v42, %v10851_v49  ;;  %10430 = vmatpush3.msra.mxu0 %v6311_v59  ;;  %v8096_v49 = vld [vmem:[%s13488_s10 + $0x70] sm:$0xff] }
0x3043   :  { %10437 = vmatprep.subr.mxu0 %v7973_v40  ;;  %10453 = vmatprep.subr.mxu1 %v8096_v49 }
0x3044   :  { %10426 = vmatprep.mubr.msk.f32.mxu0 %vm470_vm0, %v7668_v55  ;;  %10454 = vmatpush3.msra.mxu1 %v8096_v49 }
0x3045   :  { %v10861_v29 = vpop.eup %10860  ;;  %10455 = vmatprep.subr.mxu1 %v8095_v30 }
0x3046   :  { %v7669_v43 = vmul.f32 %v10861_v29, %v10853_v11  ;;  %v8094_v11 = vld [vmem:[%s13488_s10 + $0x60] sm:$0xff]  ;;  %10456 = vmatpush3.msra.mxu1 %v8095_v30 }
0x3047   :  { %10457 = vmatprep.subr.mxu1 %v8094_v11 }
0x3048   :  { %10427 = vmatmul.mubr.msk.f32.gmra.mxu0 %vm470_vm0, %v7669_v43  ;;  %10458 = vmatpush3.msra.mxu1 %v8094_v11 }
0x3049   :  { %10459 = vmatprep.subr.mxu1 %v8093_v17 }
0x304a   :  { %10460 = vmatpush3.msra.mxu1 %v8093_v17 }
0x304b   :  { %10461 = vmatprep.subr.mxu1 %v8092_v51 }
0x304c   :  { %10462 = vmatpush3.msra.mxu1 %v8092_v51 }
0x304d   :  { %10463 = vmatprep.subr.mxu1 %v8091_v3 }
0x304e   :  { %10464 = vmatpush3.msra.mxu1 %v8091_v3 }
0x304f   :  { %10465 = vmatprep.subr.mxu1 %v8090_v26 }
0x3050   :  { %10466 = vmatpush3.msra.mxu1 %v8090_v26 }
0x3051   :  { %10467 = vmatprep.subr.mxu1 %v8089_v4 }
0x3052   :  { %10468 = vmatpush3.msra.mxu1 %v8089_v4 }
0x3053   :  { %10469 = vmatprep.subr.mxu1 %v8088_v7 }
0x3054   :  { %10470 = vmatpush3.msra.mxu1 %v8088_v7 }
0x3055   :  { %10471 = vmatprep.subr.mxu1 %v8087_v8 }
0x3056   :  { %10472 = vmatpush3.msra.mxu1 %v8087_v8 }
0x3057   :  { %10473 = vmatprep.subr.mxu1 %v8086_v13 }
0x3058   :  { %10474 = vmatpush3.msra.mxu1 %v8086_v13 }
0x3101   :  { %v10425_v1 = vpop.f32.mrf.mxu0 }
0x3103   :  { %v7772_v0 = vpop.f32.mrf.mxu0 }
0x3104   :  { %10431 = vmatprep.mubr.msk.f32.mxu0 %vm1153_vm3, %v7772_v0 }
0x3105   :  { %10432 = vmatmul.mubr.msk.f32.vlgmr.msra.gmra.mxu0 %vm1153_vm3, %v10425_v1 }
0x3106   :  { %10438 = vmatpush3.msra.mxu0 %v7973_v40 }
0x3107   :  { %10439 = vmatprep.subr.mxu0 %v7972_v63 }
0x3108   :  { %v10428_v27 = vpop.f32.mrf.mxu0  ;;  %10440 = vmatpush3.msra.mxu0 %v7972_v63 }
0x3109   :  { %10441 = vmatprep.subr.mxu0 %v7971_v44 }
0x310a   :  { %v7782_v50 = vpop.f32.mrf.mxu0  ;;  %10442 = vmatpush3.msra.mxu0 %v7971_v44 }
0x310b   :  { %10434 = vmatprep.mubr.msk.f32.mxu0 %vm1153_vm3, %v7782_v50  ;;  %10443 = vmatprep.subr.mxu0 %v7970_v46 }
0x310c   :  { %10435 = vmatmul.mubr.msk.f32.gmra.mxu0 %vm1153_vm3, %v10428_v27 }
0x310d   :  { %10444 = vmatpush3.msra.mxu0 %v7970_v46 }
0x31c5   :  { %v10433_v52 = vpop.f32.mrf.mxu0 }
0x31c6   :  { %v7889_v2 = vadd.f32 %v10433_v52, %v13225_v37 }
0x31c7   :  { %v7869_v5 = vpop.f32.mrf.mxu0 }
0x31c8   :  { %v7893_v54 = vadd.f32 %v7889_v2, %v12821_v15  ;;  %v7888_v23 = vadd.f32 %v7869_v5, %v13227_v48  ;;  %v8934_v5 = vld [vmem:[#allocation8] ss:$0 sm:$0xff] }
0x31ca   :  { %v7892_v12 = vadd.f32 %v7888_v23, %v12819_v24  ;;  %v7901_v9 = vsel %vm579_vm1, %v7893_v54, 0.0 }
0x31cb   :  { %7902 = vadd.xlane.f32.xlu1 %v7901_v9  ;;  %v8935_v9 = vld [vmem:[#allocation10] ss:$0 sm:$0xff] }
0x31cc   :  { %v10436_v22 = vpop.f32.mrf.mxu0  ;;  %v7898_v38 = vsel %vm579_vm1, %v7892_v12, 0.0 }
0x31cd   :  { %7899 = vadd.xlane.f32.xlu0 %v7898_v38  ;;  %v7891_v41 = vadd.f32 %v10436_v22, %v13229_v31 }
0x31ce   :  { %v7879_v18 = vpop.f32.mrf.mxu0 }
0x31cf   :  { %v7890_v25 = vadd.f32 %v7879_v18, %v13231_v32  ;;  %v7895_v15 = vadd.f32 %v7891_v41, %v12832_v53 }
0x31d1   :  { %v7894_v37 = vadd.f32 %v7890_v25, %v12830_v21  ;;  %v7907_v24 = vsel %vm579_vm1, %v7895_v15, 0.0 }
0x31d3   :  { %v7904_v48 = vsel %vm579_vm1, %v7894_v37, 0.0 }
0x31d4   :  { %7905 = vadd.xlane.f32.xlu0 %v7904_v48 }
0x31d8   :  { %7908 = vadd.xlane.f32.xlu0 %v7907_v24 }
0x3254   :  { %v7903_v61 = vpop.xlane.xlu1 %7902 }
0x3255   :  { %v7911_v36 = vmul.f32 0.03125, %v7903_v61 }
0x3256   :  { %v7900_v20 = vpop.xlane.xlu0 %7899 }
0x3257   :  { %v13282_v58 = vsub.f32 %v7893_v54, %v7911_v36  ;;  %v7910_v6 = vmul.f32 0.03125, %v7900_v20  ;;  %v8085_v20 = vld [vmem:[%s13488_s10 + $0x18] sm:$0xff] }
0x3258   :  { %10475 = vmatprep.subr.mxu1 %v8085_v20 }
0x3259   :  { %v13284_v62 = vsub.f32 %v7892_v12, %v7910_v6  ;;  %v7919_v31 = vmul.f32 %v13282_v58, %v13282_v58  ;;  %10476 = vmatpush3.msra.mxu1 %v8085_v20  ;;  %v8083_v6 = vld [vmem:[%s13488_s10 + $0x8] sm:$0xff] }
0x325b   :  { %v7925_v21 = vsel %vm579_vm1, %v7919_v31, 0.0  ;;  %v7918_v53 = vmul.f32 %v13284_v62, %v13284_v62  ;;  %v8936_v31 = vld [vmem:[#allocation11] ss:$0 sm:$0xff] }
0x325c   :  { %7926 = vadd.xlane.f32.xlu0 %v7925_v21 }
0x325d   :  { %v7906_v32 = vpop.xlane.xlu0 %7905  ;;  %v7922_v33 = vsel %vm579_vm1, %v7918_v53, 0.0 }
0x325e   :  { %v7912_v57 = vmul.f32 0.03125, %v7906_v32  ;;  %7923 = vadd.xlane.f32.xlu1 %v7922_v33 }
0x3260   :  { %v13292_v56 = vsub.f32 %v7894_v37, %v7912_v57 }
0x3261   :  { %v7909_v10 = vpop.xlane.xlu0 %7908 }
0x3262   :  { %v7913_v35 = vmul.f32 0.03125, %v7909_v10  ;;  %v7920_v45 = vmul.f32 %v13292_v56, %v13292_v56 }
0x3264   :  { %v13296_v19 = vsub.f32 %v7895_v15, %v7913_v35  ;;  %v7928_v14 = vsel %vm579_vm1, %v7920_v45, 0.0 }
0x3265   :  { %7929 = vadd.xlane.f32.xlu1 %v7928_v14 }
0x3266   :  { %v7921_v39 = vmul.f32 %v13296_v19, %v13296_v19 }
0x3268   :  { %v7931_v34 = vsel %vm579_vm1, %v7921_v39, 0.0 }
0x3269   :  { %7932 = vadd.xlane.f32.xlu0 %v7931_v34  ;;  %v8941_v34 = vld [vmem:[#allocation13] ss:$0 sm:$0xff] }
0x32e5   :  { %v7927_v16 = vpop.xlane.xlu0 %7926 }
0x32e6   :  { %v7935_v59 = vmul.f32 0.03125, %v7927_v16 }
0x32e7   :  { %v7924_v60 = vpop.xlane.xlu1 %7923 }
0x32e8   :  { %v7939_v28 = vadd.f32 1e-05, %v7935_v59  ;;  %v7934_v42 = vmul.f32 0.03125, %v7924_v60 }
0x32ea   :  { %10862 = vrsqrt.f32 %v7939_v28  ;;  %v7938_v55 = vadd.f32 1e-05, %v7934_v42 }
0x32ec   :  { %10864 = vrsqrt.f32 %v7938_v55 }
0x32ee   :  { %v7930_v29 = vpop.xlane.xlu1 %7929 }
0x32ef   :  { %v7936_v43 = vmul.f32 0.03125, %v7930_v29 }
0x32f1   :  { %v7940_v1 = vadd.f32 1e-05, %v7936_v43 }
0x32f2   :  { %v7933_v0 = vpop.xlane.xlu0 %7932 }
0x32f3   :  { %10866 = vrsqrt.f32 %v7940_v1  ;;  %v7937_v27 = vmul.f32 0.03125, %v7933_v0 }
0x32f5   :  { %v7941_v50 = vadd.f32 1e-05, %v7937_v27 }
0x32f7   :  { %v10863_v52 = vpop.eup %10862  ;;  %10868 = vrsqrt.f32 %v7941_v50 }
0x32f8   :  { %v7947_v2 = vmul.f32 %v10863_v52, %v13282_v58  ;;  %v8084_v58 = vld [vmem:[%s13488_s10 + $0x10] sm:$0xff] }
0x32f9   :  { %v10865_v54 = vpop.eup %10864  ;;  %10477 = vmatprep.subr.mxu1 %v8084_v58 }
0x32fa   :  { %v7946_v23 = vmul.f32 %v10865_v54, %v13284_v62  ;;  %v7957_v12 = vmul.f32 %v8934_v5, %v7947_v2  ;;  %10478 = vmatpush3.msra.mxu1 %v8084_v58  ;;  %v8082_v62 = vld [vmem:[%s13488_s10] sm:$0xff] }
0x32fb   :  { %10479 = vmatprep.subr.mxu1 %v8083_v6 }
0x32fc   :  { %v7956_v22 = vmul.f32 %v8934_v5, %v7946_v23  ;;  %v7967_v18 = vadd.f32 %v8935_v9, %v7957_v12  ;;  %10480 = vmatpush3.msra.mxu1 %v8083_v6 }
0x32fd   :  { %10481 = vmatprep.subr.mxu1 %v8082_v62 }
0x32fe   :  { %v7966_v38 = vadd.f32 %v8935_v9, %v7956_v22  ;;  %10482 = vmatpush3.msra.mxu1 %v8082_v62 }
0x3300   :  { %v10867_v41 = vpop.eup %10866  ;;  %10445 = vmatprep.mubr.msk.f32.mxu0 %vm579_vm1, %v7966_v38 }
0x3301   :  { %10446 = vmatmul.mubr.msk.f32.vlgmr.msra.gmra.mxu0 %vm579_vm1, %v7967_v18  ;;  %v7948_v25 = vmul.f32 %v10867_v41, %v13292_v56  ;;  %v8269_v41 = vld [vmem:[%s13489_s11 + $0x8] sm:$0xff] }
0x3303   :  { %v7958_v37 = vmul.f32 %v8934_v5, %v7948_v25  ;;  %v8268_v25 = vld [vmem:[%s13489_s11] sm:$0xff] }
0x3304   :  { %v10869_v15 = vpop.eup %10868 }
0x3305   :  { %v7949_v48 = vmul.f32 %v10869_v15, %v13296_v19  ;;  %v7968_v24 = vadd.f32 %v8935_v9, %v7958_v37 }
0x3307   :  { %10448 = vmatprep.mubr.msk.f32.mxu0 %vm579_vm1, %v7968_v24  ;;  %v7959_v61 = vmul.f32 %v8934_v5, %v7949_v48 }
0x3309   :  { %v7969_v36 = vadd.f32 %v8935_v9, %v7959_v61 }
0x330b   :  { %10449 = vmatmul.mubr.msk.f32.gmra.mxu0 %vm579_vm1, %v7969_v36 }
0x33c1   :  { %v10447_v21 = vpop.f32.mrf.mxu0 }
0x33c2   :  { %v8065_v53 = vadd.f32 %v10447_v21, %v8936_v31 }
0x33c3   :  { %v8059_v32 = vpop.f32.mrf.mxu0 }
0x33c4   :  { %v8060_v33 = vadd.f32 %v8936_v31, %v8059_v32  ;;  %v8079_v56 = vmax.f32 %v8065_v53, 0.0 }
0x33c6   :  { %v8078_v57 = vmax.f32 %v8060_v33, 0.0  ;;  %v8942_v33 = vld [vmem:[#allocation14] ss:$0 sm:$0xff] }
0x33c8   :  { %10483 = vmatprep.mubr.f32.mxu1 %v8078_v57 }
0x33c9   :  { %10484 = vmatmul.mubr.f32.vlgmr.msra.gmra.mxu1 %v8079_v56 }
0x33cb   :  { %v10450_v10 = vpop.f32.mrf.mxu0 }
0x33cc   :  { %v8075_v35 = vadd.f32 %v10450_v10, %v8936_v31 }
0x33cd   :  { %v8069_v45 = vpop.f32.mrf.mxu0 }
0x33ce   :  { %v8070_v19 = vadd.f32 %v8936_v31, %v8069_v45  ;;  %v8081_v39 = vmax.f32 %v8075_v35, 0.0  ;;  %v8943_v35 = vld [vmem:[#allocation16] ss:$0 sm:$0xff] }
0x33d0   :  { %v8080_v14 = vmax.f32 %v8070_v19, 0.0 }
0x33d2   :  { %10486 = vmatprep.mubr.f32.mxu1 %v8080_v14 }
0x33d3   :  { %10487 = vmatmul.mubr.f32.gmra.mxu1 %v8081_v39 }
0x3489   :  { %v10485_v40 = vpop.f32.mrf.mxu1 }
0x348a   :  { %v8177_v63 = vadd.f32 %v10485_v40, %v8941_v34 }
0x348b   :  { %v8171_v44 = vpop.f32.mrf.mxu1 }
0x348c   :  { %v8191_v46 = vadd.f32 %v8177_v63, %v7967_v18  ;;  %v8172_v47 = vadd.f32 %v8941_v34, %v8171_v44  ;;  %v8270_v18 = vld [vmem:[%s13489_s11 + $0x10] sm:$0xff] }
0x348e   :  { %v8190_v49 = vadd.f32 %v8172_v47, %v7966_v38  ;;  %v8199_v30 = vsel %vm579_vm1, %v8191_v46, 0.0  ;;  %v8271_v38 = vld [vmem:[%s13489_s11 + $0x18] sm:$0xff] }
0x348f   :  { %8200 = vadd.xlane.f32.xlu0 %v8199_v30  ;;  %10489 = vmatprep.subr.mxu0 %v8271_v38  ;;  %v8383_v30 = vld [vmem:[%s13490_s6 + $0x18] sm:$0xff] }
0x3490   :  { %v8196_v11 = vsel %vm579_vm1, %v8190_v49, 0.0  ;;  %10490 = vmatpush3.msra.mxu0 %v8271_v38 }
0x3491   :  { %8197 = vadd.xlane.f32.xlu1 %v8196_v11  ;;  %10491 = vmatprep.subr.mxu0 %v8270_v18  ;;  %v8382_v11 = vld [vmem:[%s13490_s6 + $0x10] sm:$0xff] }
0x3492   :  { %10492 = vmatpush3.msra.mxu0 %v8270_v18 }
0x3493   :  { %v10488_v17 = vpop.f32.mrf.mxu1  ;;  %10493 = vmatprep.subr.mxu0 %v8269_v41 }
0x3494   :  { %v8187_v51 = vadd.f32 %v10488_v17, %v8941_v34  ;;  %10494 = vmatpush3.msra.mxu0 %v8269_v41  ;;  %v8381_v17 = vld [vmem:[%s13490_s6 + $0x8] sm:$0xff] }
0x3495   :  { %v8181_v3 = vpop.f32.mrf.mxu1  ;;  %10495 = vmatprep.subr.mxu0 %v8268_v25 }
0x3496   :  { %v8193_v26 = vadd.f32 %v8187_v51, %v7969_v36  ;;  %v8182_v4 = vadd.f32 %v8941_v34, %v8181_v3  ;;  %10496 = vmatpush3.msra.mxu0 %v8268_v25  ;;  %v8380_v51 = vld [vmem:[%s13490_s6] sm:$0xff]  ;;  %v8944_v3 = vld [vmem:[#allocation20] ss:$0 sm:$0xff] }
0x3497   :  { %10503 = vmatprep.subr.mxu0 %v8383_v30 }
0x3498   :  { %v8192_v7 = vadd.f32 %v8182_v4, %v7968_v24  ;;  %v8205_v8 = vsel %vm579_vm1, %v8193_v26, 0.0 }
0x3499   :  { %8206 = vadd.xlane.f32.xlu0 %v8205_v8 }
0x349a   :  { %v8202_v13 = vsel %vm579_vm1, %v8192_v7, 0.0 }
0x349b   :  { %8203 = vadd.xlane.f32.xlu1 %v8202_v13 }
0x3518   :  { %v8201_v16 = vpop.xlane.xlu0 %8200 }
0x3519   :  { %v8209_v59 = vmul.f32 0.03125, %v8201_v16 }
0x351a   :  { %v8198_v60 = vpop.xlane.xlu1 %8197 }
0x351b   :  { %v8213_v28 = vsub.f32 %v8191_v46, %v8209_v59  ;;  %v8208_v42 = vmul.f32 0.03125, %v8198_v60 }
0x351d   :  { %v8212_v55 = vsub.f32 %v8190_v49, %v8208_v42  ;;  %v8217_v29 = vmul.f32 %v8213_v28, %v8213_v28 }
0x351f   :  { %v8223_v43 = vsel %vm579_vm1, %v8217_v29, 0.0  ;;  %v8216_v1 = vmul.f32 %v8212_v55, %v8212_v55 }
0x3520   :  { %8224 = vadd.xlane.f32.xlu0 %v8223_v43 }
0x3521   :  { %v8220_v0 = vsel %vm579_vm1, %v8216_v1, 0.0 }
0x3522   :  { %8221 = vadd.xlane.f32.xlu1 %v8220_v0  ;;  %v8207_v27 = vpop.xlane.xlu0 %8206 }
0x3523   :  { %v8211_v50 = vmul.f32 0.03125, %v8207_v27 }
0x3524   :  { %v8204_v52 = vpop.xlane.xlu1 %8203 }
0x3525   :  { %v8215_v2 = vsub.f32 %v8193_v26, %v8211_v50  ;;  %v8210_v5 = vmul.f32 0.03125, %v8204_v52 }
0x3527   :  { %v8214_v54 = vsub.f32 %v8192_v7, %v8210_v5  ;;  %v8219_v23 = vmul.f32 %v8215_v2, %v8215_v2 }
0x3529   :  { %v8229_v12 = vsel %vm579_vm1, %v8219_v23, 0.0  ;;  %v8218_v9 = vmul.f32 %v8214_v54, %v8214_v54 }
0x352a   :  { %8230 = vadd.xlane.f32.xlu0 %v8229_v12 }
0x352b   :  { %v8226_v22 = vsel %vm579_vm1, %v8218_v9, 0.0 }
0x352c   :  { %8227 = vadd.xlane.f32.xlu1 %v8226_v22 }
0x35a9   :  { %v8225_v37 = vpop.xlane.xlu0 %8224 }
0x35aa   :  { %v8233_v15 = vmul.f32 0.03125, %v8225_v37 }
0x35ab   :  { %v8222_v48 = vpop.xlane.xlu1 %8221 }
0x35ac   :  { %v8237_v24 = vadd.f32 1e-05, %v8233_v15  ;;  %v8232_v61 = vmul.f32 0.03125, %v8222_v48 }
0x35ae   :  { %10870 = vrsqrt.f32 %v8237_v24  ;;  %v8236_v36 = vadd.f32 1e-05, %v8232_v61 }
0x35b0   :  { %10872 = vrsqrt.f32 %v8236_v36 }
0x35b3   :  { %v8231_v20 = vpop.xlane.xlu0 %8230 }
0x35b4   :  { %v8235_v58 = vmul.f32 0.03125, %v8231_v20 }
0x35b5   :  { %v8228_v6 = vpop.xlane.xlu1 %8227 }
0x35b6   :  { %v8239_v62 = vadd.f32 1e-05, %v8235_v58  ;;  %v8234_v31 = vmul.f32 0.03125, %v8228_v6 }
0x35b8   :  { %10874 = vrsqrt.f32 %v8239_v62  ;;  %v8238_v21 = vadd.f32 1e-05, %v8234_v31 }
0x35ba   :  { %10876 = vrsqrt.f32 %v8238_v21 }
0x35bb   :  { %v10871_v53 = vpop.eup %10870 }
0x35bc   :  { %v8245_v32 = vmul.f32 %v10871_v53, %v8213_v28 }
0x35bd   :  { %v10873_v57 = vpop.eup %10872 }
0x35be   :  { %v8244_v56 = vmul.f32 %v10873_v57, %v8212_v55  ;;  %v8255_v10 = vmul.f32 %v8942_v33, %v8245_v32 }
0x35c0   :  { %v8254_v45 = vmul.f32 %v8942_v33, %v8244_v56  ;;  %v8265_v14 = vadd.f32 %v8943_v35, %v8255_v10 }
0x35c2   :  { %v8264_v19 = vadd.f32 %v8943_v35, %v8254_v45 }
0x35c4   :  { %10497 = vmatprep.mubr.msk.f32.mxu0 %vm579_vm1, %v8264_v19 }
0x35c5   :  { %v10875_v39 = vpop.eup %10874  ;;  %10498 = vmatmul.mubr.msk.f32.vlgmr.msra.gmra.mxu0 %vm579_vm1, %v8265_v14 }
0x35c6   :  { %v8247_v34 = vmul.f32 %v10875_v39, %v8215_v2  ;;  %10504 = vmatpush3.msra.mxu0 %v8383_v30 }
0x35c7   :  { %v10877_v40 = vpop.eup %10876  ;;  %10505 = vmatprep.subr.mxu0 %v8382_v11 }
0x35c8   :  { %v8246_v63 = vmul.f32 %v10877_v40, %v8214_v54  ;;  %v8257_v44 = vmul.f32 %v8942_v33, %v8247_v34  ;;  %10506 = vmatpush3.msra.mxu0 %v8382_v11 }
0x35c9   :  { %10507 = vmatprep.subr.mxu0 %v8381_v17 }
0x35ca   :  { %v8256_v46 = vmul.f32 %v8942_v33, %v8246_v63  ;;  %v8267_v49 = vadd.f32 %v8943_v35, %v8257_v44  ;;  %10508 = vmatpush3.msra.mxu0 %v8381_v17 }
0x35cb   :  { %10509 = vmatprep.subr.mxu0 %v8380_v51 }
0x35cc   :  { %v8266_v47 = vadd.f32 %v8943_v35, %v8256_v46  ;;  %10510 = vmatpush3.msra.mxu0 %v8380_v51 }
0x35ce   :  { %10500 = vmatprep.mubr.msk.f32.mxu0 %vm579_vm1, %v8266_v47 }
0x35cf   :  { %10501 = vmatmul.mubr.msk.f32.gmra.mxu0 %vm579_vm1, %v8267_v49 }
0x3685   :  { %v10499_v26 = vpop.f32.mrf.mxu0 }
0x3686   :  { %v8363_v4 = vadd.f32 %v10499_v26, %v8944_v3 }
0x3687   :  { %v8357_v7 = vpop.f32.mrf.mxu0 }
0x3688   :  { %v8377_v8 = vmax.f32 %v8363_v4, 0.0  ;;  %v8358_v13 = vadd.f32 %v8944_v3, %v8357_v7 }
0x368a   :  { %8489 = vst.msk [vmem:[#allocation29 + $0x8] sm:$0xff] %vm579_vm1, %v8377_v8  ;;  %v8376_v16 = vmax.f32 %v8358_v13, 0.0 }
0x368c   :  { %8488 = vst.msk [vmem:[#allocation29] sm:$0xff] %vm579_vm1, %v8376_v16  ;;  %10511 = vmatprep.mubr.msk.f32.mxu0 %vm579_vm1, %v8376_v16 }
0x368d   :  { %10512 = vmatmul.mubr.msk.f32.vlgmr.msra.gmra.mxu0 %vm579_vm1, %v8377_v8 }
0x368f   :  { %v10502_v59 = vpop.f32.mrf.mxu0 }
0x3690   :  { %v8373_v60 = vadd.f32 %v10502_v59, %v8944_v3 }
0x3691   :  { %v8367_v28 = vpop.f32.mrf.mxu0 }
0x3692   :  { %v8379_v42 = vmax.f32 %v8373_v60, 0.0  ;;  %v8368_v55 = vadd.f32 %v8944_v3, %v8367_v28 }
0x3694   :  { %8491 = vst.msk [vmem:[#allocation29 + $0x18] sm:$0xff] %vm579_vm1, %v8379_v42  ;;  %v8378_v29 = vmax.f32 %v8368_v55, 0.0 }
0x3696   :  { %8490 = vst.msk [vmem:[#allocation29 + $0x10] sm:$0xff] %vm579_vm1, %v8378_v29  ;;  %10514 = vmatprep.mubr.msk.f32.mxu0 %vm579_vm1, %v8378_v29 }
0x3697   :  { %10515 = vmatmul.mubr.msk.f32.gmra.mxu0 %vm579_vm1, %v8379_v42 }
0x3698   :  { %11221 = shalt.err (!%p11218_p0)
}
0x3699   :  { %s11365_s25 = smov 128   ;;  %s11366_s0 = smov 8  }
0x369a   :  { %8507 = dma.vmem_to_hbm [thread:$0]  %s8502_s14, 512, %s11670_s29, [#allocation4], %s11365_s25, %s11365_s25, %s11366_s0  }
0x369b   :  { %s11230_s26 = scalar_lea.vmem %s8516_s27, 512  ;;  %p11235_p2 = scmp.lt.s32.totalorder %s8516_s27, %s8516_s27 }
0x369c   :  { %p11231_p1 = scmp.ne.s32.totalorder %s8516_s27, %s11230_s26  ;;  %p11236_p3 = scmp.lt.s32.totalorder %s11230_s26, %s11230_s26 }
0x369e   :  { %p11237_p4 = por %p11236_p3, %p11235_p2 }
0x36a0   :  { %p11238_p5 = pnand %p11237_p4, %p11231_p1 }
0x36a2   :  { %11241 = shalt.err (!%p11238_p5)
}
0x36a3   :  { %8521 = dma.vmem_to_hbm [thread:$0]  %s8516_s27, 512, %s11680_s24, [#allocation30], %s11365_s25, %s11365_s25, %s11366_s0   ;;  %v8949_v43 = vld [vmem:[#allocation22] ss:$0 sm:$0xff] }
0x374d   :  { %v10513_v1 = vpop.f32.mrf.mxu0 }
0x374e   :  { %v8475_v0 = vadd.f32 %v10513_v1, %v8949_v43 }
0x374f   :  { %v8469_v27 = vpop.f32.mrf.mxu0 }
0x3750   :  { %8493 = vst.msk [vmem:[%s11685_s13 + $0x8] sm:$0xff] %vm3331_vm4, %v8475_v0  ;;  %v8470_v50 = vadd.f32 %v8949_v43, %v8469_v27 }
0x3752   :  { %8492 = vst.msk [vmem:[%s11685_s13] sm:$0xff] %vm3331_vm4, %v8470_v50 }
0x3757   :  { %v10516_v52 = vpop.f32.mrf.mxu0 }
0x3758   :  { %v8485_v2 = vadd.f32 %v10516_v52, %v8949_v43 }
0x3759   :  { %v8479_v5 = vpop.f32.mrf.mxu0 }
0x375a   :  { %8495 = vst.msk [vmem:[%s11685_s13 + $0x18] sm:$0xff] %vm3331_vm4, %v8485_v2  ;;  %v8480_v54 = vadd.f32 %v8949_v43, %v8479_v5 }
0x375c   :  { %8494 = vst.msk [vmem:[%s11685_s13 + $0x10] sm:$0xff] %vm3331_vm4, %v8480_v54 }
0x375d   :  { %11268 = dma.done.wait [#allocation4], 512  }
0x375e   :  { %11269 = vsyncadd [#allocation4], 4294966784 }
0x375f   :  { %11270 = dma.done.wait [#allocation30], 512  }
0x3760   :  { %11271 = vsyncadd [#allocation30], 4294966784 }
0x3761   :  { %8534 = vsyncpa [#allocation3], 1 }
0x3762   :  { %8535 = vsyncpa [#allocation6], 1 }
0x3763   :  { %8536 = vsyncpa [#allocation9], 1 }
0x3764   :  { %8537 = vsyncpa [#allocation12], 1 }
0x3765   :  { %8538 = vsyncpa [#allocation15], 1 }
0x3766   :  { %8539 = vsyncpa [#allocation18], 1 }
0x3767   :  { %8540 = vsyncpa [#allocation21], 1 }
0x3768   :  { %8541 = vsyncpa [#allocation24], 1 }
0x3769   :  { %8542 = vsyncpa [#allocation27], 1 }
0x376a   :  { %8543 = vsyncpa [#allocation4], 1 }
0x376b   :  { %8544 = vsyncpa [#allocation30], 1 }

</bundles_post_ra>
